<compile_context>
chip_gen: v6e
topology: v6e:2x2x1
jax: 0.10.0
libtpu: 0.0.40
codegen_flags: <defaults>
</compile_context>

<pallas_src>
import jax
import jax.numpy as jnp
from jax.experimental import pallas as pl
from jax.experimental.pallas import tpu as pltpu


# ----------------------------- LSTM kernel (T loop inside) ---------------------
def _make_lstm_kernel(num_layers: int, seq_len: int, batch: int, hidden: int):
    L, T, B, H = num_layers, seq_len, batch, hidden

    def kernel(*refs):
        x_ref = refs[0]                       # (T, B, E)   f32
        w_refs = refs[1:1 + L]                # each (in_dim+H, 4H)  bf16 (fused W)
        b_refs = refs[1 + L:1 + 2 * L]        # each (1, 4H) f32     (b_ih + b_hh)
        out_ref = refs[1 + 2 * L]             # (T, B, H)   f32

        # Hoist the bias broadcast out of the time loop (not CSE'd otherwise).
        biases = [jnp.broadcast_to(b_refs[l][...], (B, 4 * H)) for l in range(L)]

        def step(t, carry):
            hs = carry[:L]                    # per-layer h, f32 (B, H)
            cs = carry[L:]                    # per-layer c, f32 (B, H)
            inp = x_ref[t].astype(jnp.bfloat16)          # (B, E)
            new_h, new_c = [], []
            for l in range(L):
                # Fused gate matmul: [x | h] @ W_cat  (one MXU op per layer).
                op = jnp.concatenate([inp, hs[l].astype(jnp.bfloat16)], axis=1)
                gates = jnp.dot(op, w_refs[l][...],
                                preferred_element_type=jnp.float32) + biases[l]
                i_g = jax.nn.sigmoid(gates[:, 0 * H:1 * H])
                f_g = jax.nn.sigmoid(gates[:, 1 * H:2 * H])
                g_g = jnp.tanh(gates[:, 2 * H:3 * H])
                o_g = jax.nn.sigmoid(gates[:, 3 * H:4 * H])
                c_n = f_g * cs[l] + i_g * g_g
                h_n = o_g * jnp.tanh(c_n)
                new_h.append(h_n)
                new_c.append(c_n)
                inp = h_n.astype(jnp.bfloat16)           # input to next layer
            out_ref[t] = new_h[L - 1]                    # last layer hidden, f32
            return tuple(new_h) + tuple(new_c)

        init = tuple(jnp.zeros((B, H), jnp.float32) for _ in range(2 * L))
        jax.lax.fori_loop(0, T, step, init, unroll=True)

    return kernel


def lstm_forward(x_tbe, w_cat_list, b_list, hidden_size):
    """x_tbe: (T, B, E) f32 -> (T, B, H) f32 (multi-layer LSTM, whole seq in one call)."""
    T, B, E = x_tbe.shape
    L = len(w_cat_list)
    H = hidden_size
    kernel = _make_lstm_kernel(L, T, B, H)
    # Grid-less call: whole arrays live in VMEM for the single kernel invocation,
    # so weights are single-buffered (no pipeline double-buffer waste).
    return pl.pallas_call(
        kernel,
        out_shape=jax.ShapeDtypeStruct((T, B, H), jnp.float32),
    )(x_tbe, *w_cat_list, *b_list)


# ----------------------------- Tiled linear (vocab projection) -----------------
def _linear_kernel(x_ref, w_ref, b_ref, o_ref):
    o_ref[...] = (jnp.dot(x_ref[...], w_ref[...],
                          preferred_element_type=jnp.float32) + b_ref[...])


def linear_forward(x_bf16, w_t_bf16, b_row):
    """x: (N, H) bf16, w_t: (H, V) bf16, b: (1, V) f32 -> (N, V) f32, tiled over (N, V)."""
    N, H = x_bf16.shape
    V = w_t_bf16.shape[1]
    assert N % 8 == 0 and H % 128 == 0 and V % 128 == 0
    if N <= 512:
        tn = N
    else:
        assert N % 256 == 0
        tn = 256
    tv = 128
    grid = (N // tn, V // tv)
    return pl.pallas_call(
        _linear_kernel,
        out_shape=jax.ShapeDtypeStruct((N, V), jnp.float32),
        grid_spec=pltpu.PrefetchScalarGridSpec(
            num_scalar_prefetch=0,
            grid=grid,
            in_specs=[pl.BlockSpec((tn, H), lambda n, v: (n, 0)),
                      pl.BlockSpec((H, tv), lambda n, v: (0, v)),
                      pl.BlockSpec((1, tv), lambda n, v: (0, v))],
            out_specs=pl.BlockSpec((tn, tv), lambda n, v: (n, v)),
        ),
        compiler_params=pltpu.CompilerParams(
            dimension_semantics=("parallel", "parallel")),
    )(x_bf16, w_t_bf16, b_row)


# ----------------------------- DecoderRNN forward ------------------------------
def decoder_rnn_forward(params, features, captions, lengths):
    """
    features: (B, E) f32, captions: (B, T_cap) int32,
    lengths: static python list (descending, pack_padded_sequence semantics).
    returns: (sum(lengths), vocab_size) f32.
    """
    embed_table = params["embed"]                     # (V, E) f32
    H = params["hidden_size"]
    B, E = features.shape
    # TODO(synk): generic per-gate padding for non-128-multiple E/H/V; here dims are
    # required lane-aligned and only batch / packed-row counts are padded.
    assert E % 128 == 0 and H % 128 == 0

    # Pad batch to a sublane multiple (padded rows never reach the packed gather).
    Bp = ((B + 7) // 8) * 8
    if Bp != B:
        features = jnp.pad(features, ((0, Bp - B), (0, 0)))
        captions = jnp.pad(captions, ((0, Bp - B), (0, 0)))

    # Embedding lookup + prepend image feature (glue, plain JAX).
    emb = jnp.take(embed_table, captions, axis=0)                     # (Bp, Tc, E)
    emb = jnp.concatenate([features[:, None, :], emb], axis=1)        # (Bp, T1, E)
    x_tbe = jnp.transpose(emb, (1, 0, 2))                             # (T1, Bp, E)

    hiddens = lstm_forward(x_tbe, params["w_cat"], params["b"], H)    # (T1, Bp, H)

    # pack_padded_sequence ordering: for each t, all rows with lengths[b] > t.
    T1 = x_tbe.shape[0]
    t_idx, b_idx = [], []
    for t in range(T1):
        for b in range(len(lengths)):
            if lengths[b] > t:
                t_idx.append(t)
                b_idx.append(b)
    N = len(t_idx)
    t_idx = jnp.asarray(t_idx, jnp.int32)
    b_idx = jnp.asarray(b_idx, jnp.int32)
    packed_h = hiddens[t_idx, b_idx]                                   # (N, H) f32

    # Pad packed rows to a sublane multiple (zero rows, sliced off after).
    Np = ((N + 7) // 8) * 8
    if Np != N:
        packed_h = jnp.pad(packed_h, ((0, Np - N), (0, 0)))

    logits = linear_forward(packed_h.astype(jnp.bfloat16),
                            params["linear_w_t"], params["linear_b"])  # (Np, V)
    return logits[:N]


# ----------------------------- Parameter init ----------------------------------
def init_params(key, embed_size, hidden_size, vocab_size, num_layers):
    H = hidden_size
    assert hidden_size % 128 == 0 and embed_size % 128 == 0 and vocab_size % 128 == 0
    keys = jax.random.split(key, 3 + 4 * num_layers)
    k = 1.0 / (hidden_size ** 0.5)

    params = {"hidden_size": H}
    params["embed"] = jax.random.normal(keys[0], (vocab_size, embed_size), jnp.float32)

    w_cat, bias = [], []
    for l in range(num_layers):
        in_dim = embed_size if l == 0 else H
        kk = keys[3 + 4 * l: 3 + 4 * l + 4]
        w_ih_t = jax.random.uniform(kk[0], (in_dim, 4 * H), jnp.float32, -k, k)
        w_hh_t = jax.random.uniform(kk[1], (H, 4 * H), jnp.float32, -k, k)
        b_ih = jax.random.uniform(kk[2], (4 * H,), jnp.float32, -k, k)
        b_hh = jax.random.uniform(kk[3], (4 * H,), jnp.float32, -k, k)
        # Fused weight for the single [x|h] @ W_cat gate matmul, stored in bf16.
        w_cat.append(jnp.concatenate([w_ih_t, w_hh_t], axis=0).astype(jnp.bfloat16))
        bias.append((b_ih + b_hh).reshape(1, 4 * H))
    params["w_cat"] = w_cat
    params["b"] = bias

    params["linear_w_t"] = jax.random.uniform(
        keys[1], (H, vocab_size), jnp.float32, -k, k).astype(jnp.bfloat16)
    params["linear_b"] = jax.random.uniform(
        keys[2], (1, vocab_size), jnp.float32, -k, k)
    return params


# ----------------------------- Pure-JAX reference -------------------------------
def reference_forward(params, features, captions, lengths):
    """Same numerics as the kernels: bf16 matmul operands, f32 accumulation/gates."""
    H = params["hidden_size"]
    emb = jnp.take(params["embed"], captions, axis=0)
    emb = jnp.concatenate([features[:, None, :], emb], axis=1)     # (B, T1, E)
    B, T1, _ = emb.shape
    L = len(params["w_cat"])

    h = [jnp.zeros((B, H), jnp.float32) for _ in range(L)]
    c = [jnp.zeros((B, H), jnp.float32) for _ in range(L)]
    outs = []
    for t in range(T1):
        inp = emb[:, t, :].astype(jnp.bfloat16)
        for l in range(L):
            op = jnp.concatenate([inp, h[l].astype(jnp.bfloat16)], axis=1)
            g = jnp.dot(op, params["w_cat"][l],
                        preferred_element_type=jnp.float32) + params["b"][l]
            i_g = jax.nn.sigmoid(g[:, 0 * H:1 * H])
            f_g = jax.nn.sigmoid(g[:, 1 * H:2 * H])
            g_g = jnp.tanh(g[:, 2 * H:3 * H])
            o_g = jax.nn.sigmoid(g[:, 3 * H:4 * H])
            c[l] = f_g * c[l] + i_g * g_g
            h[l] = o_g * jnp.tanh(c[l])
            inp = h[l].astype(jnp.bfloat16)
        outs.append(h[L - 1])
    hiddens = jnp.stack(outs, axis=0)                              # (T1, B, H)

    packed = []
    for t in range(T1):
        for b in range(len(lengths)):
            if lengths[b] > t:
                packed.append(hiddens[t, b])
    packed = jnp.stack(packed, axis=0)
    return (jnp.dot(packed.astype(jnp.bfloat16), params["linear_w_t"],
                    preferred_element_type=jnp.float32) + params["linear_b"])


# ----------------------------------- main ---------------------------------------
if __name__ == "__main__":
    embed_size = 128
    hidden_size = 128
    vocab_size = 256
    num_layers = 2
    batch = 4
    cap_len = 8                        # T1 = cap_len + 1 after prepending the feature
    lengths = [9, 8, 6, 5]             # descending, each <= cap_len + 1

    key = jax.random.PRNGKey(0)
    kp, kf, kc = jax.random.split(key, 3)

    params = init_params(kp, embed_size, hidden_size, vocab_size, num_layers)
    features = jax.random.normal(kf, (batch, embed_size), jnp.float32)
    captions = jax.random.randint(kc, (batch, cap_len), 0, vocab_size, jnp.int32)

    out = jax.block_until_ready(decoder_rnn_forward(params, features, captions, lengths))
    ref = jax.block_until_ready(reference_forward(params, features, captions, lengths))

    assert out.shape == (sum(lengths), vocab_size), out.shape
    max_err = float(jnp.max(jnp.abs(out - ref)))
    # Tolerance is deliberately relaxed for bf16 matmul operands + EUP transcendentals.
    assert jnp.allclose(out, ref, atol=2e-2, rtol=2e-2), max_err

    print("KERNEL_OK")
</pallas_src>

<mosaic_0001>
module attributes {stable_mosaic.version = 11 : i64} {
  func.func @kernel(%arg0: memref<9x8x128xf32, #tpu.memory_space<vmem>>, %arg1: memref<256x512xbf16, #tpu.memory_space<vmem>>, %arg2: memref<256x512xbf16, #tpu.memory_space<vmem>>, %arg3: memref<1x512xf32, #tpu.memory_space<vmem>>, %arg4: memref<1x512xf32, #tpu.memory_space<vmem>>, %arg5: memref<9x8x128xf32, #tpu.memory_space<vmem>>) attributes {dimension_semantics = [], scalar_prefetch = 0 : i64, scratch_operands = 0 : i64, tpu.core_type = #tpu.core_type<tc>} {
    %c0 = arith.constant 0 : index
    %c0_0 = arith.constant 0 : index
    %0 = vector.load %arg3[%c0, %c0_0] : memref<1x512xf32, #tpu.memory_space<vmem>>, vector<1x512xf32>
    %1 = vector.shape_cast %0 : vector<1x512xf32> to vector<1x512xf32>
    %2 = vector.broadcast %1 : vector<1x512xf32> to vector<8x512xf32>
    %c0_1 = arith.constant 0 : index
    %c0_2 = arith.constant 0 : index
    %3 = vector.load %arg4[%c0_1, %c0_2] : memref<1x512xf32, #tpu.memory_space<vmem>>, vector<1x512xf32>
    %4 = vector.shape_cast %3 : vector<1x512xf32> to vector<1x512xf32>
    %5 = vector.broadcast %4 : vector<1x512xf32> to vector<8x512xf32>
    %cst = arith.constant 0.000000e+00 : f32
    %6 = vector.broadcast %cst : f32 to vector<8x128xf32>
    %cst_3 = arith.constant 0.000000e+00 : f32
    %7 = vector.broadcast %cst_3 : f32 to vector<8x128xf32>
    %cst_4 = arith.constant 0.000000e+00 : f32
    %8 = vector.broadcast %cst_4 : f32 to vector<8x128xf32>
    %cst_5 = arith.constant 0.000000e+00 : f32
    %9 = vector.broadcast %cst_5 : f32 to vector<8x128xf32>
    %c0_i32 = arith.constant 0 : i32
    %10 = arith.index_cast %c0_i32 : i32 to index
    %c0_6 = arith.constant 0 : index
    %c0_7 = arith.constant 0 : index
    %11 = vector.load %arg0[%10, %c0_6, %c0_7] : memref<9x8x128xf32, #tpu.memory_space<vmem>>, vector<1x8x128xf32>
    %12 = vector.shape_cast %11 : vector<1x8x128xf32> to vector<8x128xf32>
    %13 = arith.truncf %12 : vector<8x128xf32> to vector<8x128xbf16>
    %14 = arith.truncf %6 : vector<8x128xf32> to vector<8x128xbf16>
    %15 = tpu.concatenate %13, %14 in 1 : vector<8x128xbf16>, vector<8x128xbf16> -> vector<8x256xbf16>
    %c0_8 = arith.constant 0 : index
    %c0_9 = arith.constant 0 : index
    %16 = vector.load %arg1[%c0_8, %c0_9] : memref<256x512xbf16, #tpu.memory_space<vmem>>, vector<256x512xbf16>
    %cst_10 = arith.constant dense<0.000000e+00> : vector<8x512xf32>
    %17 = tpu.matmul %15, %16, %cst_10 {dimension_numbers = #tpu.dot_dimension_numbers<[1], [0], [0], [1], [0, 0, 1, 1], [], []>} : vector<8x256xbf16>, vector<256x512xbf16>, vector<8x512xf32> -> vector<8x512xf32>
    %18 = arith.addf %17, %2 : vector<8x512xf32>
    %19 = vector.extract_strided_slice %18 {offsets = [0, 0], sizes = [8, 128], strides = [1, 1]} : vector<8x512xf32> to vector<8x128xf32>
    %20 = arith.negf %19 : vector<8x128xf32>
    %21 = math.exp %20 : vector<8x128xf32>
    %cst_11 = arith.constant 1.000000e+00 : f32
    %22 = vector.broadcast %cst_11 : f32 to vector<8x128xf32>
    %23 = arith.addf %22, %21 : vector<8x128xf32>
    %24 = arith.divf %22, %23 : vector<8x128xf32>
    %25 = vector.extract_strided_slice %18 {offsets = [0, 128], sizes = [8, 128], strides = [1, 1]} : vector<8x512xf32> to vector<8x128xf32>
    %26 = arith.negf %25 : vector<8x128xf32>
    %27 = math.exp %26 : vector<8x128xf32>
    %cst_12 = arith.constant 1.000000e+00 : f32
    %28 = vector.broadcast %cst_12 : f32 to vector<8x128xf32>
    %29 = arith.addf %28, %27 : vector<8x128xf32>
    %30 = arith.divf %28, %29 : vector<8x128xf32>
    %31 = vector.extract_strided_slice %18 {offsets = [0, 256], sizes = [8, 128], strides = [1, 1]} : vector<8x512xf32> to vector<8x128xf32>
    %32 = math.tanh %31 : vector<8x128xf32>
    %33 = vector.extract_strided_slice %18 {offsets = [0, 384], sizes = [8, 128], strides = [1, 1]} : vector<8x512xf32> to vector<8x128xf32>
    %34 = arith.negf %33 : vector<8x128xf32>
    %35 = math.exp %34 : vector<8x128xf32>
    %cst_13 = arith.constant 1.000000e+00 : f32
    %36 = vector.broadcast %cst_13 : f32 to vector<8x128xf32>
    %37 = arith.addf %36, %35 : vector<8x128xf32>
    %38 = arith.divf %36, %37 : vector<8x128xf32>
    %39 = arith.mulf %30, %8 : vector<8x128xf32>
    %40 = arith.mulf %24, %32 : vector<8x128xf32>
    %41 = arith.addf %39, %40 : vector<8x128xf32>
    %42 = math.tanh %41 : vector<8x128xf32>
    %43 = arith.mulf %38, %42 : vector<8x128xf32>
    %44 = arith.truncf %43 : vector<8x128xf32> to vector<8x128xbf16>
    %45 = arith.truncf %7 : vector<8x128xf32> to vector<8x128xbf16>
    %46 = tpu.concatenate %44, %45 in 1 : vector<8x128xbf16>, vector<8x128xbf16> -> vector<8x256xbf16>
    %c0_14 = arith.constant 0 : index
    %c0_15 = arith.constant 0 : index
    %47 = vector.load %arg2[%c0_14, %c0_15] : memref<256x512xbf16, #tpu.memory_space<vmem>>, vector<256x512xbf16>
    %cst_16 = arith.constant dense<0.000000e+00> : vector<8x512xf32>
    %48 = tpu.matmul %46, %47, %cst_16 {dimension_numbers = #tpu.dot_dimension_numbers<[1], [0], [0], [1], [0, 0, 1, 1], [], []>} : vector<8x256xbf16>, vector<256x512xbf16>, vector<8x512xf32> -> vector<8x512xf32>
    %49 = arith.addf %48, %5 : vector<8x512xf32>
    %50 = vector.extract_strided_slice %49 {offsets = [0, 0], sizes = [8, 128], strides = [1, 1]} : vector<8x512xf32> to vector<8x128xf32>
    %51 = arith.negf %50 : vector<8x128xf32>
    %52 = math.exp %51 : vector<8x128xf32>
    %cst_17 = arith.constant 1.000000e+00 : f32
    %53 = vector.broadcast %cst_17 : f32 to vector<8x128xf32>
    %54 = arith.addf %53, %52 : vector<8x128xf32>
    %55 = arith.divf %53, %54 : vector<8x128xf32>
    %56 = vector.extract_strided_slice %49 {offsets = [0, 128], sizes = [8, 128], strides = [1, 1]} : vector<8x512xf32> to vector<8x128xf32>
    %57 = arith.negf %56 : vector<8x128xf32>
    %58 = math.exp %57 : vector<8x128xf32>
    %cst_18 = arith.constant 1.000000e+00 : f32
    %59 = vector.broadcast %cst_18 : f32 to vector<8x128xf32>
    %60 = arith.addf %59, %58 : vector<8x128xf32>
    %61 = arith.divf %59, %60 : vector<8x128xf32>
    %62 = vector.extract_strided_slice %49 {offsets = [0, 256], sizes = [8, 128], strides = [1, 1]} : vector<8x512xf32> to vector<8x128xf32>
    %63 = math.tanh %62 : vector<8x128xf32>
    %64 = vector.extract_strided_slice %49 {offsets = [0, 384], sizes = [8, 128], strides = [1, 1]} : vector<8x512xf32> to vector<8x128xf32>
    %65 = arith.negf %64 : vector<8x128xf32>
    %66 = math.exp %65 : vector<8x128xf32>
    %cst_19 = arith.constant 1.000000e+00 : f32
    %67 = vector.broadcast %cst_19 : f32 to vector<8x128xf32>
    %68 = arith.addf %67, %66 : vector<8x128xf32>
    %69 = arith.divf %67, %68 : vector<8x128xf32>
    %70 = arith.mulf %61, %9 : vector<8x128xf32>
    %71 = arith.mulf %55, %63 : vector<8x128xf32>
    %72 = arith.addf %70, %71 : vector<8x128xf32>
    %73 = math.tanh %72 : vector<8x128xf32>
    %74 = arith.mulf %69, %73 : vector<8x128xf32>
    %75 = arith.index_cast %c0_i32 : i32 to index
    %c0_20 = arith.constant 0 : index
    %c0_21 = arith.constant 0 : index
    %76 = vector.load %arg5[%75, %c0_20, %c0_21] : memref<9x8x128xf32, #tpu.memory_space<vmem>>, vector<1x8x128xf32>
    %77 = vector.shape_cast %76 : vector<1x8x128xf32> to vector<8x128xf32>
    %78 = vector.shape_cast %74 : vector<8x128xf32> to vector<1x8x128xf32>
    tpu.vector_store %arg5[%75, %c0_20, %c0_21], %78 {strides = array<i32>} : memref<9x8x128xf32, #tpu.memory_space<vmem>>, vector<1x8x128xf32>,
    %c1_i32 = arith.constant 1 : i32
    %79 = arith.index_cast %c1_i32 : i32 to index
    %c0_22 = arith.constant 0 : index
    %c0_23 = arith.constant 0 : index
    %80 = vector.load %arg0[%79, %c0_22, %c0_23] : memref<9x8x128xf32, #tpu.memory_space<vmem>>, vector<1x8x128xf32>
    %81 = vector.shape_cast %80 : vector<1x8x128xf32> to vector<8x128xf32>
    %82 = arith.truncf %81 : vector<8x128xf32> to vector<8x128xbf16>
    %83 = arith.truncf %43 : vector<8x128xf32> to vector<8x128xbf16>
    %84 = tpu.concatenate %82, %83 in 1 : vector<8x128xbf16>, vector<8x128xbf16> -> vector<8x256xbf16>
    %c0_24 = arith.constant 0 : index
    %c0_25 = arith.constant 0 : index
    %85 = vector.load %arg1[%c0_24, %c0_25] : memref<256x512xbf16, #tpu.memory_space<vmem>>, vector<256x512xbf16>
    %cst_26 = arith.constant dense<0.000000e+00> : vector<8x512xf32>
    %86 = tpu.matmul %84, %85, %cst_26 {dimension_numbers = #tpu.dot_dimension_numbers<[1], [0], [0], [1], [0, 0, 1, 1], [], []>} : vector<8x256xbf16>, vector<256x512xbf16>, vector<8x512xf32> -> vector<8x512xf32>
    %87 = arith.addf %86, %2 : vector<8x512xf32>
    %88 = vector.extract_strided_slice %87 {offsets = [0, 0], sizes = [8, 128], strides = [1, 1]} : vector<8x512xf32> to vector<8x128xf32>
    %89 = arith.negf %88 : vector<8x128xf32>
    %90 = math.exp %89 : vector<8x128xf32>
    %cst_27 = arith.constant 1.000000e+00 : f32
    %91 = vector.broadcast %cst_27 : f32 to vector<8x128xf32>
    %92 = arith.addf %91, %90 : vector<8x128xf32>
    %93 = arith.divf %91, %92 : vector<8x128xf32>
    %94 = vector.extract_strided_slice %87 {offsets = [0, 128], sizes = [8, 128], strides = [1, 1]} : vector<8x512xf32> to vector<8x128xf32>
    %95 = arith.negf %94 : vector<8x128xf32>
    %96 = math.exp %95 : vector<8x128xf32>
    %cst_28 = arith.constant 1.000000e+00 : f32
    %97 = vector.broadcast %cst_28 : f32 to vector<8x128xf32>
    %98 = arith.addf %97, %96 : vector<8x128xf32>
    %99 = arith.divf %97, %98 : vector<8x128xf32>
    %100 = vector.extract_strided_slice %87 {offsets = [0, 256], sizes = [8, 128], strides = [1, 1]} : vector<8x512xf32> to vector<8x128xf32>
    %101 = math.tanh %100 : vector<8x128xf32>
    %102 = vector.extract_strided_slice %87 {offsets = [0, 384], sizes = [8, 128], strides = [1, 1]} : vector<8x512xf32> to vector<8x128xf32>
    %103 = arith.negf %102 : vector<8x128xf32>
    %104 = math.exp %103 : vector<8x128xf32>
    %cst_29 = arith.constant 1.000000e+00 : f32
    %105 = vector.broadcast %cst_29 : f32 to vector<8x128xf32>
    %106 = arith.addf %105, %104 : vector<8x128xf32>
    %107 = arith.divf %105, %106 : vector<8x128xf32>
    %108 = arith.mulf %99, %41 : vector<8x128xf32>
    %109 = arith.mulf %93, %101 : vector<8x128xf32>
    %110 = arith.addf %108, %109 : vector<8x128xf32>
    %111 = math.tanh %110 : vector<8x128xf32>
    %112 = arith.mulf %107, %111 : vector<8x128xf32>
    %113 = arith.truncf %112 : vector<8x128xf32> to vector<8x128xbf16>
    %114 = arith.truncf %74 : vector<8x128xf32> to vector<8x128xbf16>
    %115 = tpu.concatenate %113, %114 in 1 : vector<8x128xbf16>, vector<8x128xbf16> -> vector<8x256xbf16>
    %c0_30 = arith.constant 0 : index
    %c0_31 = arith.constant 0 : index
    %116 = vector.load %arg2[%c0_30, %c0_31] : memref<256x512xbf16, #tpu.memory_space<vmem>>, vector<256x512xbf16>
    %cst_32 = arith.constant dense<0.000000e+00> : vector<8x512xf32>
    %117 = tpu.matmul %115, %116, %cst_32 {dimension_numbers = #tpu.dot_dimension_numbers<[1], [0], [0], [1], [0, 0, 1, 1], [], []>} : vector<8x256xbf16>, vector<256x512xbf16>, vector<8x512xf32> -> vector<8x512xf32>
    %118 = arith.addf %117, %5 : vector<8x512xf32>
    %119 = vector.extract_strided_slice %118 {offsets = [0, 0], sizes = [8, 128], strides = [1, 1]} : vector<8x512xf32> to vector<8x128xf32>
    %120 = arith.negf %119 : vector<8x128xf32>
    %121 = math.exp %120 : vector<8x128xf32>
    %cst_33 = arith.constant 1.000000e+00 : f32
    %122 = vector.broadcast %cst_33 : f32 to vector<8x128xf32>
    %123 = arith.addf %122, %121 : vector<8x128xf32>
    %124 = arith.divf %122, %123 : vector<8x128xf32>
    %125 = vector.extract_strided_slice %118 {offsets = [0, 128], sizes = [8, 128], strides = [1, 1]} : vector<8x512xf32> to vector<8x128xf32>
    %126 = arith.negf %125 : vector<8x128xf32>
    %127 = math.exp %126 : vector<8x128xf32>
    %cst_34 = arith.constant 1.000000e+00 : f32
    %128 = vector.broadcast %cst_34 : f32 to vector<8x128xf32>
    %129 = arith.addf %128, %127 : vector<8x128xf32>
    %130 = arith.divf %128, %129 : vector<8x128xf32>
    %131 = vector.extract_strided_slice %118 {offsets = [0, 256], sizes = [8, 128], strides = [1, 1]} : vector<8x512xf32> to vector<8x128xf32>
    %132 = math.tanh %131 : vector<8x128xf32>
    %133 = vector.extract_strided_slice %118 {offsets = [0, 384], sizes = [8, 128], strides = [1, 1]} : vector<8x512xf32> to vector<8x128xf32>
    %134 = arith.negf %133 : vector<8x128xf32>
    %135 = math.exp %134 : vector<8x128xf32>
    %cst_35 = arith.constant 1.000000e+00 : f32
    %136 = vector.broadcast %cst_35 : f32 to vector<8x128xf32>
    %137 = arith.addf %136, %135 : vector<8x128xf32>
    %138 = arith.divf %136, %137 : vector<8x128xf32>
    %139 = arith.mulf %130, %72 : vector<8x128xf32>
    %140 = arith.mulf %124, %132 : vector<8x128xf32>
    %141 = arith.addf %139, %140 : vector<8x128xf32>
    %142 = math.tanh %141 : vector<8x128xf32>
    %143 = arith.mulf %138, %142 : vector<8x128xf32>
    %144 = arith.index_cast %c1_i32 : i32 to index
    %c0_36 = arith.constant 0 : index
    %c0_37 = arith.constant 0 : index
    %145 = vector.load %arg5[%144, %c0_36, %c0_37] : memref<9x8x128xf32, #tpu.memory_space<vmem>>, vector<1x8x128xf32>
    %146 = vector.shape_cast %145 : vector<1x8x128xf32> to vector<8x128xf32>
    %147 = vector.shape_cast %143 : vector<8x128xf32> to vector<1x8x128xf32>
    tpu.vector_store %arg5[%144, %c0_36, %c0_37], %147 {strides = array<i32>} : memref<9x8x128xf32, #tpu.memory_space<vmem>>, vector<1x8x128xf32>,
    %c2_i32 = arith.constant 2 : i32
    %148 = arith.index_cast %c2_i32 : i32 to index
    %c0_38 = arith.constant 0 : index
    %c0_39 = arith.constant 0 : index
    %149 = vector.load %arg0[%148, %c0_38, %c0_39] : memref<9x8x128xf32, #tpu.memory_space<vmem>>, vector<1x8x128xf32>
    %150 = vector.shape_cast %149 : vector<1x8x128xf32> to vector<8x128xf32>
    %151 = arith.truncf %150 : vector<8x128xf32> to vector<8x128xbf16>
    %152 = arith.truncf %112 : vector<8x128xf32> to vector<8x128xbf16>
    %153 = tpu.concatenate %151, %152 in 1 : vector<8x128xbf16>, vector<8x128xbf16> -> vector<8x256xbf16>
    %c0_40 = arith.constant 0 : index
    %c0_41 = arith.constant 0 : index
    %154 = vector.load %arg1[%c0_40, %c0_41] : memref<256x512xbf16, #tpu.memory_space<vmem>>, vector<256x512xbf16>
    %cst_42 = arith.constant dense<0.000000e+00> : vector<8x512xf32>
    %155 = tpu.matmul %153, %154, %cst_42 {dimension_numbers = #tpu.dot_dimension_numbers<[1], [0], [0], [1], [0, 0, 1, 1], [], []>} : vector<8x256xbf16>, vector<256x512xbf16>, vector<8x512xf32> -> vector<8x512xf32>
    %156 = arith.addf %155, %2 : vector<8x512xf32>
    %157 = vector.extract_strided_slice %156 {offsets = [0, 0], sizes = [8, 128], strides = [1, 1]} : vector<8x512xf32> to vector<8x128xf32>
    %158 = arith.negf %157 : vector<8x128xf32>
    %159 = math.exp %158 : vector<8x128xf32>
    %cst_43 = arith.constant 1.000000e+00 : f32
    %160 = vector.broadcast %cst_43 : f32 to vector<8x128xf32>
    %161 = arith.addf %160, %159 : vector<8x128xf32>
    %162 = arith.divf %160, %161 : vector<8x128xf32>
    %163 = vector.extract_strided_slice %156 {offsets = [0, 128], sizes = [8, 128], strides = [1, 1]} : vector<8x512xf32> to vector<8x128xf32>
    %164 = arith.negf %163 : vector<8x128xf32>
    %165 = math.exp %164 : vector<8x128xf32>
    %cst_44 = arith.constant 1.000000e+00 : f32
    %166 = vector.broadcast %cst_44 : f32 to vector<8x128xf32>
    %167 = arith.addf %166, %165 : vector<8x128xf32>
    %168 = arith.divf %166, %167 : vector<8x128xf32>
    %169 = vector.extract_strided_slice %156 {offsets = [0, 256], sizes = [8, 128], strides = [1, 1]} : vector<8x512xf32> to vector<8x128xf32>
    %170 = math.tanh %169 : vector<8x128xf32>
    %171 = vector.extract_strided_slice %156 {offsets = [0, 384], sizes = [8, 128], strides = [1, 1]} : vector<8x512xf32> to vector<8x128xf32>
    %172 = arith.negf %171 : vector<8x128xf32>
    %173 = math.exp %172 : vector<8x128xf32>
    %cst_45 = arith.constant 1.000000e+00 : f32
    %174 = vector.broadcast %cst_45 : f32 to vector<8x128xf32>
    %175 = arith.addf %174, %173 : vector<8x128xf32>
    %176 = arith.divf %174, %175 : vector<8x128xf32>
    %177 = arith.mulf %168, %110 : vector<8x128xf32>
    %178 = arith.mulf %162, %170 : vector<8x128xf32>
    %179 = arith.addf %177, %178 : vector<8x128xf32>
    %180 = math.tanh %179 : vector<8x128xf32>
    %181 = arith.mulf %176, %180 : vector<8x128xf32>
    %182 = arith.truncf %181 : vector<8x128xf32> to vector<8x128xbf16>
    %183 = arith.truncf %143 : vector<8x128xf32> to vector<8x128xbf16>
    %184 = tpu.concatenate %182, %183 in 1 : vector<8x128xbf16>, vector<8x128xbf16> -> vector<8x256xbf16>
    %c0_46 = arith.constant 0 : index
    %c0_47 = arith.constant 0 : index
    %185 = vector.load %arg2[%c0_46, %c0_47] : memref<256x512xbf16, #tpu.memory_space<vmem>>, vector<256x512xbf16>
    %cst_48 = arith.constant dense<0.000000e+00> : vector<8x512xf32>
    %186 = tpu.matmul %184, %185, %cst_48 {dimension_numbers = #tpu.dot_dimension_numbers<[1], [0], [0], [1], [0, 0, 1, 1], [], []>} : vector<8x256xbf16>, vector<256x512xbf16>, vector<8x512xf32> -> vector<8x512xf32>
    %187 = arith.addf %186, %5 : vector<8x512xf32>
    %188 = vector.extract_strided_slice %187 {offsets = [0, 0], sizes = [8, 128], strides = [1, 1]} : vector<8x512xf32> to vector<8x128xf32>
    %189 = arith.negf %188 : vector<8x128xf32>
    %190 = math.exp %189 : vector<8x128xf32>
    %cst_49 = arith.constant 1.000000e+00 : f32
    %191 = vector.broadcast %cst_49 : f32 to vector<8x128xf32>
    %192 = arith.addf %191, %190 : vector<8x128xf32>
    %193 = arith.divf %191, %192 : vector<8x128xf32>
    %194 = vector.extract_strided_slice %187 {offsets = [0, 128], sizes = [8, 128], strides = [1, 1]} : vector<8x512xf32> to vector<8x128xf32>
    %195 = arith.negf %194 : vector<8x128xf32>
    %196 = math.exp %195 : vector<8x128xf32>
    %cst_50 = arith.constant 1.000000e+00 : f32
    %197 = vector.broadcast %cst_50 : f32 to vector<8x128xf32>
    %198 = arith.addf %197, %196 : vector<8x128xf32>
    %199 = arith.divf %197, %198 : vector<8x128xf32>
    %200 = vector.extract_strided_slice %187 {offsets = [0, 256], sizes = [8, 128], strides = [1, 1]} : vector<8x512xf32> to vector<8x128xf32>
    %201 = math.tanh %200 : vector<8x128xf32>
    %202 = vector.extract_strided_slice %187 {offsets = [0, 384], sizes = [8, 128], strides = [1, 1]} : vector<8x512xf32> to vector<8x128xf32>
    %203 = arith.negf %202 : vector<8x128xf32>
    %204 = math.exp %203 : vector<8x128xf32>
    %cst_51 = arith.constant 1.000000e+00 : f32
    %205 = vector.broadcast %cst_51 : f32 to vector<8x128xf32>
    %206 = arith.addf %205, %204 : vector<8x128xf32>
    %207 = arith.divf %205, %206 : vector<8x128xf32>
    %208 = arith.mulf %199, %141 : vector<8x128xf32>
    %209 = arith.mulf %193, %201 : vector<8x128xf32>
    %210 = arith.addf %208, %209 : vector<8x128xf32>
    %211 = math.tanh %210 : vector<8x128xf32>
    %212 = arith.mulf %207, %211 : vector<8x128xf32>
    %213 = arith.index_cast %c2_i32 : i32 to index
    %c0_52 = arith.constant 0 : index
    %c0_53 = arith.constant 0 : index
    %214 = vector.load %arg5[%213, %c0_52, %c0_53] : memref<9x8x128xf32, #tpu.memory_space<vmem>>, vector<1x8x128xf32>
    %215 = vector.shape_cast %214 : vector<1x8x128xf32> to vector<8x128xf32>
    %216 = vector.shape_cast %212 : vector<8x128xf32> to vector<1x8x128xf32>
    tpu.vector_store %arg5[%213, %c0_52, %c0_53], %216 {strides = array<i32>} : memref<9x8x128xf32, #tpu.memory_space<vmem>>, vector<1x8x128xf32>,
    %c3_i32 = arith.constant 3 : i32
    %217 = arith.index_cast %c3_i32 : i32 to index
    %c0_54 = arith.constant 0 : index
    %c0_55 = arith.constant 0 : index
    %218 = vector.load %arg0[%217, %c0_54, %c0_55] : memref<9x8x128xf32, #tpu.memory_space<vmem>>, vector<1x8x128xf32>
    %219 = vector.shape_cast %218 : vector<1x8x128xf32> to vector<8x128xf32>
    %220 = arith.truncf %219 : vector<8x128xf32> to vector<8x128xbf16>
    %221 = arith.truncf %181 : vector<8x128xf32> to vector<8x128xbf16>
    %222 = tpu.concatenate %220, %221 in 1 : vector<8x128xbf16>, vector<8x128xbf16> -> vector<8x256xbf16>
    %c0_56 = arith.constant 0 : index
    %c0_57 = arith.constant 0 : index
    %223 = vector.load %arg1[%c0_56, %c0_57] : memref<256x512xbf16, #tpu.memory_space<vmem>>, vector<256x512xbf16>
    %cst_58 = arith.constant dense<0.000000e+00> : vector<8x512xf32>
    %224 = tpu.matmul %222, %223, %cst_58 {dimension_numbers = #tpu.dot_dimension_numbers<[1], [0], [0], [1], [0, 0, 1, 1], [], []>} : vector<8x256xbf16>, vector<256x512xbf16>, vector<8x512xf32> -> vector<8x512xf32>
    %225 = arith.addf %224, %2 : vector<8x512xf32>
    %226 = vector.extract_strided_slice %225 {offsets = [0, 0], sizes = [8, 128], strides = [1, 1]} : vector<8x512xf32> to vector<8x128xf32>
    %227 = arith.negf %226 : vector<8x128xf32>
    %228 = math.exp %227 : vector<8x128xf32>
    %cst_59 = arith.constant 1.000000e+00 : f32
    %229 = vector.broadcast %cst_59 : f32 to vector<8x128xf32>
    %230 = arith.addf %229, %228 : vector<8x128xf32>
    %231 = arith.divf %229, %230 : vector<8x128xf32>
    %232 = vector.extract_strided_slice %225 {offsets = [0, 128], sizes = [8, 128], strides = [1, 1]} : vector<8x512xf32> to vector<8x128xf32>
    %233 = arith.negf %232 : vector<8x128xf32>
    %234 = math.exp %233 : vector<8x128xf32>
    %cst_60 = arith.constant 1.000000e+00 : f32
    %235 = vector.broadcast %cst_60 : f32 to vector<8x128xf32>
    %236 = arith.addf %235, %234 : vector<8x128xf32>
    %237 = arith.divf %235, %236 : vector<8x128xf32>
    %238 = vector.extract_strided_slice %225 {offsets = [0, 256], sizes = [8, 128], strides = [1, 1]} : vector<8x512xf32> to vector<8x128xf32>
    %239 = math.tanh %238 : vector<8x128xf32>
    %240 = vector.extract_strided_slice %225 {offsets = [0, 384], sizes = [8, 128], strides = [1, 1]} : vector<8x512xf32> to vector<8x128xf32>
    %241 = arith.negf %240 : vector<8x128xf32>
    %242 = math.exp %241 : vector<8x128xf32>
    %cst_61 = arith.constant 1.000000e+00 : f32
    %243 = vector.broadcast %cst_61 : f32 to vector<8x128xf32>
    %244 = arith.addf %243, %242 : vector<8x128xf32>
    %245 = arith.divf %243, %244 : vector<8x128xf32>
    %246 = arith.mulf %237, %179 : vector<8x128xf32>
    %247 = arith.mulf %231, %239 : vector<8x128xf32>
    %248 = arith.addf %246, %247 : vector<8x128xf32>
    %249 = math.tanh %248 : vector<8x128xf32>
    %250 = arith.mulf %245, %249 : vector<8x128xf32>
    %251 = arith.truncf %250 : vector<8x128xf32> to vector<8x128xbf16>
    %252 = arith.truncf %212 : vector<8x128xf32> to vector<8x128xbf16>
    %253 = tpu.concatenate %251, %252 in 1 : vector<8x128xbf16>, vector<8x128xbf16> -> vector<8x256xbf16>
    %c0_62 = arith.constant 0 : index
    %c0_63 = arith.constant 0 : index
    %254 = vector.load %arg2[%c0_62, %c0_63] : memref<256x512xbf16, #tpu.memory_space<vmem>>, vector<256x512xbf16>
    %cst_64 = arith.constant dense<0.000000e+00> : vector<8x512xf32>
    %255 = tpu.matmul %253, %254, %cst_64 {dimension_numbers = #tpu.dot_dimension_numbers<[1], [0], [0], [1], [0, 0, 1, 1], [], []>} : vector<8x256xbf16>, vector<256x512xbf16>, vector<8x512xf32> -> vector<8x512xf32>
    %256 = arith.addf %255, %5 : vector<8x512xf32>
    %257 = vector.extract_strided_slice %256 {offsets = [0, 0], sizes = [8, 128], strides = [1, 1]} : vector<8x512xf32> to vector<8x128xf32>
    %258 = arith.negf %257 : vector<8x128xf32>
    %259 = math.exp %258 : vector<8x128xf32>
    %cst_65 = arith.constant 1.000000e+00 : f32
    %260 = vector.broadcast %cst_65 : f32 to vector<8x128xf32>
    %261 = arith.addf %260, %259 : vector<8x128xf32>
    %262 = arith.divf %260, %261 : vector<8x128xf32>
    %263 = vector.extract_strided_slice %256 {offsets = [0, 128], sizes = [8, 128], strides = [1, 1]} : vector<8x512xf32> to vector<8x128xf32>
    %264 = arith.negf %263 : vector<8x128xf32>
    %265 = math.exp %264 : vector<8x128xf32>
    %cst_66 = arith.constant 1.000000e+00 : f32
    %266 = vector.broadcast %cst_66 : f32 to vector<8x128xf32>
    %267 = arith.addf %266, %265 : vector<8x128xf32>
    %268 = arith.divf %266, %267 : vector<8x128xf32>
    %269 = vector.extract_strided_slice %256 {offsets = [0, 256], sizes = [8, 128], strides = [1, 1]} : vector<8x512xf32> to vector<8x128xf32>
    %270 = math.tanh %269 : vector<8x128xf32>
    %271 = vector.extract_strided_slice %256 {offsets = [0, 384], sizes = [8, 128], strides = [1, 1]} : vector<8x512xf32> to vector<8x128xf32>
    %272 = arith.negf %271 : vector<8x128xf32>
    %273 = math.exp %272 : vector<8x128xf32>
    %cst_67 = arith.constant 1.000000e+00 : f32
    %274 = vector.broadcast %cst_67 : f32 to vector<8x128xf32>
    %275 = arith.addf %274, %273 : vector<8x128xf32>
    %276 = arith.divf %274, %275 : vector<8x128xf32>
    %277 = arith.mulf %268, %210 : vector<8x128xf32>
    %278 = arith.mulf %262, %270 : vector<8x128xf32>
    %279 = arith.addf %277, %278 : vector<8x128xf32>
    %280 = math.tanh %279 : vector<8x128xf32>
    %281 = arith.mulf %276, %280 : vector<8x128xf32>
    %282 = arith.index_cast %c3_i32 : i32 to index
    %c0_68 = arith.constant 0 : index
    %c0_69 = arith.constant 0 : index
    %283 = vector.load %arg5[%282, %c0_68, %c0_69] : memref<9x8x128xf32, #tpu.memory_space<vmem>>, vector<1x8x128xf32>
    %284 = vector.shape_cast %283 : vector<1x8x128xf32> to vector<8x128xf32>
    %285 = vector.shape_cast %281 : vector<8x128xf32> to vector<1x8x128xf32>
    tpu.vector_store %arg5[%282, %c0_68, %c0_69], %285 {strides = array<i32>} : memref<9x8x128xf32, #tpu.memory_space<vmem>>, vector<1x8x128xf32>,
    %c4_i32 = arith.constant 4 : i32
    %286 = arith.index_cast %c4_i32 : i32 to index
    %c0_70 = arith.constant 0 : index
    %c0_71 = arith.constant 0 : index
    %287 = vector.load %arg0[%286, %c0_70, %c0_71] : memref<9x8x128xf32, #tpu.memory_space<vmem>>, vector<1x8x128xf32>
    %288 = vector.shape_cast %287 : vector<1x8x128xf32> to vector<8x128xf32>
    %289 = arith.truncf %288 : vector<8x128xf32> to vector<8x128xbf16>
    %290 = arith.truncf %250 : vector<8x128xf32> to vector<8x128xbf16>
    %291 = tpu.concatenate %289, %290 in 1 : vector<8x128xbf16>, vector<8x128xbf16> -> vector<8x256xbf16>
    %c0_72 = arith.constant 0 : index
    %c0_73 = arith.constant 0 : index
    %292 = vector.load %arg1[%c0_72, %c0_73] : memref<256x512xbf16, #tpu.memory_space<vmem>>, vector<256x512xbf16>
    %cst_74 = arith.constant dense<0.000000e+00> : vector<8x512xf32>
    %293 = tpu.matmul %291, %292, %cst_74 {dimension_numbers = #tpu.dot_dimension_numbers<[1], [0], [0], [1], [0, 0, 1, 1], [], []>} : vector<8x256xbf16>, vector<256x512xbf16>, vector<8x512xf32> -> vector<8x512xf32>
    %294 = arith.addf %293, %2 : vector<8x512xf32>
    %295 = vector.extract_strided_slice %294 {offsets = [0, 0], sizes = [8, 128], strides = [1, 1]} : vector<8x512xf32> to vector<8x128xf32>
    %296 = arith.negf %295 : vector<8x128xf32>
    %297 = math.exp %296 : vector<8x128xf32>
    %cst_75 = arith.constant 1.000000e+00 : f32
    %298 = vector.broadcast %cst_75 : f32 to vector<8x128xf32>
    %299 = arith.addf %298, %297 : vector<8x128xf32>
    %300 = arith.divf %298, %299 : vector<8x128xf32>
    %301 = vector.extract_strided_slice %294 {offsets = [0, 128], sizes = [8, 128], strides = [1, 1]} : vector<8x512xf32> to vector<8x128xf32>
    %302 = arith.negf %301 : vector<8x128xf32>
    %303 = math.exp %302 : vector<8x128xf32>
    %cst_76 = arith.constant 1.000000e+00 : f32
    %304 = vector.broadcast %cst_76 : f32 to vector<8x128xf32>
    %305 = arith.addf %304, %303 : vector<8x128xf32>
    %306 = arith.divf %304, %305 : vector<8x128xf32>
    %307 = vector.extract_strided_slice %294 {offsets = [0, 256], sizes = [8, 128], strides = [1, 1]} : vector<8x512xf32> to vector<8x128xf32>
    %308 = math.tanh %307 : vector<8x128xf32>
    %309 = vector.extract_strided_slice %294 {offsets = [0, 384], sizes = [8, 128], strides = [1, 1]} : vector<8x512xf32> to vector<8x128xf32>
    %310 = arith.negf %309 : vector<8x128xf32>
    %311 = math.exp %310 : vector<8x128xf32>
    %cst_77 = arith.constant 1.000000e+00 : f32
    %312 = vector.broadcast %cst_77 : f32 to vector<8x128xf32>
    %313 = arith.addf %312, %311 : vector<8x128xf32>
    %314 = arith.divf %312, %313 : vector<8x128xf32>
    %315 = arith.mulf %306, %248 : vector<8x128xf32>
    %316 = arith.mulf %300, %308 : vector<8x128xf32>
    %317 = arith.addf %315, %316 : vector<8x128xf32>
    %318 = math.tanh %317 : vector<8x128xf32>
    %319 = arith.mulf %314, %318 : vector<8x128xf32>
    %320 = arith.truncf %319 : vector<8x128xf32> to vector<8x128xbf16>
    %321 = arith.truncf %281 : vector<8x128xf32> to vector<8x128xbf16>
    %322 = tpu.concatenate %320, %321 in 1 : vector<8x128xbf16>, vector<8x128xbf16> -> vector<8x256xbf16>
    %c0_78 = arith.constant 0 : index
    %c0_79 = arith.constant 0 : index
    %323 = vector.load %arg2[%c0_78, %c0_79] : memref<256x512xbf16, #tpu.memory_space<vmem>>, vector<256x512xbf16>
    %cst_80 = arith.constant dense<0.000000e+00> : vector<8x512xf32>
    %324 = tpu.matmul %322, %323, %cst_80 {dimension_numbers = #tpu.dot_dimension_numbers<[1], [0], [0], [1], [0, 0, 1, 1], [], []>} : vector<8x256xbf16>, vector<256x512xbf16>, vector<8x512xf32> -> vector<8x512xf32>
    %325 = arith.addf %324, %5 : vector<8x512xf32>
    %326 = vector.extract_strided_slice %325 {offsets = [0, 0], sizes = [8, 128], strides = [1, 1]} : vector<8x512xf32> to vector<8x128xf32>
    %327 = arith.negf %326 : vector<8x128xf32>
    %328 = math.exp %327 : vector<8x128xf32>
    %cst_81 = arith.constant 1.000000e+00 : f32
    %329 = vector.broadcast %cst_81 : f32 to vector<8x128xf32>
    %330 = arith.addf %329, %328 : vector<8x128xf32>
    %331 = arith.divf %329, %330 : vector<8x128xf32>
    %332 = vector.extract_strided_slice %325 {offsets = [0, 128], sizes = [8, 128], strides = [1, 1]} : vector<8x512xf32> to vector<8x128xf32>
    %333 = arith.negf %332 : vector<8x128xf32>
    %334 = math.exp %333 : vector<8x128xf32>
    %cst_82 = arith.constant 1.000000e+00 : f32
    %335 = vector.broadcast %cst_82 : f32 to vector<8x128xf32>
    %336 = arith.addf %335, %334 : vector<8x128xf32>
    %337 = arith.divf %335, %336 : vector<8x128xf32>
    %338 = vector.extract_strided_slice %325 {offsets = [0, 256], sizes = [8, 128], strides = [1, 1]} : vector<8x512xf32> to vector<8x128xf32>
    %339 = math.tanh %338 : vector<8x128xf32>
    %340 = vector.extract_strided_slice %325 {offsets = [0, 384], sizes = [8, 128], strides = [1, 1]} : vector<8x512xf32> to vector<8x128xf32>
    %341 = arith.negf %340 : vector<8x128xf32>
    %342 = math.exp %341 : vector<8x128xf32>
    %cst_83 = arith.constant 1.000000e+00 : f32
    %343 = vector.broadcast %cst_83 : f32 to vector<8x128xf32>
    %344 = arith.addf %343, %342 : vector<8x128xf32>
    %345 = arith.divf %343, %344 : vector<8x128xf32>
    %346 = arith.mulf %337, %279 : vector<8x128xf32>
    %347 = arith.mulf %331, %339 : vector<8x128xf32>
    %348 = arith.addf %346, %347 : vector<8x128xf32>
    %349 = math.tanh %348 : vector<8x128xf32>
    %350 = arith.mulf %345, %349 : vector<8x128xf32>
    %351 = arith.index_cast %c4_i32 : i32 to index
    %c0_84 = arith.constant 0 : index
    %c0_85 = arith.constant 0 : index
    %352 = vector.load %arg5[%351, %c0_84, %c0_85] : memref<9x8x128xf32, #tpu.memory_space<vmem>>, vector<1x8x128xf32>
    %353 = vector.shape_cast %352 : vector<1x8x128xf32> to vector<8x128xf32>
    %354 = vector.shape_cast %350 : vector<8x128xf32> to vector<1x8x128xf32>
    tpu.vector_store %arg5[%351, %c0_84, %c0_85], %354 {strides = array<i32>} : memref<9x8x128xf32, #tpu.memory_space<vmem>>, vector<1x8x128xf32>,
    %c5_i32 = arith.constant 5 : i32
    %355 = arith.index_cast %c5_i32 : i32 to index
    %c0_86 = arith.constant 0 : index
    %c0_87 = arith.constant 0 : index
    %356 = vector.load %arg0[%355, %c0_86, %c0_87] : memref<9x8x128xf32, #tpu.memory_space<vmem>>, vector<1x8x128xf32>
    %357 = vector.shape_cast %356 : vector<1x8x128xf32> to vector<8x128xf32>
    %358 = arith.truncf %357 : vector<8x128xf32> to vector<8x128xbf16>
    %359 = arith.truncf %319 : vector<8x128xf32> to vector<8x128xbf16>
    %360 = tpu.concatenate %358, %359 in 1 : vector<8x128xbf16>, vector<8x128xbf16> -> vector<8x256xbf16>
    %c0_88 = arith.constant 0 : index
    %c0_89 = arith.constant 0 : index
    %361 = vector.load %arg1[%c0_88, %c0_89] : memref<256x512xbf16, #tpu.memory_space<vmem>>, vector<256x512xbf16>
    %cst_90 = arith.constant dense<0.000000e+00> : vector<8x512xf32>
    %362 = tpu.matmul %360, %361, %cst_90 {dimension_numbers = #tpu.dot_dimension_numbers<[1], [0], [0], [1], [0, 0, 1, 1], [], []>} : vector<8x256xbf16>, vector<256x512xbf16>, vector<8x512xf32> -> vector<8x512xf32>
    %363 = arith.addf %362, %2 : vector<8x512xf32>
    %364 = vector.extract_strided_slice %363 {offsets = [0, 0], sizes = [8, 128], strides = [1, 1]} : vector<8x512xf32> to vector<8x128xf32>
    %365 = arith.negf %364 : vector<8x128xf32>
    %366 = math.exp %365 : vector<8x128xf32>
    %cst_91 = arith.constant 1.000000e+00 : f32
    %367 = vector.broadcast %cst_91 : f32 to vector<8x128xf32>
    %368 = arith.addf %367, %366 : vector<8x128xf32>
    %369 = arith.divf %367, %368 : vector<8x128xf32>
    %370 = vector.extract_strided_slice %363 {offsets = [0, 128], sizes = [8, 128], strides = [1, 1]} : vector<8x512xf32> to vector<8x128xf32>
    %371 = arith.negf %370 : vector<8x128xf32>
    %372 = math.exp %371 : vector<8x128xf32>
    %cst_92 = arith.constant 1.000000e+00 : f32
    %373 = vector.broadcast %cst_92 : f32 to vector<8x128xf32>
    %374 = arith.addf %373, %372 : vector<8x128xf32>
    %375 = arith.divf %373, %374 : vector<8x128xf32>
    %376 = vector.extract_strided_slice %363 {offsets = [0, 256], sizes = [8, 128], strides = [1, 1]} : vector<8x512xf32> to vector<8x128xf32>
    %377 = math.tanh %376 : vector<8x128xf32>
    %378 = vector.extract_strided_slice %363 {offsets = [0, 384], sizes = [8, 128], strides = [1, 1]} : vector<8x512xf32> to vector<8x128xf32>
    %379 = arith.negf %378 : vector<8x128xf32>
    %380 = math.exp %379 : vector<8x128xf32>
    %cst_93 = arith.constant 1.000000e+00 : f32
    %381 = vector.broadcast %cst_93 : f32 to vector<8x128xf32>
    %382 = arith.addf %381, %380 : vector<8x128xf32>
    %383 = arith.divf %381, %382 : vector<8x128xf32>
    %384 = arith.mulf %375, %317 : vector<8x128xf32>
    %385 = arith.mulf %369, %377 : vector<8x128xf32>
    %386 = arith.addf %384, %385 : vector<8x128xf32>
    %387 = math.tanh %386 : vector<8x128xf32>
    %388 = arith.mulf %383, %387 : vector<8x128xf32>
    %389 = arith.truncf %388 : vector<8x128xf32> to vector<8x128xbf16>
    %390 = arith.truncf %350 : vector<8x128xf32> to vector<8x128xbf16>
    %391 = tpu.concatenate %389, %390 in 1 : vector<8x128xbf16>, vector<8x128xbf16> -> vector<8x256xbf16>
    %c0_94 = arith.constant 0 : index
    %c0_95 = arith.constant 0 : index
    %392 = vector.load %arg2[%c0_94, %c0_95] : memref<256x512xbf16, #tpu.memory_space<vmem>>, vector<256x512xbf16>
    %cst_96 = arith.constant dense<0.000000e+00> : vector<8x512xf32>
    %393 = tpu.matmul %391, %392, %cst_96 {dimension_numbers = #tpu.dot_dimension_numbers<[1], [0], [0], [1], [0, 0, 1, 1], [], []>} : vector<8x256xbf16>, vector<256x512xbf16>, vector<8x512xf32> -> vector<8x512xf32>
    %394 = arith.addf %393, %5 : vector<8x512xf32>
    %395 = vector.extract_strided_slice %394 {offsets = [0, 0], sizes = [8, 128], strides = [1, 1]} : vector<8x512xf32> to vector<8x128xf32>
    %396 = arith.negf %395 : vector<8x128xf32>
    %397 = math.exp %396 : vector<8x128xf32>
    %cst_97 = arith.constant 1.000000e+00 : f32
    %398 = vector.broadcast %cst_97 : f32 to vector<8x128xf32>
    %399 = arith.addf %398, %397 : vector<8x128xf32>
    %400 = arith.divf %398, %399 : vector<8x128xf32>
    %401 = vector.extract_strided_slice %394 {offsets = [0, 128], sizes = [8, 128], strides = [1, 1]} : vector<8x512xf32> to vector<8x128xf32>
    %402 = arith.negf %401 : vector<8x128xf32>
    %403 = math.exp %402 : vector<8x128xf32>
    %cst_98 = arith.constant 1.000000e+00 : f32
    %404 = vector.broadcast %cst_98 : f32 to vector<8x128xf32>
    %405 = arith.addf %404, %403 : vector<8x128xf32>
    %406 = arith.divf %404, %405 : vector<8x128xf32>
    %407 = vector.extract_strided_slice %394 {offsets = [0, 256], sizes = [8, 128], strides = [1, 1]} : vector<8x512xf32> to vector<8x128xf32>
    %408 = math.tanh %407 : vector<8x128xf32>
    %409 = vector.extract_strided_slice %394 {offsets = [0, 384], sizes = [8, 128], strides = [1, 1]} : vector<8x512xf32> to vector<8x128xf32>
    %410 = arith.negf %409 : vector<8x128xf32>
    %411 = math.exp %410 : vector<8x128xf32>
    %cst_99 = arith.constant 1.000000e+00 : f32
    %412 = vector.broadcast %cst_99 : f32 to vector<8x128xf32>
    %413 = arith.addf %412, %411 : vector<8x128xf32>
    %414 = arith.divf %412, %413 : vector<8x128xf32>
    %415 = arith.mulf %406, %348 : vector<8x128xf32>
    %416 = arith.mulf %400, %408 : vector<8x128xf32>
    %417 = arith.addf %415, %416 : vector<8x128xf32>
    %418 = math.tanh %417 : vector<8x128xf32>
    %419 = arith.mulf %414, %418 : vector<8x128xf32>
    %420 = arith.index_cast %c5_i32 : i32 to index
    %c0_100 = arith.constant 0 : index
    %c0_101 = arith.constant 0 : index
    %421 = vector.load %arg5[%420, %c0_100, %c0_101] : memref<9x8x128xf32, #tpu.memory_space<vmem>>, vector<1x8x128xf32>
    %422 = vector.shape_cast %421 : vector<1x8x128xf32> to vector<8x128xf32>
    %423 = vector.shape_cast %419 : vector<8x128xf32> to vector<1x8x128xf32>
    tpu.vector_store %arg5[%420, %c0_100, %c0_101], %423 {strides = array<i32>} : memref<9x8x128xf32, #tpu.memory_space<vmem>>, vector<1x8x128xf32>,
    %c6_i32 = arith.constant 6 : i32
    %424 = arith.index_cast %c6_i32 : i32 to index
    %c0_102 = arith.constant 0 : index
    %c0_103 = arith.constant 0 : index
    %425 = vector.load %arg0[%424, %c0_102, %c0_103] : memref<9x8x128xf32, #tpu.memory_space<vmem>>, vector<1x8x128xf32>
    %426 = vector.shape_cast %425 : vector<1x8x128xf32> to vector<8x128xf32>
    %427 = arith.truncf %426 : vector<8x128xf32> to vector<8x128xbf16>
    %428 = arith.truncf %388 : vector<8x128xf32> to vector<8x128xbf16>
    %429 = tpu.concatenate %427, %428 in 1 : vector<8x128xbf16>, vector<8x128xbf16> -> vector<8x256xbf16>
    %c0_104 = arith.constant 0 : index
    %c0_105 = arith.constant 0 : index
    %430 = vector.load %arg1[%c0_104, %c0_105] : memref<256x512xbf16, #tpu.memory_space<vmem>>, vector<256x512xbf16>
    %cst_106 = arith.constant dense<0.000000e+00> : vector<8x512xf32>
    %431 = tpu.matmul %429, %430, %cst_106 {dimension_numbers = #tpu.dot_dimension_numbers<[1], [0], [0], [1], [0, 0, 1, 1], [], []>} : vector<8x256xbf16>, vector<256x512xbf16>, vector<8x512xf32> -> vector<8x512xf32>
    %432 = arith.addf %431, %2 : vector<8x512xf32>
    %433 = vector.extract_strided_slice %432 {offsets = [0, 0], sizes = [8, 128], strides = [1, 1]} : vector<8x512xf32> to vector<8x128xf32>
    %434 = arith.negf %433 : vector<8x128xf32>
    %435 = math.exp %434 : vector<8x128xf32>
    %cst_107 = arith.constant 1.000000e+00 : f32
    %436 = vector.broadcast %cst_107 : f32 to vector<8x128xf32>
    %437 = arith.addf %436, %435 : vector<8x128xf32>
    %438 = arith.divf %436, %437 : vector<8x128xf32>
    %439 = vector.extract_strided_slice %432 {offsets = [0, 128], sizes = [8, 128], strides = [1, 1]} : vector<8x512xf32> to vector<8x128xf32>
    %440 = arith.negf %439 : vector<8x128xf32>
    %441 = math.exp %440 : vector<8x128xf32>
    %cst_108 = arith.constant 1.000000e+00 : f32
    %442 = vector.broadcast %cst_108 : f32 to vector<8x128xf32>
    %443 = arith.addf %442, %441 : vector<8x128xf32>
    %444 = arith.divf %442, %443 : vector<8x128xf32>
    %445 = vector.extract_strided_slice %432 {offsets = [0, 256], sizes = [8, 128], strides = [1, 1]} : vector<8x512xf32> to vector<8x128xf32>
    %446 = math.tanh %445 : vector<8x128xf32>
    %447 = vector.extract_strided_slice %432 {offsets = [0, 384], sizes = [8, 128], strides = [1, 1]} : vector<8x512xf32> to vector<8x128xf32>
    %448 = arith.negf %447 : vector<8x128xf32>
    %449 = math.exp %448 : vector<8x128xf32>
    %cst_109 = arith.constant 1.000000e+00 : f32
    %450 = vector.broadcast %cst_109 : f32 to vector<8x128xf32>
    %451 = arith.addf %450, %449 : vector<8x128xf32>
    %452 = arith.divf %450, %451 : vector<8x128xf32>
    %453 = arith.mulf %444, %386 : vector<8x128xf32>
    %454 = arith.mulf %438, %446 : vector<8x128xf32>
    %455 = arith.addf %453, %454 : vector<8x128xf32>
    %456 = math.tanh %455 : vector<8x128xf32>
    %457 = arith.mulf %452, %456 : vector<8x128xf32>
    %458 = arith.truncf %457 : vector<8x128xf32> to vector<8x128xbf16>
    %459 = arith.truncf %419 : vector<8x128xf32> to vector<8x128xbf16>
    %460 = tpu.concatenate %458, %459 in 1 : vector<8x128xbf16>, vector<8x128xbf16> -> vector<8x256xbf16>
    %c0_110 = arith.constant 0 : index
    %c0_111 = arith.constant 0 : index
    %461 = vector.load %arg2[%c0_110, %c0_111] : memref<256x512xbf16, #tpu.memory_space<vmem>>, vector<256x512xbf16>
    %cst_112 = arith.constant dense<0.000000e+00> : vector<8x512xf32>
    %462 = tpu.matmul %460, %461, %cst_112 {dimension_numbers = #tpu.dot_dimension_numbers<[1], [0], [0], [1], [0, 0, 1, 1], [], []>} : vector<8x256xbf16>, vector<256x512xbf16>, vector<8x512xf32> -> vector<8x512xf32>
    %463 = arith.addf %462, %5 : vector<8x512xf32>
    %464 = vector.extract_strided_slice %463 {offsets = [0, 0], sizes = [8, 128], strides = [1, 1]} : vector<8x512xf32> to vector<8x128xf32>
    %465 = arith.negf %464 : vector<8x128xf32>
    %466 = math.exp %465 : vector<8x128xf32>
    %cst_113 = arith.constant 1.000000e+00 : f32
    %467 = vector.broadcast %cst_113 : f32 to vector<8x128xf32>
    %468 = arith.addf %467, %466 : vector<8x128xf32>
    %469 = arith.divf %467, %468 : vector<8x128xf32>
    %470 = vector.extract_strided_slice %463 {offsets = [0, 128], sizes = [8, 128], strides = [1, 1]} : vector<8x512xf32> to vector<8x128xf32>
    %471 = arith.negf %470 : vector<8x128xf32>
    %472 = math.exp %471 : vector<8x128xf32>
    %cst_114 = arith.constant 1.000000e+00 : f32
    %473 = vector.broadcast %cst_114 : f32 to vector<8x128xf32>
    %474 = arith.addf %473, %472 : vector<8x128xf32>
    %475 = arith.divf %473, %474 : vector<8x128xf32>
    %476 = vector.extract_strided_slice %463 {offsets = [0, 256], sizes = [8, 128], strides = [1, 1]} : vector<8x512xf32> to vector<8x128xf32>
    %477 = math.tanh %476 : vector<8x128xf32>
    %478 = vector.extract_strided_slice %463 {offsets = [0, 384], sizes = [8, 128], strides = [1, 1]} : vector<8x512xf32> to vector<8x128xf32>
    %479 = arith.negf %478 : vector<8x128xf32>
    %480 = math.exp %479 : vector<8x128xf32>
    %cst_115 = arith.constant 1.000000e+00 : f32
    %481 = vector.broadcast %cst_115 : f32 to vector<8x128xf32>
    %482 = arith.addf %481, %480 : vector<8x128xf32>
    %483 = arith.divf %481, %482 : vector<8x128xf32>
    %484 = arith.mulf %475, %417 : vector<8x128xf32>
    %485 = arith.mulf %469, %477 : vector<8x128xf32>
    %486 = arith.addf %484, %485 : vector<8x128xf32>
    %487 = math.tanh %486 : vector<8x128xf32>
    %488 = arith.mulf %483, %487 : vector<8x128xf32>
    %489 = arith.index_cast %c6_i32 : i32 to index
    %c0_116 = arith.constant 0 : index
    %c0_117 = arith.constant 0 : index
    %490 = vector.load %arg5[%489, %c0_116, %c0_117] : memref<9x8x128xf32, #tpu.memory_space<vmem>>, vector<1x8x128xf32>
    %491 = vector.shape_cast %490 : vector<1x8x128xf32> to vector<8x128xf32>
    %492 = vector.shape_cast %488 : vector<8x128xf32> to vector<1x8x128xf32>
    tpu.vector_store %arg5[%489, %c0_116, %c0_117], %492 {strides = array<i32>} : memref<9x8x128xf32, #tpu.memory_space<vmem>>, vector<1x8x128xf32>,
    %c7_i32 = arith.constant 7 : i32
    %493 = arith.index_cast %c7_i32 : i32 to index
    %c0_118 = arith.constant 0 : index
    %c0_119 = arith.constant 0 : index
    %494 = vector.load %arg0[%493, %c0_118, %c0_119] : memref<9x8x128xf32, #tpu.memory_space<vmem>>, vector<1x8x128xf32>
    %495 = vector.shape_cast %494 : vector<1x8x128xf32> to vector<8x128xf32>
    %496 = arith.truncf %495 : vector<8x128xf32> to vector<8x128xbf16>
    %497 = arith.truncf %457 : vector<8x128xf32> to vector<8x128xbf16>
    %498 = tpu.concatenate %496, %497 in 1 : vector<8x128xbf16>, vector<8x128xbf16> -> vector<8x256xbf16>
    %c0_120 = arith.constant 0 : index
    %c0_121 = arith.constant 0 : index
    %499 = vector.load %arg1[%c0_120, %c0_121] : memref<256x512xbf16, #tpu.memory_space<vmem>>, vector<256x512xbf16>
    %cst_122 = arith.constant dense<0.000000e+00> : vector<8x512xf32>
    %500 = tpu.matmul %498, %499, %cst_122 {dimension_numbers = #tpu.dot_dimension_numbers<[1], [0], [0], [1], [0, 0, 1, 1], [], []>} : vector<8x256xbf16>, vector<256x512xbf16>, vector<8x512xf32> -> vector<8x512xf32>
    %501 = arith.addf %500, %2 : vector<8x512xf32>
    %502 = vector.extract_strided_slice %501 {offsets = [0, 0], sizes = [8, 128], strides = [1, 1]} : vector<8x512xf32> to vector<8x128xf32>
    %503 = arith.negf %502 : vector<8x128xf32>
    %504 = math.exp %503 : vector<8x128xf32>
    %cst_123 = arith.constant 1.000000e+00 : f32
    %505 = vector.broadcast %cst_123 : f32 to vector<8x128xf32>
    %506 = arith.addf %505, %504 : vector<8x128xf32>
    %507 = arith.divf %505, %506 : vector<8x128xf32>
    %508 = vector.extract_strided_slice %501 {offsets = [0, 128], sizes = [8, 128], strides = [1, 1]} : vector<8x512xf32> to vector<8x128xf32>
    %509 = arith.negf %508 : vector<8x128xf32>
    %510 = math.exp %509 : vector<8x128xf32>
    %cst_124 = arith.constant 1.000000e+00 : f32
    %511 = vector.broadcast %cst_124 : f32 to vector<8x128xf32>
    %512 = arith.addf %511, %510 : vector<8x128xf32>
    %513 = arith.divf %511, %512 : vector<8x128xf32>
    %514 = vector.extract_strided_slice %501 {offsets = [0, 256], sizes = [8, 128], strides = [1, 1]} : vector<8x512xf32> to vector<8x128xf32>
    %515 = math.tanh %514 : vector<8x128xf32>
    %516 = vector.extract_strided_slice %501 {offsets = [0, 384], sizes = [8, 128], strides = [1, 1]} : vector<8x512xf32> to vector<8x128xf32>
    %517 = arith.negf %516 : vector<8x128xf32>
    %518 = math.exp %517 : vector<8x128xf32>
    %cst_125 = arith.constant 1.000000e+00 : f32
    %519 = vector.broadcast %cst_125 : f32 to vector<8x128xf32>
    %520 = arith.addf %519, %518 : vector<8x128xf32>
    %521 = arith.divf %519, %520 : vector<8x128xf32>
    %522 = arith.mulf %513, %455 : vector<8x128xf32>
    %523 = arith.mulf %507, %515 : vector<8x128xf32>
    %524 = arith.addf %522, %523 : vector<8x128xf32>
    %525 = math.tanh %524 : vector<8x128xf32>
    %526 = arith.mulf %521, %525 : vector<8x128xf32>
    %527 = arith.truncf %526 : vector<8x128xf32> to vector<8x128xbf16>
    %528 = arith.truncf %488 : vector<8x128xf32> to vector<8x128xbf16>
    %529 = tpu.concatenate %527, %528 in 1 : vector<8x128xbf16>, vector<8x128xbf16> -> vector<8x256xbf16>
    %c0_126 = arith.constant 0 : index
    %c0_127 = arith.constant 0 : index
    %530 = vector.load %arg2[%c0_126, %c0_127] : memref<256x512xbf16, #tpu.memory_space<vmem>>, vector<256x512xbf16>
    %cst_128 = arith.constant dense<0.000000e+00> : vector<8x512xf32>
    %531 = tpu.matmul %529, %530, %cst_128 {dimension_numbers = #tpu.dot_dimension_numbers<[1], [0], [0], [1], [0, 0, 1, 1], [], []>} : vector<8x256xbf16>, vector<256x512xbf16>, vector<8x512xf32> -> vector<8x512xf32>
    %532 = arith.addf %531, %5 : vector<8x512xf32>
    %533 = vector.extract_strided_slice %532 {offsets = [0, 0], sizes = [8, 128], strides = [1, 1]} : vector<8x512xf32> to vector<8x128xf32>
    %534 = arith.negf %533 : vector<8x128xf32>
    %535 = math.exp %534 : vector<8x128xf32>
    %cst_129 = arith.constant 1.000000e+00 : f32
    %536 = vector.broadcast %cst_129 : f32 to vector<8x128xf32>
    %537 = arith.addf %536, %535 : vector<8x128xf32>
    %538 = arith.divf %536, %537 : vector<8x128xf32>
    %539 = vector.extract_strided_slice %532 {offsets = [0, 128], sizes = [8, 128], strides = [1, 1]} : vector<8x512xf32> to vector<8x128xf32>
    %540 = arith.negf %539 : vector<8x128xf32>
    %541 = math.exp %540 : vector<8x128xf32>
    %cst_130 = arith.constant 1.000000e+00 : f32
    %542 = vector.broadcast %cst_130 : f32 to vector<8x128xf32>
    %543 = arith.addf %542, %541 : vector<8x128xf32>
    %544 = arith.divf %542, %543 : vector<8x128xf32>
    %545 = vector.extract_strided_slice %532 {offsets = [0, 256], sizes = [8, 128], strides = [1, 1]} : vector<8x512xf32> to vector<8x128xf32>
    %546 = math.tanh %545 : vector<8x128xf32>
    %547 = vector.extract_strided_slice %532 {offsets = [0, 384], sizes = [8, 128], strides = [1, 1]} : vector<8x512xf32> to vector<8x128xf32>
    %548 = arith.negf %547 : vector<8x128xf32>
    %549 = math.exp %548 : vector<8x128xf32>
    %cst_131 = arith.constant 1.000000e+00 : f32
    %550 = vector.broadcast %cst_131 : f32 to vector<8x128xf32>
    %551 = arith.addf %550, %549 : vector<8x128xf32>
    %552 = arith.divf %550, %551 : vector<8x128xf32>
    %553 = arith.mulf %544, %486 : vector<8x128xf32>
    %554 = arith.mulf %538, %546 : vector<8x128xf32>
    %555 = arith.addf %553, %554 : vector<8x128xf32>
    %556 = math.tanh %555 : vector<8x128xf32>
    %557 = arith.mulf %552, %556 : vector<8x128xf32>
    %558 = arith.index_cast %c7_i32 : i32 to index
    %c0_132 = arith.constant 0 : index
    %c0_133 = arith.constant 0 : index
    %559 = vector.load %arg5[%558, %c0_132, %c0_133] : memref<9x8x128xf32, #tpu.memory_space<vmem>>, vector<1x8x128xf32>
    %560 = vector.shape_cast %559 : vector<1x8x128xf32> to vector<8x128xf32>
    %561 = vector.shape_cast %557 : vector<8x128xf32> to vector<1x8x128xf32>
    tpu.vector_store %arg5[%558, %c0_132, %c0_133], %561 {strides = array<i32>} : memref<9x8x128xf32, #tpu.memory_space<vmem>>, vector<1x8x128xf32>,
    %c8_i32 = arith.constant 8 : i32
    %562 = arith.index_cast %c8_i32 : i32 to index
    %c0_134 = arith.constant 0 : index
    %c0_135 = arith.constant 0 : index
    %563 = vector.load %arg0[%562, %c0_134, %c0_135] : memref<9x8x128xf32, #tpu.memory_space<vmem>>, vector<1x8x128xf32>
    %564 = vector.shape_cast %563 : vector<1x8x128xf32> to vector<8x128xf32>
    %565 = arith.truncf %564 : vector<8x128xf32> to vector<8x128xbf16>
    %566 = arith.truncf %526 : vector<8x128xf32> to vector<8x128xbf16>
    %567 = tpu.concatenate %565, %566 in 1 : vector<8x128xbf16>, vector<8x128xbf16> -> vector<8x256xbf16>
    %c0_136 = arith.constant 0 : index
    %c0_137 = arith.constant 0 : index
    %568 = vector.load %arg1[%c0_136, %c0_137] : memref<256x512xbf16, #tpu.memory_space<vmem>>, vector<256x512xbf16>
    %cst_138 = arith.constant dense<0.000000e+00> : vector<8x512xf32>
    %569 = tpu.matmul %567, %568, %cst_138 {dimension_numbers = #tpu.dot_dimension_numbers<[1], [0], [0], [1], [0, 0, 1, 1], [], []>} : vector<8x256xbf16>, vector<256x512xbf16>, vector<8x512xf32> -> vector<8x512xf32>
    %570 = arith.addf %569, %2 : vector<8x512xf32>
    %571 = vector.extract_strided_slice %570 {offsets = [0, 0], sizes = [8, 128], strides = [1, 1]} : vector<8x512xf32> to vector<8x128xf32>
    %572 = arith.negf %571 : vector<8x128xf32>
    %573 = math.exp %572 : vector<8x128xf32>
    %cst_139 = arith.constant 1.000000e+00 : f32
    %574 = vector.broadcast %cst_139 : f32 to vector<8x128xf32>
    %575 = arith.addf %574, %573 : vector<8x128xf32>
    %576 = arith.divf %574, %575 : vector<8x128xf32>
    %577 = vector.extract_strided_slice %570 {offsets = [0, 128], sizes = [8, 128], strides = [1, 1]} : vector<8x512xf32> to vector<8x128xf32>
    %578 = arith.negf %577 : vector<8x128xf32>
    %579 = math.exp %578 : vector<8x128xf32>
    %cst_140 = arith.constant 1.000000e+00 : f32
    %580 = vector.broadcast %cst_140 : f32 to vector<8x128xf32>
    %581 = arith.addf %580, %579 : vector<8x128xf32>
    %582 = arith.divf %580, %581 : vector<8x128xf32>
    %583 = vector.extract_strided_slice %570 {offsets = [0, 256], sizes = [8, 128], strides = [1, 1]} : vector<8x512xf32> to vector<8x128xf32>
    %584 = math.tanh %583 : vector<8x128xf32>
    %585 = vector.extract_strided_slice %570 {offsets = [0, 384], sizes = [8, 128], strides = [1, 1]} : vector<8x512xf32> to vector<8x128xf32>
    %586 = arith.negf %585 : vector<8x128xf32>
    %587 = math.exp %586 : vector<8x128xf32>
    %cst_141 = arith.constant 1.000000e+00 : f32
    %588 = vector.broadcast %cst_141 : f32 to vector<8x128xf32>
    %589 = arith.addf %588, %587 : vector<8x128xf32>
    %590 = arith.divf %588, %589 : vector<8x128xf32>
    %591 = arith.mulf %582, %524 : vector<8x128xf32>
    %592 = arith.mulf %576, %584 : vector<8x128xf32>
    %593 = arith.addf %591, %592 : vector<8x128xf32>
    %594 = math.tanh %593 : vector<8x128xf32>
    %595 = arith.mulf %590, %594 : vector<8x128xf32>
    %596 = arith.truncf %595 : vector<8x128xf32> to vector<8x128xbf16>
    %597 = arith.truncf %557 : vector<8x128xf32> to vector<8x128xbf16>
    %598 = tpu.concatenate %596, %597 in 1 : vector<8x128xbf16>, vector<8x128xbf16> -> vector<8x256xbf16>
    %c0_142 = arith.constant 0 : index
    %c0_143 = arith.constant 0 : index
    %599 = vector.load %arg2[%c0_142, %c0_143] : memref<256x512xbf16, #tpu.memory_space<vmem>>, vector<256x512xbf16>
    %cst_144 = arith.constant dense<0.000000e+00> : vector<8x512xf32>
    %600 = tpu.matmul %598, %599, %cst_144 {dimension_numbers = #tpu.dot_dimension_numbers<[1], [0], [0], [1], [0, 0, 1, 1], [], []>} : vector<8x256xbf16>, vector<256x512xbf16>, vector<8x512xf32> -> vector<8x512xf32>
    %601 = arith.addf %600, %5 : vector<8x512xf32>
    %602 = vector.extract_strided_slice %601 {offsets = [0, 0], sizes = [8, 128], strides = [1, 1]} : vector<8x512xf32> to vector<8x128xf32>
    %603 = arith.negf %602 : vector<8x128xf32>
    %604 = math.exp %603 : vector<8x128xf32>
    %cst_145 = arith.constant 1.000000e+00 : f32
    %605 = vector.broadcast %cst_145 : f32 to vector<8x128xf32>
    %606 = arith.addf %605, %604 : vector<8x128xf32>
    %607 = arith.divf %605, %606 : vector<8x128xf32>
    %608 = vector.extract_strided_slice %601 {offsets = [0, 128], sizes = [8, 128], strides = [1, 1]} : vector<8x512xf32> to vector<8x128xf32>
    %609 = arith.negf %608 : vector<8x128xf32>
    %610 = math.exp %609 : vector<8x128xf32>
    %cst_146 = arith.constant 1.000000e+00 : f32
    %611 = vector.broadcast %cst_146 : f32 to vector<8x128xf32>
    %612 = arith.addf %611, %610 : vector<8x128xf32>
    %613 = arith.divf %611, %612 : vector<8x128xf32>
    %614 = vector.extract_strided_slice %601 {offsets = [0, 256], sizes = [8, 128], strides = [1, 1]} : vector<8x512xf32> to vector<8x128xf32>
    %615 = math.tanh %614 : vector<8x128xf32>
    %616 = vector.extract_strided_slice %601 {offsets = [0, 384], sizes = [8, 128], strides = [1, 1]} : vector<8x512xf32> to vector<8x128xf32>
    %617 = arith.negf %616 : vector<8x128xf32>
    %618 = math.exp %617 : vector<8x128xf32>
    %cst_147 = arith.constant 1.000000e+00 : f32
    %619 = vector.broadcast %cst_147 : f32 to vector<8x128xf32>
    %620 = arith.addf %619, %618 : vector<8x128xf32>
    %621 = arith.divf %619, %620 : vector<8x128xf32>
    %622 = arith.mulf %613, %555 : vector<8x128xf32>
    %623 = arith.mulf %607, %615 : vector<8x128xf32>
    %624 = arith.addf %622, %623 : vector<8x128xf32>
    %625 = math.tanh %624 : vector<8x128xf32>
    %626 = arith.mulf %621, %625 : vector<8x128xf32>
    %627 = arith.index_cast %c8_i32 : i32 to index
    %c0_148 = arith.constant 0 : index
    %c0_149 = arith.constant 0 : index
    %628 = vector.load %arg5[%627, %c0_148, %c0_149] : memref<9x8x128xf32, #tpu.memory_space<vmem>>, vector<1x8x128xf32>
    %629 = vector.shape_cast %628 : vector<1x8x128xf32> to vector<8x128xf32>
    %630 = vector.shape_cast %626 : vector<8x128xf32> to vector<1x8x128xf32>
    tpu.vector_store %arg5[%627, %c0_148, %c0_149], %630 {strides = array<i32>} : memref<9x8x128xf32, #tpu.memory_space<vmem>>, vector<1x8x128xf32>,
    %c9_i32 = arith.constant 9 : i32
    return
  }
}

</mosaic_0001>

<bundles_post_ra>
// kernel: tpu_custom_call.1
= control target key start
LH: loop header
LB: loop body
LE: loop exit
PB: predicated region body
PF: predicated region fallthrough
CT: control target
= control target key end

     0   :  { %10 = vsyncpa [#allocation3], 0  ;;  %s13610_s0 = inlined_call_operand.hbm [shape: f32[9,8,128], index: 0, kind: input, shape index: {}]   ;;  %s13611_s1 = inlined_call_operand.hbm [shape: bf16[256,512], index: 1, kind: input, shape index: {}]   ;;  %s13612_s2 = inlined_call_operand.hbm [shape: bf16[256,512], index: 2, kind: input, shape index: {}]   ;;  %s13613_s3 = inlined_call_operand.vmem [shape: f32[1,512], index: 3, kind: input, shape index: {}]   ;;  %s13614_s4 = inlined_call_operand.hbm [shape: f32[1,512], index: 4, kind: input, shape index: {}]   ;;  %s13615_s5 = inlined_call_operand.hbm [shape: f32[9,8,128], index: 5, kind: output, shape index: {}]  }
   0x1   :  { %11 = vsyncpa [#allocation6], 0 }
   0x2   :  { %12 = vsyncpa [#allocation9], 0 }
   0x3   :  { %13 = vsyncpa [#allocation4], 0  ;;  %s11682_s18 = smov [#allocation5]  }
   0x4   :  { %s31_s19 = sshll.u32 %s11682_s18, 4  ;;  %s32_s19 = int_to_ptr.vmem [resolvable:$true] %s31_s19 }
   0x5   :  { %s11582_s20 = scalar_lea.vmem %s32_s19, 8192  ;;  %p11587_p1 = scmp.lt.s32.totalorder %s32_s19, %s32_s19 }
   0x6   :  { %p11583_p0 = scmp.ne.s32.totalorder %s32_s19, %s11582_s20  ;;  %p11588_p2 = scmp.lt.s32.totalorder %s11582_s20, %s11582_s20 }
   0x8   :  { %p11589_p3 = por %p11588_p2, %p11587_p1 }
   0xa   :  { %p11590_p4 = pnand %p11589_p3, %p11583_p0 }
   0xc   :  { %11593 = shalt.err (!%p11590_p4)
}
   0xd   :  { %s11683_s21 = smov 256   ;;  %s11684_s22 = smov 16  }
   0xe   :  { %37 = dma.hbm_to_vmem [thread:$0]  %s13611_s1, 8192, %s32_s19, [#allocation6], %s11683_s21, %s11683_s21, %s11684_s22  }
   0xf   :  { %s11685_s25 = smov [#allocation2]  }
  0x10   :  { %s19_s26 = sshll.u32 %s11685_s25, 4  ;;  %s20_s26 = int_to_ptr.vmem [resolvable:$true] %s19_s26 }
  0x11   :  { %s11602_s27 = scalar_lea.vmem %s20_s26, 1152  ;;  %p11607_p6 = scmp.lt.s32.totalorder %s20_s26, %s20_s26 }
  0x12   :  { %p11603_p5 = scmp.ne.s32.totalorder %s20_s26, %s11602_s27  ;;  %p11608_p7 = scmp.lt.s32.totalorder %s11602_s27, %s11602_s27 }
  0x14   :  { %p11609_p8 = por %p11608_p7, %p11607_p6 }
  0x16   :  { %p11610_p9 = pnand %p11609_p8, %p11603_p5 }
  0x18   :  { %11613 = shalt.err (!%p11610_p9)
}
  0x19   :  { %s11686_s28 = smov 128   ;;  %s11687_s29 = smov 8  }
  0x1a   :  { %25 = dma.hbm_to_vmem [thread:$0]  %s13610_s0, 1152, %s20_s26, [#allocation3], %s11686_s28, %s11686_s28, %s11687_s29  }
  0x1b   :  { %s11688_s1 = smov [#allocation7]   ;;  %s11689_s8 = smov [#allocation8]  }
  0x1c   :  { %s43_s7 = sshll.u32 %s11688_s1, 4  ;;  %s58_s9 = sshll.u32 %s11689_s8, 4  ;;  %s44_s7 = int_to_ptr.vmem [resolvable:$true] %s43_s7  ;;  %s59_s9 = int_to_ptr.vmem [resolvable:$true] %s58_s9 }
  0x1d   :  { %s11622_s10 = scalar_lea.vmem %s44_s7, 8192  ;;  %p11627_p11 = scmp.lt.s32.totalorder %s44_s7, %s44_s7 }
  0x1e   :  { %p11623_p10 = scmp.ne.s32.totalorder %s44_s7, %s11622_s10  ;;  %p11628_p12 = scmp.lt.s32.totalorder %s11622_s10, %s11622_s10 }
  0x20   :  { %p11629_p13 = por %p11628_p12, %p11627_p11 }
  0x22   :  { %p11630_p0 = pnand %p11629_p13, %p11623_p10 }
  0x24   :  { %11633 = shalt.err (!%p11630_p0)
}
  0x25   :  { %49 = dma.hbm_to_vmem [thread:$0]  %s13612_s2, 8192, %s44_s7, [#allocation6], %s11683_s21, %s11683_s21, %s11684_s22  }
  0x26   :  { %s11642_s0 = scalar_lea.vmem %s59_s9, 64  ;;  %p11647_p2 = scmp.lt.s32.totalorder %s59_s9, %s59_s9 }
  0x27   :  { %p11643_p1 = scmp.ne.s32.totalorder %s59_s9, %s11642_s0  ;;  %p11648_p3 = scmp.lt.s32.totalorder %s11642_s0, %s11642_s0 }
  0x29   :  { %p11649_p4 = por %p11648_p3, %p11647_p2 }
  0x2b   :  { %p11650_p5 = pnand %p11649_p4, %p11643_p1 }
  0x2d   :  { %11653 = shalt.err (!%p11650_p5)
}
  0x2e   :  { %61 = dma.hbm_to_vmem [thread:$0]  %s13614_s4, 64, %s59_s9, [#allocation9]  }
  0x2f   :  { %11674 = dma.done.wait [#allocation3], 1152  }
  0x30   :  { %11675 = vsyncadd [#allocation3], 4294966144 }
  0x31   :  { %11676 = dma.done.wait [#allocation6], 16384  }
  0x32   :  { %11677 = vsyncadd [#allocation6], 4294950912 }
  0x33   :  { %11678 = dma.done.wait [#allocation9], 64  }
  0x34   :  { %11679 = vsyncadd [#allocation9], 4294967232  ;;  %v11690_v0 = vmov 0   ;;  %v10234_v1 = vld [vmem:[#allocation5 + $0xe4] ss:$16 sps:$4 sm:$0xff]   ;;  %v119_v62 = vld [vmem:[#allocation2] sm:$0xff] }
  0x35   :  { %537 = vmatprep.mubr.bf16.mxu0 %v11690_v0  ;;  %578 = vmatprep.mubr.bf16.mxu1 %v11690_v0  ;;  %v10236_v2 = vld [vmem:[#allocation5 + $0xe0] ss:$16 sps:$4 sm:$0xff]   ;;  %v10237_v3 = vld [vmem:[#allocation5 + $0xc4] ss:$16 sps:$4 sm:$0xff]   ;;  %v10245_v6 = vld [vmem:[#allocation5 + $0xec] ss:$16 sps:$4 sm:$0xff]  }
  0x36   :  { %505 = vmatprep.subr.bf16.mxu0 %v10234_v1  ;;  %v10239_v4 = vld [vmem:[#allocation5 + $0xc0] ss:$16 sps:$4 sm:$0xff]   ;;  %v10240_v5 = vld [vmem:[#allocation5 + $0xa4] ss:$16 sps:$4 sm:$0xff]   ;;  %v10248_v7 = vld [vmem:[#allocation5 + $0xe8] ss:$16 sps:$4 sm:$0xff]   ;;  %546 = vmatprep.subr.bf16.mxu1 %v10245_v6 }
  0x37   :  { %506 = vmatpush1.bf16.msra.mxu0 %v10236_v2  ;;  %v10242_v8 = vld [vmem:[#allocation5 + $0xa0] ss:$16 sps:$4 sm:$0xff]   ;;  %v10243_v9 = vld [vmem:[#allocation5 + $0x84] ss:$16 sps:$4 sm:$0xff]   ;;  %547 = vmatpush1.bf16.msra.mxu1 %v10248_v7  ;;  %v10251_v10 = vld [vmem:[#allocation5 + $0xcc] ss:$16 sps:$4 sm:$0xff]  }
  0x38   :  { %507 = vmatprep.subr.bf16.mxu0 %v10237_v3  ;;  %v10254_v11 = vld [vmem:[#allocation5 + $0xc8] ss:$16 sps:$4 sm:$0xff]   ;;  %548 = vmatprep.subr.bf16.mxu1 %v10251_v10  ;;  %v10247_v12 = vld [vmem:[#allocation5 + $0x80] ss:$16 sps:$4 sm:$0xff]   ;;  %v10249_v13 = vld [vmem:[#allocation5 + $0x64] ss:$16 sps:$4 sm:$0xff]  }
  0x39   :  { %v10257_v14 = vld [vmem:[#allocation5 + $0xac] ss:$16 sps:$4 sm:$0xff]   ;;  %v10260_v15 = vld [vmem:[#allocation5 + $0xa8] ss:$16 sps:$4 sm:$0xff]   ;;  %v10253_v17 = vld [vmem:[#allocation5 + $0x60] ss:$16 sps:$4 sm:$0xff]  }
  0x3a   :  { %v10263_v16 = vld [vmem:[#allocation5 + $0x8c] ss:$16 sps:$4 sm:$0xff]   ;;  %v10255_v18 = vld [vmem:[#allocation5 + $0x44] ss:$16 sps:$4 sm:$0xff]   ;;  %v10266_v19 = vld [vmem:[#allocation5 + $0x88] ss:$16 sps:$4 sm:$0xff]  }
  0x3b   :  { %508 = vmatpush1.bf16.msra.mxu0 %v10239_v4  ;;  %549 = vmatpush1.bf16.msra.mxu1 %v10254_v11  ;;  %v10269_v20 = vld [vmem:[#allocation5 + $0x6c] ss:$16 sps:$4 sm:$0xff]   ;;  %v10259_v21 = vld [vmem:[#allocation5 + $0x40] ss:$16 sps:$4 sm:$0xff]   ;;  %v10261_v22 = vld [vmem:[#allocation5 + $0x24] ss:$16 sps:$4 sm:$0xff]   ;;  %v120_v4 = vpack.c.bf16 %v119_v62, %v119_v62 }
  0x3c   :  { %509 = vmatprep.subr.bf16.mxu0 %v10240_v5  ;;  %550 = vmatprep.subr.bf16.mxu1 %v10257_v14  ;;  %v10272_v23 = vld [vmem:[#allocation5 + $0x68] ss:$16 sps:$4 sm:$0xff]   ;;  %v10275_v24 = vld [vmem:[#allocation5 + $0x4c] ss:$16 sps:$4 sm:$0xff]   ;;  %v10265_v25 = vld [vmem:[#allocation5 + $0x20] ss:$16 sps:$4 sm:$0xff]  }
  0x3d   :  { %v10267_v26 = vld [vmem:[#allocation5 + $0x4] ss:$16 sps:$4 sm:$0xff]   ;;  %v10278_v27 = vld [vmem:[#allocation5 + $0x48] ss:$16 sps:$4 sm:$0xff]   ;;  %v10281_v28 = vld [vmem:[#allocation5 + $0x2c] ss:$16 sps:$4 sm:$0xff]  }
  0x3e   :  { %v10271_v29 = vld [vmem:[#allocation5] ss:$16 sps:$4 sm:$0xff]   ;;  %v10273_v30 = vld [vmem:[#allocation5 + $0x1e4] ss:$16 sps:$4 sm:$0xff]   ;;  %v10284_v31 = vld [vmem:[#allocation5 + $0x28] ss:$16 sps:$4 sm:$0xff]  }
  0x3f   :  { %510 = vmatpush1.bf16.msra.mxu0 %v10242_v8  ;;  %551 = vmatpush1.bf16.msra.mxu1 %v10260_v15  ;;  %v10287_v32 = vld [vmem:[#allocation5 + $0xc] ss:$16 sps:$4 sm:$0xff]   ;;  %v10277_v33 = vld [vmem:[#allocation5 + $0x1e0] ss:$16 sps:$4 sm:$0xff]   ;;  %v10279_v34 = vld [vmem:[#allocation5 + $0x1c4] ss:$16 sps:$4 sm:$0xff]  }
  0x40   :  { %511 = vmatprep.subr.bf16.mxu0 %v10243_v9  ;;  %552 = vmatprep.subr.bf16.mxu1 %v10263_v16  ;;  %v10290_v35 = vld [vmem:[#allocation5 + $0x8] ss:$16 sps:$4 sm:$0xff]   ;;  %v10293_v36 = vld [vmem:[#allocation5 + $0x1ec] ss:$16 sps:$4 sm:$0xff]   ;;  %v10283_v37 = vld [vmem:[#allocation5 + $0x1c0] ss:$16 sps:$4 sm:$0xff]  }
  0x41   :  { %v10285_v38 = vld [vmem:[#allocation5 + $0x1a4] ss:$16 sps:$4 sm:$0xff]   ;;  %v10296_v39 = vld [vmem:[#allocation5 + $0x1e8] ss:$16 sps:$4 sm:$0xff]   ;;  %v10299_v40 = vld [vmem:[#allocation5 + $0x1cc] ss:$16 sps:$4 sm:$0xff]  }
  0x42   :  { %v10289_v41 = vld [vmem:[#allocation5 + $0x1a0] ss:$16 sps:$4 sm:$0xff]   ;;  %v10291_v42 = vld [vmem:[#allocation5 + $0x184] ss:$16 sps:$4 sm:$0xff]   ;;  %v10302_v43 = vld [vmem:[#allocation5 + $0x1c8] ss:$16 sps:$4 sm:$0xff]  }
  0x43   :  { %512 = vmatpush1.bf16.msra.mxu0 %v10247_v12  ;;  %553 = vmatpush1.bf16.msra.mxu1 %v10266_v19  ;;  %v10305_v44 = vld [vmem:[#allocation5 + $0x1ac] ss:$16 sps:$4 sm:$0xff]   ;;  %v10295_v45 = vld [vmem:[#allocation5 + $0x180] ss:$16 sps:$4 sm:$0xff]   ;;  %v10297_v46 = vld [vmem:[#allocation5 + $0x164] ss:$16 sps:$4 sm:$0xff]  }
  0x44   :  { %513 = vmatprep.subr.bf16.mxu0 %v10249_v13  ;;  %554 = vmatprep.subr.bf16.mxu1 %v10269_v20  ;;  %v10308_v47 = vld [vmem:[#allocation5 + $0x1a8] ss:$16 sps:$4 sm:$0xff]   ;;  %v10311_v48 = vld [vmem:[#allocation5 + $0x18c] ss:$16 sps:$4 sm:$0xff]   ;;  %v10301_v49 = vld [vmem:[#allocation5 + $0x160] ss:$16 sps:$4 sm:$0xff]  }
  0x45   :  { %v10303_v50 = vld [vmem:[#allocation5 + $0x144] ss:$16 sps:$4 sm:$0xff]   ;;  %v10314_v51 = vld [vmem:[#allocation5 + $0x188] ss:$16 sps:$4 sm:$0xff]   ;;  %v10317_v52 = vld [vmem:[#allocation5 + $0x16c] ss:$16 sps:$4 sm:$0xff]  }
  0x46   :  { %v10307_v53 = vld [vmem:[#allocation5 + $0x140] ss:$16 sps:$4 sm:$0xff]   ;;  %v10309_v54 = vld [vmem:[#allocation5 + $0x124] ss:$16 sps:$4 sm:$0xff]   ;;  %v10320_v55 = vld [vmem:[#allocation5 + $0x168] ss:$16 sps:$4 sm:$0xff]  }
  0x47   :  { %514 = vmatpush1.bf16.msra.mxu0 %v10253_v17  ;;  %555 = vmatpush1.bf16.msra.mxu1 %v10272_v23  ;;  %v10321_v56 = vld [vmem:[#allocation5 + $0x14c] ss:$16 sps:$4 sm:$0xff]   ;;  %v10313_v57 = vld [vmem:[#allocation5 + $0x120] ss:$16 sps:$4 sm:$0xff]   ;;  %v10315_v58 = vld [vmem:[#allocation5 + $0x104] ss:$16 sps:$4 sm:$0xff]  }
  0x48   :  { %515 = vmatprep.subr.bf16.mxu0 %v10255_v18  ;;  %556 = vmatprep.subr.bf16.mxu1 %v10275_v24  ;;  %v10323_v59 = vld [vmem:[#allocation5 + $0x148] ss:$16 sps:$4 sm:$0xff]   ;;  %v10324_v60 = vld [vmem:[#allocation5 + $0x12c] ss:$16 sps:$4 sm:$0xff]   ;;  %v10319_v61 = vld [vmem:[#allocation5 + $0x100] ss:$16 sps:$4 sm:$0xff]  }
  0x49   :  { %v10326_v63 = vld [vmem:[#allocation5 + $0x128] ss:$16 sps:$4 sm:$0xff]   ;;  %v10332_v1 = vld [vmem:[#allocation7 + $0xe4] ss:$16 sps:$4 sm:$0xff]   ;;  %v10327_v2 = vld [vmem:[#allocation5 + $0x10c] ss:$16 sps:$4 sm:$0xff]  }
  0x4a   :  { %v10330_v3 = vld [vmem:[#allocation7 + $0xe0] ss:$16 sps:$4 sm:$0xff]   ;;  %v10329_v5 = vld [vmem:[#allocation5 + $0x108] ss:$16 sps:$4 sm:$0xff]   ;;  %v10338_v6 = vld [vmem:[#allocation7 + $0xc4] ss:$16 sps:$4 sm:$0xff]  }
  0x4b   :  { %516 = vmatpush1.bf16.msra.mxu0 %v10259_v21  ;;  %557 = vmatpush1.bf16.msra.mxu1 %v10278_v27  ;;  %v10335_v7 = vld [vmem:[#allocation7 + $0xec] ss:$16 sps:$4 sm:$0xff]   ;;  %v10336_v8 = vld [vmem:[#allocation7 + $0xc0] ss:$16 sps:$4 sm:$0xff]   ;;  %v10333_v9 = vld [vmem:[#allocation7 + $0xe8] ss:$16 sps:$4 sm:$0xff]  }
  0x4c   :  { %517 = vmatprep.subr.bf16.mxu0 %v10261_v22  ;;  %558 = vmatprep.subr.bf16.mxu1 %v10281_v28  ;;  %v10341_v10 = vld [vmem:[#allocation7 + $0xcc] ss:$16 sps:$4 sm:$0xff]   ;;  %v10339_v11 = vld [vmem:[#allocation7 + $0xc8] ss:$16 sps:$4 sm:$0xff]   ;;  %v10344_v12 = vld [vmem:[#allocation7 + $0xa4] ss:$16 sps:$4 sm:$0xff]  }
  0x4d   :  { %v10342_v13 = vld [vmem:[#allocation7 + $0xa0] ss:$16 sps:$4 sm:$0xff]   ;;  %v10347_v14 = vld [vmem:[#allocation7 + $0xac] ss:$16 sps:$4 sm:$0xff]   ;;  %v10345_v15 = vld [vmem:[#allocation7 + $0xa8] ss:$16 sps:$4 sm:$0xff]  }
  0x4e   :  { %v10350_v16 = vld [vmem:[#allocation7 + $0x84] ss:$16 sps:$4 sm:$0xff]   ;;  %v10348_v17 = vld [vmem:[#allocation7 + $0x80] ss:$16 sps:$4 sm:$0xff]   ;;  %v10353_v18 = vld [vmem:[#allocation7 + $0x8c] ss:$16 sps:$4 sm:$0xff]  }
  0x4f   :  { %518 = vmatpush1.bf16.msra.mxu0 %v10265_v25  ;;  %559 = vmatpush1.bf16.msra.mxu1 %v10284_v31  ;;  %v10351_v19 = vld [vmem:[#allocation7 + $0x88] ss:$16 sps:$4 sm:$0xff]   ;;  %v10356_v20 = vld [vmem:[#allocation7 + $0x64] ss:$16 sps:$4 sm:$0xff]   ;;  %v10359_v21 = vld [vmem:[#allocation7 + $0x6c] ss:$16 sps:$4 sm:$0xff]  }
  0x50   :  { %519 = vmatprep.subr.bf16.mxu0 %v10267_v26  ;;  %560 = vmatprep.subr.bf16.mxu1 %v10287_v32  ;;  %v10357_v22 = vld [vmem:[#allocation7 + $0x68] ss:$16 sps:$4 sm:$0xff]   ;;  %v10362_v23 = vld [vmem:[#allocation7 + $0x44] ss:$16 sps:$4 sm:$0xff]   ;;  %v10360_v24 = vld [vmem:[#allocation7 + $0x40] ss:$16 sps:$4 sm:$0xff]  }
  0x51   :  { %v10365_v25 = vld [vmem:[#allocation7 + $0x4c] ss:$16 sps:$4 sm:$0xff]   ;;  %v10363_v26 = vld [vmem:[#allocation7 + $0x48] ss:$16 sps:$4 sm:$0xff]   ;;  %v10368_v27 = vld [vmem:[#allocation7 + $0x24] ss:$16 sps:$4 sm:$0xff]  }
  0x52   :  { %v10366_v28 = vld [vmem:[#allocation7 + $0x20] ss:$16 sps:$4 sm:$0xff]   ;;  %v11747_v31 = vld [vmem:[#allocation7 + $0x4] ss:$16 sps:$4 sm:$0xff]   ;;  %v11835_v62 = vld [vmem:[#allocation7 + $0x128] ss:$16 sps:$4 sm:$0xff]  }
  0x53   :  { %520 = vmatpush1.bf16.msra.mxu0 %v10271_v29  ;;  %561 = vmatpush1.bf16.msra.mxu1 %v10290_v35  ;;  %v10371_v29 = vld [vmem:[#allocation7 + $0x2c] ss:$16 sps:$4 sm:$0xff]   ;;  %v11749_v32 = vld [vmem:[#allocation7] ss:$16 sps:$4 sm:$0xff]   ;;  %v11759_v35 = vld [vmem:[#allocation7 + $0x1e4] ss:$16 sps:$4 sm:$0xff]  }
  0x54   :  { %521 = vmatprep.subr.bf16.mxu0 %v10273_v30  ;;  %562 = vmatprep.subr.bf16.mxu1 %v10293_v36  ;;  %v10369_v30 = vld [vmem:[#allocation7 + $0x28] ss:$16 sps:$4 sm:$0xff]   ;;  %v11761_v36 = vld [vmem:[#allocation7 + $0x1e0] ss:$16 sps:$4 sm:$0xff]  }
  0x57   :  { %522 = vmatpush2.bf16.msra.mxu0 %v10277_v33  ;;  %563 = vmatpush2.bf16.msra.mxu1 %v10296_v39  ;;  %v11751_v33 = vld [vmem:[#allocation7 + $0xc] ss:$16 sps:$4 sm:$0xff]   ;;  %v11771_v39 = vld [vmem:[#allocation7 + $0x1c4] ss:$16 sps:$4 sm:$0xff]  }
  0x58   :  { %523 = vmatprep.subr.bf16.mxu0 %v10279_v34  ;;  %564 = vmatprep.subr.bf16.mxu1 %v10299_v40  ;;  %v11754_v34 = vld [vmem:[#allocation7 + $0x8] ss:$16 sps:$4 sm:$0xff]   ;;  %v11773_v40 = vld [vmem:[#allocation7 + $0x1c0] ss:$16 sps:$4 sm:$0xff]  }
  0x5b   :  { %524 = vmatpush2.bf16.msra.mxu0 %v10283_v37  ;;  %565 = vmatpush2.bf16.msra.mxu1 %v10302_v43  ;;  %v11763_v37 = vld [vmem:[#allocation7 + $0x1ec] ss:$16 sps:$4 sm:$0xff]   ;;  %v11783_v43 = vld [vmem:[#allocation7 + $0x1a4] ss:$16 sps:$4 sm:$0xff]  }
  0x5c   :  { %525 = vmatprep.subr.bf16.mxu0 %v10285_v38  ;;  %566 = vmatprep.subr.bf16.mxu1 %v10305_v44  ;;  %v11766_v38 = vld [vmem:[#allocation7 + $0x1e8] ss:$16 sps:$4 sm:$0xff]   ;;  %v11785_v44 = vld [vmem:[#allocation7 + $0x1a0] ss:$16 sps:$4 sm:$0xff]  }
  0x5f   :  { %526 = vmatpush2.bf16.msra.mxu0 %v10289_v41  ;;  %567 = vmatpush2.bf16.msra.mxu1 %v10308_v47  ;;  %v11775_v41 = vld [vmem:[#allocation7 + $0x1cc] ss:$16 sps:$4 sm:$0xff]   ;;  %v11795_v47 = vld [vmem:[#allocation7 + $0x184] ss:$16 sps:$4 sm:$0xff]  }
  0x60   :  { %527 = vmatprep.subr.bf16.mxu0 %v10291_v42  ;;  %568 = vmatprep.subr.bf16.mxu1 %v10311_v48  ;;  %v11778_v42 = vld [vmem:[#allocation7 + $0x1c8] ss:$16 sps:$4 sm:$0xff]   ;;  %v11797_v48 = vld [vmem:[#allocation7 + $0x180] ss:$16 sps:$4 sm:$0xff]  }
  0x63   :  { %528 = vmatpush2.bf16.msra.mxu0 %v10295_v45  ;;  %569 = vmatpush2.bf16.msra.mxu1 %v10314_v51  ;;  %v11787_v45 = vld [vmem:[#allocation7 + $0x1ac] ss:$16 sps:$4 sm:$0xff]   ;;  %v11807_v51 = vld [vmem:[#allocation7 + $0x164] ss:$16 sps:$4 sm:$0xff]  }
  0x64   :  { %529 = vmatprep.subr.bf16.mxu0 %v10297_v46  ;;  %570 = vmatprep.subr.bf16.mxu1 %v10317_v52  ;;  %v11790_v46 = vld [vmem:[#allocation7 + $0x1a8] ss:$16 sps:$4 sm:$0xff]   ;;  %v11809_v52 = vld [vmem:[#allocation7 + $0x160] ss:$16 sps:$4 sm:$0xff]  }
  0x67   :  { %530 = vmatpush2.bf16.msra.mxu0 %v10301_v49  ;;  %571 = vmatpush2.bf16.msra.mxu1 %v10320_v55  ;;  %v11799_v49 = vld [vmem:[#allocation7 + $0x18c] ss:$16 sps:$4 sm:$0xff]   ;;  %v11816_v55 = vld [vmem:[#allocation7 + $0x144] ss:$16 sps:$4 sm:$0xff]  }
  0x68   :  { %531 = vmatprep.subr.bf16.mxu0 %v10303_v50  ;;  %572 = vmatprep.subr.bf16.mxu1 %v10321_v56  ;;  %v11802_v50 = vld [vmem:[#allocation7 + $0x188] ss:$16 sps:$4 sm:$0xff]   ;;  %v11820_v56 = vld [vmem:[#allocation7 + $0x140] ss:$16 sps:$4 sm:$0xff]  }
  0x6b   :  { %532 = vmatpush2.bf16.msra.mxu0 %v10307_v53  ;;  %573 = vmatpush2.bf16.msra.mxu1 %v10323_v59  ;;  %v11811_v53 = vld [vmem:[#allocation7 + $0x168] ss:$16 sps:$4 sm:$0xff]   ;;  %v11828_v59 = vld [vmem:[#allocation7 + $0x124] ss:$16 sps:$4 sm:$0xff]  }
  0x6c   :  { %533 = vmatprep.subr.bf16.mxu0 %v10309_v54  ;;  %574 = vmatprep.subr.bf16.mxu1 %v10324_v60  ;;  %v11813_v54 = vld [vmem:[#allocation7 + $0x16c] ss:$16 sps:$4 sm:$0xff]   ;;  %v11831_v60 = vld [vmem:[#allocation7 + $0x120] ss:$16 sps:$4 sm:$0xff]  }
  0x6f   :  { %534 = vmatpush2.bf16.msra.mxu0 %v10313_v57  ;;  %575 = vmatpush2.bf16.msra.mxu1 %v10326_v63  ;;  %v11822_v57 = vld [vmem:[#allocation7 + $0x14c] ss:$16 sps:$4 sm:$0xff]   ;;  %v11837_v63 = vld [vmem:[#allocation7 + $0x104] ss:$16 sps:$4 sm:$0xff]  }
  0x70   :  { %535 = vmatprep.subr.bf16.mxu0 %v10315_v58  ;;  %576 = vmatprep.subr.bf16.mxu1 %v10327_v2  ;;  %v11826_v58 = vld [vmem:[#allocation7 + $0x148] ss:$16 sps:$4 sm:$0xff]   ;;  %v11845_v2 = vld [vmem:[#allocation7 + $0x100] ss:$16 sps:$4 sm:$0xff]  }
  0x73   :  { %536 = vmatpush2.bf16.msra.mxu0 %v10319_v61  ;;  %577 = vmatpush2.bf16.msra.mxu1 %v10329_v5  ;;  %v11833_v61 = vld [vmem:[#allocation7 + $0x12c] ss:$16 sps:$4 sm:$0xff]  }
  0x74   :  { %996 = vmatprep.subr.bf16.mxu0 %v10332_v1  ;;  %1037 = vmatprep.subr.bf16.mxu1 %v10335_v7  ;;  %v11840_v1 = vld [vmem:[#allocation7 + $0x10c] ss:$16 sps:$4 sm:$0xff]  }
  0x75   :  { %v11483_v5 = vld [vmem:[#allocation5 + $0xec] ss:$16 sps:$4 sm:$0xff]  }
  0x76   :  { %538 = vmatmul.mubr.bf16.vlgmr.msra.gmra.mxu0 %v120_v4  ;;  %579 = vmatmul.mubr.bf16.vlgmr.msra.gmra.mxu1 %v120_v4  ;;  %v11482_v4 = vld [vmem:[#allocation5 + $0xe4] ss:$16 sps:$4 sm:$0xff]  }
  0x77   :  { %997 = vmatpush1.bf16.msra.mxu0 %v10330_v3  ;;  %1028 = vmatprep.mubr.bf16.mxu0 %v11690_v0  ;;  %v11847_v3 = vld [vmem:[#allocation7 + $0x108] ss:$16 sps:$4 sm:$0xff]  }
  0x78   :  { %998 = vmatprep.subr.bf16.mxu0 %v10338_v6  ;;  %1038 = vmatpush1.bf16.msra.mxu1 %v10333_v9  ;;  %v77_v6 = vlaneseq }
  0x79   :  { %1069 = vmatprep.mubr.bf16.mxu1 %v11690_v0  ;;  %1039 = vmatprep.subr.bf16.mxu1 %v10341_v10  ;;  %v10354_v0 = vld [vmem:[#allocation7 + $0x60] ss:$16 sps:$4 sm:$0xff]  }
  0x7a   :  { %v11855_v7 = vshrl.u32 %v77_v6, 7 }
  0x7b   :  { %999 = vmatpush1.bf16.msra.mxu0 %v10336_v8  ;;  %v75_v8 = vld [vmem:[%s13613_s3] sm:$0xf]  ;;  %s11691_s3 = smov [#allocation10]  }
  0x7c   :  { %1040 = vmatpush1.bf16.msra.mxu1 %v10339_v11  ;;  %1000 = vmatprep.subr.bf16.mxu0 %v10344_v12  ;;  %v79_v9 = vsub.s32 0, %v11855_v7  ;;  %v83_v10 = vsub.s32 1, %v11855_v7  ;;  %s9004_s15 = sshll.u32 %s11691_s3, 4  ;;  %s9005_s15 = int_to_ptr.vmem [resolvable:$true] %s9004_s15 }
  0x7d   :  { %1041 = vmatprep.subr.bf16.mxu1 %v10347_v14  ;;  %s11654_s16 = scalar_lea.vmem %s9005_s15, 1152  ;;  %p11659_p7 = scmp.lt.s32.totalorder %s9005_s15, %s9005_s15 }
  0x7e   :  { %v11864_v11 = vrot.slane %v75_v8, %v79_v9  ;;  %v11868_v12 = vrot.slane %v75_v8, %v83_v10  ;;  %p11655_p6 = scmp.ne.s32.totalorder %s9005_s15, %s11654_s16  ;;  %p11660_p8 = scmp.lt.s32.totalorder %s11654_s16, %s11654_s16 }
  0x7f   :  { %1001 = vmatpush1.bf16.msra.mxu0 %v10342_v13 }
  0x80   :  { %1042 = vmatpush1.bf16.msra.mxu1 %v10345_v15  ;;  %1002 = vmatprep.subr.bf16.mxu0 %v10350_v16  ;;  %p11661_p9 = por %p11660_p8, %p11659_p7 }
  0x81   :  { %1043 = vmatprep.subr.bf16.mxu1 %v10353_v18 }
  0x82   :  { %p11662_p10 = pnand %p11661_p9, %p11655_p6 }
  0x83   :  { %1003 = vmatpush1.bf16.msra.mxu0 %v10348_v17 }
  0x84   :  { %1044 = vmatpush1.bf16.msra.mxu1 %v10351_v19  ;;  %1004 = vmatprep.subr.bf16.mxu0 %v10356_v20  ;;  %v91_v19 = vsub.s32 3, %v11855_v7 }
  0x85   :  { %1045 = vmatprep.subr.bf16.mxu1 %v10359_v21 }
  0x87   :  { %1005 = vmatpush1.bf16.msra.mxu0 %v10354_v0 }
  0x88   :  { %1046 = vmatpush1.bf16.msra.mxu1 %v10357_v22  ;;  %1006 = vmatprep.subr.bf16.mxu0 %v10362_v23  ;;  %v87_v22 = vsub.s32 2, %v11855_v7 }
  0x89   :  { %1047 = vmatprep.subr.bf16.mxu1 %v10365_v25 }
  0x8b   :  { %1007 = vmatpush1.bf16.msra.mxu0 %v10360_v24  ;;  %v11876_v24 = vrot.slane %v75_v8, %v91_v19 }
  0x8c   :  { %1048 = vmatpush1.bf16.msra.mxu1 %v10363_v26  ;;  %1008 = vmatprep.subr.bf16.mxu0 %v10368_v27  ;;  %v11880_v26 = vrot.slane %v75_v8, %v87_v22 }
  0x8d   :  { %1049 = vmatprep.subr.bf16.mxu1 %v10371_v29 }
  0x8f   :  { %1009 = vmatpush1.bf16.msra.mxu0 %v10366_v28 }
  0x90   :  { %1050 = vmatpush1.bf16.msra.mxu1 %v10369_v30  ;;  %1010 = vmatprep.subr.bf16.mxu0 %v11747_v31 }
  0x91   :  { %1051 = vmatprep.subr.bf16.mxu1 %v11751_v33 }
  0x93   :  { %1011 = vmatpush1.bf16.msra.mxu0 %v11749_v32 }
  0x94   :  { %1052 = vmatpush1.bf16.msra.mxu1 %v11754_v34  ;;  %1012 = vmatprep.subr.bf16.mxu0 %v11759_v35 }
  0x95   :  { %1053 = vmatprep.subr.bf16.mxu1 %v11763_v37 }
  0x97   :  { %1013 = vmatpush2.bf16.msra.mxu0 %v11761_v36 }
  0x98   :  { %1054 = vmatpush2.bf16.msra.mxu1 %v11766_v38  ;;  %1014 = vmatprep.subr.bf16.mxu0 %v11771_v39 }
  0x99   :  { %1055 = vmatprep.subr.bf16.mxu1 %v11775_v41 }
  0x9b   :  { %1015 = vmatpush2.bf16.msra.mxu0 %v11773_v40 }
  0x9c   :  { %1056 = vmatpush2.bf16.msra.mxu1 %v11778_v42  ;;  %1016 = vmatprep.subr.bf16.mxu0 %v11783_v43 }
  0x9d   :  { %1057 = vmatprep.subr.bf16.mxu1 %v11787_v45 }
  0x9f   :  { %1017 = vmatpush2.bf16.msra.mxu0 %v11785_v44 }
  0xa0   :  { %1058 = vmatpush2.bf16.msra.mxu1 %v11790_v46  ;;  %1018 = vmatprep.subr.bf16.mxu0 %v11795_v47 }
  0xa1   :  { %1059 = vmatprep.subr.bf16.mxu1 %v11799_v49 }
  0xa3   :  { %1019 = vmatpush2.bf16.msra.mxu0 %v11797_v48 }
  0xa4   :  { %1060 = vmatpush2.bf16.msra.mxu1 %v11802_v50  ;;  %1020 = vmatprep.subr.bf16.mxu0 %v11807_v51 }
  0xa5   :  { %1061 = vmatprep.subr.bf16.mxu1 %v11813_v54 }
  0xa7   :  { %1021 = vmatpush2.bf16.msra.mxu0 %v11809_v52 }
  0xa8   :  { %1062 = vmatpush2.bf16.msra.mxu1 %v11811_v53  ;;  %1022 = vmatprep.subr.bf16.mxu0 %v11816_v55 }
  0xa9   :  { %1063 = vmatprep.subr.bf16.mxu1 %v11822_v57 }
  0xab   :  { %1023 = vmatpush2.bf16.msra.mxu0 %v11820_v56 }
  0xac   :  { %1064 = vmatpush2.bf16.msra.mxu1 %v11826_v58  ;;  %1024 = vmatprep.subr.bf16.mxu0 %v11828_v59 }
  0xad   :  { %1065 = vmatprep.subr.bf16.mxu1 %v11833_v61 }
  0xaf   :  { %1025 = vmatpush2.bf16.msra.mxu0 %v11831_v60 }
  0xb0   :  { %1066 = vmatpush2.bf16.msra.mxu1 %v11835_v62  ;;  %1026 = vmatprep.subr.bf16.mxu0 %v11837_v63 }
  0xb1   :  { %1067 = vmatprep.subr.bf16.mxu1 %v11840_v1 }
  0xb3   :  { %1027 = vmatpush2.bf16.msra.mxu0 %v11845_v2 }
  0xb4   :  { %1068 = vmatpush2.bf16.msra.mxu1 %v11847_v3  ;;  %1490 = vmatprep.subr.bf16.mxu0 %v11482_v4 }
  0xb5   :  { %1531 = vmatprep.subr.bf16.mxu1 %v11483_v5 }
 0x136   :  { %v539_v13 = vpop.f32.mrf.mxu0  ;;  %v580_v0 = vpop.f32.mrf.mxu1 }
 0x137   :  { %v540_v14 = vadd.f32 %v539_v13, %v11864_v11  ;;  %v581_v29 = vadd.f32 %v580_v0, %v11880_v26 }
 0x138   :  { %v541_v15 = vpop.f32.mrf.mxu0  ;;  %v582_v23 = vpop.f32.mrf.mxu1 }
 0x139   :  { %v9082_v16 = vmul.f32 -1.442695, %v540_v14  ;;  %v542_v17 = vadd.f32 %v541_v15, %v11868_v12  ;;  %v583_v28 = vadd.f32 %v582_v23, %v11876_v24 }
 0x13a   :  { %v543_v18 = vpop.f32.mrf.mxu0  ;;  %v584_v25 = vpop.f32.mrf.mxu1 }
 0x13b   :  { %11194 = vpow2.f32 %v9082_v16  ;;  %v9083_v20 = vmul.f32 -1.442695, %v542_v17  ;;  %v9084_v30 = vmul.f32 -1.442695, %v583_v28  ;;  %v11484_v28 = vld [vmem:[#allocation5 + $0xe0] ss:$16 sps:$4 sm:$0xff]  }
 0x13c   :  { %v544_v21 = vpop.f32.mrf.mxu0  ;;  %v585_v27 = vpop.f32.mrf.mxu1 }
 0x13d   :  { %11196 = vpow2.f32 %v9083_v20 }
 0x13e   :  { %11198 = vtanh.f32 %v581_v29  ;;  %v11485_v29 = vld [vmem:[#allocation5 + $0xc4] ss:$16 sps:$4 sm:$0xff]  }
 0x13f   :  { %11200 = vpow2.f32 %v9084_v30  ;;  %v11486_v30 = vld [vmem:[#allocation5 + $0xe8] ss:$16 sps:$4 sm:$0xff]  }
 0x148   :  { %v11195_v4 = vpop.eup %11194 }
 0x149   :  { %v590_v5 = vadd.f32 1.0, %v11195_v4  ;;  %v11487_v4 = vld [vmem:[#allocation5 + $0xcc] ss:$16 sps:$4 sm:$0xff]  }
 0x14a   :  { %v11197_v6 = vpop.eup %11196 }
 0x14b   :  { %11202 = vrcp.f32 %v590_v5  ;;  %v596_v13 = vadd.f32 1.0, %v11197_v6  ;;  %v11199_v14 = vpop.eup %11198  ;;  %v11488_v5 = vld [vmem:[#allocation5 + $0xc0] ss:$16 sps:$4 sm:$0xff]   ;;  %v11489_v6 = vld [vmem:[#allocation5 + $0xa4] ss:$16 sps:$4 sm:$0xff]  }
 0x14c   :  { %v11201_v15 = vpop.eup %11200 }
 0x14d   :  { %11204 = vrcp.f32 %v596_v13  ;;  %v603_v8 = vadd.f32 1.0, %v11201_v15  ;;  %v11490_v13 = vld [vmem:[#allocation5 + $0xc8] ss:$16 sps:$4 sm:$0xff]   ;;  %v11492_v15 = vld [vmem:[#allocation5 + $0xa0] ss:$16 sps:$4 sm:$0xff]  }
 0x14f   :  { %11206 = vrcp.f32 %v603_v8  ;;  %v11495_v8 = vld [vmem:[#allocation5 + $0x8c] ss:$16 sps:$4 sm:$0xff]  }
 0x158   :  { %v11203_v16 = vpop.eup %11202 }
 0x159   :  { %v607_v20 = vmul.f32 %v11203_v16, %v11199_v14  ;;  %v11491_v14 = vld [vmem:[#allocation5 + $0xac] ss:$16 sps:$4 sm:$0xff]   ;;  %v11493_v16 = vld [vmem:[#allocation5 + $0x84] ss:$16 sps:$4 sm:$0xff]  }
 0x15a   :  { %v11205_v17 = vpop.eup %11204 }
 0x15b   :  { %v606_v18 = vmul.f32 0.0, %v11205_v17  ;;  %v11494_v17 = vld [vmem:[#allocation5 + $0xa8] ss:$16 sps:$4 sm:$0xff]  }
 0x15c   :  { %v11207_v0 = vpop.eup %11206 }
 0x15d   :  { %v11884_v21 = vadd.f32 %v607_v20, %v606_v18  ;;  %v11496_v18 = vld [vmem:[#allocation5 + $0x80] ss:$16 sps:$4 sm:$0xff]   ;;  %v11497_v20 = vld [vmem:[#allocation5 + $0x64] ss:$16 sps:$4 sm:$0xff]  }
 0x15f   :  { %11208 = vtanh.f32 %v11884_v21 }
 0x16c   :  { %v11209_v23 = vpop.eup %11208 }
 0x16d   :  { %v610_v25 = vmul.f32 %v11209_v23, %v11207_v0  ;;  %v11498_v0 = vld [vmem:[#allocation5 + $0x88] ss:$16 sps:$4 sm:$0xff]   ;;  %v11499_v23 = vld [vmem:[#allocation5 + $0x6c] ss:$16 sps:$4 sm:$0xff]  }
 0x16f   :  { %v611_v27 = vpack.c.bf16 %v610_v25, %v610_v25  ;;  %v11500_v25 = vld [vmem:[#allocation5 + $0x60] ss:$16 sps:$4 sm:$0xff]  }
 0x171   :  { %1029 = vmatmul.mubr.bf16.vlgmr.msra.gmra.mxu0 %v611_v27  ;;  %1070 = vmatmul.mubr.bf16.vlgmr.msra.gmra.mxu1 %v611_v27 }
 0x172   :  { %1491 = vmatpush1.bf16.msra.mxu0 %v11484_v28  ;;  %1522 = vmatprep.mubr.bf16.mxu0 %v611_v27  ;;  %v11502_v28 = vld [vmem:[#allocation5 + $0x68] ss:$16 sps:$4 sm:$0xff]  }
 0x173   :  { %1563 = vmatprep.mubr.bf16.mxu1 %v611_v27  ;;  %1492 = vmatprep.subr.bf16.mxu0 %v11485_v29  ;;  %v11501_v27 = vld [vmem:[#allocation5 + $0x44] ss:$16 sps:$4 sm:$0xff]   ;;  %v11503_v29 = vld [vmem:[#allocation5 + $0x4c] ss:$16 sps:$4 sm:$0xff]  }
 0x174   :  { %1532 = vmatpush1.bf16.msra.mxu1 %v11486_v30  ;;  %v11504_v30 = vld [vmem:[#allocation5 + $0x40] ss:$16 sps:$4 sm:$0xff]  }
 0x175   :  { %1533 = vmatprep.subr.bf16.mxu1 %v11487_v4  ;;  %v11505_v4 = vld [vmem:[#allocation5 + $0x24] ss:$16 sps:$4 sm:$0xff]  }
 0x176   :  { %1493 = vmatpush1.bf16.msra.mxu0 %v11488_v5  ;;  %v11506_v5 = vld [vmem:[#allocation5 + $0x48] ss:$16 sps:$4 sm:$0xff]  }
 0x177   :  { %1494 = vmatprep.subr.bf16.mxu0 %v11489_v6  ;;  %v11507_v6 = vld [vmem:[#allocation5 + $0x2c] ss:$16 sps:$4 sm:$0xff]  }
 0x178   :  { %1534 = vmatpush1.bf16.msra.mxu1 %v11490_v13  ;;  %v11508_v13 = vld [vmem:[#allocation5 + $0x20] ss:$16 sps:$4 sm:$0xff]  }
 0x179   :  { %1535 = vmatprep.subr.bf16.mxu1 %v11491_v14  ;;  %v11509_v14 = vld [vmem:[#allocation5 + $0x4] ss:$16 sps:$4 sm:$0xff]  }
 0x17a   :  { %1495 = vmatpush1.bf16.msra.mxu0 %v11492_v15  ;;  %v11510_v15 = vld [vmem:[#allocation5 + $0x28] ss:$16 sps:$4 sm:$0xff]  }
 0x17b   :  { %1496 = vmatprep.subr.bf16.mxu0 %v11493_v16  ;;  %v11511_v16 = vld [vmem:[#allocation5 + $0xc] ss:$16 sps:$4 sm:$0xff]  }
 0x17c   :  { %1536 = vmatpush1.bf16.msra.mxu1 %v11494_v17  ;;  %v11512_v17 = vld [vmem:[#allocation5] ss:$16 sps:$4 sm:$0xff]  }
 0x17d   :  { %1537 = vmatprep.subr.bf16.mxu1 %v11495_v8  ;;  %v11513_v8 = vld [vmem:[#allocation5 + $0x1e4] ss:$16 sps:$4 sm:$0xff]  }
 0x17e   :  { %1497 = vmatpush1.bf16.msra.mxu0 %v11496_v18  ;;  %v11514_v18 = vld [vmem:[#allocation5 + $0x8] ss:$16 sps:$4 sm:$0xff]  }
 0x17f   :  { %1498 = vmatprep.subr.bf16.mxu0 %v11497_v20  ;;  %v11515_v20 = vld [vmem:[#allocation5 + $0x1ec] ss:$16 sps:$4 sm:$0xff]  }
 0x180   :  { %1538 = vmatpush1.bf16.msra.mxu1 %v11498_v0  ;;  %v11516_v0 = vld [vmem:[#allocation5 + $0x1e0] ss:$16 sps:$4 sm:$0xff]  }
 0x181   :  { %1539 = vmatprep.subr.bf16.mxu1 %v11499_v23  ;;  %v11517_v23 = vld [vmem:[#allocation5 + $0x1c4] ss:$16 sps:$4 sm:$0xff]  }
 0x182   :  { %1499 = vmatpush1.bf16.msra.mxu0 %v11500_v25  ;;  %v11518_v25 = vld [vmem:[#allocation5 + $0x1e8] ss:$16 sps:$4 sm:$0xff]  }
 0x183   :  { %1500 = vmatprep.subr.bf16.mxu0 %v11501_v27  ;;  %v11519_v27 = vld [vmem:[#allocation5 + $0x1cc] ss:$16 sps:$4 sm:$0xff]  }
 0x184   :  { %1540 = vmatpush1.bf16.msra.mxu1 %v11502_v28  ;;  %v11520_v28 = vld [vmem:[#allocation5 + $0x1c0] ss:$16 sps:$4 sm:$0xff]  }
 0x185   :  { %1541 = vmatprep.subr.bf16.mxu1 %v11503_v29  ;;  %v11521_v29 = vld [vmem:[#allocation5 + $0x1a4] ss:$16 sps:$4 sm:$0xff]  }
 0x186   :  { %1501 = vmatpush1.bf16.msra.mxu0 %v11504_v30  ;;  %v11522_v30 = vld [vmem:[#allocation5 + $0x1c8] ss:$16 sps:$4 sm:$0xff]  }
 0x187   :  { %1502 = vmatprep.subr.bf16.mxu0 %v11505_v4  ;;  %v11523_v4 = vld [vmem:[#allocation5 + $0x1ac] ss:$16 sps:$4 sm:$0xff]  }
 0x188   :  { %1542 = vmatpush1.bf16.msra.mxu1 %v11506_v5  ;;  %v11524_v5 = vld [vmem:[#allocation5 + $0x1a0] ss:$16 sps:$4 sm:$0xff]  }
 0x189   :  { %1543 = vmatprep.subr.bf16.mxu1 %v11507_v6  ;;  %v11525_v6 = vld [vmem:[#allocation5 + $0x184] ss:$16 sps:$4 sm:$0xff]  }
 0x18a   :  { %1503 = vmatpush1.bf16.msra.mxu0 %v11508_v13  ;;  %v11526_v13 = vld [vmem:[#allocation5 + $0x1a8] ss:$16 sps:$4 sm:$0xff]  }
 0x18b   :  { %1504 = vmatprep.subr.bf16.mxu0 %v11509_v14  ;;  %v11527_v14 = vld [vmem:[#allocation5 + $0x18c] ss:$16 sps:$4 sm:$0xff]  }
 0x18c   :  { %1544 = vmatpush1.bf16.msra.mxu1 %v11510_v15  ;;  %v11528_v15 = vld [vmem:[#allocation5 + $0x180] ss:$16 sps:$4 sm:$0xff]  }
 0x18d   :  { %1545 = vmatprep.subr.bf16.mxu1 %v11511_v16  ;;  %v11529_v16 = vld [vmem:[#allocation5 + $0x164] ss:$16 sps:$4 sm:$0xff]  }
 0x18e   :  { %1505 = vmatpush1.bf16.msra.mxu0 %v11512_v17  ;;  %v11530_v17 = vld [vmem:[#allocation5 + $0x188] ss:$16 sps:$4 sm:$0xff]  }
 0x18f   :  { %1506 = vmatprep.subr.bf16.mxu0 %v11513_v8  ;;  %v11531_v8 = vld [vmem:[#allocation5 + $0x16c] ss:$16 sps:$4 sm:$0xff]  }
 0x190   :  { %1546 = vmatpush1.bf16.msra.mxu1 %v11514_v18  ;;  %v11532_v18 = vld [vmem:[#allocation5 + $0x160] ss:$16 sps:$4 sm:$0xff]  }
 0x191   :  { %1547 = vmatprep.subr.bf16.mxu1 %v11515_v20  ;;  %v11533_v20 = vld [vmem:[#allocation5 + $0x144] ss:$16 sps:$4 sm:$0xff]  }
 0x192   :  { %1507 = vmatpush2.bf16.msra.mxu0 %v11516_v0  ;;  %v11534_v0 = vld [vmem:[#allocation5 + $0x168] ss:$16 sps:$4 sm:$0xff]  }
 0x193   :  { %1508 = vmatprep.subr.bf16.mxu0 %v11517_v23  ;;  %v11535_v23 = vld [vmem:[#allocation5 + $0x14c] ss:$16 sps:$4 sm:$0xff]  }
 0x194   :  { %1548 = vmatpush2.bf16.msra.mxu1 %v11518_v25  ;;  %v11536_v25 = vld [vmem:[#allocation5 + $0x140] ss:$16 sps:$4 sm:$0xff]  }
 0x195   :  { %1549 = vmatprep.subr.bf16.mxu1 %v11519_v27  ;;  %v11537_v27 = vld [vmem:[#allocation5 + $0x124] ss:$16 sps:$4 sm:$0xff]  }
 0x196   :  { %1509 = vmatpush2.bf16.msra.mxu0 %v11520_v28  ;;  %v11538_v28 = vld [vmem:[#allocation5 + $0x148] ss:$16 sps:$4 sm:$0xff]  }
 0x197   :  { %1510 = vmatprep.subr.bf16.mxu0 %v11521_v29  ;;  %v11539_v29 = vld [vmem:[#allocation5 + $0x12c] ss:$16 sps:$4 sm:$0xff]  }
 0x198   :  { %1550 = vmatpush2.bf16.msra.mxu1 %v11522_v30  ;;  %v11540_v30 = vld [vmem:[#allocation5 + $0x120] ss:$16 sps:$4 sm:$0xff]  }
 0x199   :  { %1551 = vmatprep.subr.bf16.mxu1 %v11523_v4  ;;  %v1104_v4 = vld [vmem:[#allocation2 + $0x8] sm:$0xff] }
 0x19a   :  { %1511 = vmatpush2.bf16.msra.mxu0 %v11524_v5  ;;  %v11541_v5 = vld [vmem:[#allocation5 + $0x104] ss:$16 sps:$4 sm:$0xff]  }
 0x19b   :  { %1512 = vmatprep.subr.bf16.mxu0 %v11525_v6  ;;  %v11542_v6 = vld [vmem:[#allocation5 + $0x128] ss:$16 sps:$4 sm:$0xff]  }
 0x19c   :  { %1552 = vmatpush2.bf16.msra.mxu1 %v11526_v13  ;;  %v1105_v13 = vpack.c.bf16 %v1104_v4, %v1104_v4  ;;  %v11557_v4 = vld [vmem:[#allocation7 + $0x84] ss:$16 sps:$4 sm:$0xff]  }
 0x19d   :  { %1553 = vmatprep.subr.bf16.mxu1 %v11527_v14  ;;  %v11543_v14 = vld [vmem:[#allocation5 + $0x10c] ss:$16 sps:$4 sm:$0xff]  }
 0x19e   :  { %1513 = vmatpush2.bf16.msra.mxu0 %v11528_v15  ;;  %v11544_v15 = vld [vmem:[#allocation5 + $0x100] ss:$16 sps:$4 sm:$0xff]  }
 0x19f   :  { %1514 = vmatprep.subr.bf16.mxu0 %v11529_v16  ;;  %v11545_v16 = vld [vmem:[#allocation7 + $0xe4] ss:$16 sps:$4 sm:$0xff]  }
 0x1a0   :  { %1554 = vmatpush2.bf16.msra.mxu1 %v11530_v17  ;;  %v11546_v17 = vld [vmem:[#allocation5 + $0x108] ss:$16 sps:$4 sm:$0xff]  }
 0x1a1   :  { %1555 = vmatprep.subr.bf16.mxu1 %v11531_v8  ;;  %v11547_v8 = vld [vmem:[#allocation7 + $0xec] ss:$16 sps:$4 sm:$0xff]  }
 0x1a2   :  { %1515 = vmatpush2.bf16.msra.mxu0 %v11532_v18  ;;  %v11548_v18 = vld [vmem:[#allocation7 + $0xe0] ss:$16 sps:$4 sm:$0xff]  }
 0x1a3   :  { %1516 = vmatprep.subr.bf16.mxu0 %v11533_v20  ;;  %v11549_v20 = vld [vmem:[#allocation7 + $0xc4] ss:$16 sps:$4 sm:$0xff]  }
 0x1a4   :  { %1556 = vmatpush2.bf16.msra.mxu1 %v11534_v0  ;;  %v11550_v0 = vld [vmem:[#allocation7 + $0xe8] ss:$16 sps:$4 sm:$0xff]  }
 0x1a5   :  { %1557 = vmatprep.subr.bf16.mxu1 %v11535_v23  ;;  %v11551_v23 = vld [vmem:[#allocation7 + $0xcc] ss:$16 sps:$4 sm:$0xff]  }
 0x1a6   :  { %1517 = vmatpush2.bf16.msra.mxu0 %v11536_v25  ;;  %v11552_v25 = vld [vmem:[#allocation7 + $0xc0] ss:$16 sps:$4 sm:$0xff]  }
 0x1a7   :  { %1518 = vmatprep.subr.bf16.mxu0 %v11537_v27  ;;  %v11553_v27 = vld [vmem:[#allocation7 + $0xa4] ss:$16 sps:$4 sm:$0xff]  }
 0x1a8   :  { %1558 = vmatpush2.bf16.msra.mxu1 %v11538_v28  ;;  %v11554_v28 = vld [vmem:[#allocation7 + $0xc8] ss:$16 sps:$4 sm:$0xff]  }
 0x1a9   :  { %1559 = vmatprep.subr.bf16.mxu1 %v11539_v29  ;;  %v11555_v29 = vld [vmem:[#allocation7 + $0xac] ss:$16 sps:$4 sm:$0xff]  }
 0x1aa   :  { %1519 = vmatpush2.bf16.msra.mxu0 %v11540_v30  ;;  %v11556_v30 = vld [vmem:[#allocation7 + $0xa0] ss:$16 sps:$4 sm:$0xff]  }
 0x1ab   :  { %1520 = vmatprep.subr.bf16.mxu0 %v11541_v5  ;;  %v11558_v5 = vld [vmem:[#allocation7 + $0xa8] ss:$16 sps:$4 sm:$0xff]  }
 0x1ac   :  { %1560 = vmatpush2.bf16.msra.mxu1 %v11542_v6  ;;  %v11559_v6 = vld [vmem:[#allocation7 + $0x8c] ss:$16 sps:$4 sm:$0xff]  }
 0x1ad   :  { %1561 = vmatprep.subr.bf16.mxu1 %v11543_v14  ;;  %v11561_v14 = vld [vmem:[#allocation7 + $0x64] ss:$16 sps:$4 sm:$0xff]  }
 0x1ae   :  { %1521 = vmatpush2.bf16.msra.mxu0 %v11544_v15  ;;  %v11562_v15 = vld [vmem:[#allocation7 + $0x88] ss:$16 sps:$4 sm:$0xff]  }
 0x1af   :  { %1982 = vmatprep.subr.bf16.mxu0 %v11545_v16  ;;  %v11563_v16 = vld [vmem:[#allocation7 + $0x6c] ss:$16 sps:$4 sm:$0xff]  }
 0x1b0   :  { %1562 = vmatpush2.bf16.msra.mxu1 %v11546_v17  ;;  %v11564_v17 = vld [vmem:[#allocation7 + $0x60] ss:$16 sps:$4 sm:$0xff]  }
 0x1b1   :  { %1523 = vmatmul.mubr.bf16.vlgmr.msra.gmra.mxu0 %v1105_v13  ;;  %2023 = vmatprep.subr.bf16.mxu1 %v11547_v8  ;;  %v11565_v8 = vld [vmem:[#allocation7 + $0x44] ss:$16 sps:$4 sm:$0xff]  }
 0x1b2   :  { %1983 = vmatpush1.bf16.msra.mxu0 %v11548_v18  ;;  %v11566_v18 = vld [vmem:[#allocation7 + $0x68] ss:$16 sps:$4 sm:$0xff]  }
 0x1b3   :  { %1564 = vmatmul.mubr.bf16.vlgmr.msra.gmra.mxu1 %v1105_v13  ;;  %1984 = vmatprep.subr.bf16.mxu0 %v11549_v20  ;;  %v11560_v13 = vld [vmem:[#allocation7 + $0x80] ss:$16 sps:$4 sm:$0xff]   ;;  %v11567_v20 = vld [vmem:[#allocation7 + $0x4c] ss:$16 sps:$4 sm:$0xff]  }
 0x1b4   :  { %2024 = vmatpush1.bf16.msra.mxu1 %v11550_v0  ;;  %v11568_v0 = vld [vmem:[#allocation7 + $0x40] ss:$16 sps:$4 sm:$0xff]  }
 0x1b5   :  { %2025 = vmatprep.subr.bf16.mxu1 %v11551_v23  ;;  %v11569_v23 = vld [vmem:[#allocation7 + $0x24] ss:$16 sps:$4 sm:$0xff]  }
 0x1b6   :  { %1985 = vmatpush1.bf16.msra.mxu0 %v11552_v25  ;;  %v11570_v25 = vld [vmem:[#allocation7 + $0x48] ss:$16 sps:$4 sm:$0xff]  }
 0x1b7   :  { %1986 = vmatprep.subr.bf16.mxu0 %v11553_v27  ;;  %v11571_v27 = vld [vmem:[#allocation7 + $0x2c] ss:$16 sps:$4 sm:$0xff]  }
 0x1b8   :  { %2026 = vmatpush1.bf16.msra.mxu1 %v11554_v28  ;;  %v11572_v28 = vld [vmem:[#allocation7 + $0x20] ss:$16 sps:$4 sm:$0xff]  }
 0x1b9   :  { %2027 = vmatprep.subr.bf16.mxu1 %v11555_v29  ;;  %v11573_v29 = vld [vmem:[#allocation7 + $0x28] ss:$16 sps:$4 sm:$0xff]  }
 0x1ba   :  { %1987 = vmatpush1.bf16.msra.mxu0 %v11556_v30 }
 0x1bb   :  { %1988 = vmatprep.subr.bf16.mxu0 %v11557_v4 }
 0x1bc   :  { %2028 = vmatpush1.bf16.msra.mxu1 %v11558_v5 }
 0x1bd   :  { %2029 = vmatprep.subr.bf16.mxu1 %v11559_v6 }
 0x1be   :  { %1989 = vmatpush1.bf16.msra.mxu0 %v11560_v13 }
 0x1bf   :  { %1990 = vmatprep.subr.bf16.mxu0 %v11561_v14 }
 0x1c0   :  { %2030 = vmatpush1.bf16.msra.mxu1 %v11562_v15 }
 0x1c1   :  { %2031 = vmatprep.subr.bf16.mxu1 %v11563_v16 }
 0x1c2   :  { %1991 = vmatpush1.bf16.msra.mxu0 %v11564_v17 }
 0x1c3   :  { %1992 = vmatprep.subr.bf16.mxu0 %v11565_v8 }
 0x1c4   :  { %2032 = vmatpush1.bf16.msra.mxu1 %v11566_v18 }
 0x1c5   :  { %2033 = vmatprep.subr.bf16.mxu1 %v11567_v20 }
 0x1c6   :  { %1993 = vmatpush1.bf16.msra.mxu0 %v11568_v0 }
 0x1c7   :  { %1994 = vmatprep.subr.bf16.mxu0 %v11569_v23 }
 0x1c8   :  { %2034 = vmatpush1.bf16.msra.mxu1 %v11570_v25 }
 0x1c9   :  { %2035 = vmatprep.subr.bf16.mxu1 %v11571_v27 }
 0x1ca   :  { %1995 = vmatpush1.bf16.msra.mxu0 %v11572_v28 }
 0x1cb   :  { %1996 = vmatprep.subr.bf16.mxu0 %v11747_v31  ;;  %v11923_v31 = vld [vmem:[#allocation5 + $0xe4] ss:$16 sps:$4 sm:$0xff]  }
 0x1cc   :  { %2036 = vmatpush1.bf16.msra.mxu1 %v11573_v29 }
 0x1cd   :  { %2037 = vmatprep.subr.bf16.mxu1 %v11751_v33 }
 0x1ce   :  { %1997 = vmatpush1.bf16.msra.mxu0 %v11749_v32  ;;  %v97_v32 = vld [vmem:[#allocation8] sm:$0xf] }
 0x1cf   :  { %1998 = vmatprep.subr.bf16.mxu0 %v11759_v35  ;;  %v11928_v33 = vrot.slane %v97_v32, %v79_v9 }
 0x1d0   :  { %2038 = vmatpush1.bf16.msra.mxu1 %v11754_v34  ;;  %v11932_v34 = vrot.slane %v97_v32, %v83_v10 }
 0x1d1   :  { %2039 = vmatprep.subr.bf16.mxu1 %v11763_v37 }
 0x1d2   :  { %1999 = vmatpush2.bf16.msra.mxu0 %v11761_v36 }
 0x1d3   :  { %2000 = vmatprep.subr.bf16.mxu0 %v11771_v39 }
 0x1d4   :  { %2040 = vmatpush2.bf16.msra.mxu1 %v11766_v38 }
 0x1d5   :  { %2041 = vmatprep.subr.bf16.mxu1 %v11775_v41 }
 0x1d6   :  { %2001 = vmatpush2.bf16.msra.mxu0 %v11773_v40 }
 0x1d7   :  { %2002 = vmatprep.subr.bf16.mxu0 %v11783_v43 }
 0x1d8   :  { %2042 = vmatpush2.bf16.msra.mxu1 %v11778_v42 }
 0x1d9   :  { %2043 = vmatprep.subr.bf16.mxu1 %v11787_v45 }
 0x1da   :  { %2003 = vmatpush2.bf16.msra.mxu0 %v11785_v44 }
 0x1db   :  { %2004 = vmatprep.subr.bf16.mxu0 %v11795_v47  ;;  %v11936_v47 = vld [vmem:[#allocation5 + $0xec] ss:$16 sps:$4 sm:$0xff]  }
 0x1dc   :  { %2044 = vmatpush2.bf16.msra.mxu1 %v11790_v46 }
 0x1dd   :  { %2045 = vmatprep.subr.bf16.mxu1 %v11799_v49 }
 0x1de   :  { %2005 = vmatpush2.bf16.msra.mxu0 %v11797_v48  ;;  %v11940_v48 = vrot.slane %v97_v32, %v91_v19 }
 0x1df   :  { %2006 = vmatprep.subr.bf16.mxu0 %v11807_v51 }
 0x1e0   :  { %2046 = vmatpush2.bf16.msra.mxu1 %v11802_v50  ;;  %v11946_v50 = vrot.slane %v97_v32, %v87_v22 }
 0x1e1   :  { %2047 = vmatprep.subr.bf16.mxu1 %v11813_v54 }
 0x1e2   :  { %2007 = vmatpush2.bf16.msra.mxu0 %v11809_v52 }
 0x1e3   :  { %2008 = vmatprep.subr.bf16.mxu0 %v11816_v55 }
 0x1e4   :  { %2048 = vmatpush2.bf16.msra.mxu1 %v11811_v53 }
 0x1e5   :  { %2049 = vmatprep.subr.bf16.mxu1 %v11822_v57 }
 0x1e6   :  { %2009 = vmatpush2.bf16.msra.mxu0 %v11820_v56 }
 0x1e7   :  { %2010 = vmatprep.subr.bf16.mxu0 %v11828_v59 }
 0x1e8   :  { %2050 = vmatpush2.bf16.msra.mxu1 %v11826_v58 }
 0x1e9   :  { %2051 = vmatprep.subr.bf16.mxu1 %v11833_v61 }
 0x1ea   :  { %2011 = vmatpush2.bf16.msra.mxu0 %v11831_v60 }
 0x1eb   :  { %2012 = vmatprep.subr.bf16.mxu0 %v11837_v63 }
 0x1ec   :  { %2052 = vmatpush2.bf16.msra.mxu1 %v11835_v62 }
 0x1ed   :  { %2053 = vmatprep.subr.bf16.mxu1 %v11840_v1 }
 0x1ee   :  { %2013 = vmatpush2.bf16.msra.mxu0 %v11845_v2 }
 0x1ef   :  { %2477 = vmatprep.subr.bf16.mxu0 %v11923_v31 }
 0x1f0   :  { %2054 = vmatpush2.bf16.msra.mxu1 %v11847_v3 }
 0x1f1   :  { %2518 = vmatprep.subr.bf16.mxu1 %v11936_v47 }
 0x231   :  { %v1030_v35 = vpop.f32.mrf.mxu0  ;;  %v1071_v36 = vpop.f32.mrf.mxu1 }
 0x232   :  { %v1031_v37 = vadd.f32 %v1030_v35, %v11928_v33  ;;  %v1072_v53 = vadd.f32 %v1071_v36, %v11946_v50 }
 0x233   :  { %v1032_v38 = vpop.f32.mrf.mxu0  ;;  %v1073_v39 = vpop.f32.mrf.mxu1 }
 0x234   :  { %v9149_v40 = vmul.f32 -1.442695, %v1031_v37  ;;  %v1033_v41 = vadd.f32 %v1032_v38, %v11932_v34  ;;  %v1074_v49 = vadd.f32 %v1073_v39, %v11940_v48 }
 0x235   :  { %v1034_v42 = vpop.f32.mrf.mxu0  ;;  %v1075_v43 = vpop.f32.mrf.mxu1 }
 0x236   :  { %11210 = vpow2.f32 %v9149_v40  ;;  %v9150_v44 = vmul.f32 -1.442695, %v1033_v41  ;;  %v9151_v51 = vmul.f32 -1.442695, %v1074_v49  ;;  %v11960_v43 = vld [vmem:[#allocation5 + $0xe0] ss:$16 sps:$4 sm:$0xff]  }
 0x237   :  { %v1035_v45 = vpop.f32.mrf.mxu0  ;;  %v1076_v46 = vpop.f32.mrf.mxu1  ;;  %v11966_v49 = vld [vmem:[#allocation5 + $0xcc] ss:$16 sps:$4 sm:$0xff]  }
 0x238   :  { %11212 = vpow2.f32 %v9150_v44  ;;  %v11962_v45 = vld [vmem:[#allocation5 + $0xc4] ss:$16 sps:$4 sm:$0xff]   ;;  %v11964_v46 = vld [vmem:[#allocation5 + $0xe8] ss:$16 sps:$4 sm:$0xff]  }
 0x239   :  { %11214 = vpow2.f32 %v9151_v51  ;;  %v11972_v51 = vld [vmem:[#allocation5 + $0xa4] ss:$16 sps:$4 sm:$0xff]  }
 0x243   :  { %v11211_v52 = vpop.eup %11210 }
 0x244   :  { %v1081_v54 = vadd.f32 1.0, %v11211_v52  ;;  %v11975_v52 = vld [vmem:[#allocation5 + $0xc8] ss:$16 sps:$4 sm:$0xff]  }
 0x245   :  { %v11213_v55 = vpop.eup %11212 }
 0x246   :  { %11216 = vrcp.f32 %v1081_v54  ;;  %v1087_v56 = vadd.f32 1.0, %v11213_v55  ;;  %v11215_v57 = vpop.eup %11214  ;;  %v11981_v54 = vld [vmem:[#allocation5 + $0xa0] ss:$16 sps:$4 sm:$0xff]   ;;  %v11984_v55 = vld [vmem:[#allocation5 + $0x84] ss:$16 sps:$4 sm:$0xff]  }
 0x247   :  { %11218 = vtanh.f32 %v1072_v53  ;;  %v1094_v61 = vadd.f32 1.0, %v11215_v57  ;;  %v11978_v53 = vld [vmem:[#allocation5 + $0xac] ss:$16 sps:$4 sm:$0xff]  }
 0x248   :  { %11220 = vrcp.f32 %v1087_v56  ;;  %v11987_v56 = vld [vmem:[#allocation5 + $0xa8] ss:$16 sps:$4 sm:$0xff]   ;;  %v11990_v57 = vld [vmem:[#allocation5 + $0x8c] ss:$16 sps:$4 sm:$0xff]  }
 0x249   :  { %11222 = vrcp.f32 %v1094_v61  ;;  %v12002_v61 = vld [vmem:[#allocation5 + $0x6c] ss:$16 sps:$4 sm:$0xff]  }
 0x253   :  { %v11217_v58 = vpop.eup %11216 }
 0x254   :  { %v11219_v59 = vpop.eup %11218 }
 0x255   :  { %v11221_v60 = vpop.eup %11220  ;;  %v1098_v63 = vmul.f32 %v11219_v59, %v11217_v58  ;;  %v11993_v58 = vld [vmem:[#allocation5 + $0x80] ss:$16 sps:$4 sm:$0xff]   ;;  %v11996_v59 = vld [vmem:[#allocation5 + $0x64] ss:$16 sps:$4 sm:$0xff]  }
 0x256   :  { %v1097_v62 = vmul.f32 0.0, %v11221_v60  ;;  %v11223_v2 = vpop.eup %11222  ;;  %v11999_v60 = vld [vmem:[#allocation5 + $0x88] ss:$16 sps:$4 sm:$0xff]  }
 0x258   :  { %v11949_v1 = vadd.f32 %v1098_v63, %v1097_v62  ;;  %v12005_v62 = vld [vmem:[#allocation5 + $0x60] ss:$16 sps:$4 sm:$0xff]   ;;  %v12008_v63 = vld [vmem:[#allocation5 + $0x44] ss:$16 sps:$4 sm:$0xff]  }
 0x25a   :  { %11224 = vtanh.f32 %v11949_v1 }
 0x267   :  { %v11225_v3 = vpop.eup %11224 }
 0x268   :  { %v1101_v7 = vmul.f32 %v11225_v3, %v11223_v2  ;;  %v12011_v2 = vld [vmem:[#allocation5 + $0x68] ss:$16 sps:$4 sm:$0xff]   ;;  %v12014_v3 = vld [vmem:[#allocation5 + $0x4c] ss:$16 sps:$4 sm:$0xff]  }
 0x26a   :  { %1102 = vst [vmem:[#allocation10] sm:$0xff] %v1101_v7  ;;  %v1597_v9 = vpack.c.bf16 %v1101_v7, %v1101_v7  ;;  %v12017_v7 = vld [vmem:[#allocation5 + $0x40] ss:$16 sps:$4 sm:$0xff]  }
 0x26c   :  { %2014 = vmatprep.mubr.bf16.mxu0 %v1597_v9  ;;  %2055 = vmatprep.mubr.bf16.mxu1 %v1597_v9  ;;  %v12020_v9 = vld [vmem:[#allocation5 + $0x24] ss:$16 sps:$4 sm:$0xff]  }
 0x271   :  { %v1524_v10 = vpop.f32.mrf.mxu0 }
 0x272   :  { %v1525_v19 = vadd.f32 %v1524_v10, %v11864_v11  ;;  %v12023_v10 = vld [vmem:[#allocation5 + $0x48] ss:$16 sps:$4 sm:$0xff]  }
 0x273   :  { %v1526_v22 = vpop.f32.mrf.mxu0  ;;  %v1565_v30 = vpop.f32.mrf.mxu1 }
 0x274   :  { %v9216_v4 = vmul.f32 -1.442695, %v1525_v19  ;;  %v1527_v5 = vadd.f32 %v1526_v22, %v11868_v12  ;;  %v1566_v18 = vadd.f32 %v1565_v30, %v11880_v26  ;;  %v12026_v19 = vld [vmem:[#allocation5 + $0x2c] ss:$16 sps:$4 sm:$0xff]   ;;  %v12029_v22 = vld [vmem:[#allocation5 + $0x20] ss:$16 sps:$4 sm:$0xff]  }
 0x275   :  { %v1528_v6 = vpop.f32.mrf.mxu0  ;;  %v1567_v13 = vpop.f32.mrf.mxu1  ;;  %v12032_v30 = vld [vmem:[#allocation5 + $0x4] ss:$16 sps:$4 sm:$0xff]  }
 0x276   :  { %11226 = vpow2.f32 %v9216_v4  ;;  %v9217_v14 = vmul.f32 -1.442695, %v1527_v5  ;;  %v1568_v8 = vadd.f32 %v1567_v13, %v11876_v24  ;;  %v12035_v4 = vld [vmem:[#allocation5 + $0x28] ss:$16 sps:$4 sm:$0xff]   ;;  %v12038_v5 = vld [vmem:[#allocation5 + $0xc] ss:$16 sps:$4 sm:$0xff]  }
 0x277   :  { %v1529_v15 = vpop.f32.mrf.mxu0  ;;  %v1569_v16 = vpop.f32.mrf.mxu1  ;;  %v12041_v6 = vld [vmem:[#allocation5] ss:$16 sps:$4 sm:$0xff]   ;;  %v12044_v13 = vld [vmem:[#allocation5 + $0x1e4] ss:$16 sps:$4 sm:$0xff]  }
 0x278   :  { %11228 = vpow2.f32 %v9217_v14  ;;  %v9218_v20 = vmul.f32 -1.442695, %v1568_v8  ;;  %v12047_v14 = vld [vmem:[#allocation5 + $0x8] ss:$16 sps:$4 sm:$0xff]   ;;  %v12050_v15 = vld [vmem:[#allocation5 + $0x1ec] ss:$16 sps:$4 sm:$0xff]  }
 0x279   :  { %v1570_v17 = vpop.f32.mrf.mxu1  ;;  %11230 = vtanh.f32 %v1566_v18  ;;  %v12053_v16 = vld [vmem:[#allocation5 + $0x1e0] ss:$16 sps:$4 sm:$0xff]   ;;  %v12059_v8 = vld [vmem:[#allocation5 + $0x1e8] ss:$16 sps:$4 sm:$0xff]   ;;  %v12062_v18 = vld [vmem:[#allocation5 + $0x1cc] ss:$16 sps:$4 sm:$0xff]  }
 0x27a   :  { %11232 = vpow2.f32 %v9218_v20  ;;  %v12056_v17 = vld [vmem:[#allocation5 + $0x1c4] ss:$16 sps:$4 sm:$0xff]   ;;  %v12065_v20 = vld [vmem:[#allocation5 + $0x1c0] ss:$16 sps:$4 sm:$0xff]  }
 0x283   :  { %v11227_v0 = vpop.eup %11226 }
 0x284   :  { %v1575_v23 = vadd.f32 1.0, %v11227_v0  ;;  %v12068_v0 = vld [vmem:[#allocation5 + $0x1a4] ss:$16 sps:$4 sm:$0xff]  }
 0x285   :  { %v11229_v25 = vpop.eup %11228  ;;  %13883 = vst [vmem:[#allocation15_spill] sm:$0xff] %v12068_v0 }
 0x286   :  { %11234 = vrcp.f32 %v1575_v23  ;;  %v1581_v27 = vadd.f32 1.0, %v11229_v25  ;;  %v11231_v28 = vpop.eup %11230  ;;  %v12071_v23 = vld [vmem:[#allocation5 + $0x1c8] ss:$16 sps:$4 sm:$0xff]   ;;  %v12074_v25 = vld [vmem:[#allocation5 + $0x1ac] ss:$16 sps:$4 sm:$0xff]  }
 0x287   :  { %v11233_v29 = vpop.eup %11232  ;;  %13884 = vst [vmem:[#allocation16_spill] sm:$0xff] %v12071_v23  ;;  %13885 = vst [vmem:[#allocation17_spill] sm:$0xff] %v12074_v25 }
 0x288   :  { %11236 = vrcp.f32 %v1581_v27  ;;  %v1588_v36 = vadd.f32 1.0, %v11233_v29  ;;  %v12077_v27 = vld [vmem:[#allocation5 + $0x1a0] ss:$16 sps:$4 sm:$0xff]   ;;  %v12083_v29 = vld [vmem:[#allocation5 + $0x1a8] ss:$16 sps:$4 sm:$0xff]  }
 0x289   :  { %13886 = vst [vmem:[#allocation18_spill] sm:$0xff] %v12077_v27  ;;  %13888 = vst [vmem:[#allocation20_spill] sm:$0xff] %v12083_v29 }
 0x28a   :  { %11238 = vrcp.f32 %v1588_v36  ;;  %v12092_v36 = vld [vmem:[#allocation5 + $0x164] ss:$16 sps:$4 sm:$0xff]  }
 0x28b   :  { %13891 = vst [vmem:[#allocation23_spill] sm:$0xff] %v12092_v36 }
 0x293   :  { %v11235_v32 = vpop.eup %11234 }
 0x294   :  { %v1592_v38 = vmul.f32 %v11235_v32, %v11231_v28  ;;  %v12080_v28 = vld [vmem:[#allocation5 + $0x184] ss:$16 sps:$4 sm:$0xff]   ;;  %v12086_v32 = vld [vmem:[#allocation5 + $0x18c] ss:$16 sps:$4 sm:$0xff]  }
 0x295   :  { %v11237_v35 = vpop.eup %11236  ;;  %13887 = vst [vmem:[#allocation19_spill] sm:$0xff] %v12080_v28  ;;  %13889 = vst [vmem:[#allocation21_spill] sm:$0xff] %v12086_v32 }
 0x296   :  { %v1591_v37 = vmul.f32 %v11237_v35, %v11884_v21  ;;  %v11969_v21 = vld [vmem:[#allocation5 + $0xc0] ss:$16 sps:$4 sm:$0xff]  }
 0x297   :  { %v11239_v40 = vpop.eup %11238  ;;  %v12089_v35 = vld [vmem:[#allocation5 + $0x180] ss:$16 sps:$4 sm:$0xff]  }
 0x298   :  { %v11957_v39 = vadd.f32 %v1592_v38, %v1591_v37  ;;  %13890 = vst [vmem:[#allocation22_spill] sm:$0xff] %v12089_v35  ;;  %v12095_v37 = vld [vmem:[#allocation5 + $0x188] ss:$16 sps:$4 sm:$0xff]   ;;  %v12098_v38 = vld [vmem:[#allocation5 + $0x16c] ss:$16 sps:$4 sm:$0xff]  }
 0x299   :  { %13892 = vst [vmem:[#allocation24_spill] sm:$0xff] %v12095_v37  ;;  %13893 = vst [vmem:[#allocation25_spill] sm:$0xff] %v12098_v38 }
 0x29a   :  { %11240 = vtanh.f32 %v11957_v39 }
 0x2a7   :  { %v11241_v41 = vpop.eup %11240 }
 0x2a8   :  { %v1595_v42 = vmul.f32 %v11241_v41, %v11239_v40  ;;  %v12101_v40 = vld [vmem:[#allocation5 + $0x160] ss:$16 sps:$4 sm:$0xff]   ;;  %v12104_v41 = vld [vmem:[#allocation5 + $0x144] ss:$16 sps:$4 sm:$0xff]  }
 0x2a9   :  { %13894 = vst [vmem:[#allocation26_spill] sm:$0xff] %v12101_v40  ;;  %13895 = vst [vmem:[#allocation27_spill] sm:$0xff] %v12104_v41 }
 0x2aa   :  { %v1596_v44 = vpack.c.bf16 %v1595_v42, %v1595_v42  ;;  %v12107_v42 = vld [vmem:[#allocation5 + $0x168] ss:$16 sps:$4 sm:$0xff]  }
 0x2ab   :  { %13896 = vst [vmem:[#allocation28_spill] sm:$0xff] %v12107_v42 }
 0x2ac   :  { %2015 = vmatmul.mubr.bf16.vlgmr.msra.gmra.mxu0 %v1596_v44  ;;  %2056 = vmatmul.mubr.bf16.vlgmr.msra.gmra.mxu1 %v1596_v44 }
 0x2ad   :  { %2478 = vmatpush1.bf16.msra.mxu0 %v11960_v43  ;;  %2509 = vmatprep.mubr.bf16.mxu0 %v1596_v44 }
 0x2ae   :  { %2550 = vmatprep.mubr.bf16.mxu1 %v1596_v44  ;;  %2479 = vmatprep.subr.bf16.mxu0 %v11962_v45  ;;  %v12110_v44 = vld [vmem:[#allocation5 + $0x14c] ss:$16 sps:$4 sm:$0xff]  }
 0x2af   :  { %2519 = vmatpush1.bf16.msra.mxu1 %v11964_v46  ;;  %13897 = vst [vmem:[#allocation29_spill] sm:$0xff] %v12110_v44 }
 0x2b0   :  { %2520 = vmatprep.subr.bf16.mxu1 %v11966_v49 }
 0x2b1   :  { %2480 = vmatpush1.bf16.msra.mxu0 %v11969_v21 }
 0x2b2   :  { %2481 = vmatprep.subr.bf16.mxu0 %v11972_v51 }
 0x2b3   :  { %2521 = vmatpush1.bf16.msra.mxu1 %v11975_v52 }
 0x2b4   :  { %2522 = vmatprep.subr.bf16.mxu1 %v11978_v53 }
 0x2b5   :  { %2482 = vmatpush1.bf16.msra.mxu0 %v11981_v54 }
 0x2b6   :  { %2483 = vmatprep.subr.bf16.mxu0 %v11984_v55 }
 0x2b7   :  { %2523 = vmatpush1.bf16.msra.mxu1 %v11987_v56 }
 0x2b8   :  { %2524 = vmatprep.subr.bf16.mxu1 %v11990_v57 }
 0x2b9   :  { %2484 = vmatpush1.bf16.msra.mxu0 %v11993_v58 }
 0x2ba   :  { %2485 = vmatprep.subr.bf16.mxu0 %v11996_v59 }
 0x2bb   :  { %2525 = vmatpush1.bf16.msra.mxu1 %v11999_v60 }
 0x2bc   :  { %2526 = vmatprep.subr.bf16.mxu1 %v12002_v61 }
 0x2bd   :  { %2486 = vmatpush1.bf16.msra.mxu0 %v12005_v62 }
 0x2be   :  { %2487 = vmatprep.subr.bf16.mxu0 %v12008_v63 }
 0x2bf   :  { %2527 = vmatpush1.bf16.msra.mxu1 %v12011_v2 }
 0x2c0   :  { %2528 = vmatprep.subr.bf16.mxu1 %v12014_v3 }
 0x2c1   :  { %2488 = vmatpush1.bf16.msra.mxu0 %v12017_v7 }
 0x2c2   :  { %2489 = vmatprep.subr.bf16.mxu0 %v12020_v9 }
 0x2c3   :  { %2529 = vmatpush1.bf16.msra.mxu1 %v12023_v10 }
 0x2c4   :  { %2530 = vmatprep.subr.bf16.mxu1 %v12026_v19 }
 0x2c5   :  { %2490 = vmatpush1.bf16.msra.mxu0 %v12029_v22 }
 0x2c6   :  { %2491 = vmatprep.subr.bf16.mxu0 %v12032_v30 }
 0x2c7   :  { %2531 = vmatpush1.bf16.msra.mxu1 %v12035_v4 }
 0x2c8   :  { %2532 = vmatprep.subr.bf16.mxu1 %v12038_v5 }
 0x2c9   :  { %2492 = vmatpush1.bf16.msra.mxu0 %v12041_v6 }
 0x2ca   :  { %2493 = vmatprep.subr.bf16.mxu0 %v12044_v13 }
 0x2cb   :  { %2533 = vmatpush1.bf16.msra.mxu1 %v12047_v14 }
 0x2cc   :  { %2534 = vmatprep.subr.bf16.mxu1 %v12050_v15 }
 0x2cd   :  { %2494 = vmatpush2.bf16.msra.mxu0 %v12053_v16 }
 0x2ce   :  { %2495 = vmatprep.subr.bf16.mxu0 %v12056_v17 }
 0x2cf   :  { %2535 = vmatpush2.bf16.msra.mxu1 %v12059_v8 }
 0x2d0   :  { %2536 = vmatprep.subr.bf16.mxu1 %v12062_v18 }
 0x2d1   :  { %2496 = vmatpush2.bf16.msra.mxu0 %v12065_v20 }
 0x2d2   :  { %2497 = vmatprep.subr.bf16.mxu0 %v12068_v0 }
 0x2d3   :  { %2537 = vmatpush2.bf16.msra.mxu1 %v12071_v23 }
 0x2d4   :  { %2538 = vmatprep.subr.bf16.mxu1 %v12074_v25 }
 0x2d5   :  { %2498 = vmatpush2.bf16.msra.mxu0 %v12077_v27 }
 0x2d6   :  { %2499 = vmatprep.subr.bf16.mxu0 %v12080_v28 }
 0x2d7   :  { %2539 = vmatpush2.bf16.msra.mxu1 %v12083_v29  ;;  %v2091_v29 = vld [vmem:[#allocation2 + $0x10] sm:$0xff] }
 0x2d8   :  { %2540 = vmatprep.subr.bf16.mxu1 %v12086_v32  ;;  %v12113_v32 = vld [vmem:[#allocation5 + $0x140] ss:$16 sps:$4 sm:$0xff]  }
 0x2d9   :  { %2500 = vmatpush2.bf16.msra.mxu0 %v12089_v35  ;;  %13898 = vst [vmem:[#allocation30_spill] sm:$0xff] %v12113_v32  ;;  %v12116_v35 = vld [vmem:[#allocation5 + $0x124] ss:$16 sps:$4 sm:$0xff]  }
 0x2da   :  { %2501 = vmatprep.subr.bf16.mxu0 %v12092_v36  ;;  %13899 = vst [vmem:[#allocation31_spill] sm:$0xff] %v12116_v35  ;;  %v12119_v36 = vld [vmem:[#allocation5 + $0x148] ss:$16 sps:$4 sm:$0xff]  }
 0x2db   :  { %2541 = vmatpush2.bf16.msra.mxu1 %v12095_v37  ;;  %13900 = vst [vmem:[#allocation32_spill] sm:$0xff] %v12119_v36  ;;  %v12122_v37 = vld [vmem:[#allocation5 + $0x12c] ss:$16 sps:$4 sm:$0xff]  }
 0x2dc   :  { %2542 = vmatprep.subr.bf16.mxu1 %v12098_v38  ;;  %13901 = vst [vmem:[#allocation33_spill] sm:$0xff] %v12122_v37  ;;  %v12125_v38 = vld [vmem:[#allocation5 + $0x120] ss:$16 sps:$4 sm:$0xff]  }
 0x2dd   :  { %2502 = vmatpush2.bf16.msra.mxu0 %v12101_v40  ;;  %13902 = vst [vmem:[#allocation34_spill] sm:$0xff] %v12125_v38  ;;  %v12128_v40 = vld [vmem:[#allocation5 + $0x104] ss:$16 sps:$4 sm:$0xff]  }
 0x2de   :  { %2503 = vmatprep.subr.bf16.mxu0 %v12104_v41  ;;  %13903 = vst [vmem:[#allocation35_spill] sm:$0xff] %v12128_v40  ;;  %v12131_v41 = vld [vmem:[#allocation5 + $0x128] ss:$16 sps:$4 sm:$0xff]  }
 0x2df   :  { %2543 = vmatpush2.bf16.msra.mxu1 %v12107_v42  ;;  %13904 = vst [vmem:[#allocation36_spill] sm:$0xff] %v12131_v41  ;;  %v12134_v42 = vld [vmem:[#allocation5 + $0x10c] ss:$16 sps:$4 sm:$0xff]  }
 0x2e0   :  { %2544 = vmatprep.subr.bf16.mxu1 %v12110_v44  ;;  %13905 = vst [vmem:[#allocation37_spill] sm:$0xff] %v12134_v42  ;;  %v12137_v44 = vld [vmem:[#allocation5 + $0x100] ss:$16 sps:$4 sm:$0xff]  }
 0x2e1   :  { %2504 = vmatpush2.bf16.msra.mxu0 %v12113_v32  ;;  %13906 = vst [vmem:[#allocation38_spill] sm:$0xff] %v12137_v44  ;;  %v2092_v32 = vpack.c.bf16 %v2091_v29, %v2091_v29  ;;  %v12158_v29 = vld [vmem:[#allocation7 + $0xc0] ss:$16 sps:$4 sm:$0xff]  }
 0x2e2   :  { %2505 = vmatprep.subr.bf16.mxu0 %v12116_v35  ;;  %v12141_v35 = vld [vmem:[#allocation5 + $0x108] ss:$16 sps:$4 sm:$0xff]   ;;  %13912 = vst [vmem:[#allocation44_spill] sm:$0xff] %v12158_v29 }
 0x2e3   :  { %2545 = vmatpush2.bf16.msra.mxu1 %v12119_v36  ;;  %13907 = vst [vmem:[#allocation39_spill] sm:$0xff] %v12141_v35  ;;  %v12150_v36 = vld [vmem:[#allocation7 + $0xe8] ss:$16 sps:$4 sm:$0xff]  }
 0x2e4   :  { %2546 = vmatprep.subr.bf16.mxu1 %v12122_v37  ;;  %v12146_v37 = vld [vmem:[#allocation7 + $0xe0] ss:$16 sps:$4 sm:$0xff]   ;;  %13910 = vst [vmem:[#allocation42_spill] sm:$0xff] %v12150_v36 }
 0x2e5   :  { %2506 = vmatpush2.bf16.msra.mxu0 %v12125_v38  ;;  %13908 = vst [vmem:[#allocation40_spill] sm:$0xff] %v12146_v37  ;;  %v12148_v38 = vld [vmem:[#allocation7 + $0xe4] ss:$16 sps:$4 sm:$0xff]  }
 0x2e6   :  { %2507 = vmatprep.subr.bf16.mxu0 %v12128_v40  ;;  %13909 = vst [vmem:[#allocation41_spill] sm:$0xff] %v12148_v38  ;;  %v12152_v40 = vld [vmem:[#allocation7 + $0xec] ss:$16 sps:$4 sm:$0xff]  }
 0x2e7   :  { %2547 = vmatpush2.bf16.msra.mxu1 %v12131_v41  ;;  %13911 = vst [vmem:[#allocation43_spill] sm:$0xff] %v12152_v40 }
 0x2e8   :  { %2548 = vmatprep.subr.bf16.mxu1 %v12134_v42  ;;  %v12299_v42 = vld [vmem:[#allocation7 + $0x144] ss:$16 sps:$4 sm:$0xff]  }
 0x2e9   :  { %2508 = vmatpush2.bf16.msra.mxu0 %v12137_v44  ;;  %v12164_v44 = vld [vmem:[#allocation7 + $0xcc] ss:$16 sps:$4 sm:$0xff]   ;;  %13960 = vst [vmem:[#allocation92_spill] sm:$0xff] %v12299_v42 }
 0x2ea   :  { %2969 = vmatprep.subr.bf16.mxu0 %v12148_v38  ;;  %13915 = vst [vmem:[#allocation47_spill] sm:$0xff] %v12164_v44  ;;  %v12177_v38 = vld [vmem:[#allocation7 + $0xa8] ss:$16 sps:$4 sm:$0xff]  }
 0x2eb   :  { %2549 = vmatpush2.bf16.msra.mxu1 %v12141_v35  ;;  %v12160_v35 = vld [vmem:[#allocation7 + $0xc4] ss:$16 sps:$4 sm:$0xff]   ;;  %13919 = vst [vmem:[#allocation51_spill] sm:$0xff] %v12177_v38 }
 0x2ec   :  { %2510 = vmatmul.mubr.bf16.vlgmr.msra.gmra.mxu0 %v2092_v32  ;;  %3010 = vmatprep.subr.bf16.mxu1 %v12152_v40  ;;  %13913 = vst [vmem:[#allocation45_spill] sm:$0xff] %v12160_v35  ;;  %v12172_v40 = vld [vmem:[#allocation7 + $0xa0] ss:$16 sps:$4 sm:$0xff]  }
 0x2ed   :  { %2970 = vmatpush1.bf16.msra.mxu0 %v12146_v37  ;;  %v12170_v37 = vld [vmem:[#allocation7 + $0xa4] ss:$16 sps:$4 sm:$0xff]   ;;  %13917 = vst [vmem:[#allocation49_spill] sm:$0xff] %v12172_v40 }
 0x2ee   :  { %2551 = vmatmul.mubr.bf16.vlgmr.msra.gmra.mxu1 %v2092_v32  ;;  %v12162_v32 = vld [vmem:[#allocation7 + $0xc8] ss:$16 sps:$4 sm:$0xff]   ;;  %2971 = vmatprep.subr.bf16.mxu0 %v12160_v35  ;;  %13916 = vst [vmem:[#allocation48_spill] sm:$0xff] %v12170_v37 }
 0x2ef   :  { %3011 = vmatpush1.bf16.msra.mxu1 %v12150_v36  ;;  %13914 = vst [vmem:[#allocation46_spill] sm:$0xff] %v12162_v32  ;;  %v12174_v36 = vld [vmem:[#allocation7 + $0xac] ss:$16 sps:$4 sm:$0xff]   ;;  %v12189_v35 = vld [vmem:[#allocation7 + $0x88] ss:$16 sps:$4 sm:$0xff]  }
 0x2f0   :  { %3012 = vmatprep.subr.bf16.mxu1 %v12164_v44  ;;  %13918 = vst [vmem:[#allocation50_spill] sm:$0xff] %v12174_v36  ;;  %v12184_v44 = vld [vmem:[#allocation7 + $0x80] ss:$16 sps:$4 sm:$0xff]   ;;  %13923 = vst [vmem:[#allocation55_spill] sm:$0xff] %v12189_v35 }
 0x2f1   :  { %2972 = vmatpush1.bf16.msra.mxu0 %v12158_v29  ;;  %v12182_v29 = vld [vmem:[#allocation7 + $0x84] ss:$16 sps:$4 sm:$0xff]   ;;  %13921 = vst [vmem:[#allocation53_spill] sm:$0xff] %v12184_v44 }
 0x2f2   :  { %2973 = vmatprep.subr.bf16.mxu0 %v12170_v37  ;;  %13920 = vst [vmem:[#allocation52_spill] sm:$0xff] %v12182_v29  ;;  %v12201_v37 = vld [vmem:[#allocation7 + $0x68] ss:$16 sps:$4 sm:$0xff]  }
 0x2f3   :  { %3013 = vmatpush1.bf16.msra.mxu1 %v12162_v32  ;;  %v12186_v32 = vld [vmem:[#allocation7 + $0x8c] ss:$16 sps:$4 sm:$0xff]   ;;  %13927 = vst [vmem:[#allocation59_spill] sm:$0xff] %v12201_v37 }
 0x2f4   :  { %3014 = vmatprep.subr.bf16.mxu1 %v12174_v36  ;;  %13922 = vst [vmem:[#allocation54_spill] sm:$0xff] %v12186_v32  ;;  %v12196_v36 = vld [vmem:[#allocation7 + $0x60] ss:$16 sps:$4 sm:$0xff]  }
 0x2f5   :  { %2974 = vmatpush1.bf16.msra.mxu0 %v12172_v40  ;;  %v12194_v40 = vld [vmem:[#allocation7 + $0x64] ss:$16 sps:$4 sm:$0xff]   ;;  %13925 = vst [vmem:[#allocation57_spill] sm:$0xff] %v12196_v36 }
 0x2f6   :  { %2975 = vmatprep.subr.bf16.mxu0 %v12182_v29  ;;  %13924 = vst [vmem:[#allocation56_spill] sm:$0xff] %v12194_v40  ;;  %v12213_v29 = vld [vmem:[#allocation7 + $0x48] ss:$16 sps:$4 sm:$0xff]  }
 0x2f7   :  { %3015 = vmatpush1.bf16.msra.mxu1 %v12177_v38  ;;  %v12198_v38 = vld [vmem:[#allocation7 + $0x6c] ss:$16 sps:$4 sm:$0xff]   ;;  %13931 = vst [vmem:[#allocation63_spill] sm:$0xff] %v12213_v29 }
 0x2f8   :  { %3016 = vmatprep.subr.bf16.mxu1 %v12186_v32  ;;  %13926 = vst [vmem:[#allocation58_spill] sm:$0xff] %v12198_v38  ;;  %v12208_v32 = vld [vmem:[#allocation7 + $0x40] ss:$16 sps:$4 sm:$0xff]  }
 0x2f9   :  { %2976 = vmatpush1.bf16.msra.mxu0 %v12184_v44  ;;  %v12206_v44 = vld [vmem:[#allocation7 + $0x44] ss:$16 sps:$4 sm:$0xff]   ;;  %13929 = vst [vmem:[#allocation61_spill] sm:$0xff] %v12208_v32 }
 0x2fa   :  { %2977 = vmatprep.subr.bf16.mxu0 %v12194_v40  ;;  %13928 = vst [vmem:[#allocation60_spill] sm:$0xff] %v12206_v44  ;;  %v12225_v40 = vld [vmem:[#allocation7 + $0x28] ss:$16 sps:$4 sm:$0xff]  }
 0x2fb   :  { %3017 = vmatpush1.bf16.msra.mxu1 %v12189_v35  ;;  %v12210_v35 = vld [vmem:[#allocation7 + $0x4c] ss:$16 sps:$4 sm:$0xff]   ;;  %13935 = vst [vmem:[#allocation67_spill] sm:$0xff] %v12225_v40 }
 0x2fc   :  { %3018 = vmatprep.subr.bf16.mxu1 %v12198_v38  ;;  %13930 = vst [vmem:[#allocation62_spill] sm:$0xff] %v12210_v35  ;;  %v12220_v38 = vld [vmem:[#allocation7 + $0x20] ss:$16 sps:$4 sm:$0xff]  }
 0x2fd   :  { %2978 = vmatpush1.bf16.msra.mxu0 %v12196_v36  ;;  %v12218_v36 = vld [vmem:[#allocation7 + $0x24] ss:$16 sps:$4 sm:$0xff]   ;;  %13933 = vst [vmem:[#allocation65_spill] sm:$0xff] %v12220_v38 }
 0x2fe   :  { %2979 = vmatprep.subr.bf16.mxu0 %v12206_v44  ;;  %13932 = vst [vmem:[#allocation64_spill] sm:$0xff] %v12218_v36  ;;  %v12237_v44 = vld [vmem:[#allocation7 + $0x8] ss:$16 sps:$4 sm:$0xff]  }
 0x2ff   :  { %3019 = vmatpush1.bf16.msra.mxu1 %v12201_v37  ;;  %v12222_v37 = vld [vmem:[#allocation7 + $0x2c] ss:$16 sps:$4 sm:$0xff]   ;;  %13939 = vst [vmem:[#allocation71_spill] sm:$0xff] %v12237_v44 }
 0x300   :  { %3020 = vmatprep.subr.bf16.mxu1 %v12210_v35  ;;  %13934 = vst [vmem:[#allocation66_spill] sm:$0xff] %v12222_v37  ;;  %v12232_v35 = vld [vmem:[#allocation7] ss:$16 sps:$4 sm:$0xff]  }
 0x301   :  { %2980 = vmatpush1.bf16.msra.mxu0 %v12208_v32  ;;  %v12230_v32 = vld [vmem:[#allocation7 + $0x4] ss:$16 sps:$4 sm:$0xff]   ;;  %13937 = vst [vmem:[#allocation69_spill] sm:$0xff] %v12232_v35 }
 0x302   :  { %2981 = vmatprep.subr.bf16.mxu0 %v12218_v36  ;;  %13936 = vst [vmem:[#allocation68_spill] sm:$0xff] %v12230_v32  ;;  %v12249_v36 = vld [vmem:[#allocation7 + $0x1e8] ss:$16 sps:$4 sm:$0xff]  }
 0x303   :  { %3021 = vmatpush1.bf16.msra.mxu1 %v12213_v29  ;;  %v12234_v29 = vld [vmem:[#allocation7 + $0xc] ss:$16 sps:$4 sm:$0xff]   ;;  %13943 = vst [vmem:[#allocation75_spill] sm:$0xff] %v12249_v36 }
 0x304   :  { %3022 = vmatprep.subr.bf16.mxu1 %v12222_v37  ;;  %13938 = vst [vmem:[#allocation70_spill] sm:$0xff] %v12234_v29  ;;  %v12244_v37 = vld [vmem:[#allocation7 + $0x1e0] ss:$16 sps:$4 sm:$0xff]  }
 0x305   :  { %2982 = vmatpush1.bf16.msra.mxu0 %v12220_v38  ;;  %v12242_v38 = vld [vmem:[#allocation7 + $0x1e4] ss:$16 sps:$4 sm:$0xff]   ;;  %13941 = vst [vmem:[#allocation73_spill] sm:$0xff] %v12244_v37 }
 0x306   :  { %2983 = vmatprep.subr.bf16.mxu0 %v12230_v32  ;;  %13940 = vst [vmem:[#allocation72_spill] sm:$0xff] %v12242_v38  ;;  %v12261_v32 = vld [vmem:[#allocation7 + $0x1c8] ss:$16 sps:$4 sm:$0xff]  }
 0x307   :  { %3023 = vmatpush1.bf16.msra.mxu1 %v12225_v40  ;;  %v12246_v40 = vld [vmem:[#allocation7 + $0x1ec] ss:$16 sps:$4 sm:$0xff]   ;;  %13947 = vst [vmem:[#allocation79_spill] sm:$0xff] %v12261_v32 }
 0x308   :  { %3024 = vmatprep.subr.bf16.mxu1 %v12234_v29  ;;  %13942 = vst [vmem:[#allocation74_spill] sm:$0xff] %v12246_v40  ;;  %v12256_v29 = vld [vmem:[#allocation7 + $0x1c0] ss:$16 sps:$4 sm:$0xff]  }
 0x309   :  { %2984 = vmatpush1.bf16.msra.mxu0 %v12232_v35  ;;  %v12254_v35 = vld [vmem:[#allocation7 + $0x1c4] ss:$16 sps:$4 sm:$0xff]   ;;  %13945 = vst [vmem:[#allocation77_spill] sm:$0xff] %v12256_v29 }
 0x30a   :  { %2985 = vmatprep.subr.bf16.mxu0 %v12242_v38  ;;  %13944 = vst [vmem:[#allocation76_spill] sm:$0xff] %v12254_v35  ;;  %v12273_v38 = vld [vmem:[#allocation7 + $0x1a8] ss:$16 sps:$4 sm:$0xff]  }
 0x30b   :  { %3025 = vmatpush1.bf16.msra.mxu1 %v12237_v44  ;;  %v12258_v44 = vld [vmem:[#allocation7 + $0x1cc] ss:$16 sps:$4 sm:$0xff]   ;;  %13951 = vst [vmem:[#allocation83_spill] sm:$0xff] %v12273_v38 }
 0x30c   :  { %3026 = vmatprep.subr.bf16.mxu1 %v12246_v40  ;;  %13946 = vst [vmem:[#allocation78_spill] sm:$0xff] %v12258_v44  ;;  %v12268_v40 = vld [vmem:[#allocation7 + $0x1a0] ss:$16 sps:$4 sm:$0xff]  }
 0x30d   :  { %2986 = vmatpush2.bf16.msra.mxu0 %v12244_v37  ;;  %v12266_v37 = vld [vmem:[#allocation7 + $0x1a4] ss:$16 sps:$4 sm:$0xff]   ;;  %13949 = vst [vmem:[#allocation81_spill] sm:$0xff] %v12268_v40 }
 0x30e   :  { %2987 = vmatprep.subr.bf16.mxu0 %v12254_v35  ;;  %13948 = vst [vmem:[#allocation80_spill] sm:$0xff] %v12266_v37  ;;  %v12285_v35 = vld [vmem:[#allocation7 + $0x188] ss:$16 sps:$4 sm:$0xff]  }
 0x30f   :  { %3027 = vmatpush2.bf16.msra.mxu1 %v12249_v36  ;;  %v12270_v36 = vld [vmem:[#allocation7 + $0x1ac] ss:$16 sps:$4 sm:$0xff]   ;;  %13955 = vst [vmem:[#allocation87_spill] sm:$0xff] %v12285_v35 }
 0x310   :  { %3028 = vmatprep.subr.bf16.mxu1 %v12258_v44  ;;  %13950 = vst [vmem:[#allocation82_spill] sm:$0xff] %v12270_v36  ;;  %v12280_v44 = vld [vmem:[#allocation7 + $0x180] ss:$16 sps:$4 sm:$0xff]  }
 0x311   :  { %2988 = vmatpush2.bf16.msra.mxu0 %v12256_v29  ;;  %v12278_v29 = vld [vmem:[#allocation7 + $0x184] ss:$16 sps:$4 sm:$0xff]   ;;  %13953 = vst [vmem:[#allocation85_spill] sm:$0xff] %v12280_v44 }
 0x312   :  { %2989 = vmatprep.subr.bf16.mxu0 %v12266_v37  ;;  %13952 = vst [vmem:[#allocation84_spill] sm:$0xff] %v12278_v29  ;;  %v12296_v37 = vld [vmem:[#allocation7 + $0x16c] ss:$16 sps:$4 sm:$0xff]  }
 0x313   :  { %3029 = vmatpush2.bf16.msra.mxu1 %v12261_v32  ;;  %v12282_v32 = vld [vmem:[#allocation7 + $0x18c] ss:$16 sps:$4 sm:$0xff]   ;;  %13959 = vst [vmem:[#allocation91_spill] sm:$0xff] %v12296_v37 }
 0x314   :  { %3030 = vmatprep.subr.bf16.mxu1 %v12270_v36  ;;  %13954 = vst [vmem:[#allocation86_spill] sm:$0xff] %v12282_v32  ;;  %v12292_v36 = vld [vmem:[#allocation7 + $0x160] ss:$16 sps:$4 sm:$0xff]  }
 0x315   :  { %2990 = vmatpush2.bf16.msra.mxu0 %v12268_v40  ;;  %v12290_v40 = vld [vmem:[#allocation7 + $0x164] ss:$16 sps:$4 sm:$0xff]   ;;  %13957 = vst [vmem:[#allocation89_spill] sm:$0xff] %v12292_v36 }
 0x316   :  { %2991 = vmatprep.subr.bf16.mxu0 %v12278_v29  ;;  %13956 = vst [vmem:[#allocation88_spill] sm:$0xff] %v12290_v40  ;;  %v12311_v29 = vld [vmem:[#allocation7 + $0x124] ss:$16 sps:$4 sm:$0xff]  }
 0x317   :  { %3031 = vmatpush2.bf16.msra.mxu1 %v12273_v38  ;;  %v12294_v38 = vld [vmem:[#allocation7 + $0x168] ss:$16 sps:$4 sm:$0xff]   ;;  %13964 = vst [vmem:[#allocation96_spill] sm:$0xff] %v12311_v29 }
 0x318   :  { %3032 = vmatprep.subr.bf16.mxu1 %v12282_v32  ;;  %13958 = vst [vmem:[#allocation90_spill] sm:$0xff] %v12294_v38  ;;  %v12305_v32 = vld [vmem:[#allocation7 + $0x14c] ss:$16 sps:$4 sm:$0xff]  }
 0x319   :  { %2992 = vmatpush2.bf16.msra.mxu0 %v12280_v44  ;;  %v12303_v44 = vld [vmem:[#allocation7 + $0x140] ss:$16 sps:$4 sm:$0xff]   ;;  %13962 = vst [vmem:[#allocation94_spill] sm:$0xff] %v12305_v32 }
 0x31a   :  { %2993 = vmatprep.subr.bf16.mxu0 %v12290_v40  ;;  %13961 = vst [vmem:[#allocation93_spill] sm:$0xff] %v12303_v44  ;;  %v12314_v40 = vld [vmem:[#allocation7 + $0x12c] ss:$16 sps:$4 sm:$0xff]  }
 0x31b   :  { %3033 = vmatpush2.bf16.msra.mxu1 %v12285_v35  ;;  %v12309_v35 = vld [vmem:[#allocation7 + $0x148] ss:$16 sps:$4 sm:$0xff]   ;;  %13965 = vst [vmem:[#allocation97_spill] sm:$0xff] %v12314_v40 }
 0x31c   :  { %3034 = vmatprep.subr.bf16.mxu1 %v12296_v37  ;;  %13963 = vst [vmem:[#allocation95_spill] sm:$0xff] %v12309_v35  ;;  %v12321_v37 = vld [vmem:[#allocation7 + $0x128] ss:$16 sps:$4 sm:$0xff]  }
 0x31d   :  { %2994 = vmatpush2.bf16.msra.mxu0 %v12292_v36  ;;  %v12317_v36 = vld [vmem:[#allocation7 + $0x120] ss:$16 sps:$4 sm:$0xff]   ;;  %13967 = vst [vmem:[#allocation99_spill] sm:$0xff] %v12321_v37 }
 0x31e   :  { %2995 = vmatprep.subr.bf16.mxu0 %v12299_v42  ;;  %13966 = vst [vmem:[#allocation98_spill] sm:$0xff] %v12317_v36  ;;  %v12326_v42 = vld [vmem:[#allocation7 + $0x10c] ss:$16 sps:$4 sm:$0xff]  }
 0x31f   :  { %3035 = vmatpush2.bf16.msra.mxu1 %v12294_v38  ;;  %v12323_v38 = vld [vmem:[#allocation7 + $0x104] ss:$16 sps:$4 sm:$0xff]   ;;  %13969 = vst [vmem:[#allocation101_spill] sm:$0xff] %v12326_v42 }
 0x320   :  { %3036 = vmatprep.subr.bf16.mxu1 %v12305_v32  ;;  %13968 = vst [vmem:[#allocation100_spill] sm:$0xff] %v12323_v38  ;;  %v12329_v32 = vld [vmem:[#allocation7 + $0x100] ss:$16 sps:$4 sm:$0xff]  }
 0x321   :  { %2996 = vmatpush2.bf16.msra.mxu0 %v12303_v44  ;;  %13970 = vst [vmem:[#allocation102_spill] sm:$0xff] %v12329_v32  ;;  %v12333_v44 = vld [vmem:[#allocation7 + $0x108] ss:$16 sps:$4 sm:$0xff]  }
 0x322   :  { %2997 = vmatprep.subr.bf16.mxu0 %v12311_v29  ;;  %13971 = vst [vmem:[#allocation103_spill] sm:$0xff] %v12333_v44 }
 0x323   :  { %3037 = vmatpush2.bf16.msra.mxu1 %v12309_v35 }
 0x324   :  { %3038 = vmatprep.subr.bf16.mxu1 %v12314_v40 }
 0x325   :  { %2998 = vmatpush2.bf16.msra.mxu0 %v12317_v36 }
 0x326   :  { %2999 = vmatprep.subr.bf16.mxu0 %v12323_v38 }
 0x327   :  { %3039 = vmatpush2.bf16.msra.mxu1 %v12321_v37 }
 0x328   :  { %3040 = vmatprep.subr.bf16.mxu1 %v12326_v42 }
 0x329   :  { %3000 = vmatpush2.bf16.msra.mxu0 %v12329_v32 }
 0x32a   :  { %3464 = vmatprep.subr.bf16.mxu0 %v11923_v31 }
 0x32b   :  { %3041 = vmatpush2.bf16.msra.mxu1 %v12333_v44 }
 0x32c   :  { %3505 = vmatprep.subr.bf16.mxu1 %v11936_v47 }
 0x36c   :  { %v2016_v40 = vpop.f32.mrf.mxu0  ;;  %v2057_v36 = vpop.f32.mrf.mxu1 }
 0x36d   :  { %v2017_v35 = vadd.f32 %v2016_v40, %v11928_v33  ;;  %v2058_v23 = vadd.f32 %v2057_v36, %v11946_v50 }
 0x36e   :  { %v2018_v29 = vpop.f32.mrf.mxu0  ;;  %v2059_v37 = vpop.f32.mrf.mxu1 }
 0x36f   :  { %v9283_v41 = vmul.f32 -1.442695, %v2017_v35  ;;  %v2019_v38 = vadd.f32 %v2018_v29, %v11932_v34  ;;  %v2060_v31 = vadd.f32 %v2059_v37, %v11940_v48 }
 0x370   :  { %v2020_v28 = vpop.f32.mrf.mxu0  ;;  %v2061_v27 = vpop.f32.mrf.mxu1 }
 0x371   :  { %11242 = vpow2.f32 %v9283_v41  ;;  %v9284_v42 = vmul.f32 -1.442695, %v2019_v38  ;;  %v9285_v44 = vmul.f32 -1.442695, %v2060_v31 }
 0x372   :  { %v2021_v32 = vpop.f32.mrf.mxu0  ;;  %v2062_v25 = vpop.f32.mrf.mxu1 }
 0x373   :  { %11244 = vpow2.f32 %v9284_v42 }
 0x374   :  { %11246 = vpow2.f32 %v9285_v44 }
 0x37e   :  { %v11243_v47 = vpop.eup %11242 }
 0x37f   :  { %v2067_v0 = vadd.f32 1.0, %v11243_v47 }
 0x380   :  { %v11245_v40 = vpop.eup %11244 }
 0x381   :  { %11248 = vrcp.f32 %v2067_v0  ;;  %v2073_v35 = vadd.f32 1.0, %v11245_v40  ;;  %v11247_v28 = vpop.eup %11246 }
 0x382   :  { %11250 = vtanh.f32 %v2058_v23  ;;  %v2080_v29 = vadd.f32 1.0, %v11247_v28 }
 0x383   :  { %11252 = vrcp.f32 %v2073_v35 }
 0x384   :  { %11254 = vrcp.f32 %v2080_v29 }
 0x38e   :  { %v11249_v27 = vpop.eup %11248 }
 0x38f   :  { %v11251_v41 = vpop.eup %11250 }
 0x390   :  { %v11253_v38 = vpop.eup %11252  ;;  %v2084_v25 = vmul.f32 %v11251_v41, %v11249_v27 }
 0x391   :  { %v2083_v42 = vmul.f32 %v11253_v38, %v11949_v1  ;;  %v11255_v36 = vpop.eup %11254 }
 0x393   :  { %v12345_v37 = vadd.f32 %v2084_v25, %v2083_v42 }
 0x395   :  { %11256 = vtanh.f32 %v12345_v37 }
 0x3a2   :  { %v11257_v32 = vpop.eup %11256 }
 0x3a3   :  { %v2087_v44 = vmul.f32 %v11257_v32, %v11255_v36 }
 0x3a5   :  { %2089 = vst [vmem:[#allocation10 + $0x8] sm:$0xff] %v2087_v44  ;;  %v2584_v0 = vpack.c.bf16 %v2087_v44, %v2087_v44 }
 0x3a7   :  { %3001 = vmatprep.mubr.bf16.mxu0 %v2584_v0  ;;  %3042 = vmatprep.mubr.bf16.mxu1 %v2584_v0 }
 0x3ac   :  { %v2511_v23 = vpop.f32.mrf.mxu0 }
 0x3ad   :  { %v2512_v31 = vadd.f32 %v2511_v23, %v11864_v11 }
 0x3ae   :  { %v2513_v47 = vpop.f32.mrf.mxu0  ;;  %v2552_v40 = vpop.f32.mrf.mxu1 }
 0x3af   :  { %v9350_v35 = vmul.f32 -1.442695, %v2512_v31  ;;  %v2514_v1 = vadd.f32 %v2513_v47, %v11868_v12  ;;  %v2553_v36 = vadd.f32 %v2552_v40, %v11880_v26 }
 0x3b0   :  { %v2515_v28 = vpop.f32.mrf.mxu0  ;;  %v2554_v27 = vpop.f32.mrf.mxu1 }
 0x3b1   :  { %11258 = vpow2.f32 %v9350_v35  ;;  %v9351_v41 = vmul.f32 -1.442695, %v2514_v1  ;;  %v2555_v42 = vadd.f32 %v2554_v27, %v11876_v24 }
 0x3b2   :  { %v2516_v38 = vpop.f32.mrf.mxu0  ;;  %v2556_v29 = vpop.f32.mrf.mxu1 }
 0x3b3   :  { %11260 = vpow2.f32 %v9351_v41  ;;  %v9352_v32 = vmul.f32 -1.442695, %v2555_v42 }
 0x3b4   :  { %v2557_v25 = vpop.f32.mrf.mxu1  ;;  %11262 = vtanh.f32 %v2553_v36 }
 0x3b5   :  { %11264 = vpow2.f32 %v9352_v32  ;;  %v14008_v32 = vld [vmem:[#allocation52_spill] sm:$0xff] }
 0x3be   :  { %v11259_v44 = vpop.eup %11258 }
 0x3bf   :  { %v2562_v0 = vadd.f32 1.0, %v11259_v44  ;;  %v14009_v44 = vld [vmem:[#allocation51_spill] sm:$0xff] }
 0x3c0   :  { %v11261_v23 = vpop.eup %11260 }
 0x3c1   :  { %11266 = vrcp.f32 %v2562_v0  ;;  %v2568_v31 = vadd.f32 1.0, %v11261_v23  ;;  %v11263_v47 = vpop.eup %11262  ;;  %v14010_v0 = vld [vmem:[#allocation54_spill] sm:$0xff]  ;;  %v14011_v23 = vld [vmem:[#allocation53_spill] sm:$0xff] }
 0x3c2   :  { %v11265_v35 = vpop.eup %11264 }
 0x3c3   :  { %11268 = vrcp.f32 %v2568_v31  ;;  %v2575_v38 = vadd.f32 1.0, %v11265_v35  ;;  %v14012_v31 = vld [vmem:[#allocation56_spill] sm:$0xff]  ;;  %v14014_v35 = vld [vmem:[#allocation58_spill] sm:$0xff] }
 0x3c5   :  { %11270 = vrcp.f32 %v2575_v38  ;;  %v14017_v38 = vld [vmem:[#allocation59_spill] sm:$0xff] }
 0x3ce   :  { %v11267_v1 = vpop.eup %11266 }
 0x3cf   :  { %v2579_v29 = vmul.f32 %v11267_v1, %v11263_v47  ;;  %v14013_v47 = vld [vmem:[#allocation55_spill] sm:$0xff]  ;;  %v14015_v1 = vld [vmem:[#allocation57_spill] sm:$0xff] }
 0x3d0   :  { %v11269_v28 = vpop.eup %11268 }
 0x3d1   :  { %v2578_v41 = vmul.f32 %v11269_v28, %v11957_v39  ;;  %v13972_v39 = vld [vmem:[#allocation15_spill] sm:$0xff]  ;;  %v14016_v28 = vld [vmem:[#allocation60_spill] sm:$0xff] }
 0x3d2   :  { %v11271_v40 = vpop.eup %11270 }
 0x3d3   :  { %v12353_v27 = vadd.f32 %v2579_v29, %v2578_v41  ;;  %v14018_v41 = vld [vmem:[#allocation62_spill] sm:$0xff]  ;;  %v14019_v29 = vld [vmem:[#allocation61_spill] sm:$0xff] }
 0x3d5   :  { %11272 = vtanh.f32 %v12353_v27 }
 0x3e2   :  { %v11273_v25 = vpop.eup %11272 }
 0x3e3   :  { %v2582_v42 = vmul.f32 %v11273_v25, %v11271_v40  ;;  %v14020_v40 = vld [vmem:[#allocation64_spill] sm:$0xff]  ;;  %v14021_v25 = vld [vmem:[#allocation63_spill] sm:$0xff] }
 0x3e5   :  { %v2583_v36 = vpack.c.bf16 %v2582_v42, %v2582_v42  ;;  %v14022_v42 = vld [vmem:[#allocation66_spill] sm:$0xff] }
 0x3e7   :  { %3002 = vmatmul.mubr.bf16.vlgmr.msra.gmra.mxu0 %v2583_v36  ;;  %3043 = vmatmul.mubr.bf16.vlgmr.msra.gmra.mxu1 %v2583_v36 }
 0x3e8   :  { %3465 = vmatpush1.bf16.msra.mxu0 %v11960_v43  ;;  %3496 = vmatprep.mubr.bf16.mxu0 %v2583_v36  ;;  %v13973_v43 = vld [vmem:[#allocation16_spill] sm:$0xff] }
 0x3e9   :  { %3537 = vmatprep.mubr.bf16.mxu1 %v2583_v36  ;;  %3466 = vmatprep.subr.bf16.mxu0 %v11962_v45  ;;  %v13974_v45 = vld [vmem:[#allocation17_spill] sm:$0xff] }
 0x3ea   :  { %3506 = vmatpush1.bf16.msra.mxu1 %v11964_v46  ;;  %v13975_v46 = vld [vmem:[#allocation18_spill] sm:$0xff]  ;;  %v14023_v36 = vld [vmem:[#allocation65_spill] sm:$0xff] }
 0x3eb   :  { %3507 = vmatprep.subr.bf16.mxu1 %v11966_v49  ;;  %v13976_v49 = vld [vmem:[#allocation19_spill] sm:$0xff] }
 0x3ec   :  { %3467 = vmatpush1.bf16.msra.mxu0 %v11969_v21  ;;  %v13977_v21 = vld [vmem:[#allocation20_spill] sm:$0xff] }
 0x3ed   :  { %3468 = vmatprep.subr.bf16.mxu0 %v11972_v51  ;;  %v13978_v51 = vld [vmem:[#allocation21_spill] sm:$0xff] }
 0x3ee   :  { %3508 = vmatpush1.bf16.msra.mxu1 %v11975_v52  ;;  %v13979_v52 = vld [vmem:[#allocation22_spill] sm:$0xff] }
 0x3ef   :  { %3509 = vmatprep.subr.bf16.mxu1 %v11978_v53  ;;  %v13980_v53 = vld [vmem:[#allocation23_spill] sm:$0xff] }
 0x3f0   :  { %3469 = vmatpush1.bf16.msra.mxu0 %v11981_v54  ;;  %v13981_v54 = vld [vmem:[#allocation24_spill] sm:$0xff] }
 0x3f1   :  { %3470 = vmatprep.subr.bf16.mxu0 %v11984_v55  ;;  %v13982_v55 = vld [vmem:[#allocation25_spill] sm:$0xff] }
 0x3f2   :  { %3510 = vmatpush1.bf16.msra.mxu1 %v11987_v56  ;;  %v13983_v56 = vld [vmem:[#allocation26_spill] sm:$0xff] }
 0x3f3   :  { %3511 = vmatprep.subr.bf16.mxu1 %v11990_v57  ;;  %v13984_v57 = vld [vmem:[#allocation27_spill] sm:$0xff] }
 0x3f4   :  { %3471 = vmatpush1.bf16.msra.mxu0 %v11993_v58  ;;  %v13985_v58 = vld [vmem:[#allocation28_spill] sm:$0xff] }
 0x3f5   :  { %3472 = vmatprep.subr.bf16.mxu0 %v11996_v59  ;;  %v13986_v59 = vld [vmem:[#allocation29_spill] sm:$0xff] }
 0x3f6   :  { %3512 = vmatpush1.bf16.msra.mxu1 %v11999_v60  ;;  %v13987_v60 = vld [vmem:[#allocation30_spill] sm:$0xff] }
 0x3f7   :  { %3513 = vmatprep.subr.bf16.mxu1 %v12002_v61  ;;  %v13988_v61 = vld [vmem:[#allocation31_spill] sm:$0xff] }
 0x3f8   :  { %3473 = vmatpush1.bf16.msra.mxu0 %v12005_v62  ;;  %v13989_v62 = vld [vmem:[#allocation32_spill] sm:$0xff] }
 0x3f9   :  { %3474 = vmatprep.subr.bf16.mxu0 %v12008_v63  ;;  %v13990_v63 = vld [vmem:[#allocation33_spill] sm:$0xff] }
 0x3fa   :  { %3514 = vmatpush1.bf16.msra.mxu1 %v12011_v2  ;;  %v13991_v2 = vld [vmem:[#allocation34_spill] sm:$0xff] }
 0x3fb   :  { %3515 = vmatprep.subr.bf16.mxu1 %v12014_v3  ;;  %v3078_v3 = vld [vmem:[#allocation2 + $0x18] sm:$0xff] }
 0x3fc   :  { %3475 = vmatpush1.bf16.msra.mxu0 %v12017_v7  ;;  %v13992_v7 = vld [vmem:[#allocation35_spill] sm:$0xff] }
 0x3fd   :  { %3476 = vmatprep.subr.bf16.mxu0 %v12020_v9  ;;  %v13993_v9 = vld [vmem:[#allocation36_spill] sm:$0xff] }
 0x3fe   :  { %3516 = vmatpush1.bf16.msra.mxu1 %v12023_v10  ;;  %v3079_v10 = vpack.c.bf16 %v3078_v3, %v3078_v3  ;;  %v14044_v3 = vld [vmem:[#allocation88_spill] sm:$0xff] }
 0x3ff   :  { %3517 = vmatprep.subr.bf16.mxu1 %v12026_v19  ;;  %v13994_v19 = vld [vmem:[#allocation37_spill] sm:$0xff] }
 0x400   :  { %3477 = vmatpush1.bf16.msra.mxu0 %v12029_v22  ;;  %v13995_v22 = vld [vmem:[#allocation38_spill] sm:$0xff] }
 0x401   :  { %3478 = vmatprep.subr.bf16.mxu0 %v12032_v30  ;;  %v13996_v30 = vld [vmem:[#allocation41_spill] sm:$0xff] }
 0x402   :  { %3518 = vmatpush1.bf16.msra.mxu1 %v12035_v4  ;;  %v13997_v4 = vld [vmem:[#allocation39_spill] sm:$0xff] }
 0x403   :  { %3519 = vmatprep.subr.bf16.mxu1 %v12038_v5  ;;  %v13998_v5 = vld [vmem:[#allocation43_spill] sm:$0xff] }
 0x404   :  { %3479 = vmatpush1.bf16.msra.mxu0 %v12041_v6  ;;  %v13999_v6 = vld [vmem:[#allocation40_spill] sm:$0xff] }
 0x405   :  { %3480 = vmatprep.subr.bf16.mxu0 %v12044_v13  ;;  %v14000_v13 = vld [vmem:[#allocation45_spill] sm:$0xff] }
 0x406   :  { %3520 = vmatpush1.bf16.msra.mxu1 %v12047_v14  ;;  %v14001_v14 = vld [vmem:[#allocation42_spill] sm:$0xff] }
 0x407   :  { %3521 = vmatprep.subr.bf16.mxu1 %v12050_v15  ;;  %v14002_v15 = vld [vmem:[#allocation47_spill] sm:$0xff] }
 0x408   :  { %3481 = vmatpush2.bf16.msra.mxu0 %v12053_v16  ;;  %v14003_v16 = vld [vmem:[#allocation44_spill] sm:$0xff] }
 0x409   :  { %3482 = vmatprep.subr.bf16.mxu0 %v12056_v17  ;;  %v14004_v17 = vld [vmem:[#allocation48_spill] sm:$0xff] }
 0x40a   :  { %3522 = vmatpush2.bf16.msra.mxu1 %v12059_v8  ;;  %v14005_v8 = vld [vmem:[#allocation46_spill] sm:$0xff] }
 0x40b   :  { %3523 = vmatprep.subr.bf16.mxu1 %v12062_v18  ;;  %v14006_v18 = vld [vmem:[#allocation50_spill] sm:$0xff] }
 0x40c   :  { %3483 = vmatpush2.bf16.msra.mxu0 %v12065_v20  ;;  %v14007_v20 = vld [vmem:[#allocation49_spill] sm:$0xff] }
 0x40d   :  { %3484 = vmatprep.subr.bf16.mxu0 %v13972_v39  ;;  %v14024_v39 = vld [vmem:[#allocation68_spill] sm:$0xff] }
 0x40e   :  { %3524 = vmatpush2.bf16.msra.mxu1 %v13973_v43  ;;  %v14025_v43 = vld [vmem:[#allocation67_spill] sm:$0xff] }
 0x40f   :  { %3525 = vmatprep.subr.bf16.mxu1 %v13974_v45  ;;  %v14026_v45 = vld [vmem:[#allocation70_spill] sm:$0xff] }
 0x410   :  { %3485 = vmatpush2.bf16.msra.mxu0 %v13975_v46  ;;  %v14027_v46 = vld [vmem:[#allocation69_spill] sm:$0xff] }
 0x411   :  { %3486 = vmatprep.subr.bf16.mxu0 %v13976_v49  ;;  %v14028_v49 = vld [vmem:[#allocation72_spill] sm:$0xff] }
 0x412   :  { %3526 = vmatpush2.bf16.msra.mxu1 %v13977_v21  ;;  %v14029_v21 = vld [vmem:[#allocation71_spill] sm:$0xff] }
 0x413   :  { %3527 = vmatprep.subr.bf16.mxu1 %v13978_v51  ;;  %v14030_v51 = vld [vmem:[#allocation74_spill] sm:$0xff] }
 0x414   :  { %3487 = vmatpush2.bf16.msra.mxu0 %v13979_v52  ;;  %v14031_v52 = vld [vmem:[#allocation73_spill] sm:$0xff] }
 0x415   :  { %3488 = vmatprep.subr.bf16.mxu0 %v13980_v53  ;;  %v14032_v53 = vld [vmem:[#allocation76_spill] sm:$0xff] }
 0x416   :  { %3528 = vmatpush2.bf16.msra.mxu1 %v13981_v54  ;;  %v14033_v54 = vld [vmem:[#allocation75_spill] sm:$0xff] }
 0x417   :  { %3529 = vmatprep.subr.bf16.mxu1 %v13982_v55  ;;  %v14034_v55 = vld [vmem:[#allocation78_spill] sm:$0xff] }
 0x418   :  { %3489 = vmatpush2.bf16.msra.mxu0 %v13983_v56  ;;  %v14035_v56 = vld [vmem:[#allocation77_spill] sm:$0xff] }
 0x419   :  { %3490 = vmatprep.subr.bf16.mxu0 %v13984_v57  ;;  %v14036_v57 = vld [vmem:[#allocation80_spill] sm:$0xff] }
 0x41a   :  { %3530 = vmatpush2.bf16.msra.mxu1 %v13985_v58  ;;  %v14037_v58 = vld [vmem:[#allocation79_spill] sm:$0xff] }
 0x41b   :  { %3531 = vmatprep.subr.bf16.mxu1 %v13986_v59  ;;  %v14038_v59 = vld [vmem:[#allocation82_spill] sm:$0xff] }
 0x41c   :  { %3491 = vmatpush2.bf16.msra.mxu0 %v13987_v60  ;;  %v14039_v60 = vld [vmem:[#allocation81_spill] sm:$0xff] }
 0x41d   :  { %3492 = vmatprep.subr.bf16.mxu0 %v13988_v61  ;;  %v14040_v61 = vld [vmem:[#allocation84_spill] sm:$0xff] }
 0x41e   :  { %3532 = vmatpush2.bf16.msra.mxu1 %v13989_v62  ;;  %v14041_v62 = vld [vmem:[#allocation83_spill] sm:$0xff] }
 0x41f   :  { %3533 = vmatprep.subr.bf16.mxu1 %v13990_v63  ;;  %v14042_v63 = vld [vmem:[#allocation86_spill] sm:$0xff] }
 0x420   :  { %3493 = vmatpush2.bf16.msra.mxu0 %v13991_v2  ;;  %v14043_v2 = vld [vmem:[#allocation85_spill] sm:$0xff] }
 0x421   :  { %3494 = vmatprep.subr.bf16.mxu0 %v13992_v7  ;;  %v14045_v7 = vld [vmem:[#allocation87_spill] sm:$0xff] }
 0x422   :  { %3534 = vmatpush2.bf16.msra.mxu1 %v13993_v9  ;;  %v14046_v9 = vld [vmem:[#allocation91_spill] sm:$0xff] }
 0x423   :  { %3535 = vmatprep.subr.bf16.mxu1 %v13994_v19  ;;  %v14048_v19 = vld [vmem:[#allocation92_spill] sm:$0xff] }
 0x424   :  { %3495 = vmatpush2.bf16.msra.mxu0 %v13995_v22  ;;  %v14049_v22 = vld [vmem:[#allocation90_spill] sm:$0xff] }
 0x425   :  { %3956 = vmatprep.subr.bf16.mxu0 %v13996_v30  ;;  %v14050_v30 = vld [vmem:[#allocation94_spill] sm:$0xff] }
 0x426   :  { %3536 = vmatpush2.bf16.msra.mxu1 %v13997_v4  ;;  %v14051_v4 = vld [vmem:[#allocation93_spill] sm:$0xff] }
 0x427   :  { %3497 = vmatmul.mubr.bf16.vlgmr.msra.gmra.mxu0 %v3079_v10  ;;  %3997 = vmatprep.subr.bf16.mxu1 %v13998_v5  ;;  %v14052_v5 = vld [vmem:[#allocation96_spill] sm:$0xff] }
 0x428   :  { %3957 = vmatpush1.bf16.msra.mxu0 %v13999_v6  ;;  %v14053_v6 = vld [vmem:[#allocation95_spill] sm:$0xff] }
 0x429   :  { %3538 = vmatmul.mubr.bf16.vlgmr.msra.gmra.mxu1 %v3079_v10  ;;  %3958 = vmatprep.subr.bf16.mxu0 %v14000_v13  ;;  %v14047_v10 = vld [vmem:[#allocation89_spill] sm:$0xff] }
 0x42a   :  { %3998 = vmatpush1.bf16.msra.mxu1 %v14001_v14  ;;  %v14054_v13 = vld [vmem:[#allocation97_spill] sm:$0xff]  ;;  %v14055_v14 = vld [vmem:[#allocation98_spill] sm:$0xff] }
 0x42b   :  { %3999 = vmatprep.subr.bf16.mxu1 %v14002_v15  ;;  %v14056_v15 = vld [vmem:[#allocation100_spill] sm:$0xff] }
 0x42c   :  { %3959 = vmatpush1.bf16.msra.mxu0 %v14003_v16  ;;  %v14057_v16 = vld [vmem:[#allocation99_spill] sm:$0xff] }
 0x42d   :  { %3960 = vmatprep.subr.bf16.mxu0 %v14004_v17  ;;  %v14058_v17 = vld [vmem:[#allocation101_spill] sm:$0xff] }
 0x42e   :  { %4000 = vmatpush1.bf16.msra.mxu1 %v14005_v8  ;;  %v14059_v8 = vld [vmem:[#allocation102_spill] sm:$0xff] }
 0x42f   :  { %4001 = vmatprep.subr.bf16.mxu1 %v14006_v18  ;;  %v14060_v18 = vld [vmem:[#allocation103_spill] sm:$0xff] }
 0x430   :  { %3961 = vmatpush1.bf16.msra.mxu0 %v14007_v20  ;;  %v12482_v20 = vld [vmem:[#allocation5 + $0xe4] ss:$16 sps:$4 sm:$0xff]  }
 0x431   :  { %3962 = vmatprep.subr.bf16.mxu0 %v14008_v32 }
 0x432   :  { %4002 = vmatpush1.bf16.msra.mxu1 %v14009_v44 }
 0x433   :  { %4003 = vmatprep.subr.bf16.mxu1 %v14010_v0 }
 0x434   :  { %3963 = vmatpush1.bf16.msra.mxu0 %v14011_v23 }
 0x435   :  { %3964 = vmatprep.subr.bf16.mxu0 %v14012_v31 }
 0x436   :  { %4004 = vmatpush1.bf16.msra.mxu1 %v14013_v47 }
 0x437   :  { %4005 = vmatprep.subr.bf16.mxu1 %v14014_v35 }
 0x438   :  { %3965 = vmatpush1.bf16.msra.mxu0 %v14015_v1 }
 0x439   :  { %3966 = vmatprep.subr.bf16.mxu0 %v14016_v28 }
 0x43a   :  { %4006 = vmatpush1.bf16.msra.mxu1 %v14017_v38 }
 0x43b   :  { %4007 = vmatprep.subr.bf16.mxu1 %v14018_v41 }
 0x43c   :  { %3967 = vmatpush1.bf16.msra.mxu0 %v14019_v29 }
 0x43d   :  { %3968 = vmatprep.subr.bf16.mxu0 %v14020_v40  ;;  %v12487_v40 = vld [vmem:[#allocation5 + $0xec] ss:$16 sps:$4 sm:$0xff]  }
 0x43e   :  { %4008 = vmatpush1.bf16.msra.mxu1 %v14021_v25 }
 0x43f   :  { %4009 = vmatprep.subr.bf16.mxu1 %v14022_v42 }
 0x440   :  { %3969 = vmatpush1.bf16.msra.mxu0 %v14023_v36 }
 0x441   :  { %3970 = vmatprep.subr.bf16.mxu0 %v14024_v39 }
 0x442   :  { %4010 = vmatpush1.bf16.msra.mxu1 %v14025_v43 }
 0x443   :  { %4011 = vmatprep.subr.bf16.mxu1 %v14026_v45 }
 0x444   :  { %3971 = vmatpush1.bf16.msra.mxu0 %v14027_v46 }
 0x445   :  { %3972 = vmatprep.subr.bf16.mxu0 %v14028_v49 }
 0x446   :  { %4012 = vmatpush1.bf16.msra.mxu1 %v14029_v21 }
 0x447   :  { %4013 = vmatprep.subr.bf16.mxu1 %v14030_v51 }
 0x448   :  { %3973 = vmatpush2.bf16.msra.mxu0 %v14031_v52 }
 0x449   :  { %3974 = vmatprep.subr.bf16.mxu0 %v14032_v53 }
 0x44a   :  { %4014 = vmatpush2.bf16.msra.mxu1 %v14033_v54 }
 0x44b   :  { %4015 = vmatprep.subr.bf16.mxu1 %v14034_v55 }
 0x44c   :  { %3975 = vmatpush2.bf16.msra.mxu0 %v14035_v56 }
 0x44d   :  { %3976 = vmatprep.subr.bf16.mxu0 %v14036_v57 }
 0x44e   :  { %4016 = vmatpush2.bf16.msra.mxu1 %v14037_v58 }
 0x44f   :  { %4017 = vmatprep.subr.bf16.mxu1 %v14038_v59 }
 0x450   :  { %3977 = vmatpush2.bf16.msra.mxu0 %v14039_v60 }
 0x451   :  { %3978 = vmatprep.subr.bf16.mxu0 %v14040_v61 }
 0x452   :  { %4018 = vmatpush2.bf16.msra.mxu1 %v14041_v62 }
 0x453   :  { %4019 = vmatprep.subr.bf16.mxu1 %v14042_v63 }
 0x454   :  { %3979 = vmatpush2.bf16.msra.mxu0 %v14043_v2 }
 0x455   :  { %3980 = vmatprep.subr.bf16.mxu0 %v14044_v3 }
 0x456   :  { %4020 = vmatpush2.bf16.msra.mxu1 %v14045_v7 }
 0x457   :  { %4021 = vmatprep.subr.bf16.mxu1 %v14046_v9 }
 0x458   :  { %3981 = vmatpush2.bf16.msra.mxu0 %v14047_v10 }
 0x459   :  { %3982 = vmatprep.subr.bf16.mxu0 %v14048_v19 }
 0x45a   :  { %4022 = vmatpush2.bf16.msra.mxu1 %v14049_v22 }
 0x45b   :  { %4023 = vmatprep.subr.bf16.mxu1 %v14050_v30 }
 0x45c   :  { %3983 = vmatpush2.bf16.msra.mxu0 %v14051_v4 }
 0x45d   :  { %3984 = vmatprep.subr.bf16.mxu0 %v14052_v5 }
 0x45e   :  { %4024 = vmatpush2.bf16.msra.mxu1 %v14053_v6 }
 0x45f   :  { %4025 = vmatprep.subr.bf16.mxu1 %v14054_v13 }
 0x460   :  { %3985 = vmatpush2.bf16.msra.mxu0 %v14055_v14 }
 0x461   :  { %3986 = vmatprep.subr.bf16.mxu0 %v14056_v15 }
 0x462   :  { %4026 = vmatpush2.bf16.msra.mxu1 %v14057_v16 }
 0x463   :  { %4027 = vmatprep.subr.bf16.mxu1 %v14058_v17 }
 0x464   :  { %3987 = vmatpush2.bf16.msra.mxu0 %v14059_v8 }
 0x465   :  { %4451 = vmatprep.subr.bf16.mxu0 %v12482_v20 }
 0x466   :  { %4028 = vmatpush2.bf16.msra.mxu1 %v14060_v18 }
 0x467   :  { %4492 = vmatprep.subr.bf16.mxu1 %v12487_v40 }
 0x4a7   :  { %v3003_v32 = vpop.f32.mrf.mxu0  ;;  %v3044_v44 = vpop.f32.mrf.mxu1 }
 0x4a8   :  { %v3004_v0 = vadd.f32 %v3003_v32, %v11928_v33  ;;  %v3045_v39 = vadd.f32 %v3044_v44, %v11946_v50 }
 0x4a9   :  { %v3005_v23 = vpop.f32.mrf.mxu0  ;;  %v3046_v31 = vpop.f32.mrf.mxu1 }
 0x4aa   :  { %v9417_v47 = vmul.f32 -1.442695, %v3004_v0  ;;  %v3006_v35 = vadd.f32 %v3005_v23, %v11932_v34  ;;  %v3047_v25 = vadd.f32 %v3046_v31, %v11940_v48 }
 0x4ab   :  { %v3007_v1 = vpop.f32.mrf.mxu0  ;;  %v3048_v28 = vpop.f32.mrf.mxu1 }
 0x4ac   :  { %11274 = vpow2.f32 %v9417_v47  ;;  %v9418_v38 = vmul.f32 -1.442695, %v3006_v35  ;;  %v9419_v42 = vmul.f32 -1.442695, %v3047_v25  ;;  %v12504_v28 = vld [vmem:[#allocation5 + $0xe0] ss:$16 sps:$4 sm:$0xff]  }
 0x4ad   :  { %v3008_v41 = vpop.f32.mrf.mxu0  ;;  %v3049_v29 = vpop.f32.mrf.mxu1  ;;  %v12510_v25 = vld [vmem:[#allocation5 + $0xcc] ss:$16 sps:$4 sm:$0xff]  }
 0x4ae   :  { %11276 = vpow2.f32 %v9418_v38  ;;  %v12506_v41 = vld [vmem:[#allocation5 + $0xc4] ss:$16 sps:$4 sm:$0xff]   ;;  %v12508_v29 = vld [vmem:[#allocation5 + $0xe8] ss:$16 sps:$4 sm:$0xff]  }
 0x4af   :  { %11278 = vpow2.f32 %v9419_v42  ;;  %v12516_v42 = vld [vmem:[#allocation5 + $0xa4] ss:$16 sps:$4 sm:$0xff]  }
 0x4b9   :  { %v11275_v36 = vpop.eup %11274 }
 0x4ba   :  { %v3054_v43 = vadd.f32 1.0, %v11275_v36  ;;  %v12519_v36 = vld [vmem:[#allocation5 + $0xc8] ss:$16 sps:$4 sm:$0xff]  }
 0x4bb   :  { %v11277_v45 = vpop.eup %11276 }
 0x4bc   :  { %11280 = vrcp.f32 %v3054_v43  ;;  %v3060_v46 = vadd.f32 1.0, %v11277_v45  ;;  %v11279_v49 = vpop.eup %11278  ;;  %v12525_v43 = vld [vmem:[#allocation5 + $0xa0] ss:$16 sps:$4 sm:$0xff]   ;;  %v12528_v45 = vld [vmem:[#allocation5 + $0x84] ss:$16 sps:$4 sm:$0xff]  }
 0x4bd   :  { %11282 = vtanh.f32 %v3045_v39  ;;  %v3067_v53 = vadd.f32 1.0, %v11279_v49  ;;  %v12522_v39 = vld [vmem:[#allocation5 + $0xac] ss:$16 sps:$4 sm:$0xff]  }
 0x4be   :  { %11284 = vrcp.f32 %v3060_v46  ;;  %v12531_v46 = vld [vmem:[#allocation5 + $0xa8] ss:$16 sps:$4 sm:$0xff]   ;;  %v12534_v49 = vld [vmem:[#allocation5 + $0x8c] ss:$16 sps:$4 sm:$0xff]  }
 0x4bf   :  { %11286 = vrcp.f32 %v3067_v53  ;;  %v12546_v53 = vld [vmem:[#allocation5 + $0x6c] ss:$16 sps:$4 sm:$0xff]  }
 0x4c9   :  { %v11281_v21 = vpop.eup %11280 }
 0x4ca   :  { %v11283_v51 = vpop.eup %11282 }
 0x4cb   :  { %v11285_v52 = vpop.eup %11284  ;;  %v3071_v54 = vmul.f32 %v11283_v51, %v11281_v21  ;;  %v12537_v21 = vld [vmem:[#allocation5 + $0x80] ss:$16 sps:$4 sm:$0xff]   ;;  %v12540_v51 = vld [vmem:[#allocation5 + $0x64] ss:$16 sps:$4 sm:$0xff]  }
 0x4cc   :  { %v3070_v55 = vmul.f32 %v11285_v52, %v12345_v37  ;;  %v11287_v57 = vpop.eup %11286  ;;  %v12543_v52 = vld [vmem:[#allocation5 + $0x88] ss:$16 sps:$4 sm:$0xff]  }
 0x4ce   :  { %v12493_v56 = vadd.f32 %v3071_v54, %v3070_v55  ;;  %v12549_v54 = vld [vmem:[#allocation5 + $0x60] ss:$16 sps:$4 sm:$0xff]   ;;  %v12552_v55 = vld [vmem:[#allocation5 + $0x44] ss:$16 sps:$4 sm:$0xff]  }
 0x4d0   :  { %11288 = vtanh.f32 %v12493_v56 }
 0x4dd   :  { %v11289_v58 = vpop.eup %11288 }
 0x4de   :  { %v3074_v59 = vmul.f32 %v11289_v58, %v11287_v57  ;;  %v12555_v57 = vld [vmem:[#allocation5 + $0x68] ss:$16 sps:$4 sm:$0xff]   ;;  %v12558_v58 = vld [vmem:[#allocation5 + $0x4c] ss:$16 sps:$4 sm:$0xff]  }
 0x4e0   :  { %3076 = vst [vmem:[#allocation10 + $0x10] sm:$0xff] %v3074_v59  ;;  %v3571_v60 = vpack.c.bf16 %v3074_v59, %v3074_v59  ;;  %v12561_v59 = vld [vmem:[#allocation5 + $0x40] ss:$16 sps:$4 sm:$0xff]  }
 0x4e2   :  { %3988 = vmatprep.mubr.bf16.mxu0 %v3571_v60  ;;  %4029 = vmatprep.mubr.bf16.mxu1 %v3571_v60  ;;  %v12564_v60 = vld [vmem:[#allocation5 + $0x24] ss:$16 sps:$4 sm:$0xff]  }
 0x4e7   :  { %v3498_v61 = vpop.f32.mrf.mxu0 }
 0x4e8   :  { %v3499_v62 = vadd.f32 %v3498_v61, %v11864_v11  ;;  %v12567_v61 = vld [vmem:[#allocation5 + $0x48] ss:$16 sps:$4 sm:$0xff]  }
 0x4e9   :  { %v3500_v63 = vpop.f32.mrf.mxu0  ;;  %v3539_v2 = vpop.f32.mrf.mxu1 }
 0x4ea   :  { %v9484_v3 = vmul.f32 -1.442695, %v3499_v62  ;;  %v3501_v37 = vadd.f32 %v3500_v63, %v11868_v12  ;;  %v3540_v5 = vadd.f32 %v3539_v2, %v11880_v26  ;;  %v12570_v62 = vld [vmem:[#allocation5 + $0x2c] ss:$16 sps:$4 sm:$0xff]   ;;  %v12573_v63 = vld [vmem:[#allocation5 + $0x20] ss:$16 sps:$4 sm:$0xff]  }
 0x4eb   :  { %v3502_v7 = vpop.f32.mrf.mxu0  ;;  %v3541_v9 = vpop.f32.mrf.mxu1  ;;  %v12576_v2 = vld [vmem:[#allocation5 + $0x4] ss:$16 sps:$4 sm:$0xff]  }
 0x4ec   :  { %11290 = vpow2.f32 %v9484_v3  ;;  %v9485_v10 = vmul.f32 -1.442695, %v3501_v37  ;;  %v3542_v4 = vadd.f32 %v3541_v9, %v11876_v24  ;;  %v12579_v3 = vld [vmem:[#allocation5 + $0x28] ss:$16 sps:$4 sm:$0xff]   ;;  %v12582_v37 = vld [vmem:[#allocation5 + $0xc] ss:$16 sps:$4 sm:$0xff]  }
 0x4ed   :  { %v3503_v19 = vpop.f32.mrf.mxu0  ;;  %v3543_v22 = vpop.f32.mrf.mxu1  ;;  %v12585_v7 = vld [vmem:[#allocation5] ss:$16 sps:$4 sm:$0xff]   ;;  %v12588_v9 = vld [vmem:[#allocation5 + $0x1e4] ss:$16 sps:$4 sm:$0xff]  }
 0x4ee   :  { %11292 = vpow2.f32 %v9485_v10  ;;  %v9486_v6 = vmul.f32 -1.442695, %v3542_v4  ;;  %v12591_v10 = vld [vmem:[#allocation5 + $0x8] ss:$16 sps:$4 sm:$0xff]   ;;  %v12594_v19 = vld [vmem:[#allocation5 + $0x1ec] ss:$16 sps:$4 sm:$0xff]  }
 0x4ef   :  { %v3544_v30 = vpop.f32.mrf.mxu1  ;;  %11294 = vtanh.f32 %v3540_v5  ;;  %v12597_v22 = vld [vmem:[#allocation5 + $0x1e0] ss:$16 sps:$4 sm:$0xff]   ;;  %v12603_v4 = vld [vmem:[#allocation5 + $0x1e8] ss:$16 sps:$4 sm:$0xff]   ;;  %v12606_v5 = vld [vmem:[#allocation5 + $0x1cc] ss:$16 sps:$4 sm:$0xff]  }
 0x4f0   :  { %11296 = vpow2.f32 %v9486_v6  ;;  %v12600_v30 = vld [vmem:[#allocation5 + $0x1c4] ss:$16 sps:$4 sm:$0xff]   ;;  %v12609_v6 = vld [vmem:[#allocation5 + $0x1c0] ss:$16 sps:$4 sm:$0xff]  }
 0x4f9   :  { %v11291_v13 = vpop.eup %11290 }
 0x4fa   :  { %v3549_v14 = vadd.f32 1.0, %v11291_v13  ;;  %v12612_v13 = vld [vmem:[#allocation5 + $0x1a4] ss:$16 sps:$4 sm:$0xff]  }
 0x4fb   :  { %v11293_v15 = vpop.eup %11292  ;;  %14061 = vst [vmem:[#allocation15_spill] sm:$0xff] %v12612_v13 }
 0x4fc   :  { %11298 = vrcp.f32 %v3549_v14  ;;  %v3555_v16 = vadd.f32 1.0, %v11293_v15  ;;  %v11295_v17 = vpop.eup %11294  ;;  %v12615_v14 = vld [vmem:[#allocation5 + $0x1c8] ss:$16 sps:$4 sm:$0xff]   ;;  %v12618_v15 = vld [vmem:[#allocation5 + $0x1ac] ss:$16 sps:$4 sm:$0xff]  }
 0x4fd   :  { %v11297_v8 = vpop.eup %11296  ;;  %14062 = vst [vmem:[#allocation16_spill] sm:$0xff] %v12615_v14  ;;  %14063 = vst [vmem:[#allocation17_spill] sm:$0xff] %v12618_v15 }
 0x4fe   :  { %11300 = vrcp.f32 %v3555_v16  ;;  %v3562_v44 = vadd.f32 1.0, %v11297_v8  ;;  %v12621_v16 = vld [vmem:[#allocation5 + $0x1a0] ss:$16 sps:$4 sm:$0xff]   ;;  %v12627_v8 = vld [vmem:[#allocation5 + $0x1a8] ss:$16 sps:$4 sm:$0xff]  }
 0x4ff   :  { %14064 = vst [vmem:[#allocation18_spill] sm:$0xff] %v12621_v16  ;;  %14066 = vst [vmem:[#allocation20_spill] sm:$0xff] %v12627_v8 }
 0x500   :  { %11302 = vrcp.f32 %v3562_v44  ;;  %v12636_v44 = vld [vmem:[#allocation5 + $0x164] ss:$16 sps:$4 sm:$0xff]  }
 0x501   :  { %14069 = vst [vmem:[#allocation23_spill] sm:$0xff] %v12636_v44 }
 0x509   :  { %v11299_v18 = vpop.eup %11298 }
 0x50a   :  { %v3566_v23 = vmul.f32 %v11299_v18, %v11295_v17  ;;  %v12624_v17 = vld [vmem:[#allocation5 + $0x184] ss:$16 sps:$4 sm:$0xff]   ;;  %v12630_v18 = vld [vmem:[#allocation5 + $0x18c] ss:$16 sps:$4 sm:$0xff]  }
 0x50b   :  { %v11301_v32 = vpop.eup %11300  ;;  %14065 = vst [vmem:[#allocation19_spill] sm:$0xff] %v12624_v17  ;;  %14067 = vst [vmem:[#allocation21_spill] sm:$0xff] %v12630_v18 }
 0x50c   :  { %v3565_v0 = vmul.f32 %v11301_v32, %v12353_v27  ;;  %v12513_v27 = vld [vmem:[#allocation5 + $0xc0] ss:$16 sps:$4 sm:$0xff]  }
 0x50d   :  { %v11303_v47 = vpop.eup %11302  ;;  %v12633_v32 = vld [vmem:[#allocation5 + $0x180] ss:$16 sps:$4 sm:$0xff]  }
 0x50e   :  { %v12501_v31 = vadd.f32 %v3566_v23, %v3565_v0  ;;  %14068 = vst [vmem:[#allocation22_spill] sm:$0xff] %v12633_v32  ;;  %v12639_v0 = vld [vmem:[#allocation5 + $0x188] ss:$16 sps:$4 sm:$0xff]   ;;  %v12642_v23 = vld [vmem:[#allocation5 + $0x16c] ss:$16 sps:$4 sm:$0xff]  }
 0x50f   :  { %14070 = vst [vmem:[#allocation24_spill] sm:$0xff] %v12639_v0  ;;  %14071 = vst [vmem:[#allocation25_spill] sm:$0xff] %v12642_v23 }
 0x510   :  { %11304 = vtanh.f32 %v12501_v31 }
 0x51d   :  { %v11305_v35 = vpop.eup %11304 }
 0x51e   :  { %v3569_v1 = vmul.f32 %v11305_v35, %v11303_v47  ;;  %v12645_v47 = vld [vmem:[#allocation5 + $0x160] ss:$16 sps:$4 sm:$0xff]   ;;  %v12648_v35 = vld [vmem:[#allocation5 + $0x144] ss:$16 sps:$4 sm:$0xff]  }
 0x51f   :  { %14072 = vst [vmem:[#allocation26_spill] sm:$0xff] %v12645_v47  ;;  %14073 = vst [vmem:[#allocation27_spill] sm:$0xff] %v12648_v35 }
 0x520   :  { %v3570_v38 = vpack.c.bf16 %v3569_v1, %v3569_v1  ;;  %v12651_v1 = vld [vmem:[#allocation5 + $0x168] ss:$16 sps:$4 sm:$0xff]  }
 0x521   :  { %14074 = vst [vmem:[#allocation28_spill] sm:$0xff] %v12651_v1 }
 0x522   :  { %3989 = vmatmul.mubr.bf16.vlgmr.msra.gmra.mxu0 %v3570_v38  ;;  %4030 = vmatmul.mubr.bf16.vlgmr.msra.gmra.mxu1 %v3570_v38 }
 0x523   :  { %4452 = vmatpush1.bf16.msra.mxu0 %v12504_v28  ;;  %4483 = vmatprep.mubr.bf16.mxu0 %v3570_v38 }
 0x524   :  { %4524 = vmatprep.mubr.bf16.mxu1 %v3570_v38  ;;  %4453 = vmatprep.subr.bf16.mxu0 %v12506_v41  ;;  %v12654_v38 = vld [vmem:[#allocation5 + $0x14c] ss:$16 sps:$4 sm:$0xff]  }
 0x525   :  { %4493 = vmatpush1.bf16.msra.mxu1 %v12508_v29  ;;  %14075 = vst [vmem:[#allocation29_spill] sm:$0xff] %v12654_v38 }
 0x526   :  { %4494 = vmatprep.subr.bf16.mxu1 %v12510_v25 }
 0x527   :  { %4454 = vmatpush1.bf16.msra.mxu0 %v12513_v27 }
 0x528   :  { %4455 = vmatprep.subr.bf16.mxu0 %v12516_v42 }
 0x529   :  { %4495 = vmatpush1.bf16.msra.mxu1 %v12519_v36 }
 0x52a   :  { %4496 = vmatprep.subr.bf16.mxu1 %v12522_v39 }
 0x52b   :  { %4456 = vmatpush1.bf16.msra.mxu0 %v12525_v43 }
 0x52c   :  { %4457 = vmatprep.subr.bf16.mxu0 %v12528_v45 }
 0x52d   :  { %4497 = vmatpush1.bf16.msra.mxu1 %v12531_v46 }
 0x52e   :  { %4498 = vmatprep.subr.bf16.mxu1 %v12534_v49 }
 0x52f   :  { %4458 = vmatpush1.bf16.msra.mxu0 %v12537_v21 }
 0x530   :  { %4459 = vmatprep.subr.bf16.mxu0 %v12540_v51 }
 0x531   :  { %4499 = vmatpush1.bf16.msra.mxu1 %v12543_v52 }
 0x532   :  { %4500 = vmatprep.subr.bf16.mxu1 %v12546_v53 }
 0x533   :  { %4460 = vmatpush1.bf16.msra.mxu0 %v12549_v54 }
 0x534   :  { %4461 = vmatprep.subr.bf16.mxu0 %v12552_v55 }
 0x535   :  { %4501 = vmatpush1.bf16.msra.mxu1 %v12555_v57 }
 0x536   :  { %4502 = vmatprep.subr.bf16.mxu1 %v12558_v58 }
 0x537   :  { %4462 = vmatpush1.bf16.msra.mxu0 %v12561_v59 }
 0x538   :  { %4463 = vmatprep.subr.bf16.mxu0 %v12564_v60 }
 0x539   :  { %4503 = vmatpush1.bf16.msra.mxu1 %v12567_v61 }
 0x53a   :  { %4504 = vmatprep.subr.bf16.mxu1 %v12570_v62 }
 0x53b   :  { %4464 = vmatpush1.bf16.msra.mxu0 %v12573_v63 }
 0x53c   :  { %4465 = vmatprep.subr.bf16.mxu0 %v12576_v2 }
 0x53d   :  { %4505 = vmatpush1.bf16.msra.mxu1 %v12579_v3 }
 0x53e   :  { %4506 = vmatprep.subr.bf16.mxu1 %v12582_v37 }
 0x53f   :  { %4466 = vmatpush1.bf16.msra.mxu0 %v12585_v7 }
 0x540   :  { %4467 = vmatprep.subr.bf16.mxu0 %v12588_v9 }
 0x541   :  { %4507 = vmatpush1.bf16.msra.mxu1 %v12591_v10 }
 0x542   :  { %4508 = vmatprep.subr.bf16.mxu1 %v12594_v19 }
 0x543   :  { %4468 = vmatpush2.bf16.msra.mxu0 %v12597_v22 }
 0x544   :  { %4469 = vmatprep.subr.bf16.mxu0 %v12600_v30 }
 0x545   :  { %4509 = vmatpush2.bf16.msra.mxu1 %v12603_v4 }
 0x546   :  { %4510 = vmatprep.subr.bf16.mxu1 %v12606_v5 }
 0x547   :  { %4470 = vmatpush2.bf16.msra.mxu0 %v12609_v6 }
 0x548   :  { %4471 = vmatprep.subr.bf16.mxu0 %v12612_v13 }
 0x549   :  { %4511 = vmatpush2.bf16.msra.mxu1 %v12615_v14 }
 0x54a   :  { %4512 = vmatprep.subr.bf16.mxu1 %v12618_v15 }
 0x54b   :  { %4472 = vmatpush2.bf16.msra.mxu0 %v12621_v16 }
 0x54c   :  { %4473 = vmatprep.subr.bf16.mxu0 %v12624_v17 }
 0x54d   :  { %4513 = vmatpush2.bf16.msra.mxu1 %v12627_v8  ;;  %v4065_v8 = vld [vmem:[#allocation2 + $0x20] sm:$0xff] }
 0x54e   :  { %4514 = vmatprep.subr.bf16.mxu1 %v12630_v18  ;;  %v12657_v18 = vld [vmem:[#allocation5 + $0x140] ss:$16 sps:$4 sm:$0xff]  }
 0x54f   :  { %4474 = vmatpush2.bf16.msra.mxu0 %v12633_v32  ;;  %14076 = vst [vmem:[#allocation30_spill] sm:$0xff] %v12657_v18  ;;  %v12660_v32 = vld [vmem:[#allocation5 + $0x124] ss:$16 sps:$4 sm:$0xff]  }
 0x550   :  { %4475 = vmatprep.subr.bf16.mxu0 %v12636_v44  ;;  %14077 = vst [vmem:[#allocation31_spill] sm:$0xff] %v12660_v32  ;;  %v12663_v44 = vld [vmem:[#allocation5 + $0x148] ss:$16 sps:$4 sm:$0xff]  }
 0x551   :  { %4515 = vmatpush2.bf16.msra.mxu1 %v12639_v0  ;;  %14078 = vst [vmem:[#allocation32_spill] sm:$0xff] %v12663_v44  ;;  %v12666_v0 = vld [vmem:[#allocation5 + $0x12c] ss:$16 sps:$4 sm:$0xff]  }
 0x552   :  { %4516 = vmatprep.subr.bf16.mxu1 %v12642_v23  ;;  %14079 = vst [vmem:[#allocation33_spill] sm:$0xff] %v12666_v0  ;;  %v12669_v23 = vld [vmem:[#allocation5 + $0x120] ss:$16 sps:$4 sm:$0xff]  }
 0x553   :  { %4476 = vmatpush2.bf16.msra.mxu0 %v12645_v47  ;;  %14080 = vst [vmem:[#allocation34_spill] sm:$0xff] %v12669_v23  ;;  %v12672_v47 = vld [vmem:[#allocation5 + $0x104] ss:$16 sps:$4 sm:$0xff]  }
 0x554   :  { %4477 = vmatprep.subr.bf16.mxu0 %v12648_v35  ;;  %14081 = vst [vmem:[#allocation35_spill] sm:$0xff] %v12672_v47  ;;  %v12675_v35 = vld [vmem:[#allocation5 + $0x128] ss:$16 sps:$4 sm:$0xff]  }
 0x555   :  { %4517 = vmatpush2.bf16.msra.mxu1 %v12651_v1  ;;  %14082 = vst [vmem:[#allocation36_spill] sm:$0xff] %v12675_v35  ;;  %v12678_v1 = vld [vmem:[#allocation5 + $0x10c] ss:$16 sps:$4 sm:$0xff]  }
 0x556   :  { %4518 = vmatprep.subr.bf16.mxu1 %v12654_v38  ;;  %14083 = vst [vmem:[#allocation37_spill] sm:$0xff] %v12678_v1  ;;  %v12681_v38 = vld [vmem:[#allocation5 + $0x100] ss:$16 sps:$4 sm:$0xff]  }
 0x557   :  { %4478 = vmatpush2.bf16.msra.mxu0 %v12657_v18  ;;  %14084 = vst [vmem:[#allocation38_spill] sm:$0xff] %v12681_v38  ;;  %v4066_v18 = vpack.c.bf16 %v4065_v8, %v4065_v8  ;;  %v12702_v8 = vld [vmem:[#allocation7 + $0xc0] ss:$16 sps:$4 sm:$0xff]  }
 0x558   :  { %4479 = vmatprep.subr.bf16.mxu0 %v12660_v32  ;;  %v12685_v32 = vld [vmem:[#allocation5 + $0x108] ss:$16 sps:$4 sm:$0xff]   ;;  %14090 = vst [vmem:[#allocation42_spill] sm:$0xff] %v12702_v8 }
 0x559   :  { %4519 = vmatpush2.bf16.msra.mxu1 %v12663_v44  ;;  %14085 = vst [vmem:[#allocation41_spill] sm:$0xff] %v12685_v32  ;;  %v12694_v44 = vld [vmem:[#allocation7 + $0xe8] ss:$16 sps:$4 sm:$0xff]  }
 0x55a   :  { %4520 = vmatprep.subr.bf16.mxu1 %v12666_v0  ;;  %v12690_v0 = vld [vmem:[#allocation7 + $0xe0] ss:$16 sps:$4 sm:$0xff]   ;;  %14088 = vst [vmem:[#allocation40_spill] sm:$0xff] %v12694_v44 }
 0x55b   :  { %4480 = vmatpush2.bf16.msra.mxu0 %v12669_v23  ;;  %14086 = vst [vmem:[#allocation39_spill] sm:$0xff] %v12690_v0  ;;  %v12692_v23 = vld [vmem:[#allocation7 + $0xe4] ss:$16 sps:$4 sm:$0xff]  }
 0x55c   :  { %4481 = vmatprep.subr.bf16.mxu0 %v12672_v47  ;;  %14087 = vst [vmem:[#allocation43_spill] sm:$0xff] %v12692_v23  ;;  %v12696_v47 = vld [vmem:[#allocation7 + $0xec] ss:$16 sps:$4 sm:$0xff]  }
 0x55d   :  { %4521 = vmatpush2.bf16.msra.mxu1 %v12675_v35  ;;  %14089 = vst [vmem:[#allocation45_spill] sm:$0xff] %v12696_v47 }
 0x55e   :  { %4522 = vmatprep.subr.bf16.mxu1 %v12678_v1  ;;  %v12843_v1 = vld [vmem:[#allocation7 + $0x144] ss:$16 sps:$4 sm:$0xff]  }
 0x55f   :  { %4482 = vmatpush2.bf16.msra.mxu0 %v12681_v38  ;;  %v12708_v38 = vld [vmem:[#allocation7 + $0xcc] ss:$16 sps:$4 sm:$0xff]   ;;  %14138 = vst [vmem:[#allocation90_spill] sm:$0xff] %v12843_v1 }
 0x560   :  { %4943 = vmatprep.subr.bf16.mxu0 %v12692_v23  ;;  %14093 = vst [vmem:[#allocation48_spill] sm:$0xff] %v12708_v38  ;;  %v12721_v23 = vld [vmem:[#allocation7 + $0xa8] ss:$16 sps:$4 sm:$0xff]  }
 0x561   :  { %4523 = vmatpush2.bf16.msra.mxu1 %v12685_v32  ;;  %v12704_v32 = vld [vmem:[#allocation7 + $0xc4] ss:$16 sps:$4 sm:$0xff]   ;;  %14097 = vst [vmem:[#allocation52_spill] sm:$0xff] %v12721_v23 }
 0x562   :  { %4484 = vmatmul.mubr.bf16.vlgmr.msra.gmra.mxu0 %v4066_v18  ;;  %4984 = vmatprep.subr.bf16.mxu1 %v12696_v47  ;;  %14091 = vst [vmem:[#allocation47_spill] sm:$0xff] %v12704_v32  ;;  %v12716_v47 = vld [vmem:[#allocation7 + $0xa0] ss:$16 sps:$4 sm:$0xff]  }
 0x563   :  { %4944 = vmatpush1.bf16.msra.mxu0 %v12690_v0  ;;  %v12714_v0 = vld [vmem:[#allocation7 + $0xa4] ss:$16 sps:$4 sm:$0xff]   ;;  %14095 = vst [vmem:[#allocation50_spill] sm:$0xff] %v12716_v47 }
 0x564   :  { %4525 = vmatmul.mubr.bf16.vlgmr.msra.gmra.mxu1 %v4066_v18  ;;  %v12706_v18 = vld [vmem:[#allocation7 + $0xc8] ss:$16 sps:$4 sm:$0xff]   ;;  %4945 = vmatprep.subr.bf16.mxu0 %v12704_v32  ;;  %14094 = vst [vmem:[#allocation46_spill] sm:$0xff] %v12714_v0 }
 0x565   :  { %4985 = vmatpush1.bf16.msra.mxu1 %v12694_v44  ;;  %14092 = vst [vmem:[#allocation44_spill] sm:$0xff] %v12706_v18  ;;  %v12718_v44 = vld [vmem:[#allocation7 + $0xac] ss:$16 sps:$4 sm:$0xff]   ;;  %v12733_v32 = vld [vmem:[#allocation7 + $0x88] ss:$16 sps:$4 sm:$0xff]  }
 0x566   :  { %4986 = vmatprep.subr.bf16.mxu1 %v12708_v38  ;;  %14096 = vst [vmem:[#allocation49_spill] sm:$0xff] %v12718_v44  ;;  %v12728_v38 = vld [vmem:[#allocation7 + $0x80] ss:$16 sps:$4 sm:$0xff]   ;;  %14101 = vst [vmem:[#allocation56_spill] sm:$0xff] %v12733_v32 }
 0x567   :  { %4946 = vmatpush1.bf16.msra.mxu0 %v12702_v8  ;;  %v12726_v8 = vld [vmem:[#allocation7 + $0x84] ss:$16 sps:$4 sm:$0xff]   ;;  %14099 = vst [vmem:[#allocation54_spill] sm:$0xff] %v12728_v38 }
 0x568   :  { %4947 = vmatprep.subr.bf16.mxu0 %v12714_v0  ;;  %14098 = vst [vmem:[#allocation51_spill] sm:$0xff] %v12726_v8  ;;  %v12745_v0 = vld [vmem:[#allocation7 + $0x68] ss:$16 sps:$4 sm:$0xff]  }
 0x569   :  { %4987 = vmatpush1.bf16.msra.mxu1 %v12706_v18  ;;  %v12730_v18 = vld [vmem:[#allocation7 + $0x8c] ss:$16 sps:$4 sm:$0xff]   ;;  %14105 = vst [vmem:[#allocation60_spill] sm:$0xff] %v12745_v0 }
 0x56a   :  { %4988 = vmatprep.subr.bf16.mxu1 %v12718_v44  ;;  %14100 = vst [vmem:[#allocation53_spill] sm:$0xff] %v12730_v18  ;;  %v12740_v44 = vld [vmem:[#allocation7 + $0x60] ss:$16 sps:$4 sm:$0xff]  }
 0x56b   :  { %4948 = vmatpush1.bf16.msra.mxu0 %v12716_v47  ;;  %v12738_v47 = vld [vmem:[#allocation7 + $0x64] ss:$16 sps:$4 sm:$0xff]   ;;  %14103 = vst [vmem:[#allocation58_spill] sm:$0xff] %v12740_v44 }
 0x56c   :  { %4949 = vmatprep.subr.bf16.mxu0 %v12726_v8  ;;  %14102 = vst [vmem:[#allocation55_spill] sm:$0xff] %v12738_v47  ;;  %v12757_v8 = vld [vmem:[#allocation7 + $0x48] ss:$16 sps:$4 sm:$0xff]  }
 0x56d   :  { %4989 = vmatpush1.bf16.msra.mxu1 %v12721_v23  ;;  %v12742_v23 = vld [vmem:[#allocation7 + $0x6c] ss:$16 sps:$4 sm:$0xff]   ;;  %14109 = vst [vmem:[#allocation64_spill] sm:$0xff] %v12757_v8 }
 0x56e   :  { %4990 = vmatprep.subr.bf16.mxu1 %v12730_v18  ;;  %14104 = vst [vmem:[#allocation57_spill] sm:$0xff] %v12742_v23  ;;  %v12752_v18 = vld [vmem:[#allocation7 + $0x40] ss:$16 sps:$4 sm:$0xff]  }
 0x56f   :  { %4950 = vmatpush1.bf16.msra.mxu0 %v12728_v38  ;;  %v12750_v38 = vld [vmem:[#allocation7 + $0x44] ss:$16 sps:$4 sm:$0xff]   ;;  %14107 = vst [vmem:[#allocation62_spill] sm:$0xff] %v12752_v18 }
 0x570   :  { %4951 = vmatprep.subr.bf16.mxu0 %v12738_v47  ;;  %14106 = vst [vmem:[#allocation59_spill] sm:$0xff] %v12750_v38  ;;  %v12769_v47 = vld [vmem:[#allocation7 + $0x28] ss:$16 sps:$4 sm:$0xff]  }
 0x571   :  { %4991 = vmatpush1.bf16.msra.mxu1 %v12733_v32  ;;  %v12754_v32 = vld [vmem:[#allocation7 + $0x4c] ss:$16 sps:$4 sm:$0xff]   ;;  %14113 = vst [vmem:[#allocation68_spill] sm:$0xff] %v12769_v47 }
 0x572   :  { %4992 = vmatprep.subr.bf16.mxu1 %v12742_v23  ;;  %14108 = vst [vmem:[#allocation61_spill] sm:$0xff] %v12754_v32  ;;  %v12764_v23 = vld [vmem:[#allocation7 + $0x20] ss:$16 sps:$4 sm:$0xff]  }
 0x573   :  { %4952 = vmatpush1.bf16.msra.mxu0 %v12740_v44  ;;  %v12762_v44 = vld [vmem:[#allocation7 + $0x24] ss:$16 sps:$4 sm:$0xff]   ;;  %14111 = vst [vmem:[#allocation66_spill] sm:$0xff] %v12764_v23 }
 0x574   :  { %4953 = vmatprep.subr.bf16.mxu0 %v12750_v38  ;;  %14110 = vst [vmem:[#allocation63_spill] sm:$0xff] %v12762_v44  ;;  %v12781_v38 = vld [vmem:[#allocation7 + $0x8] ss:$16 sps:$4 sm:$0xff]  }
 0x575   :  { %4993 = vmatpush1.bf16.msra.mxu1 %v12745_v0  ;;  %v12766_v0 = vld [vmem:[#allocation7 + $0x2c] ss:$16 sps:$4 sm:$0xff]   ;;  %14117 = vst [vmem:[#allocation72_spill] sm:$0xff] %v12781_v38 }
 0x576   :  { %4994 = vmatprep.subr.bf16.mxu1 %v12754_v32  ;;  %14112 = vst [vmem:[#allocation65_spill] sm:$0xff] %v12766_v0  ;;  %v12776_v32 = vld [vmem:[#allocation7] ss:$16 sps:$4 sm:$0xff]  }
 0x577   :  { %4954 = vmatpush1.bf16.msra.mxu0 %v12752_v18  ;;  %v12774_v18 = vld [vmem:[#allocation7 + $0x4] ss:$16 sps:$4 sm:$0xff]   ;;  %14115 = vst [vmem:[#allocation70_spill] sm:$0xff] %v12776_v32 }
 0x578   :  { %4955 = vmatprep.subr.bf16.mxu0 %v12762_v44  ;;  %14114 = vst [vmem:[#allocation67_spill] sm:$0xff] %v12774_v18  ;;  %v12793_v44 = vld [vmem:[#allocation7 + $0x1e8] ss:$16 sps:$4 sm:$0xff]  }
 0x579   :  { %4995 = vmatpush1.bf16.msra.mxu1 %v12757_v8  ;;  %v12778_v8 = vld [vmem:[#allocation7 + $0xc] ss:$16 sps:$4 sm:$0xff]   ;;  %14121 = vst [vmem:[#allocation76_spill] sm:$0xff] %v12793_v44 }
 0x57a   :  { %4996 = vmatprep.subr.bf16.mxu1 %v12766_v0  ;;  %14116 = vst [vmem:[#allocation69_spill] sm:$0xff] %v12778_v8  ;;  %v12788_v0 = vld [vmem:[#allocation7 + $0x1e0] ss:$16 sps:$4 sm:$0xff]  }
 0x57b   :  { %4956 = vmatpush1.bf16.msra.mxu0 %v12764_v23  ;;  %v12786_v23 = vld [vmem:[#allocation7 + $0x1e4] ss:$16 sps:$4 sm:$0xff]   ;;  %14119 = vst [vmem:[#allocation74_spill] sm:$0xff] %v12788_v0 }
 0x57c   :  { %4957 = vmatprep.subr.bf16.mxu0 %v12774_v18  ;;  %14118 = vst [vmem:[#allocation71_spill] sm:$0xff] %v12786_v23  ;;  %v12805_v18 = vld [vmem:[#allocation7 + $0x1c8] ss:$16 sps:$4 sm:$0xff]  }
 0x57d   :  { %4997 = vmatpush1.bf16.msra.mxu1 %v12769_v47  ;;  %v12790_v47 = vld [vmem:[#allocation7 + $0x1ec] ss:$16 sps:$4 sm:$0xff]   ;;  %14125 = vst [vmem:[#allocation80_spill] sm:$0xff] %v12805_v18 }
 0x57e   :  { %4998 = vmatprep.subr.bf16.mxu1 %v12778_v8  ;;  %14120 = vst [vmem:[#allocation73_spill] sm:$0xff] %v12790_v47  ;;  %v12800_v8 = vld [vmem:[#allocation7 + $0x1c0] ss:$16 sps:$4 sm:$0xff]  }
 0x57f   :  { %4958 = vmatpush1.bf16.msra.mxu0 %v12776_v32  ;;  %v12798_v32 = vld [vmem:[#allocation7 + $0x1c4] ss:$16 sps:$4 sm:$0xff]   ;;  %14123 = vst [vmem:[#allocation78_spill] sm:$0xff] %v12800_v8 }
 0x580   :  { %4959 = vmatprep.subr.bf16.mxu0 %v12786_v23  ;;  %14122 = vst [vmem:[#allocation75_spill] sm:$0xff] %v12798_v32  ;;  %v12817_v23 = vld [vmem:[#allocation7 + $0x1a8] ss:$16 sps:$4 sm:$0xff]  }
 0x581   :  { %4999 = vmatpush1.bf16.msra.mxu1 %v12781_v38  ;;  %v12802_v38 = vld [vmem:[#allocation7 + $0x1cc] ss:$16 sps:$4 sm:$0xff]   ;;  %14129 = vst [vmem:[#allocation84_spill] sm:$0xff] %v12817_v23 }
 0x582   :  { %5000 = vmatprep.subr.bf16.mxu1 %v12790_v47  ;;  %14124 = vst [vmem:[#allocation77_spill] sm:$0xff] %v12802_v38  ;;  %v12812_v47 = vld [vmem:[#allocation7 + $0x1a0] ss:$16 sps:$4 sm:$0xff]  }
 0x583   :  { %4960 = vmatpush2.bf16.msra.mxu0 %v12788_v0  ;;  %v12810_v0 = vld [vmem:[#allocation7 + $0x1a4] ss:$16 sps:$4 sm:$0xff]   ;;  %14127 = vst [vmem:[#allocation82_spill] sm:$0xff] %v12812_v47 }
 0x584   :  { %4961 = vmatprep.subr.bf16.mxu0 %v12798_v32  ;;  %14126 = vst [vmem:[#allocation79_spill] sm:$0xff] %v12810_v0  ;;  %v12829_v32 = vld [vmem:[#allocation7 + $0x188] ss:$16 sps:$4 sm:$0xff]  }
 0x585   :  { %5001 = vmatpush2.bf16.msra.mxu1 %v12793_v44  ;;  %v12814_v44 = vld [vmem:[#allocation7 + $0x1ac] ss:$16 sps:$4 sm:$0xff]   ;;  %14133 = vst [vmem:[#allocation88_spill] sm:$0xff] %v12829_v32 }
 0x586   :  { %5002 = vmatprep.subr.bf16.mxu1 %v12802_v38  ;;  %14128 = vst [vmem:[#allocation81_spill] sm:$0xff] %v12814_v44  ;;  %v12824_v38 = vld [vmem:[#allocation7 + $0x180] ss:$16 sps:$4 sm:$0xff]  }
 0x587   :  { %4962 = vmatpush2.bf16.msra.mxu0 %v12800_v8  ;;  %v12822_v8 = vld [vmem:[#allocation7 + $0x184] ss:$16 sps:$4 sm:$0xff]   ;;  %14131 = vst [vmem:[#allocation86_spill] sm:$0xff] %v12824_v38 }
 0x588   :  { %4963 = vmatprep.subr.bf16.mxu0 %v12810_v0  ;;  %14130 = vst [vmem:[#allocation83_spill] sm:$0xff] %v12822_v8  ;;  %v12840_v0 = vld [vmem:[#allocation7 + $0x16c] ss:$16 sps:$4 sm:$0xff]  }
 0x589   :  { %5003 = vmatpush2.bf16.msra.mxu1 %v12805_v18  ;;  %v12826_v18 = vld [vmem:[#allocation7 + $0x18c] ss:$16 sps:$4 sm:$0xff]   ;;  %14137 = vst [vmem:[#allocation92_spill] sm:$0xff] %v12840_v0 }
 0x58a   :  { %5004 = vmatprep.subr.bf16.mxu1 %v12814_v44  ;;  %14132 = vst [vmem:[#allocation85_spill] sm:$0xff] %v12826_v18  ;;  %v12836_v44 = vld [vmem:[#allocation7 + $0x160] ss:$16 sps:$4 sm:$0xff]  }
 0x58b   :  { %4964 = vmatpush2.bf16.msra.mxu0 %v12812_v47  ;;  %v12834_v47 = vld [vmem:[#allocation7 + $0x164] ss:$16 sps:$4 sm:$0xff]   ;;  %14135 = vst [vmem:[#allocation91_spill] sm:$0xff] %v12836_v44 }
 0x58c   :  { %4965 = vmatprep.subr.bf16.mxu0 %v12822_v8  ;;  %14134 = vst [vmem:[#allocation87_spill] sm:$0xff] %v12834_v47  ;;  %v12855_v8 = vld [vmem:[#allocation7 + $0x124] ss:$16 sps:$4 sm:$0xff]  }
 0x58d   :  { %5005 = vmatpush2.bf16.msra.mxu1 %v12817_v23  ;;  %v12838_v23 = vld [vmem:[#allocation7 + $0x168] ss:$16 sps:$4 sm:$0xff]   ;;  %14142 = vst [vmem:[#allocation95_spill] sm:$0xff] %v12855_v8 }
 0x58e   :  { %5006 = vmatprep.subr.bf16.mxu1 %v12826_v18  ;;  %14136 = vst [vmem:[#allocation89_spill] sm:$0xff] %v12838_v23  ;;  %v12849_v18 = vld [vmem:[#allocation7 + $0x14c] ss:$16 sps:$4 sm:$0xff]  }
 0x58f   :  { %4966 = vmatpush2.bf16.msra.mxu0 %v12824_v38  ;;  %v12847_v38 = vld [vmem:[#allocation7 + $0x140] ss:$16 sps:$4 sm:$0xff]   ;;  %14140 = vst [vmem:[#allocation93_spill] sm:$0xff] %v12849_v18 }
 0x590   :  { %4967 = vmatprep.subr.bf16.mxu0 %v12834_v47  ;;  %14139 = vst [vmem:[#allocation94_spill] sm:$0xff] %v12847_v38  ;;  %v12858_v47 = vld [vmem:[#allocation7 + $0x12c] ss:$16 sps:$4 sm:$0xff]  }
 0x591   :  { %5007 = vmatpush2.bf16.msra.mxu1 %v12829_v32  ;;  %v12853_v32 = vld [vmem:[#allocation7 + $0x148] ss:$16 sps:$4 sm:$0xff]   ;;  %14143 = vst [vmem:[#allocation97_spill] sm:$0xff] %v12858_v47 }
 0x592   :  { %5008 = vmatprep.subr.bf16.mxu1 %v12840_v0  ;;  %14141 = vst [vmem:[#allocation96_spill] sm:$0xff] %v12853_v32  ;;  %v12865_v0 = vld [vmem:[#allocation7 + $0x128] ss:$16 sps:$4 sm:$0xff]  }
 0x593   :  { %4968 = vmatpush2.bf16.msra.mxu0 %v12836_v44  ;;  %v12861_v44 = vld [vmem:[#allocation7 + $0x120] ss:$16 sps:$4 sm:$0xff]   ;;  %14145 = vst [vmem:[#allocation100_spill] sm:$0xff] %v12865_v0 }
 0x594   :  { %4969 = vmatprep.subr.bf16.mxu0 %v12843_v1  ;;  %14144 = vst [vmem:[#allocation98_spill] sm:$0xff] %v12861_v44  ;;  %v12870_v1 = vld [vmem:[#allocation7 + $0x10c] ss:$16 sps:$4 sm:$0xff]  }
 0x595   :  { %5009 = vmatpush2.bf16.msra.mxu1 %v12838_v23  ;;  %v12867_v23 = vld [vmem:[#allocation7 + $0x104] ss:$16 sps:$4 sm:$0xff]   ;;  %14147 = vst [vmem:[#allocation101_spill] sm:$0xff] %v12870_v1 }
 0x596   :  { %5010 = vmatprep.subr.bf16.mxu1 %v12849_v18  ;;  %14146 = vst [vmem:[#allocation99_spill] sm:$0xff] %v12867_v23  ;;  %v12873_v18 = vld [vmem:[#allocation7 + $0x100] ss:$16 sps:$4 sm:$0xff]  }
 0x597   :  { %4970 = vmatpush2.bf16.msra.mxu0 %v12847_v38  ;;  %14148 = vst [vmem:[#allocation102_spill] sm:$0xff] %v12873_v18  ;;  %v12877_v38 = vld [vmem:[#allocation7 + $0x108] ss:$16 sps:$4 sm:$0xff]  }
 0x598   :  { %4971 = vmatprep.subr.bf16.mxu0 %v12855_v8  ;;  %14149 = vst [vmem:[#allocation103_spill] sm:$0xff] %v12877_v38 }
 0x599   :  { %5011 = vmatpush2.bf16.msra.mxu1 %v12853_v32 }
 0x59a   :  { %5012 = vmatprep.subr.bf16.mxu1 %v12858_v47 }
 0x59b   :  { %4972 = vmatpush2.bf16.msra.mxu0 %v12861_v44 }
 0x59c   :  { %4973 = vmatprep.subr.bf16.mxu0 %v12867_v23 }
 0x59d   :  { %5013 = vmatpush2.bf16.msra.mxu1 %v12865_v0 }
 0x59e   :  { %5014 = vmatprep.subr.bf16.mxu1 %v12870_v1 }
 0x59f   :  { %4974 = vmatpush2.bf16.msra.mxu0 %v12873_v18 }
 0x5a0   :  { %5438 = vmatprep.subr.bf16.mxu0 %v12482_v20 }
 0x5a1   :  { %5015 = vmatpush2.bf16.msra.mxu1 %v12877_v38 }
 0x5a2   :  { %5479 = vmatprep.subr.bf16.mxu1 %v12487_v40 }
 0x5e2   :  { %v3990_v47 = vpop.f32.mrf.mxu0  ;;  %v4031_v44 = vpop.f32.mrf.mxu1 }
 0x5e3   :  { %v3991_v32 = vadd.f32 %v3990_v47, %v11928_v33  ;;  %v4032_v14 = vadd.f32 %v4031_v44, %v11946_v50 }
 0x5e4   :  { %v3992_v8 = vpop.f32.mrf.mxu0  ;;  %v4033_v0 = vpop.f32.mrf.mxu1 }
 0x5e5   :  { %v9551_v35 = vmul.f32 -1.442695, %v3991_v32  ;;  %v3993_v23 = vadd.f32 %v3992_v8, %v11932_v34  ;;  %v4034_v20 = vadd.f32 %v4033_v0, %v11940_v48 }
 0x5e6   :  { %v3994_v17 = vpop.f32.mrf.mxu0  ;;  %v4035_v16 = vpop.f32.mrf.mxu1 }
 0x5e7   :  { %11306 = vpow2.f32 %v9551_v35  ;;  %v9552_v1 = vmul.f32 -1.442695, %v3993_v23  ;;  %v9553_v38 = vmul.f32 -1.442695, %v4034_v20 }
 0x5e8   :  { %v3995_v18 = vpop.f32.mrf.mxu0  ;;  %v4036_v15 = vpop.f32.mrf.mxu1 }
 0x5e9   :  { %11308 = vpow2.f32 %v9552_v1 }
 0x5ea   :  { %11310 = vpow2.f32 %v9553_v38 }
 0x5f4   :  { %v11307_v40 = vpop.eup %11306 }
 0x5f5   :  { %v4041_v13 = vadd.f32 1.0, %v11307_v40 }
 0x5f6   :  { %v11309_v47 = vpop.eup %11308 }
 0x5f7   :  { %11312 = vrcp.f32 %v4041_v13  ;;  %v4047_v32 = vadd.f32 1.0, %v11309_v47  ;;  %v11311_v17 = vpop.eup %11310 }
 0x5f8   :  { %11314 = vtanh.f32 %v4032_v14  ;;  %v4054_v8 = vadd.f32 1.0, %v11311_v17 }
 0x5f9   :  { %11316 = vrcp.f32 %v4047_v32 }
 0x5fa   :  { %11318 = vrcp.f32 %v4054_v8 }
 0x604   :  { %v11313_v16 = vpop.eup %11312 }
 0x605   :  { %v11315_v35 = vpop.eup %11314 }
 0x606   :  { %v11317_v23 = vpop.eup %11316  ;;  %v4058_v15 = vmul.f32 %v11315_v35, %v11313_v16 }
 0x607   :  { %v4057_v1 = vmul.f32 %v11317_v23, %v12493_v56  ;;  %v11319_v44 = vpop.eup %11318 }
 0x609   :  { %v12889_v0 = vadd.f32 %v4058_v15, %v4057_v1 }
 0x60b   :  { %11320 = vtanh.f32 %v12889_v0 }
 0x618   :  { %v11321_v18 = vpop.eup %11320 }
 0x619   :  { %v4061_v38 = vmul.f32 %v11321_v18, %v11319_v44 }
 0x61b   :  { %4063 = vst [vmem:[#allocation10 + $0x18] sm:$0xff] %v4061_v38  ;;  %v4558_v13 = vpack.c.bf16 %v4061_v38, %v4061_v38 }
 0x61d   :  { %4975 = vmatprep.mubr.bf16.mxu0 %v4558_v13  ;;  %5016 = vmatprep.mubr.bf16.mxu1 %v4558_v13 }
 0x622   :  { %v4485_v14 = vpop.f32.mrf.mxu0 }
 0x623   :  { %v4486_v20 = vadd.f32 %v4485_v14, %v11864_v11 }
 0x624   :  { %v4487_v40 = vpop.f32.mrf.mxu0  ;;  %v4526_v47 = vpop.f32.mrf.mxu1 }
 0x625   :  { %v9618_v32 = vmul.f32 -1.442695, %v4486_v20  ;;  %v4488_v56 = vadd.f32 %v4487_v40, %v11868_v12  ;;  %v4527_v44 = vadd.f32 %v4526_v47, %v11880_v26 }
 0x626   :  { %v4489_v17 = vpop.f32.mrf.mxu0  ;;  %v4528_v16 = vpop.f32.mrf.mxu1 }
 0x627   :  { %11322 = vpow2.f32 %v9618_v32  ;;  %v9619_v35 = vmul.f32 -1.442695, %v4488_v56  ;;  %v4529_v1 = vadd.f32 %v4528_v16, %v11876_v24 }
 0x628   :  { %v4490_v23 = vpop.f32.mrf.mxu0  ;;  %v4530_v8 = vpop.f32.mrf.mxu1 }
 0x629   :  { %11324 = vpow2.f32 %v9619_v35  ;;  %v9620_v18 = vmul.f32 -1.442695, %v4529_v1 }
 0x62a   :  { %v4531_v15 = vpop.f32.mrf.mxu1  ;;  %11326 = vtanh.f32 %v4527_v44 }
 0x62b   :  { %11328 = vpow2.f32 %v9620_v18  ;;  %v14186_v18 = vld [vmem:[#allocation51_spill] sm:$0xff] }
 0x634   :  { %v11323_v38 = vpop.eup %11322 }
 0x635   :  { %v4536_v13 = vadd.f32 1.0, %v11323_v38  ;;  %v14187_v38 = vld [vmem:[#allocation52_spill] sm:$0xff] }
 0x636   :  { %v11325_v14 = vpop.eup %11324 }
 0x637   :  { %11330 = vrcp.f32 %v4536_v13  ;;  %v4542_v20 = vadd.f32 1.0, %v11325_v14  ;;  %v11327_v40 = vpop.eup %11326  ;;  %v14188_v13 = vld [vmem:[#allocation53_spill] sm:$0xff]  ;;  %v14189_v14 = vld [vmem:[#allocation54_spill] sm:$0xff] }
 0x638   :  { %v11329_v32 = vpop.eup %11328 }
 0x639   :  { %11332 = vrcp.f32 %v4542_v20  ;;  %v4549_v23 = vadd.f32 1.0, %v11329_v32  ;;  %v14190_v20 = vld [vmem:[#allocation55_spill] sm:$0xff]  ;;  %v14192_v32 = vld [vmem:[#allocation57_spill] sm:$0xff] }
 0x63b   :  { %11334 = vrcp.f32 %v4549_v23  ;;  %v14195_v23 = vld [vmem:[#allocation60_spill] sm:$0xff] }
 0x644   :  { %v11331_v56 = vpop.eup %11330 }
 0x645   :  { %v4553_v8 = vmul.f32 %v11331_v56, %v11327_v40  ;;  %v14191_v40 = vld [vmem:[#allocation56_spill] sm:$0xff]  ;;  %v14193_v56 = vld [vmem:[#allocation58_spill] sm:$0xff] }
 0x646   :  { %v11333_v17 = vpop.eup %11332 }
 0x647   :  { %v4552_v35 = vmul.f32 %v11333_v17, %v12501_v31  ;;  %v14150_v31 = vld [vmem:[#allocation15_spill] sm:$0xff] }
 0x648   :  { %v11335_v47 = vpop.eup %11334  ;;  %v14194_v17 = vld [vmem:[#allocation59_spill] sm:$0xff] }
 0x649   :  { %v12897_v16 = vadd.f32 %v4553_v8, %v4552_v35  ;;  %v14196_v35 = vld [vmem:[#allocation61_spill] sm:$0xff]  ;;  %v14197_v8 = vld [vmem:[#allocation62_spill] sm:$0xff] }
 0x64b   :  { %11336 = vtanh.f32 %v12897_v16 }
 0x658   :  { %v11337_v15 = vpop.eup %11336 }
 0x659   :  { %v4556_v1 = vmul.f32 %v11337_v15, %v11335_v47  ;;  %v14198_v47 = vld [vmem:[#allocation63_spill] sm:$0xff]  ;;  %v14199_v15 = vld [vmem:[#allocation64_spill] sm:$0xff] }
 0x65b   :  { %v4557_v44 = vpack.c.bf16 %v4556_v1, %v4556_v1  ;;  %v14200_v1 = vld [vmem:[#allocation65_spill] sm:$0xff] }
 0x65d   :  { %4976 = vmatmul.mubr.bf16.vlgmr.msra.gmra.mxu0 %v4557_v44  ;;  %5017 = vmatmul.mubr.bf16.vlgmr.msra.gmra.mxu1 %v4557_v44 }
 0x65e   :  { %5439 = vmatpush1.bf16.msra.mxu0 %v12504_v28  ;;  %5470 = vmatprep.mubr.bf16.mxu0 %v4557_v44  ;;  %v14151_v28 = vld [vmem:[#allocation16_spill] sm:$0xff] }
 0x65f   :  { %5511 = vmatprep.mubr.bf16.mxu1 %v4557_v44  ;;  %5440 = vmatprep.subr.bf16.mxu0 %v12506_v41  ;;  %v14152_v41 = vld [vmem:[#allocation17_spill] sm:$0xff]  ;;  %v14201_v44 = vld [vmem:[#allocation66_spill] sm:$0xff] }
 0x660   :  { %5480 = vmatpush1.bf16.msra.mxu1 %v12508_v29  ;;  %v14153_v29 = vld [vmem:[#allocation18_spill] sm:$0xff] }
 0x661   :  { %5481 = vmatprep.subr.bf16.mxu1 %v12510_v25  ;;  %v14154_v25 = vld [vmem:[#allocation19_spill] sm:$0xff] }
 0x662   :  { %5441 = vmatpush1.bf16.msra.mxu0 %v12513_v27  ;;  %v14155_v27 = vld [vmem:[#allocation20_spill] sm:$0xff] }
 0x663   :  { %5442 = vmatprep.subr.bf16.mxu0 %v12516_v42  ;;  %v14156_v42 = vld [vmem:[#allocation21_spill] sm:$0xff] }
 0x664   :  { %5482 = vmatpush1.bf16.msra.mxu1 %v12519_v36  ;;  %v14157_v36 = vld [vmem:[#allocation22_spill] sm:$0xff] }
 0x665   :  { %5483 = vmatprep.subr.bf16.mxu1 %v12522_v39  ;;  %v14158_v39 = vld [vmem:[#allocation23_spill] sm:$0xff] }
 0x666   :  { %5443 = vmatpush1.bf16.msra.mxu0 %v12525_v43  ;;  %v14159_v43 = vld [vmem:[#allocation24_spill] sm:$0xff] }
 0x667   :  { %5444 = vmatprep.subr.bf16.mxu0 %v12528_v45  ;;  %v14160_v45 = vld [vmem:[#allocation25_spill] sm:$0xff] }
 0x668   :  { %5484 = vmatpush1.bf16.msra.mxu1 %v12531_v46  ;;  %v14161_v46 = vld [vmem:[#allocation26_spill] sm:$0xff] }
 0x669   :  { %5485 = vmatprep.subr.bf16.mxu1 %v12534_v49  ;;  %v14162_v49 = vld [vmem:[#allocation27_spill] sm:$0xff] }
 0x66a   :  { %5445 = vmatpush1.bf16.msra.mxu0 %v12537_v21  ;;  %v14163_v21 = vld [vmem:[#allocation28_spill] sm:$0xff] }
 0x66b   :  { %5446 = vmatprep.subr.bf16.mxu0 %v12540_v51  ;;  %v14164_v51 = vld [vmem:[#allocation29_spill] sm:$0xff] }
 0x66c   :  { %5486 = vmatpush1.bf16.msra.mxu1 %v12543_v52  ;;  %v14165_v52 = vld [vmem:[#allocation30_spill] sm:$0xff] }
 0x66d   :  { %5487 = vmatprep.subr.bf16.mxu1 %v12546_v53  ;;  %v14166_v53 = vld [vmem:[#allocation31_spill] sm:$0xff] }
 0x66e   :  { %5447 = vmatpush1.bf16.msra.mxu0 %v12549_v54  ;;  %v14167_v54 = vld [vmem:[#allocation32_spill] sm:$0xff] }
 0x66f   :  { %5448 = vmatprep.subr.bf16.mxu0 %v12552_v55  ;;  %v14168_v55 = vld [vmem:[#allocation33_spill] sm:$0xff] }
 0x670   :  { %5488 = vmatpush1.bf16.msra.mxu1 %v12555_v57  ;;  %v14169_v57 = vld [vmem:[#allocation34_spill] sm:$0xff] }
 0x671   :  { %5489 = vmatprep.subr.bf16.mxu1 %v12558_v58  ;;  %v5052_v58 = vld [vmem:[#allocation2 + $0x28] sm:$0xff] }
 0x672   :  { %5449 = vmatpush1.bf16.msra.mxu0 %v12561_v59  ;;  %v14170_v59 = vld [vmem:[#allocation35_spill] sm:$0xff] }
 0x673   :  { %5450 = vmatprep.subr.bf16.mxu0 %v12564_v60  ;;  %v14171_v60 = vld [vmem:[#allocation36_spill] sm:$0xff] }
 0x674   :  { %5490 = vmatpush1.bf16.msra.mxu1 %v12567_v61  ;;  %v5053_v61 = vpack.c.bf16 %v5052_v58, %v5052_v58  ;;  %v14222_v58 = vld [vmem:[#allocation87_spill] sm:$0xff] }
 0x675   :  { %5491 = vmatprep.subr.bf16.mxu1 %v12570_v62  ;;  %v14172_v62 = vld [vmem:[#allocation37_spill] sm:$0xff] }
 0x676   :  { %5451 = vmatpush1.bf16.msra.mxu0 %v12573_v63  ;;  %v14173_v63 = vld [vmem:[#allocation38_spill] sm:$0xff] }
 0x677   :  { %5452 = vmatprep.subr.bf16.mxu0 %v12576_v2  ;;  %v14174_v2 = vld [vmem:[#allocation43_spill] sm:$0xff] }
 0x678   :  { %5492 = vmatpush1.bf16.msra.mxu1 %v12579_v3  ;;  %v14175_v3 = vld [vmem:[#allocation41_spill] sm:$0xff] }
 0x679   :  { %5493 = vmatprep.subr.bf16.mxu1 %v12582_v37  ;;  %v14176_v37 = vld [vmem:[#allocation45_spill] sm:$0xff] }
 0x67a   :  { %5453 = vmatpush1.bf16.msra.mxu0 %v12585_v7  ;;  %v14177_v7 = vld [vmem:[#allocation39_spill] sm:$0xff] }
 0x67b   :  { %5454 = vmatprep.subr.bf16.mxu0 %v12588_v9  ;;  %v14178_v9 = vld [vmem:[#allocation47_spill] sm:$0xff] }
 0x67c   :  { %5494 = vmatpush1.bf16.msra.mxu1 %v12591_v10  ;;  %v14179_v10 = vld [vmem:[#allocation40_spill] sm:$0xff] }
 0x67d   :  { %5495 = vmatprep.subr.bf16.mxu1 %v12594_v19  ;;  %v14180_v19 = vld [vmem:[#allocation48_spill] sm:$0xff] }
 0x67e   :  { %5455 = vmatpush2.bf16.msra.mxu0 %v12597_v22  ;;  %v14181_v22 = vld [vmem:[#allocation42_spill] sm:$0xff] }
 0x67f   :  { %5456 = vmatprep.subr.bf16.mxu0 %v12600_v30  ;;  %v14182_v30 = vld [vmem:[#allocation46_spill] sm:$0xff] }
 0x680   :  { %5496 = vmatpush2.bf16.msra.mxu1 %v12603_v4  ;;  %v14183_v4 = vld [vmem:[#allocation44_spill] sm:$0xff] }
 0x681   :  { %5497 = vmatprep.subr.bf16.mxu1 %v12606_v5  ;;  %v14184_v5 = vld [vmem:[#allocation49_spill] sm:$0xff] }
 0x682   :  { %5457 = vmatpush2.bf16.msra.mxu0 %v12609_v6  ;;  %v14185_v6 = vld [vmem:[#allocation50_spill] sm:$0xff] }
 0x683   :  { %5458 = vmatprep.subr.bf16.mxu0 %v14150_v31  ;;  %v14202_v31 = vld [vmem:[#allocation67_spill] sm:$0xff] }
 0x684   :  { %5498 = vmatpush2.bf16.msra.mxu1 %v14151_v28  ;;  %v14203_v28 = vld [vmem:[#allocation68_spill] sm:$0xff] }
 0x685   :  { %5499 = vmatprep.subr.bf16.mxu1 %v14152_v41  ;;  %v14204_v41 = vld [vmem:[#allocation69_spill] sm:$0xff] }
 0x686   :  { %5459 = vmatpush2.bf16.msra.mxu0 %v14153_v29  ;;  %v14205_v29 = vld [vmem:[#allocation70_spill] sm:$0xff] }
 0x687   :  { %5460 = vmatprep.subr.bf16.mxu0 %v14154_v25  ;;  %v14206_v25 = vld [vmem:[#allocation71_spill] sm:$0xff] }
 0x688   :  { %5500 = vmatpush2.bf16.msra.mxu1 %v14155_v27  ;;  %v14207_v27 = vld [vmem:[#allocation72_spill] sm:$0xff] }
 0x689   :  { %5501 = vmatprep.subr.bf16.mxu1 %v14156_v42  ;;  %v14208_v42 = vld [vmem:[#allocation73_spill] sm:$0xff] }
 0x68a   :  { %5461 = vmatpush2.bf16.msra.mxu0 %v14157_v36  ;;  %v14209_v36 = vld [vmem:[#allocation74_spill] sm:$0xff] }
 0x68b   :  { %5462 = vmatprep.subr.bf16.mxu0 %v14158_v39  ;;  %v14210_v39 = vld [vmem:[#allocation75_spill] sm:$0xff] }
 0x68c   :  { %5502 = vmatpush2.bf16.msra.mxu1 %v14159_v43  ;;  %v14211_v43 = vld [vmem:[#allocation76_spill] sm:$0xff] }
 0x68d   :  { %5503 = vmatprep.subr.bf16.mxu1 %v14160_v45  ;;  %v14212_v45 = vld [vmem:[#allocation77_spill] sm:$0xff] }
 0x68e   :  { %5463 = vmatpush2.bf16.msra.mxu0 %v14161_v46  ;;  %v14213_v46 = vld [vmem:[#allocation78_spill] sm:$0xff] }
 0x68f   :  { %5464 = vmatprep.subr.bf16.mxu0 %v14162_v49  ;;  %v14214_v49 = vld [vmem:[#allocation79_spill] sm:$0xff] }
 0x690   :  { %5504 = vmatpush2.bf16.msra.mxu1 %v14163_v21  ;;  %v14215_v21 = vld [vmem:[#allocation80_spill] sm:$0xff] }
 0x691   :  { %5505 = vmatprep.subr.bf16.mxu1 %v14164_v51  ;;  %v14216_v51 = vld [vmem:[#allocation81_spill] sm:$0xff] }
 0x692   :  { %5465 = vmatpush2.bf16.msra.mxu0 %v14165_v52  ;;  %v14217_v52 = vld [vmem:[#allocation82_spill] sm:$0xff] }
 0x693   :  { %5466 = vmatprep.subr.bf16.mxu0 %v14166_v53  ;;  %v14218_v53 = vld [vmem:[#allocation83_spill] sm:$0xff] }
 0x694   :  { %5506 = vmatpush2.bf16.msra.mxu1 %v14167_v54  ;;  %v14219_v54 = vld [vmem:[#allocation84_spill] sm:$0xff] }
 0x695   :  { %5507 = vmatprep.subr.bf16.mxu1 %v14168_v55  ;;  %v14220_v55 = vld [vmem:[#allocation85_spill] sm:$0xff] }
 0x696   :  { %5467 = vmatpush2.bf16.msra.mxu0 %v14169_v57  ;;  %v14221_v57 = vld [vmem:[#allocation86_spill] sm:$0xff] }
 0x697   :  { %5468 = vmatprep.subr.bf16.mxu0 %v14170_v59  ;;  %v14223_v59 = vld [vmem:[#allocation88_spill] sm:$0xff] }
 0x698   :  { %5508 = vmatpush2.bf16.msra.mxu1 %v14171_v60  ;;  %v14224_v60 = vld [vmem:[#allocation92_spill] sm:$0xff] }
 0x699   :  { %5509 = vmatprep.subr.bf16.mxu1 %v14172_v62  ;;  %v14226_v62 = vld [vmem:[#allocation90_spill] sm:$0xff] }
 0x69a   :  { %5469 = vmatpush2.bf16.msra.mxu0 %v14173_v63  ;;  %v14227_v63 = vld [vmem:[#allocation89_spill] sm:$0xff] }
 0x69b   :  { %5930 = vmatprep.subr.bf16.mxu0 %v14174_v2  ;;  %v14228_v2 = vld [vmem:[#allocation93_spill] sm:$0xff] }
 0x69c   :  { %5510 = vmatpush2.bf16.msra.mxu1 %v14175_v3  ;;  %v14229_v3 = vld [vmem:[#allocation94_spill] sm:$0xff] }
 0x69d   :  { %5471 = vmatmul.mubr.bf16.vlgmr.msra.gmra.mxu0 %v5053_v61  ;;  %5971 = vmatprep.subr.bf16.mxu1 %v14176_v37  ;;  %v14230_v37 = vld [vmem:[#allocation95_spill] sm:$0xff] }
 0x69e   :  { %5931 = vmatpush1.bf16.msra.mxu0 %v14177_v7  ;;  %v14231_v7 = vld [vmem:[#allocation96_spill] sm:$0xff] }
 0x69f   :  { %5512 = vmatmul.mubr.bf16.vlgmr.msra.gmra.mxu1 %v5053_v61  ;;  %5932 = vmatprep.subr.bf16.mxu0 %v14178_v9  ;;  %v14225_v61 = vld [vmem:[#allocation91_spill] sm:$0xff]  ;;  %v14232_v9 = vld [vmem:[#allocation97_spill] sm:$0xff] }
 0x6a0   :  { %5972 = vmatpush1.bf16.msra.mxu1 %v14179_v10  ;;  %v14233_v10 = vld [vmem:[#allocation98_spill] sm:$0xff] }
 0x6a1   :  { %5973 = vmatprep.subr.bf16.mxu1 %v14180_v19  ;;  %v14234_v19 = vld [vmem:[#allocation99_spill] sm:$0xff] }
 0x6a2   :  { %5933 = vmatpush1.bf16.msra.mxu0 %v14181_v22  ;;  %v14235_v22 = vld [vmem:[#allocation100_spill] sm:$0xff] }
 0x6a3   :  { %5934 = vmatprep.subr.bf16.mxu0 %v14182_v30  ;;  %v14236_v30 = vld [vmem:[#allocation101_spill] sm:$0xff] }
 0x6a4   :  { %5974 = vmatpush1.bf16.msra.mxu1 %v14183_v4  ;;  %v14237_v4 = vld [vmem:[#allocation102_spill] sm:$0xff] }
 0x6a5   :  { %5975 = vmatprep.subr.bf16.mxu1 %v14184_v5  ;;  %v14238_v5 = vld [vmem:[#allocation103_spill] sm:$0xff] }
 0x6a6   :  { %5935 = vmatpush1.bf16.msra.mxu0 %v14185_v6  ;;  %v13026_v6 = vld [vmem:[#allocation5 + $0xe4] ss:$16 sps:$4 sm:$0xff]  }
 0x6a7   :  { %5936 = vmatprep.subr.bf16.mxu0 %v14186_v18 }
 0x6a8   :  { %5976 = vmatpush1.bf16.msra.mxu1 %v14187_v38 }
 0x6a9   :  { %5977 = vmatprep.subr.bf16.mxu1 %v14188_v13 }
 0x6aa   :  { %5937 = vmatpush1.bf16.msra.mxu0 %v14189_v14 }
 0x6ab   :  { %5938 = vmatprep.subr.bf16.mxu0 %v14190_v20 }
 0x6ac   :  { %5978 = vmatpush1.bf16.msra.mxu1 %v14191_v40 }
 0x6ad   :  { %5979 = vmatprep.subr.bf16.mxu1 %v14192_v32 }
 0x6ae   :  { %5939 = vmatpush1.bf16.msra.mxu0 %v14193_v56 }
 0x6af   :  { %5940 = vmatprep.subr.bf16.mxu0 %v14194_v17 }
 0x6b0   :  { %5980 = vmatpush1.bf16.msra.mxu1 %v14195_v23 }
 0x6b1   :  { %5981 = vmatprep.subr.bf16.mxu1 %v14196_v35 }
 0x6b2   :  { %5941 = vmatpush1.bf16.msra.mxu0 %v14197_v8 }
 0x6b3   :  { %5942 = vmatprep.subr.bf16.mxu0 %v14198_v47  ;;  %v13031_v47 = vld [vmem:[#allocation5 + $0xec] ss:$16 sps:$4 sm:$0xff]  }
 0x6b4   :  { %5982 = vmatpush1.bf16.msra.mxu1 %v14199_v15 }
 0x6b5   :  { %5983 = vmatprep.subr.bf16.mxu1 %v14200_v1 }
 0x6b6   :  { %5943 = vmatpush1.bf16.msra.mxu0 %v14201_v44 }
 0x6b7   :  { %5944 = vmatprep.subr.bf16.mxu0 %v14202_v31 }
 0x6b8   :  { %5984 = vmatpush1.bf16.msra.mxu1 %v14203_v28 }
 0x6b9   :  { %5985 = vmatprep.subr.bf16.mxu1 %v14204_v41 }
 0x6ba   :  { %5945 = vmatpush1.bf16.msra.mxu0 %v14205_v29 }
 0x6bb   :  { %5946 = vmatprep.subr.bf16.mxu0 %v14206_v25 }
 0x6bc   :  { %5986 = vmatpush1.bf16.msra.mxu1 %v14207_v27 }
 0x6bd   :  { %5987 = vmatprep.subr.bf16.mxu1 %v14208_v42 }
 0x6be   :  { %5947 = vmatpush2.bf16.msra.mxu0 %v14209_v36 }
 0x6bf   :  { %5948 = vmatprep.subr.bf16.mxu0 %v14210_v39 }
 0x6c0   :  { %5988 = vmatpush2.bf16.msra.mxu1 %v14211_v43 }
 0x6c1   :  { %5989 = vmatprep.subr.bf16.mxu1 %v14212_v45 }
 0x6c2   :  { %5949 = vmatpush2.bf16.msra.mxu0 %v14213_v46 }
 0x6c3   :  { %5950 = vmatprep.subr.bf16.mxu0 %v14214_v49 }
 0x6c4   :  { %5990 = vmatpush2.bf16.msra.mxu1 %v14215_v21 }
 0x6c5   :  { %5991 = vmatprep.subr.bf16.mxu1 %v14216_v51 }
 0x6c6   :  { %5951 = vmatpush2.bf16.msra.mxu0 %v14217_v52 }
 0x6c7   :  { %5952 = vmatprep.subr.bf16.mxu0 %v14218_v53 }
 0x6c8   :  { %5992 = vmatpush2.bf16.msra.mxu1 %v14219_v54 }
 0x6c9   :  { %5993 = vmatprep.subr.bf16.mxu1 %v14220_v55 }
 0x6ca   :  { %5953 = vmatpush2.bf16.msra.mxu0 %v14221_v57 }
 0x6cb   :  { %5954 = vmatprep.subr.bf16.mxu0 %v14222_v58 }
 0x6cc   :  { %5994 = vmatpush2.bf16.msra.mxu1 %v14223_v59 }
 0x6cd   :  { %5995 = vmatprep.subr.bf16.mxu1 %v14224_v60 }
 0x6ce   :  { %5955 = vmatpush2.bf16.msra.mxu0 %v14225_v61 }
 0x6cf   :  { %5956 = vmatprep.subr.bf16.mxu0 %v14226_v62 }
 0x6d0   :  { %5996 = vmatpush2.bf16.msra.mxu1 %v14227_v63 }
 0x6d1   :  { %5997 = vmatprep.subr.bf16.mxu1 %v14228_v2 }
 0x6d2   :  { %5957 = vmatpush2.bf16.msra.mxu0 %v14229_v3 }
 0x6d3   :  { %5958 = vmatprep.subr.bf16.mxu0 %v14230_v37 }
 0x6d4   :  { %5998 = vmatpush2.bf16.msra.mxu1 %v14231_v7 }
 0x6d5   :  { %5999 = vmatprep.subr.bf16.mxu1 %v14232_v9 }
 0x6d6   :  { %5959 = vmatpush2.bf16.msra.mxu0 %v14233_v10 }
 0x6d7   :  { %5960 = vmatprep.subr.bf16.mxu0 %v14234_v19 }
 0x6d8   :  { %6000 = vmatpush2.bf16.msra.mxu1 %v14235_v22 }
 0x6d9   :  { %6001 = vmatprep.subr.bf16.mxu1 %v14236_v30 }
 0x6da   :  { %5961 = vmatpush2.bf16.msra.mxu0 %v14237_v4 }
 0x6db   :  { %6425 = vmatprep.subr.bf16.mxu0 %v13026_v6 }
 0x6dc   :  { %6002 = vmatpush2.bf16.msra.mxu1 %v14238_v5 }
 0x6dd   :  { %6466 = vmatprep.subr.bf16.mxu1 %v13031_v47 }
 0x71d   :  { %v4977_v18 = vpop.f32.mrf.mxu0  ;;  %v5018_v38 = vpop.f32.mrf.mxu1 }
 0x71e   :  { %v4978_v13 = vadd.f32 %v4977_v18, %v11928_v33  ;;  %v5019_v31 = vadd.f32 %v5018_v38, %v11946_v50 }
 0x71f   :  { %v4979_v14 = vpop.f32.mrf.mxu0  ;;  %v5020_v20 = vpop.f32.mrf.mxu1 }
 0x720   :  { %v9685_v40 = vmul.f32 -1.442695, %v4978_v13  ;;  %v4980_v32 = vadd.f32 %v4979_v14, %v11932_v34  ;;  %v5021_v15 = vadd.f32 %v5020_v20, %v11940_v48 }
 0x721   :  { %v4981_v56 = vpop.f32.mrf.mxu0  ;;  %v5022_v17 = vpop.f32.mrf.mxu1 }
 0x722   :  { %11338 = vpow2.f32 %v9685_v40  ;;  %v9686_v23 = vmul.f32 -1.442695, %v4980_v32  ;;  %v9687_v1 = vmul.f32 -1.442695, %v5021_v15  ;;  %v13048_v17 = vld [vmem:[#allocation5 + $0xe0] ss:$16 sps:$4 sm:$0xff]  }
 0x723   :  { %v4982_v35 = vpop.f32.mrf.mxu0  ;;  %v5023_v8 = vpop.f32.mrf.mxu1  ;;  %v13054_v15 = vld [vmem:[#allocation5 + $0xcc] ss:$16 sps:$4 sm:$0xff]  }
 0x724   :  { %11340 = vpow2.f32 %v9686_v23  ;;  %v13050_v35 = vld [vmem:[#allocation5 + $0xc4] ss:$16 sps:$4 sm:$0xff]   ;;  %v13052_v8 = vld [vmem:[#allocation5 + $0xe8] ss:$16 sps:$4 sm:$0xff]  }
 0x725   :  { %11342 = vpow2.f32 %v9687_v1  ;;  %v13060_v1 = vld [vmem:[#allocation5 + $0xa4] ss:$16 sps:$4 sm:$0xff]  }
 0x72f   :  { %v11339_v44 = vpop.eup %11338 }
 0x730   :  { %v5028_v28 = vadd.f32 1.0, %v11339_v44  ;;  %v13063_v44 = vld [vmem:[#allocation5 + $0xc8] ss:$16 sps:$4 sm:$0xff]  }
 0x731   :  { %v11341_v41 = vpop.eup %11340 }
 0x732   :  { %11344 = vrcp.f32 %v5028_v28  ;;  %v5034_v29 = vadd.f32 1.0, %v11341_v41  ;;  %v11343_v25 = vpop.eup %11342  ;;  %v13069_v28 = vld [vmem:[#allocation5 + $0xa0] ss:$16 sps:$4 sm:$0xff]   ;;  %v13072_v41 = vld [vmem:[#allocation5 + $0x84] ss:$16 sps:$4 sm:$0xff]  }
 0x733   :  { %11346 = vtanh.f32 %v5019_v31  ;;  %v5041_v39 = vadd.f32 1.0, %v11343_v25  ;;  %v13066_v31 = vld [vmem:[#allocation5 + $0xac] ss:$16 sps:$4 sm:$0xff]  }
 0x734   :  { %11348 = vrcp.f32 %v5034_v29  ;;  %v13075_v29 = vld [vmem:[#allocation5 + $0xa8] ss:$16 sps:$4 sm:$0xff]   ;;  %v13078_v25 = vld [vmem:[#allocation5 + $0x8c] ss:$16 sps:$4 sm:$0xff]  }
 0x735   :  { %11350 = vrcp.f32 %v5041_v39  ;;  %v13090_v39 = vld [vmem:[#allocation5 + $0x6c] ss:$16 sps:$4 sm:$0xff]  }
 0x73f   :  { %v11345_v27 = vpop.eup %11344 }
 0x740   :  { %v11347_v42 = vpop.eup %11346 }
 0x741   :  { %v11349_v36 = vpop.eup %11348  ;;  %v5045_v43 = vmul.f32 %v11347_v42, %v11345_v27  ;;  %v13081_v27 = vld [vmem:[#allocation5 + $0x80] ss:$16 sps:$4 sm:$0xff]   ;;  %v13084_v42 = vld [vmem:[#allocation5 + $0x64] ss:$16 sps:$4 sm:$0xff]  }
 0x742   :  { %v5044_v45 = vmul.f32 %v11349_v36, %v12889_v0  ;;  %v11351_v49 = vpop.eup %11350  ;;  %v13087_v36 = vld [vmem:[#allocation5 + $0x88] ss:$16 sps:$4 sm:$0xff]  }
 0x744   :  { %v13037_v46 = vadd.f32 %v5045_v43, %v5044_v45  ;;  %v13093_v43 = vld [vmem:[#allocation5 + $0x60] ss:$16 sps:$4 sm:$0xff]   ;;  %v13096_v45 = vld [vmem:[#allocation5 + $0x44] ss:$16 sps:$4 sm:$0xff]  }
 0x746   :  { %11352 = vtanh.f32 %v13037_v46 }
 0x753   :  { %v11353_v21 = vpop.eup %11352 }
 0x754   :  { %v5048_v51 = vmul.f32 %v11353_v21, %v11351_v49  ;;  %v13099_v49 = vld [vmem:[#allocation5 + $0x68] ss:$16 sps:$4 sm:$0xff]   ;;  %v13102_v21 = vld [vmem:[#allocation5 + $0x4c] ss:$16 sps:$4 sm:$0xff]  }
 0x756   :  { %5050 = vst [vmem:[#allocation10 + $0x20] sm:$0xff] %v5048_v51  ;;  %v5545_v52 = vpack.c.bf16 %v5048_v51, %v5048_v51  ;;  %v13105_v51 = vld [vmem:[#allocation5 + $0x40] ss:$16 sps:$4 sm:$0xff]  }
 0x758   :  { %5962 = vmatprep.mubr.bf16.mxu0 %v5545_v52  ;;  %6003 = vmatprep.mubr.bf16.mxu1 %v5545_v52  ;;  %v13108_v52 = vld [vmem:[#allocation5 + $0x24] ss:$16 sps:$4 sm:$0xff]  }
 0x75d   :  { %v5472_v53 = vpop.f32.mrf.mxu0 }
 0x75e   :  { %v5473_v54 = vadd.f32 %v5472_v53, %v11864_v11  ;;  %v13111_v53 = vld [vmem:[#allocation5 + $0x48] ss:$16 sps:$4 sm:$0xff]  }
 0x75f   :  { %v5474_v55 = vpop.f32.mrf.mxu0  ;;  %v5513_v57 = vpop.f32.mrf.mxu1 }
 0x760   :  { %v9752_v58 = vmul.f32 -1.442695, %v5473_v54  ;;  %v5475_v0 = vadd.f32 %v5474_v55, %v11868_v12  ;;  %v5514_v37 = vadd.f32 %v5513_v57, %v11880_v26  ;;  %v13114_v54 = vld [vmem:[#allocation5 + $0x2c] ss:$16 sps:$4 sm:$0xff]   ;;  %v13117_v55 = vld [vmem:[#allocation5 + $0x20] ss:$16 sps:$4 sm:$0xff]  }
 0x761   :  { %v5476_v59 = vpop.f32.mrf.mxu0  ;;  %v5515_v60 = vpop.f32.mrf.mxu1  ;;  %v13120_v57 = vld [vmem:[#allocation5 + $0x4] ss:$16 sps:$4 sm:$0xff]  }
 0x762   :  { %11354 = vpow2.f32 %v9752_v58  ;;  %v9753_v61 = vmul.f32 -1.442695, %v5475_v0  ;;  %v5516_v3 = vadd.f32 %v5515_v60, %v11876_v24  ;;  %v13123_v58 = vld [vmem:[#allocation5 + $0x28] ss:$16 sps:$4 sm:$0xff]   ;;  %v13126_v0 = vld [vmem:[#allocation5 + $0xc] ss:$16 sps:$4 sm:$0xff]  }
 0x763   :  { %v5477_v62 = vpop.f32.mrf.mxu0  ;;  %v5517_v63 = vpop.f32.mrf.mxu1  ;;  %v13129_v59 = vld [vmem:[#allocation5] ss:$16 sps:$4 sm:$0xff]   ;;  %v13132_v60 = vld [vmem:[#allocation5 + $0x1e4] ss:$16 sps:$4 sm:$0xff]  }
 0x764   :  { %11356 = vpow2.f32 %v9753_v61  ;;  %v9754_v7 = vmul.f32 -1.442695, %v5516_v3  ;;  %v13135_v61 = vld [vmem:[#allocation5 + $0x8] ss:$16 sps:$4 sm:$0xff]   ;;  %v13138_v62 = vld [vmem:[#allocation5 + $0x1ec] ss:$16 sps:$4 sm:$0xff]  }
 0x765   :  { %v5518_v2 = vpop.f32.mrf.mxu1  ;;  %11358 = vtanh.f32 %v5514_v37  ;;  %v13141_v63 = vld [vmem:[#allocation5 + $0x1e0] ss:$16 sps:$4 sm:$0xff]   ;;  %v13147_v3 = vld [vmem:[#allocation5 + $0x1e8] ss:$16 sps:$4 sm:$0xff]   ;;  %v13150_v37 = vld [vmem:[#allocation5 + $0x1cc] ss:$16 sps:$4 sm:$0xff]  }
 0x766   :  { %11360 = vpow2.f32 %v9754_v7  ;;  %v13144_v2 = vld [vmem:[#allocation5 + $0x1c4] ss:$16 sps:$4 sm:$0xff]   ;;  %v13153_v7 = vld [vmem:[#allocation5 + $0x1c0] ss:$16 sps:$4 sm:$0xff]  }
 0x76f   :  { %v11355_v9 = vpop.eup %11354 }
 0x770   :  { %v5523_v10 = vadd.f32 1.0, %v11355_v9  ;;  %v13156_v9 = vld [vmem:[#allocation5 + $0x1a4] ss:$16 sps:$4 sm:$0xff]  }
 0x771   :  { %v11357_v19 = vpop.eup %11356  ;;  %14239 = vst [vmem:[#allocation15_spill] sm:$0xff] %v13156_v9 }
 0x772   :  { %11362 = vrcp.f32 %v5523_v10  ;;  %v5529_v22 = vadd.f32 1.0, %v11357_v19  ;;  %v11359_v30 = vpop.eup %11358  ;;  %v13159_v10 = vld [vmem:[#allocation5 + $0x1c8] ss:$16 sps:$4 sm:$0xff]   ;;  %v13162_v19 = vld [vmem:[#allocation5 + $0x1ac] ss:$16 sps:$4 sm:$0xff]  }
 0x773   :  { %v11361_v4 = vpop.eup %11360  ;;  %14240 = vst [vmem:[#allocation16_spill] sm:$0xff] %v13159_v10  ;;  %14241 = vst [vmem:[#allocation17_spill] sm:$0xff] %v13162_v19 }
 0x774   :  { %11364 = vrcp.f32 %v5529_v22  ;;  %v5536_v38 = vadd.f32 1.0, %v11361_v4  ;;  %v13165_v22 = vld [vmem:[#allocation5 + $0x1a0] ss:$16 sps:$4 sm:$0xff]   ;;  %v13171_v4 = vld [vmem:[#allocation5 + $0x1a8] ss:$16 sps:$4 sm:$0xff]  }
 0x775   :  { %14242 = vst [vmem:[#allocation18_spill] sm:$0xff] %v13165_v22  ;;  %14244 = vst [vmem:[#allocation20_spill] sm:$0xff] %v13171_v4 }
 0x776   :  { %11366 = vrcp.f32 %v5536_v38  ;;  %v13180_v38 = vld [vmem:[#allocation5 + $0x164] ss:$16 sps:$4 sm:$0xff]  }
 0x777   :  { %14247 = vst [vmem:[#allocation23_spill] sm:$0xff] %v13180_v38 }
 0x77f   :  { %v11363_v5 = vpop.eup %11362 }
 0x780   :  { %v5540_v14 = vmul.f32 %v11363_v5, %v11359_v30  ;;  %v13168_v30 = vld [vmem:[#allocation5 + $0x184] ss:$16 sps:$4 sm:$0xff]   ;;  %v13174_v5 = vld [vmem:[#allocation5 + $0x18c] ss:$16 sps:$4 sm:$0xff]  }
 0x781   :  { %v11365_v18 = vpop.eup %11364  ;;  %14243 = vst [vmem:[#allocation19_spill] sm:$0xff] %v13168_v30  ;;  %14245 = vst [vmem:[#allocation21_spill] sm:$0xff] %v13174_v5 }
 0x782   :  { %v5539_v13 = vmul.f32 %v11365_v18, %v12897_v16  ;;  %v13057_v16 = vld [vmem:[#allocation5 + $0xc0] ss:$16 sps:$4 sm:$0xff]  }
 0x783   :  { %v11367_v40 = vpop.eup %11366  ;;  %v13177_v18 = vld [vmem:[#allocation5 + $0x180] ss:$16 sps:$4 sm:$0xff]  }
 0x784   :  { %v13045_v20 = vadd.f32 %v5540_v14, %v5539_v13  ;;  %14246 = vst [vmem:[#allocation22_spill] sm:$0xff] %v13177_v18  ;;  %v13183_v13 = vld [vmem:[#allocation5 + $0x188] ss:$16 sps:$4 sm:$0xff]   ;;  %v13186_v14 = vld [vmem:[#allocation5 + $0x16c] ss:$16 sps:$4 sm:$0xff]  }
 0x785   :  { %14248 = vst [vmem:[#allocation24_spill] sm:$0xff] %v13183_v13  ;;  %14249 = vst [vmem:[#allocation25_spill] sm:$0xff] %v13186_v14 }
 0x786   :  { %11368 = vtanh.f32 %v13045_v20 }
 0x793   :  { %v11369_v32 = vpop.eup %11368 }
 0x794   :  { %v5543_v56 = vmul.f32 %v11369_v32, %v11367_v40  ;;  %v13189_v40 = vld [vmem:[#allocation5 + $0x160] ss:$16 sps:$4 sm:$0xff]   ;;  %v13192_v32 = vld [vmem:[#allocation5 + $0x144] ss:$16 sps:$4 sm:$0xff]  }
 0x795   :  { %14250 = vst [vmem:[#allocation26_spill] sm:$0xff] %v13189_v40  ;;  %14251 = vst [vmem:[#allocation27_spill] sm:$0xff] %v13192_v32 }
 0x796   :  { %v5544_v23 = vpack.c.bf16 %v5543_v56, %v5543_v56  ;;  %v13195_v56 = vld [vmem:[#allocation5 + $0x168] ss:$16 sps:$4 sm:$0xff]  }
 0x797   :  { %14252 = vst [vmem:[#allocation28_spill] sm:$0xff] %v13195_v56 }
 0x798   :  { %5963 = vmatmul.mubr.bf16.vlgmr.msra.gmra.mxu0 %v5544_v23  ;;  %6004 = vmatmul.mubr.bf16.vlgmr.msra.gmra.mxu1 %v5544_v23 }
 0x799   :  { %6426 = vmatpush1.bf16.msra.mxu0 %v13048_v17  ;;  %6457 = vmatprep.mubr.bf16.mxu0 %v5544_v23 }
 0x79a   :  { %6498 = vmatprep.mubr.bf16.mxu1 %v5544_v23  ;;  %6427 = vmatprep.subr.bf16.mxu0 %v13050_v35  ;;  %v13198_v23 = vld [vmem:[#allocation5 + $0x14c] ss:$16 sps:$4 sm:$0xff]  }
 0x79b   :  { %6467 = vmatpush1.bf16.msra.mxu1 %v13052_v8  ;;  %14253 = vst [vmem:[#allocation29_spill] sm:$0xff] %v13198_v23 }
 0x79c   :  { %6468 = vmatprep.subr.bf16.mxu1 %v13054_v15 }
 0x79d   :  { %6428 = vmatpush1.bf16.msra.mxu0 %v13057_v16 }
 0x79e   :  { %6429 = vmatprep.subr.bf16.mxu0 %v13060_v1 }
 0x79f   :  { %6469 = vmatpush1.bf16.msra.mxu1 %v13063_v44 }
 0x7a0   :  { %6470 = vmatprep.subr.bf16.mxu1 %v13066_v31 }
 0x7a1   :  { %6430 = vmatpush1.bf16.msra.mxu0 %v13069_v28 }
 0x7a2   :  { %6431 = vmatprep.subr.bf16.mxu0 %v13072_v41 }
 0x7a3   :  { %6471 = vmatpush1.bf16.msra.mxu1 %v13075_v29 }
 0x7a4   :  { %6472 = vmatprep.subr.bf16.mxu1 %v13078_v25 }
 0x7a5   :  { %6432 = vmatpush1.bf16.msra.mxu0 %v13081_v27 }
 0x7a6   :  { %6433 = vmatprep.subr.bf16.mxu0 %v13084_v42 }
 0x7a7   :  { %6473 = vmatpush1.bf16.msra.mxu1 %v13087_v36 }
 0x7a8   :  { %6474 = vmatprep.subr.bf16.mxu1 %v13090_v39 }
 0x7a9   :  { %6434 = vmatpush1.bf16.msra.mxu0 %v13093_v43 }
 0x7aa   :  { %6435 = vmatprep.subr.bf16.mxu0 %v13096_v45 }
 0x7ab   :  { %6475 = vmatpush1.bf16.msra.mxu1 %v13099_v49 }
 0x7ac   :  { %6476 = vmatprep.subr.bf16.mxu1 %v13102_v21 }
 0x7ad   :  { %6436 = vmatpush1.bf16.msra.mxu0 %v13105_v51 }
 0x7ae   :  { %6437 = vmatprep.subr.bf16.mxu0 %v13108_v52 }
 0x7af   :  { %6477 = vmatpush1.bf16.msra.mxu1 %v13111_v53 }
 0x7b0   :  { %6478 = vmatprep.subr.bf16.mxu1 %v13114_v54 }
 0x7b1   :  { %6438 = vmatpush1.bf16.msra.mxu0 %v13117_v55 }
 0x7b2   :  { %6439 = vmatprep.subr.bf16.mxu0 %v13120_v57 }
 0x7b3   :  { %6479 = vmatpush1.bf16.msra.mxu1 %v13123_v58 }
 0x7b4   :  { %6480 = vmatprep.subr.bf16.mxu1 %v13126_v0 }
 0x7b5   :  { %6440 = vmatpush1.bf16.msra.mxu0 %v13129_v59 }
 0x7b6   :  { %6441 = vmatprep.subr.bf16.mxu0 %v13132_v60 }
 0x7b7   :  { %6481 = vmatpush1.bf16.msra.mxu1 %v13135_v61 }
 0x7b8   :  { %6482 = vmatprep.subr.bf16.mxu1 %v13138_v62 }
 0x7b9   :  { %6442 = vmatpush2.bf16.msra.mxu0 %v13141_v63 }
 0x7ba   :  { %6443 = vmatprep.subr.bf16.mxu0 %v13144_v2 }
 0x7bb   :  { %6483 = vmatpush2.bf16.msra.mxu1 %v13147_v3 }
 0x7bc   :  { %6484 = vmatprep.subr.bf16.mxu1 %v13150_v37 }
 0x7bd   :  { %6444 = vmatpush2.bf16.msra.mxu0 %v13153_v7 }
 0x7be   :  { %6445 = vmatprep.subr.bf16.mxu0 %v13156_v9 }
 0x7bf   :  { %6485 = vmatpush2.bf16.msra.mxu1 %v13159_v10 }
 0x7c0   :  { %6486 = vmatprep.subr.bf16.mxu1 %v13162_v19 }
 0x7c1   :  { %6446 = vmatpush2.bf16.msra.mxu0 %v13165_v22 }
 0x7c2   :  { %6447 = vmatprep.subr.bf16.mxu0 %v13168_v30 }
 0x7c3   :  { %6487 = vmatpush2.bf16.msra.mxu1 %v13171_v4  ;;  %v6039_v4 = vld [vmem:[#allocation2 + $0x30] sm:$0xff] }
 0x7c4   :  { %6488 = vmatprep.subr.bf16.mxu1 %v13174_v5  ;;  %v13201_v5 = vld [vmem:[#allocation5 + $0x140] ss:$16 sps:$4 sm:$0xff]  }
 0x7c5   :  { %6448 = vmatpush2.bf16.msra.mxu0 %v13177_v18  ;;  %14254 = vst [vmem:[#allocation30_spill] sm:$0xff] %v13201_v5  ;;  %v13204_v18 = vld [vmem:[#allocation5 + $0x124] ss:$16 sps:$4 sm:$0xff]  }
 0x7c6   :  { %6449 = vmatprep.subr.bf16.mxu0 %v13180_v38  ;;  %14255 = vst [vmem:[#allocation31_spill] sm:$0xff] %v13204_v18  ;;  %v13207_v38 = vld [vmem:[#allocation5 + $0x148] ss:$16 sps:$4 sm:$0xff]  }
 0x7c7   :  { %6489 = vmatpush2.bf16.msra.mxu1 %v13183_v13  ;;  %14256 = vst [vmem:[#allocation32_spill] sm:$0xff] %v13207_v38  ;;  %v13210_v13 = vld [vmem:[#allocation5 + $0x12c] ss:$16 sps:$4 sm:$0xff]  }
 0x7c8   :  { %6490 = vmatprep.subr.bf16.mxu1 %v13186_v14  ;;  %14257 = vst [vmem:[#allocation33_spill] sm:$0xff] %v13210_v13  ;;  %v13213_v14 = vld [vmem:[#allocation5 + $0x120] ss:$16 sps:$4 sm:$0xff]  }
 0x7c9   :  { %6450 = vmatpush2.bf16.msra.mxu0 %v13189_v40  ;;  %14258 = vst [vmem:[#allocation34_spill] sm:$0xff] %v13213_v14  ;;  %v13216_v40 = vld [vmem:[#allocation5 + $0x104] ss:$16 sps:$4 sm:$0xff]  }
 0x7ca   :  { %6451 = vmatprep.subr.bf16.mxu0 %v13192_v32  ;;  %14259 = vst [vmem:[#allocation35_spill] sm:$0xff] %v13216_v40  ;;  %v13219_v32 = vld [vmem:[#allocation5 + $0x128] ss:$16 sps:$4 sm:$0xff]  }
 0x7cb   :  { %6491 = vmatpush2.bf16.msra.mxu1 %v13195_v56  ;;  %14260 = vst [vmem:[#allocation36_spill] sm:$0xff] %v13219_v32  ;;  %v13222_v56 = vld [vmem:[#allocation5 + $0x10c] ss:$16 sps:$4 sm:$0xff]  }
 0x7cc   :  { %6492 = vmatprep.subr.bf16.mxu1 %v13198_v23  ;;  %14261 = vst [vmem:[#allocation37_spill] sm:$0xff] %v13222_v56  ;;  %v13225_v23 = vld [vmem:[#allocation5 + $0x100] ss:$16 sps:$4 sm:$0xff]  }
 0x7cd   :  { %6452 = vmatpush2.bf16.msra.mxu0 %v13201_v5  ;;  %14262 = vst [vmem:[#allocation38_spill] sm:$0xff] %v13225_v23  ;;  %v6040_v5 = vpack.c.bf16 %v6039_v4, %v6039_v4  ;;  %v13246_v4 = vld [vmem:[#allocation7 + $0xc0] ss:$16 sps:$4 sm:$0xff]  }
 0x7ce   :  { %6453 = vmatprep.subr.bf16.mxu0 %v13204_v18  ;;  %v13229_v18 = vld [vmem:[#allocation5 + $0x108] ss:$16 sps:$4 sm:$0xff]   ;;  %14268 = vst [vmem:[#allocation40_spill] sm:$0xff] %v13246_v4 }
 0x7cf   :  { %6493 = vmatpush2.bf16.msra.mxu1 %v13207_v38  ;;  %14263 = vst [vmem:[#allocation43_spill] sm:$0xff] %v13229_v18  ;;  %v13238_v38 = vld [vmem:[#allocation7 + $0xe8] ss:$16 sps:$4 sm:$0xff]  }
 0x7d0   :  { %6494 = vmatprep.subr.bf16.mxu1 %v13210_v13  ;;  %v13234_v13 = vld [vmem:[#allocation7 + $0xe0] ss:$16 sps:$4 sm:$0xff]   ;;  %14266 = vst [vmem:[#allocation39_spill] sm:$0xff] %v13238_v38 }
 0x7d1   :  { %6454 = vmatpush2.bf16.msra.mxu0 %v13213_v14  ;;  %14264 = vst [vmem:[#allocation41_spill] sm:$0xff] %v13234_v13  ;;  %v13236_v14 = vld [vmem:[#allocation7 + $0xe4] ss:$16 sps:$4 sm:$0xff]  }
 0x7d2   :  { %6455 = vmatprep.subr.bf16.mxu0 %v13216_v40  ;;  %14265 = vst [vmem:[#allocation45_spill] sm:$0xff] %v13236_v14  ;;  %v13240_v40 = vld [vmem:[#allocation7 + $0xec] ss:$16 sps:$4 sm:$0xff]  }
 0x7d3   :  { %6495 = vmatpush2.bf16.msra.mxu1 %v13219_v32  ;;  %14267 = vst [vmem:[#allocation47_spill] sm:$0xff] %v13240_v40 }
 0x7d4   :  { %6496 = vmatprep.subr.bf16.mxu1 %v13222_v56  ;;  %v13387_v56 = vld [vmem:[#allocation7 + $0x144] ss:$16 sps:$4 sm:$0xff]  }
 0x7d5   :  { %6456 = vmatpush2.bf16.msra.mxu0 %v13225_v23  ;;  %v13252_v23 = vld [vmem:[#allocation7 + $0xcc] ss:$16 sps:$4 sm:$0xff]   ;;  %14316 = vst [vmem:[#allocation89_spill] sm:$0xff] %v13387_v56 }
 0x7d6   :  { %6917 = vmatprep.subr.bf16.mxu0 %v13236_v14  ;;  %14271 = vst [vmem:[#allocation46_spill] sm:$0xff] %v13252_v23  ;;  %v13265_v14 = vld [vmem:[#allocation7 + $0xa8] ss:$16 sps:$4 sm:$0xff]  }
 0x7d7   :  { %6497 = vmatpush2.bf16.msra.mxu1 %v13229_v18  ;;  %v13248_v18 = vld [vmem:[#allocation7 + $0xc4] ss:$16 sps:$4 sm:$0xff]   ;;  %14275 = vst [vmem:[#allocation51_spill] sm:$0xff] %v13265_v14 }
 0x7d8   :  { %6458 = vmatmul.mubr.bf16.vlgmr.msra.gmra.mxu0 %v6040_v5  ;;  %6958 = vmatprep.subr.bf16.mxu1 %v13240_v40  ;;  %14269 = vst [vmem:[#allocation48_spill] sm:$0xff] %v13248_v18  ;;  %v13260_v40 = vld [vmem:[#allocation7 + $0xa0] ss:$16 sps:$4 sm:$0xff]  }
 0x7d9   :  { %6918 = vmatpush1.bf16.msra.mxu0 %v13234_v13  ;;  %v13258_v13 = vld [vmem:[#allocation7 + $0xa4] ss:$16 sps:$4 sm:$0xff]   ;;  %14273 = vst [vmem:[#allocation49_spill] sm:$0xff] %v13260_v40 }
 0x7da   :  { %6499 = vmatmul.mubr.bf16.vlgmr.msra.gmra.mxu1 %v6040_v5  ;;  %v13250_v5 = vld [vmem:[#allocation7 + $0xc8] ss:$16 sps:$4 sm:$0xff]   ;;  %6919 = vmatprep.subr.bf16.mxu0 %v13248_v18  ;;  %14272 = vst [vmem:[#allocation44_spill] sm:$0xff] %v13258_v13 }
 0x7db   :  { %6959 = vmatpush1.bf16.msra.mxu1 %v13238_v38  ;;  %14270 = vst [vmem:[#allocation42_spill] sm:$0xff] %v13250_v5  ;;  %v13262_v38 = vld [vmem:[#allocation7 + $0xac] ss:$16 sps:$4 sm:$0xff]   ;;  %v13277_v18 = vld [vmem:[#allocation7 + $0x88] ss:$16 sps:$4 sm:$0xff]  }
 0x7dc   :  { %6960 = vmatprep.subr.bf16.mxu1 %v13252_v23  ;;  %14274 = vst [vmem:[#allocation50_spill] sm:$0xff] %v13262_v38  ;;  %v13272_v23 = vld [vmem:[#allocation7 + $0x80] ss:$16 sps:$4 sm:$0xff]   ;;  %14279 = vst [vmem:[#allocation55_spill] sm:$0xff] %v13277_v18 }
 0x7dd   :  { %6920 = vmatpush1.bf16.msra.mxu0 %v13246_v4  ;;  %v13270_v4 = vld [vmem:[#allocation7 + $0x84] ss:$16 sps:$4 sm:$0xff]   ;;  %14277 = vst [vmem:[#allocation53_spill] sm:$0xff] %v13272_v23 }
 0x7de   :  { %6921 = vmatprep.subr.bf16.mxu0 %v13258_v13  ;;  %14276 = vst [vmem:[#allocation52_spill] sm:$0xff] %v13270_v4  ;;  %v13289_v13 = vld [vmem:[#allocation7 + $0x68] ss:$16 sps:$4 sm:$0xff]  }
 0x7df   :  { %6961 = vmatpush1.bf16.msra.mxu1 %v13250_v5  ;;  %v13274_v5 = vld [vmem:[#allocation7 + $0x8c] ss:$16 sps:$4 sm:$0xff]   ;;  %14283 = vst [vmem:[#allocation59_spill] sm:$0xff] %v13289_v13 }
 0x7e0   :  { %6962 = vmatprep.subr.bf16.mxu1 %v13262_v38  ;;  %14278 = vst [vmem:[#allocation54_spill] sm:$0xff] %v13274_v5  ;;  %v13284_v38 = vld [vmem:[#allocation7 + $0x60] ss:$16 sps:$4 sm:$0xff]  }
 0x7e1   :  { %6922 = vmatpush1.bf16.msra.mxu0 %v13260_v40  ;;  %v13282_v40 = vld [vmem:[#allocation7 + $0x64] ss:$16 sps:$4 sm:$0xff]   ;;  %14281 = vst [vmem:[#allocation57_spill] sm:$0xff] %v13284_v38 }
 0x7e2   :  { %6923 = vmatprep.subr.bf16.mxu0 %v13270_v4  ;;  %14280 = vst [vmem:[#allocation56_spill] sm:$0xff] %v13282_v40  ;;  %v13301_v4 = vld [vmem:[#allocation7 + $0x48] ss:$16 sps:$4 sm:$0xff]  }
 0x7e3   :  { %6963 = vmatpush1.bf16.msra.mxu1 %v13265_v14  ;;  %v13286_v14 = vld [vmem:[#allocation7 + $0x6c] ss:$16 sps:$4 sm:$0xff]   ;;  %14287 = vst [vmem:[#allocation63_spill] sm:$0xff] %v13301_v4 }
 0x7e4   :  { %6964 = vmatprep.subr.bf16.mxu1 %v13274_v5  ;;  %14282 = vst [vmem:[#allocation58_spill] sm:$0xff] %v13286_v14  ;;  %v13296_v5 = vld [vmem:[#allocation7 + $0x40] ss:$16 sps:$4 sm:$0xff]  }
 0x7e5   :  { %6924 = vmatpush1.bf16.msra.mxu0 %v13272_v23  ;;  %v13294_v23 = vld [vmem:[#allocation7 + $0x44] ss:$16 sps:$4 sm:$0xff]   ;;  %14285 = vst [vmem:[#allocation61_spill] sm:$0xff] %v13296_v5 }
 0x7e6   :  { %6925 = vmatprep.subr.bf16.mxu0 %v13282_v40  ;;  %14284 = vst [vmem:[#allocation60_spill] sm:$0xff] %v13294_v23  ;;  %v13313_v40 = vld [vmem:[#allocation7 + $0x28] ss:$16 sps:$4 sm:$0xff]  }
 0x7e7   :  { %6965 = vmatpush1.bf16.msra.mxu1 %v13277_v18  ;;  %v13298_v18 = vld [vmem:[#allocation7 + $0x4c] ss:$16 sps:$4 sm:$0xff]   ;;  %14291 = vst [vmem:[#allocation67_spill] sm:$0xff] %v13313_v40 }
 0x7e8   :  { %6966 = vmatprep.subr.bf16.mxu1 %v13286_v14  ;;  %14286 = vst [vmem:[#allocation62_spill] sm:$0xff] %v13298_v18  ;;  %v13308_v14 = vld [vmem:[#allocation7 + $0x20] ss:$16 sps:$4 sm:$0xff]  }
 0x7e9   :  { %6926 = vmatpush1.bf16.msra.mxu0 %v13284_v38  ;;  %v13306_v38 = vld [vmem:[#allocation7 + $0x24] ss:$16 sps:$4 sm:$0xff]   ;;  %14289 = vst [vmem:[#allocation65_spill] sm:$0xff] %v13308_v14 }
 0x7ea   :  { %6927 = vmatprep.subr.bf16.mxu0 %v13294_v23  ;;  %14288 = vst [vmem:[#allocation64_spill] sm:$0xff] %v13306_v38  ;;  %v13325_v23 = vld [vmem:[#allocation7 + $0x8] ss:$16 sps:$4 sm:$0xff]  }
 0x7eb   :  { %6967 = vmatpush1.bf16.msra.mxu1 %v13289_v13  ;;  %v13310_v13 = vld [vmem:[#allocation7 + $0x2c] ss:$16 sps:$4 sm:$0xff]   ;;  %14295 = vst [vmem:[#allocation71_spill] sm:$0xff] %v13325_v23 }
 0x7ec   :  { %6968 = vmatprep.subr.bf16.mxu1 %v13298_v18  ;;  %14290 = vst [vmem:[#allocation66_spill] sm:$0xff] %v13310_v13  ;;  %v13320_v18 = vld [vmem:[#allocation7] ss:$16 sps:$4 sm:$0xff]  }
 0x7ed   :  { %6928 = vmatpush1.bf16.msra.mxu0 %v13296_v5  ;;  %v13318_v5 = vld [vmem:[#allocation7 + $0x4] ss:$16 sps:$4 sm:$0xff]   ;;  %14293 = vst [vmem:[#allocation69_spill] sm:$0xff] %v13320_v18 }
 0x7ee   :  { %6929 = vmatprep.subr.bf16.mxu0 %v13306_v38  ;;  %14292 = vst [vmem:[#allocation68_spill] sm:$0xff] %v13318_v5  ;;  %v13337_v38 = vld [vmem:[#allocation7 + $0x1e8] ss:$16 sps:$4 sm:$0xff]  }
 0x7ef   :  { %6969 = vmatpush1.bf16.msra.mxu1 %v13301_v4  ;;  %v13322_v4 = vld [vmem:[#allocation7 + $0xc] ss:$16 sps:$4 sm:$0xff]   ;;  %14299 = vst [vmem:[#allocation75_spill] sm:$0xff] %v13337_v38 }
 0x7f0   :  { %6970 = vmatprep.subr.bf16.mxu1 %v13310_v13  ;;  %14294 = vst [vmem:[#allocation70_spill] sm:$0xff] %v13322_v4  ;;  %v13332_v13 = vld [vmem:[#allocation7 + $0x1e0] ss:$16 sps:$4 sm:$0xff]  }
 0x7f1   :  { %6930 = vmatpush1.bf16.msra.mxu0 %v13308_v14  ;;  %v13330_v14 = vld [vmem:[#allocation7 + $0x1e4] ss:$16 sps:$4 sm:$0xff]   ;;  %14297 = vst [vmem:[#allocation73_spill] sm:$0xff] %v13332_v13 }
 0x7f2   :  { %6931 = vmatprep.subr.bf16.mxu0 %v13318_v5  ;;  %14296 = vst [vmem:[#allocation72_spill] sm:$0xff] %v13330_v14  ;;  %v13349_v5 = vld [vmem:[#allocation7 + $0x1c8] ss:$16 sps:$4 sm:$0xff]  }
 0x7f3   :  { %6971 = vmatpush1.bf16.msra.mxu1 %v13313_v40  ;;  %v13334_v40 = vld [vmem:[#allocation7 + $0x1ec] ss:$16 sps:$4 sm:$0xff]   ;;  %14303 = vst [vmem:[#allocation79_spill] sm:$0xff] %v13349_v5 }
 0x7f4   :  { %6972 = vmatprep.subr.bf16.mxu1 %v13322_v4  ;;  %14298 = vst [vmem:[#allocation74_spill] sm:$0xff] %v13334_v40  ;;  %v13344_v4 = vld [vmem:[#allocation7 + $0x1c0] ss:$16 sps:$4 sm:$0xff]  }
 0x7f5   :  { %6932 = vmatpush1.bf16.msra.mxu0 %v13320_v18  ;;  %v13342_v18 = vld [vmem:[#allocation7 + $0x1c4] ss:$16 sps:$4 sm:$0xff]   ;;  %14301 = vst [vmem:[#allocation77_spill] sm:$0xff] %v13344_v4 }
 0x7f6   :  { %6933 = vmatprep.subr.bf16.mxu0 %v13330_v14  ;;  %14300 = vst [vmem:[#allocation76_spill] sm:$0xff] %v13342_v18  ;;  %v13361_v14 = vld [vmem:[#allocation7 + $0x1a8] ss:$16 sps:$4 sm:$0xff]  }
 0x7f7   :  { %6973 = vmatpush1.bf16.msra.mxu1 %v13325_v23  ;;  %v13346_v23 = vld [vmem:[#allocation7 + $0x1cc] ss:$16 sps:$4 sm:$0xff]   ;;  %14307 = vst [vmem:[#allocation83_spill] sm:$0xff] %v13361_v14 }
 0x7f8   :  { %6974 = vmatprep.subr.bf16.mxu1 %v13334_v40  ;;  %14302 = vst [vmem:[#allocation78_spill] sm:$0xff] %v13346_v23  ;;  %v13356_v40 = vld [vmem:[#allocation7 + $0x1a0] ss:$16 sps:$4 sm:$0xff]  }
 0x7f9   :  { %6934 = vmatpush2.bf16.msra.mxu0 %v13332_v13  ;;  %v13354_v13 = vld [vmem:[#allocation7 + $0x1a4] ss:$16 sps:$4 sm:$0xff]   ;;  %14305 = vst [vmem:[#allocation81_spill] sm:$0xff] %v13356_v40 }
 0x7fa   :  { %6935 = vmatprep.subr.bf16.mxu0 %v13342_v18  ;;  %14304 = vst [vmem:[#allocation80_spill] sm:$0xff] %v13354_v13  ;;  %v13373_v18 = vld [vmem:[#allocation7 + $0x188] ss:$16 sps:$4 sm:$0xff]  }
 0x7fb   :  { %6975 = vmatpush2.bf16.msra.mxu1 %v13337_v38  ;;  %v13358_v38 = vld [vmem:[#allocation7 + $0x1ac] ss:$16 sps:$4 sm:$0xff]   ;;  %14311 = vst [vmem:[#allocation87_spill] sm:$0xff] %v13373_v18 }
 0x7fc   :  { %6976 = vmatprep.subr.bf16.mxu1 %v13346_v23  ;;  %14306 = vst [vmem:[#allocation82_spill] sm:$0xff] %v13358_v38  ;;  %v13368_v23 = vld [vmem:[#allocation7 + $0x180] ss:$16 sps:$4 sm:$0xff]  }
 0x7fd   :  { %6936 = vmatpush2.bf16.msra.mxu0 %v13344_v4  ;;  %v13366_v4 = vld [vmem:[#allocation7 + $0x184] ss:$16 sps:$4 sm:$0xff]   ;;  %14309 = vst [vmem:[#allocation85_spill] sm:$0xff] %v13368_v23 }
 0x7fe   :  { %6937 = vmatprep.subr.bf16.mxu0 %v13354_v13  ;;  %14308 = vst [vmem:[#allocation84_spill] sm:$0xff] %v13366_v4  ;;  %v13384_v13 = vld [vmem:[#allocation7 + $0x16c] ss:$16 sps:$4 sm:$0xff]  }
 0x7ff   :  { %6977 = vmatpush2.bf16.msra.mxu1 %v13349_v5  ;;  %v13370_v5 = vld [vmem:[#allocation7 + $0x18c] ss:$16 sps:$4 sm:$0xff]   ;;  %14315 = vst [vmem:[#allocation90_spill] sm:$0xff] %v13384_v13 }
 0x800   :  { %6978 = vmatprep.subr.bf16.mxu1 %v13358_v38  ;;  %14310 = vst [vmem:[#allocation86_spill] sm:$0xff] %v13370_v5  ;;  %v13380_v38 = vld [vmem:[#allocation7 + $0x160] ss:$16 sps:$4 sm:$0xff]  }
 0x801   :  { %6938 = vmatpush2.bf16.msra.mxu0 %v13356_v40  ;;  %v13378_v40 = vld [vmem:[#allocation7 + $0x164] ss:$16 sps:$4 sm:$0xff]   ;;  %14313 = vst [vmem:[#allocation92_spill] sm:$0xff] %v13380_v38 }
 0x802   :  { %6939 = vmatprep.subr.bf16.mxu0 %v13366_v4  ;;  %14312 = vst [vmem:[#allocation88_spill] sm:$0xff] %v13378_v40  ;;  %v13399_v4 = vld [vmem:[#allocation7 + $0x124] ss:$16 sps:$4 sm:$0xff]  }
 0x803   :  { %6979 = vmatpush2.bf16.msra.mxu1 %v13361_v14  ;;  %v13382_v14 = vld [vmem:[#allocation7 + $0x168] ss:$16 sps:$4 sm:$0xff]   ;;  %14320 = vst [vmem:[#allocation96_spill] sm:$0xff] %v13399_v4 }
 0x804   :  { %6980 = vmatprep.subr.bf16.mxu1 %v13370_v5  ;;  %14314 = vst [vmem:[#allocation91_spill] sm:$0xff] %v13382_v14  ;;  %v13393_v5 = vld [vmem:[#allocation7 + $0x14c] ss:$16 sps:$4 sm:$0xff]  }
 0x805   :  { %6940 = vmatpush2.bf16.msra.mxu0 %v13368_v23  ;;  %v13391_v23 = vld [vmem:[#allocation7 + $0x140] ss:$16 sps:$4 sm:$0xff]   ;;  %14318 = vst [vmem:[#allocation94_spill] sm:$0xff] %v13393_v5 }
 0x806   :  { %6941 = vmatprep.subr.bf16.mxu0 %v13378_v40  ;;  %14317 = vst [vmem:[#allocation93_spill] sm:$0xff] %v13391_v23  ;;  %v13402_v40 = vld [vmem:[#allocation7 + $0x12c] ss:$16 sps:$4 sm:$0xff]  }
 0x807   :  { %6981 = vmatpush2.bf16.msra.mxu1 %v13373_v18  ;;  %v13397_v18 = vld [vmem:[#allocation7 + $0x148] ss:$16 sps:$4 sm:$0xff]   ;;  %14321 = vst [vmem:[#allocation97_spill] sm:$0xff] %v13402_v40 }
 0x808   :  { %6982 = vmatprep.subr.bf16.mxu1 %v13384_v13  ;;  %14319 = vst [vmem:[#allocation95_spill] sm:$0xff] %v13397_v18  ;;  %v13409_v13 = vld [vmem:[#allocation7 + $0x128] ss:$16 sps:$4 sm:$0xff]  }
 0x809   :  { %6942 = vmatpush2.bf16.msra.mxu0 %v13380_v38  ;;  %v13405_v38 = vld [vmem:[#allocation7 + $0x120] ss:$16 sps:$4 sm:$0xff]   ;;  %14323 = vst [vmem:[#allocation99_spill] sm:$0xff] %v13409_v13 }
 0x80a   :  { %6943 = vmatprep.subr.bf16.mxu0 %v13387_v56  ;;  %14322 = vst [vmem:[#allocation98_spill] sm:$0xff] %v13405_v38  ;;  %v13414_v56 = vld [vmem:[#allocation7 + $0x10c] ss:$16 sps:$4 sm:$0xff]  }
 0x80b   :  { %6983 = vmatpush2.bf16.msra.mxu1 %v13382_v14  ;;  %v13411_v14 = vld [vmem:[#allocation7 + $0x104] ss:$16 sps:$4 sm:$0xff]   ;;  %14325 = vst [vmem:[#allocation101_spill] sm:$0xff] %v13414_v56 }
 0x80c   :  { %6984 = vmatprep.subr.bf16.mxu1 %v13393_v5  ;;  %14324 = vst [vmem:[#allocation100_spill] sm:$0xff] %v13411_v14  ;;  %v13417_v5 = vld [vmem:[#allocation7 + $0x100] ss:$16 sps:$4 sm:$0xff]  }
 0x80d   :  { %6944 = vmatpush2.bf16.msra.mxu0 %v13391_v23  ;;  %14326 = vst [vmem:[#allocation102_spill] sm:$0xff] %v13417_v5  ;;  %v13421_v23 = vld [vmem:[#allocation7 + $0x108] ss:$16 sps:$4 sm:$0xff]  }
 0x80e   :  { %6945 = vmatprep.subr.bf16.mxu0 %v13399_v4  ;;  %14327 = vst [vmem:[#allocation103_spill] sm:$0xff] %v13421_v23 }
 0x80f   :  { %6985 = vmatpush2.bf16.msra.mxu1 %v13397_v18 }
 0x810   :  { %6986 = vmatprep.subr.bf16.mxu1 %v13402_v40 }
 0x811   :  { %6946 = vmatpush2.bf16.msra.mxu0 %v13405_v38 }
 0x812   :  { %6947 = vmatprep.subr.bf16.mxu0 %v13411_v14 }
 0x813   :  { %6987 = vmatpush2.bf16.msra.mxu1 %v13409_v13 }
 0x814   :  { %6988 = vmatprep.subr.bf16.mxu1 %v13414_v56 }
 0x815   :  { %6948 = vmatpush2.bf16.msra.mxu0 %v13417_v5 }
 0x816   :  { %7412 = vmatprep.subr.bf16.mxu0 %v13026_v6 }
 0x817   :  { %6989 = vmatpush2.bf16.msra.mxu1 %v13421_v23 }
 0x818   :  { %7453 = vmatprep.subr.bf16.mxu1 %v13031_v47 }
 0x858   :  { %v5964_v40 = vpop.f32.mrf.mxu0  ;;  %v6005_v38 = vpop.f32.mrf.mxu1 }
 0x859   :  { %v5965_v18 = vadd.f32 %v5964_v40, %v11928_v33  ;;  %v6006_v10 = vadd.f32 %v6005_v38, %v11946_v50 }
 0x85a   :  { %v5966_v4 = vpop.f32.mrf.mxu0  ;;  %v6007_v13 = vpop.f32.mrf.mxu1 }
 0x85b   :  { %v9819_v32 = vmul.f32 -1.442695, %v5965_v18  ;;  %v5967_v14 = vadd.f32 %v5966_v4, %v11932_v34  ;;  %v6008_v6 = vadd.f32 %v6007_v13, %v11940_v48 }
 0x85c   :  { %v5968_v30 = vpop.f32.mrf.mxu0  ;;  %v6009_v22 = vpop.f32.mrf.mxu1 }
 0x85d   :  { %11370 = vpow2.f32 %v9819_v32  ;;  %v9820_v56 = vmul.f32 -1.442695, %v5967_v14  ;;  %v9821_v23 = vmul.f32 -1.442695, %v6008_v6 }
 0x85e   :  { %v5969_v5 = vpop.f32.mrf.mxu0  ;;  %v6010_v19 = vpop.f32.mrf.mxu1 }
 0x85f   :  { %11372 = vpow2.f32 %v9820_v56 }
 0x860   :  { %11374 = vpow2.f32 %v9821_v23 }
 0x86a   :  { %v11371_v47 = vpop.eup %11370 }
 0x86b   :  { %v6015_v9 = vadd.f32 1.0, %v11371_v47 }
 0x86c   :  { %v11373_v40 = vpop.eup %11372 }
 0x86d   :  { %11376 = vrcp.f32 %v6015_v9  ;;  %v6021_v18 = vadd.f32 1.0, %v11373_v40  ;;  %v11375_v30 = vpop.eup %11374 }
 0x86e   :  { %11378 = vtanh.f32 %v6006_v10  ;;  %v6028_v4 = vadd.f32 1.0, %v11375_v30 }
 0x86f   :  { %11380 = vrcp.f32 %v6021_v18 }
 0x870   :  { %11382 = vrcp.f32 %v6028_v4 }
 0x87a   :  { %v11377_v22 = vpop.eup %11376 }
 0x87b   :  { %v11379_v32 = vpop.eup %11378 }
 0x87c   :  { %v11381_v14 = vpop.eup %11380  ;;  %v6032_v19 = vmul.f32 %v11379_v32, %v11377_v22 }
 0x87d   :  { %v6031_v56 = vmul.f32 %v11381_v14, %v13037_v46  ;;  %v11383_v38 = vpop.eup %11382 }
 0x87f   :  { %v13433_v13 = vadd.f32 %v6032_v19, %v6031_v56 }
 0x881   :  { %11384 = vtanh.f32 %v13433_v13 }
 0x88e   :  { %v11385_v5 = vpop.eup %11384 }
 0x88f   :  { %v6035_v23 = vmul.f32 %v11385_v5, %v11383_v38 }
 0x891   :  { %6037 = vst [vmem:[#allocation10 + $0x28] sm:$0xff] %v6035_v23  ;;  %v6532_v9 = vpack.c.bf16 %v6035_v23, %v6035_v23 }
 0x893   :  { %6949 = vmatprep.mubr.bf16.mxu0 %v6532_v9  ;;  %6990 = vmatprep.mubr.bf16.mxu1 %v6532_v9 }
 0x898   :  { %v6459_v10 = vpop.f32.mrf.mxu0 }
 0x899   :  { %v6460_v6 = vadd.f32 %v6459_v10, %v11864_v11 }
 0x89a   :  { %v6461_v47 = vpop.f32.mrf.mxu0  ;;  %v6500_v40 = vpop.f32.mrf.mxu1 }
 0x89b   :  { %v9886_v18 = vmul.f32 -1.442695, %v6460_v6  ;;  %v6462_v46 = vadd.f32 %v6461_v47, %v11868_v12  ;;  %v6501_v38 = vadd.f32 %v6500_v40, %v11880_v26 }
 0x89c   :  { %v6463_v30 = vpop.f32.mrf.mxu0  ;;  %v6502_v22 = vpop.f32.mrf.mxu1 }
 0x89d   :  { %11386 = vpow2.f32 %v9886_v18  ;;  %v9887_v32 = vmul.f32 -1.442695, %v6462_v46  ;;  %v6503_v56 = vadd.f32 %v6502_v22, %v11876_v24 }
 0x89e   :  { %v6464_v14 = vpop.f32.mrf.mxu0  ;;  %v6504_v4 = vpop.f32.mrf.mxu1 }
 0x89f   :  { %11388 = vpow2.f32 %v9887_v32  ;;  %v9888_v5 = vmul.f32 -1.442695, %v6503_v56 }
 0x8a0   :  { %v6505_v19 = vpop.f32.mrf.mxu1  ;;  %11390 = vtanh.f32 %v6501_v38 }
 0x8a1   :  { %11392 = vpow2.f32 %v9888_v5  ;;  %v14364_v5 = vld [vmem:[#allocation52_spill] sm:$0xff] }
 0x8aa   :  { %v11387_v23 = vpop.eup %11386 }
 0x8ab   :  { %v6510_v9 = vadd.f32 1.0, %v11387_v23  ;;  %v14365_v23 = vld [vmem:[#allocation51_spill] sm:$0xff] }
 0x8ac   :  { %v11389_v10 = vpop.eup %11388 }
 0x8ad   :  { %11394 = vrcp.f32 %v6510_v9  ;;  %v6516_v6 = vadd.f32 1.0, %v11389_v10  ;;  %v11391_v47 = vpop.eup %11390  ;;  %v14366_v9 = vld [vmem:[#allocation54_spill] sm:$0xff]  ;;  %v14367_v10 = vld [vmem:[#allocation53_spill] sm:$0xff] }
 0x8ae   :  { %v11393_v18 = vpop.eup %11392 }
 0x8af   :  { %11396 = vrcp.f32 %v6516_v6  ;;  %v6523_v14 = vadd.f32 1.0, %v11393_v18  ;;  %v14368_v6 = vld [vmem:[#allocation56_spill] sm:$0xff]  ;;  %v14370_v18 = vld [vmem:[#allocation58_spill] sm:$0xff] }
 0x8b1   :  { %11398 = vrcp.f32 %v6523_v14  ;;  %v14373_v14 = vld [vmem:[#allocation59_spill] sm:$0xff] }
 0x8ba   :  { %v11395_v46 = vpop.eup %11394 }
 0x8bb   :  { %v6527_v4 = vmul.f32 %v11395_v46, %v11391_v47  ;;  %v14369_v47 = vld [vmem:[#allocation55_spill] sm:$0xff]  ;;  %v14371_v46 = vld [vmem:[#allocation57_spill] sm:$0xff] }
 0x8bc   :  { %v11397_v30 = vpop.eup %11396 }
 0x8bd   :  { %v6526_v32 = vmul.f32 %v11397_v30, %v13045_v20  ;;  %v14328_v20 = vld [vmem:[#allocation15_spill] sm:$0xff]  ;;  %v14372_v30 = vld [vmem:[#allocation60_spill] sm:$0xff] }
 0x8be   :  { %v11399_v40 = vpop.eup %11398 }
 0x8bf   :  { %v13441_v22 = vadd.f32 %v6527_v4, %v6526_v32  ;;  %v14374_v32 = vld [vmem:[#allocation62_spill] sm:$0xff]  ;;  %v14375_v4 = vld [vmem:[#allocation61_spill] sm:$0xff] }
 0x8c1   :  { %11400 = vtanh.f32 %v13441_v22 }
 0x8ce   :  { %v11401_v19 = vpop.eup %11400 }
 0x8cf   :  { %v6530_v56 = vmul.f32 %v11401_v19, %v11399_v40  ;;  %v14376_v40 = vld [vmem:[#allocation64_spill] sm:$0xff]  ;;  %v14377_v19 = vld [vmem:[#allocation63_spill] sm:$0xff] }
 0x8d1   :  { %v6531_v38 = vpack.c.bf16 %v6530_v56, %v6530_v56  ;;  %v14378_v56 = vld [vmem:[#allocation66_spill] sm:$0xff] }
 0x8d3   :  { %6950 = vmatmul.mubr.bf16.vlgmr.msra.gmra.mxu0 %v6531_v38  ;;  %6991 = vmatmul.mubr.bf16.vlgmr.msra.gmra.mxu1 %v6531_v38 }
 0x8d4   :  { %7413 = vmatpush1.bf16.msra.mxu0 %v13048_v17  ;;  %7444 = vmatprep.mubr.bf16.mxu0 %v6531_v38  ;;  %v14329_v17 = vld [vmem:[#allocation16_spill] sm:$0xff] }
 0x8d5   :  { %7485 = vmatprep.mubr.bf16.mxu1 %v6531_v38  ;;  %7414 = vmatprep.subr.bf16.mxu0 %v13050_v35  ;;  %v14330_v35 = vld [vmem:[#allocation17_spill] sm:$0xff] }
 0x8d6   :  { %7454 = vmatpush1.bf16.msra.mxu1 %v13052_v8  ;;  %v14331_v8 = vld [vmem:[#allocation18_spill] sm:$0xff]  ;;  %v14379_v38 = vld [vmem:[#allocation65_spill] sm:$0xff] }
 0x8d7   :  { %7455 = vmatprep.subr.bf16.mxu1 %v13054_v15  ;;  %v14332_v15 = vld [vmem:[#allocation19_spill] sm:$0xff] }
 0x8d8   :  { %7415 = vmatpush1.bf16.msra.mxu0 %v13057_v16  ;;  %v14333_v16 = vld [vmem:[#allocation20_spill] sm:$0xff] }
 0x8d9   :  { %7416 = vmatprep.subr.bf16.mxu0 %v13060_v1  ;;  %v14334_v1 = vld [vmem:[#allocation21_spill] sm:$0xff] }
 0x8da   :  { %7456 = vmatpush1.bf16.msra.mxu1 %v13063_v44  ;;  %v14335_v44 = vld [vmem:[#allocation22_spill] sm:$0xff] }
 0x8db   :  { %7457 = vmatprep.subr.bf16.mxu1 %v13066_v31  ;;  %v14336_v31 = vld [vmem:[#allocation23_spill] sm:$0xff] }
 0x8dc   :  { %7417 = vmatpush1.bf16.msra.mxu0 %v13069_v28  ;;  %v14337_v28 = vld [vmem:[#allocation24_spill] sm:$0xff] }
 0x8dd   :  { %7418 = vmatprep.subr.bf16.mxu0 %v13072_v41  ;;  %v14338_v41 = vld [vmem:[#allocation25_spill] sm:$0xff] }
 0x8de   :  { %7458 = vmatpush1.bf16.msra.mxu1 %v13075_v29  ;;  %v14339_v29 = vld [vmem:[#allocation26_spill] sm:$0xff] }
 0x8df   :  { %7459 = vmatprep.subr.bf16.mxu1 %v13078_v25  ;;  %v14340_v25 = vld [vmem:[#allocation27_spill] sm:$0xff] }
 0x8e0   :  { %7419 = vmatpush1.bf16.msra.mxu0 %v13081_v27  ;;  %v14341_v27 = vld [vmem:[#allocation28_spill] sm:$0xff] }
 0x8e1   :  { %7420 = vmatprep.subr.bf16.mxu0 %v13084_v42  ;;  %v14342_v42 = vld [vmem:[#allocation29_spill] sm:$0xff] }
 0x8e2   :  { %7460 = vmatpush1.bf16.msra.mxu1 %v13087_v36  ;;  %v14343_v36 = vld [vmem:[#allocation30_spill] sm:$0xff] }
 0x8e3   :  { %7461 = vmatprep.subr.bf16.mxu1 %v13090_v39  ;;  %v14344_v39 = vld [vmem:[#allocation31_spill] sm:$0xff] }
 0x8e4   :  { %7421 = vmatpush1.bf16.msra.mxu0 %v13093_v43  ;;  %v14345_v43 = vld [vmem:[#allocation32_spill] sm:$0xff] }
 0x8e5   :  { %7422 = vmatprep.subr.bf16.mxu0 %v13096_v45  ;;  %v14346_v45 = vld [vmem:[#allocation33_spill] sm:$0xff] }
 0x8e6   :  { %7462 = vmatpush1.bf16.msra.mxu1 %v13099_v49  ;;  %v14347_v49 = vld [vmem:[#allocation34_spill] sm:$0xff] }
 0x8e7   :  { %7463 = vmatprep.subr.bf16.mxu1 %v13102_v21  ;;  %v7026_v21 = vld [vmem:[#allocation2 + $0x38] sm:$0xff] }
 0x8e8   :  { %7423 = vmatpush1.bf16.msra.mxu0 %v13105_v51  ;;  %v14348_v51 = vld [vmem:[#allocation35_spill] sm:$0xff] }
 0x8e9   :  { %7424 = vmatprep.subr.bf16.mxu0 %v13108_v52  ;;  %v14349_v52 = vld [vmem:[#allocation36_spill] sm:$0xff] }
 0x8ea   :  { %7464 = vmatpush1.bf16.msra.mxu1 %v13111_v53  ;;  %v7027_v53 = vpack.c.bf16 %v7026_v21, %v7026_v21  ;;  %v14400_v21 = vld [vmem:[#allocation88_spill] sm:$0xff] }
 0x8eb   :  { %7465 = vmatprep.subr.bf16.mxu1 %v13114_v54  ;;  %v14350_v54 = vld [vmem:[#allocation37_spill] sm:$0xff] }
 0x8ec   :  { %7425 = vmatpush1.bf16.msra.mxu0 %v13117_v55  ;;  %v14351_v55 = vld [vmem:[#allocation38_spill] sm:$0xff] }
 0x8ed   :  { %7426 = vmatprep.subr.bf16.mxu0 %v13120_v57  ;;  %v14352_v57 = vld [vmem:[#allocation45_spill] sm:$0xff] }
 0x8ee   :  { %7466 = vmatpush1.bf16.msra.mxu1 %v13123_v58  ;;  %v14353_v58 = vld [vmem:[#allocation43_spill] sm:$0xff] }
 0x8ef   :  { %7467 = vmatprep.subr.bf16.mxu1 %v13126_v0  ;;  %v14354_v0 = vld [vmem:[#allocation47_spill] sm:$0xff] }
 0x8f0   :  { %7427 = vmatpush1.bf16.msra.mxu0 %v13129_v59  ;;  %v14355_v59 = vld [vmem:[#allocation41_spill] sm:$0xff] }
 0x8f1   :  { %7428 = vmatprep.subr.bf16.mxu0 %v13132_v60  ;;  %v14356_v60 = vld [vmem:[#allocation48_spill] sm:$0xff] }
 0x8f2   :  { %7468 = vmatpush1.bf16.msra.mxu1 %v13135_v61  ;;  %v14357_v61 = vld [vmem:[#allocation39_spill] sm:$0xff] }
 0x8f3   :  { %7469 = vmatprep.subr.bf16.mxu1 %v13138_v62  ;;  %v14358_v62 = vld [vmem:[#allocation46_spill] sm:$0xff] }
 0x8f4   :  { %7429 = vmatpush2.bf16.msra.mxu0 %v13141_v63  ;;  %v14359_v63 = vld [vmem:[#allocation40_spill] sm:$0xff] }
 0x8f5   :  { %7430 = vmatprep.subr.bf16.mxu0 %v13144_v2  ;;  %v14360_v2 = vld [vmem:[#allocation44_spill] sm:$0xff] }
 0x8f6   :  { %7470 = vmatpush2.bf16.msra.mxu1 %v13147_v3  ;;  %v14361_v3 = vld [vmem:[#allocation42_spill] sm:$0xff] }
 0x8f7   :  { %7471 = vmatprep.subr.bf16.mxu1 %v13150_v37  ;;  %v14362_v37 = vld [vmem:[#allocation50_spill] sm:$0xff] }
 0x8f8   :  { %7431 = vmatpush2.bf16.msra.mxu0 %v13153_v7  ;;  %v14363_v7 = vld [vmem:[#allocation49_spill] sm:$0xff] }
 0x8f9   :  { %7432 = vmatprep.subr.bf16.mxu0 %v14328_v20  ;;  %v14380_v20 = vld [vmem:[#allocation68_spill] sm:$0xff] }
 0x8fa   :  { %7472 = vmatpush2.bf16.msra.mxu1 %v14329_v17  ;;  %v14381_v17 = vld [vmem:[#allocation67_spill] sm:$0xff] }
 0x8fb   :  { %7473 = vmatprep.subr.bf16.mxu1 %v14330_v35  ;;  %v14382_v35 = vld [vmem:[#allocation70_spill] sm:$0xff] }
 0x8fc   :  { %7433 = vmatpush2.bf16.msra.mxu0 %v14331_v8  ;;  %v14383_v8 = vld [vmem:[#allocation69_spill] sm:$0xff] }
 0x8fd   :  { %7434 = vmatprep.subr.bf16.mxu0 %v14332_v15  ;;  %v14384_v15 = vld [vmem:[#allocation72_spill] sm:$0xff] }
 0x8fe   :  { %7474 = vmatpush2.bf16.msra.mxu1 %v14333_v16  ;;  %v14385_v16 = vld [vmem:[#allocation71_spill] sm:$0xff] }
 0x8ff   :  { %7475 = vmatprep.subr.bf16.mxu1 %v14334_v1  ;;  %v14386_v1 = vld [vmem:[#allocation74_spill] sm:$0xff] }
 0x900   :  { %7435 = vmatpush2.bf16.msra.mxu0 %v14335_v44  ;;  %v14387_v44 = vld [vmem:[#allocation73_spill] sm:$0xff] }
 0x901   :  { %7436 = vmatprep.subr.bf16.mxu0 %v14336_v31  ;;  %v14388_v31 = vld [vmem:[#allocation76_spill] sm:$0xff] }
 0x902   :  { %7476 = vmatpush2.bf16.msra.mxu1 %v14337_v28  ;;  %v14389_v28 = vld [vmem:[#allocation75_spill] sm:$0xff] }
 0x903   :  { %7477 = vmatprep.subr.bf16.mxu1 %v14338_v41  ;;  %v14390_v41 = vld [vmem:[#allocation78_spill] sm:$0xff] }
 0x904   :  { %7437 = vmatpush2.bf16.msra.mxu0 %v14339_v29  ;;  %v14391_v29 = vld [vmem:[#allocation77_spill] sm:$0xff] }
 0x905   :  { %7438 = vmatprep.subr.bf16.mxu0 %v14340_v25  ;;  %v14392_v25 = vld [vmem:[#allocation80_spill] sm:$0xff] }
 0x906   :  { %7478 = vmatpush2.bf16.msra.mxu1 %v14341_v27  ;;  %v14393_v27 = vld [vmem:[#allocation79_spill] sm:$0xff] }
 0x907   :  { %7479 = vmatprep.subr.bf16.mxu1 %v14342_v42  ;;  %v14394_v42 = vld [vmem:[#allocation82_spill] sm:$0xff] }
 0x908   :  { %7439 = vmatpush2.bf16.msra.mxu0 %v14343_v36  ;;  %v14395_v36 = vld [vmem:[#allocation81_spill] sm:$0xff] }
 0x909   :  { %7440 = vmatprep.subr.bf16.mxu0 %v14344_v39  ;;  %v14396_v39 = vld [vmem:[#allocation84_spill] sm:$0xff] }
 0x90a   :  { %7480 = vmatpush2.bf16.msra.mxu1 %v14345_v43  ;;  %v14397_v43 = vld [vmem:[#allocation83_spill] sm:$0xff] }
 0x90b   :  { %7481 = vmatprep.subr.bf16.mxu1 %v14346_v45  ;;  %v14398_v45 = vld [vmem:[#allocation86_spill] sm:$0xff] }
 0x90c   :  { %7441 = vmatpush2.bf16.msra.mxu0 %v14347_v49  ;;  %v14399_v49 = vld [vmem:[#allocation85_spill] sm:$0xff] }
 0x90d   :  { %7442 = vmatprep.subr.bf16.mxu0 %v14348_v51  ;;  %v14401_v51 = vld [vmem:[#allocation87_spill] sm:$0xff] }
 0x90e   :  { %7482 = vmatpush2.bf16.msra.mxu1 %v14349_v52  ;;  %v14402_v52 = vld [vmem:[#allocation90_spill] sm:$0xff] }
 0x90f   :  { %7483 = vmatprep.subr.bf16.mxu1 %v14350_v54  ;;  %v14404_v54 = vld [vmem:[#allocation89_spill] sm:$0xff] }
 0x910   :  { %7443 = vmatpush2.bf16.msra.mxu0 %v14351_v55  ;;  %v14405_v55 = vld [vmem:[#allocation91_spill] sm:$0xff] }
 0x911   :  { %7904 = vmatprep.subr.bf16.mxu0 %v14352_v57  ;;  %v14406_v57 = vld [vmem:[#allocation94_spill] sm:$0xff] }
 0x912   :  { %7484 = vmatpush2.bf16.msra.mxu1 %v14353_v58  ;;  %v14407_v58 = vld [vmem:[#allocation93_spill] sm:$0xff] }
 0x913   :  { %7445 = vmatmul.mubr.bf16.vlgmr.msra.gmra.mxu0 %v7027_v53  ;;  %7945 = vmatprep.subr.bf16.mxu1 %v14354_v0  ;;  %v14408_v0 = vld [vmem:[#allocation96_spill] sm:$0xff] }
 0x914   :  { %7905 = vmatpush1.bf16.msra.mxu0 %v14355_v59  ;;  %v14409_v59 = vld [vmem:[#allocation95_spill] sm:$0xff] }
 0x915   :  { %7486 = vmatmul.mubr.bf16.vlgmr.msra.gmra.mxu1 %v7027_v53  ;;  %7906 = vmatprep.subr.bf16.mxu0 %v14356_v60  ;;  %v14403_v53 = vld [vmem:[#allocation92_spill] sm:$0xff]  ;;  %v14410_v60 = vld [vmem:[#allocation97_spill] sm:$0xff] }
 0x916   :  { %7946 = vmatpush1.bf16.msra.mxu1 %v14357_v61  ;;  %v14411_v61 = vld [vmem:[#allocation98_spill] sm:$0xff] }
 0x917   :  { %7947 = vmatprep.subr.bf16.mxu1 %v14358_v62  ;;  %v14412_v62 = vld [vmem:[#allocation100_spill] sm:$0xff] }
 0x918   :  { %7907 = vmatpush1.bf16.msra.mxu0 %v14359_v63  ;;  %v14413_v63 = vld [vmem:[#allocation99_spill] sm:$0xff] }
 0x919   :  { %7908 = vmatprep.subr.bf16.mxu0 %v14360_v2  ;;  %v14414_v2 = vld [vmem:[#allocation101_spill] sm:$0xff] }
 0x91a   :  { %7948 = vmatpush1.bf16.msra.mxu1 %v14361_v3  ;;  %v14415_v3 = vld [vmem:[#allocation102_spill] sm:$0xff] }
 0x91b   :  { %7949 = vmatprep.subr.bf16.mxu1 %v14362_v37  ;;  %v14416_v37 = vld [vmem:[#allocation103_spill] sm:$0xff] }
 0x91c   :  { %7909 = vmatpush1.bf16.msra.mxu0 %v14363_v7  ;;  %v11004_v7 = vld [vmem:[#allocation5 + $0xe4] ss:$16 sps:$4 sm:$0xff]  }
 0x91d   :  { %7910 = vmatprep.subr.bf16.mxu0 %v14364_v5 }
 0x91e   :  { %7950 = vmatpush1.bf16.msra.mxu1 %v14365_v23 }
 0x91f   :  { %7951 = vmatprep.subr.bf16.mxu1 %v14366_v9 }
 0x920   :  { %7911 = vmatpush1.bf16.msra.mxu0 %v14367_v10 }
 0x921   :  { %7912 = vmatprep.subr.bf16.mxu0 %v14368_v6 }
 0x922   :  { %7952 = vmatpush1.bf16.msra.mxu1 %v14369_v47 }
 0x923   :  { %7953 = vmatprep.subr.bf16.mxu1 %v14370_v18 }
 0x924   :  { %7913 = vmatpush1.bf16.msra.mxu0 %v14371_v46 }
 0x925   :  { %7914 = vmatprep.subr.bf16.mxu0 %v14372_v30 }
 0x926   :  { %7954 = vmatpush1.bf16.msra.mxu1 %v14373_v14 }
 0x927   :  { %7955 = vmatprep.subr.bf16.mxu1 %v14374_v32 }
 0x928   :  { %7915 = vmatpush1.bf16.msra.mxu0 %v14375_v4 }
 0x929   :  { %7916 = vmatprep.subr.bf16.mxu0 %v14376_v40  ;;  %v11016_v40 = vld [vmem:[#allocation5 + $0xec] ss:$16 sps:$4 sm:$0xff]  }
 0x92a   :  { %7956 = vmatpush1.bf16.msra.mxu1 %v14377_v19 }
 0x92b   :  { %7957 = vmatprep.subr.bf16.mxu1 %v14378_v56 }
 0x92c   :  { %7917 = vmatpush1.bf16.msra.mxu0 %v14379_v38 }
 0x92d   :  { %7918 = vmatprep.subr.bf16.mxu0 %v14380_v20 }
 0x92e   :  { %7958 = vmatpush1.bf16.msra.mxu1 %v14381_v17 }
 0x92f   :  { %7959 = vmatprep.subr.bf16.mxu1 %v14382_v35 }
 0x930   :  { %7919 = vmatpush1.bf16.msra.mxu0 %v14383_v8 }
 0x931   :  { %7920 = vmatprep.subr.bf16.mxu0 %v14384_v15 }
 0x932   :  { %7960 = vmatpush1.bf16.msra.mxu1 %v14385_v16 }
 0x933   :  { %7961 = vmatprep.subr.bf16.mxu1 %v14386_v1 }
 0x934   :  { %7921 = vmatpush2.bf16.msra.mxu0 %v14387_v44 }
 0x935   :  { %7922 = vmatprep.subr.bf16.mxu0 %v14388_v31 }
 0x936   :  { %7962 = vmatpush2.bf16.msra.mxu1 %v14389_v28 }
 0x937   :  { %7963 = vmatprep.subr.bf16.mxu1 %v14390_v41 }
 0x938   :  { %7923 = vmatpush2.bf16.msra.mxu0 %v14391_v29 }
 0x939   :  { %7924 = vmatprep.subr.bf16.mxu0 %v14392_v25 }
 0x93a   :  { %7964 = vmatpush2.bf16.msra.mxu1 %v14393_v27 }
 0x93b   :  { %7965 = vmatprep.subr.bf16.mxu1 %v14394_v42 }
 0x93c   :  { %7925 = vmatpush2.bf16.msra.mxu0 %v14395_v36 }
 0x93d   :  { %7926 = vmatprep.subr.bf16.mxu0 %v14396_v39 }
 0x93e   :  { %7966 = vmatpush2.bf16.msra.mxu1 %v14397_v43 }
 0x93f   :  { %7967 = vmatprep.subr.bf16.mxu1 %v14398_v45 }
 0x940   :  { %7927 = vmatpush2.bf16.msra.mxu0 %v14399_v49 }
 0x941   :  { %7928 = vmatprep.subr.bf16.mxu0 %v14400_v21 }
 0x942   :  { %7968 = vmatpush2.bf16.msra.mxu1 %v14401_v51 }
 0x943   :  { %7969 = vmatprep.subr.bf16.mxu1 %v14402_v52 }
 0x944   :  { %7929 = vmatpush2.bf16.msra.mxu0 %v14403_v53 }
 0x945   :  { %7930 = vmatprep.subr.bf16.mxu0 %v14404_v54 }
 0x946   :  { %7970 = vmatpush2.bf16.msra.mxu1 %v14405_v55 }
 0x947   :  { %7971 = vmatprep.subr.bf16.mxu1 %v14406_v57 }
 0x948   :  { %7931 = vmatpush2.bf16.msra.mxu0 %v14407_v58 }
 0x949   :  { %7932 = vmatprep.subr.bf16.mxu0 %v14408_v0 }
 0x94a   :  { %7972 = vmatpush2.bf16.msra.mxu1 %v14409_v59 }
 0x94b   :  { %7973 = vmatprep.subr.bf16.mxu1 %v14410_v60 }
 0x94c   :  { %7933 = vmatpush2.bf16.msra.mxu0 %v14411_v61 }
 0x94d   :  { %7934 = vmatprep.subr.bf16.mxu0 %v14412_v62 }
 0x94e   :  { %7974 = vmatpush2.bf16.msra.mxu1 %v14413_v63 }
 0x94f   :  { %7975 = vmatprep.subr.bf16.mxu1 %v14414_v2 }
 0x950   :  { %7935 = vmatpush2.bf16.msra.mxu0 %v14415_v3 }
 0x951   :  { %8399 = vmatprep.subr.bf16.mxu0 %v11004_v7 }
 0x952   :  { %7976 = vmatpush2.bf16.msra.mxu1 %v14416_v37 }
 0x953   :  { %8440 = vmatprep.subr.bf16.mxu1 %v11016_v40  ;;  %v11005_v40 = vld [vmem:[#allocation5 + $0xc0] ss:$16 sps:$4 sm:$0xff]  }
 0x993   :  { %v6951_v5 = vpop.f32.mrf.mxu0  ;;  %v6992_v23 = vpop.f32.mrf.mxu1 }
 0x994   :  { %v6952_v9 = vadd.f32 %v6951_v5, %v11928_v33  ;;  %v6993_v20 = vadd.f32 %v6992_v23, %v11946_v50 }
 0x995   :  { %v6953_v10 = vpop.f32.mrf.mxu0  ;;  %v6994_v6 = vpop.f32.mrf.mxu1 }
 0x996   :  { %v9953_v47 = vmul.f32 -1.442695, %v6952_v9  ;;  %v6954_v18 = vadd.f32 %v6953_v10, %v11932_v34  ;;  %v6995_v19 = vadd.f32 %v6994_v6, %v11940_v48 }
 0x997   :  { %v6955_v46 = vpop.f32.mrf.mxu0  ;;  %v6996_v30 = vpop.f32.mrf.mxu1 }
 0x998   :  { %11402 = vpow2.f32 %v9953_v47  ;;  %v9954_v14 = vmul.f32 -1.442695, %v6954_v18  ;;  %v9955_v56 = vmul.f32 -1.442695, %v6995_v19  ;;  %v11002_v46 = vld [vmem:[#allocation5 + $0xe0] ss:$16 sps:$4 sm:$0xff]  }
 0x999   :  { %v6956_v32 = vpop.f32.mrf.mxu0  ;;  %v6997_v4 = vpop.f32.mrf.mxu1  ;;  %v11020_v19 = vld [vmem:[#allocation5 + $0xc8] ss:$16 sps:$4 sm:$0xff]  }
 0x99a   :  { %11404 = vpow2.f32 %v9954_v14  ;;  %v11007_v14 = vld [vmem:[#allocation5 + $0xc4] ss:$16 sps:$4 sm:$0xff]   ;;  %v11014_v32 = vld [vmem:[#allocation5 + $0xe8] ss:$16 sps:$4 sm:$0xff]   ;;  %v11022_v4 = vld [vmem:[#allocation5 + $0xcc] ss:$16 sps:$4 sm:$0xff]  }
 0x99b   :  { %11406 = vpow2.f32 %v9955_v56  ;;  %v11028_v56 = vld [vmem:[#allocation5 + $0xac] ss:$16 sps:$4 sm:$0xff]  }
 0x9a5   :  { %v11403_v38 = vpop.eup %11402 }
 0x9a6   :  { %v7002_v17 = vadd.f32 1.0, %v11403_v38  ;;  %v11008_v38 = vld [vmem:[#allocation5 + $0xa0] ss:$16 sps:$4 sm:$0xff]  }
 0x9a7   :  { %v11405_v35 = vpop.eup %11404 }
 0x9a8   :  { %11408 = vrcp.f32 %v7002_v17  ;;  %v7008_v8 = vadd.f32 1.0, %v11405_v35  ;;  %v11407_v15 = vpop.eup %11406  ;;  %v11026_v17 = vld [vmem:[#allocation5 + $0xa8] ss:$16 sps:$4 sm:$0xff]   ;;  %v11034_v35 = vld [vmem:[#allocation5 + $0x8c] ss:$16 sps:$4 sm:$0xff]  }
 0x9a9   :  { %11410 = vtanh.f32 %v6993_v20  ;;  %v7015_v31 = vadd.f32 1.0, %v11407_v15  ;;  %v11013_v20 = vld [vmem:[#allocation5 + $0x84] ss:$16 sps:$4 sm:$0xff]  }
 0x9aa   :  { %11412 = vrcp.f32 %v7008_v8  ;;  %v11011_v8 = vld [vmem:[#allocation5 + $0x80] ss:$16 sps:$4 sm:$0xff]   ;;  %v11019_v15 = vld [vmem:[#allocation5 + $0x64] ss:$16 sps:$4 sm:$0xff]  }
 0x9ab   :  { %11414 = vrcp.f32 %v7015_v31  ;;  %v11025_v31 = vld [vmem:[#allocation5 + $0x44] ss:$16 sps:$4 sm:$0xff]  }
 0x9b5   :  { %v11409_v16 = vpop.eup %11408 }
 0x9b6   :  { %v11411_v1 = vpop.eup %11410 }
 0x9b7   :  { %v11413_v44 = vpop.eup %11412  ;;  %v7019_v28 = vmul.f32 %v11411_v1, %v11409_v16  ;;  %v11032_v16 = vld [vmem:[#allocation5 + $0x88] ss:$16 sps:$4 sm:$0xff]   ;;  %v11040_v1 = vld [vmem:[#allocation5 + $0x6c] ss:$16 sps:$4 sm:$0xff]  }
 0x9b8   :  { %v7018_v41 = vmul.f32 %v11413_v44, %v13433_v13  ;;  %v11415_v25 = vpop.eup %11414  ;;  %v11017_v44 = vld [vmem:[#allocation5 + $0x60] ss:$16 sps:$4 sm:$0xff]  }
 0x9ba   :  { %v13575_v29 = vadd.f32 %v7019_v28, %v7018_v41  ;;  %v11038_v28 = vld [vmem:[#allocation5 + $0x68] ss:$16 sps:$4 sm:$0xff]   ;;  %v11046_v41 = vld [vmem:[#allocation5 + $0x4c] ss:$16 sps:$4 sm:$0xff]  }
 0x9bc   :  { %11416 = vtanh.f32 %v13575_v29 }
 0x9c9   :  { %v11417_v27 = vpop.eup %11416 }
 0x9ca   :  { %v7022_v42 = vmul.f32 %v11417_v27, %v11415_v25  ;;  %v11023_v25 = vld [vmem:[#allocation5 + $0x40] ss:$16 sps:$4 sm:$0xff]   ;;  %v11031_v27 = vld [vmem:[#allocation5 + $0x24] ss:$16 sps:$4 sm:$0xff]  }
 0x9cc   :  { %7024 = vst [vmem:[#allocation10 + $0x30] sm:$0xff] %v7022_v42  ;;  %v7519_v36 = vpack.c.bf16 %v7022_v42, %v7022_v42  ;;  %v11044_v42 = vld [vmem:[#allocation5 + $0x48] ss:$16 sps:$4 sm:$0xff]  }
 0x9ce   :  { %7936 = vmatprep.mubr.bf16.mxu0 %v7519_v36  ;;  %7977 = vmatprep.mubr.bf16.mxu1 %v7519_v36  ;;  %v11052_v36 = vld [vmem:[#allocation5 + $0x2c] ss:$16 sps:$4 sm:$0xff]  }
 0x9d3   :  { %v7446_v39 = vpop.f32.mrf.mxu0 }
 0x9d4   :  { %v7447_v43 = vadd.f32 %v7446_v39, %v11864_v11  ;;  %v11029_v39 = vld [vmem:[#allocation5 + $0x20] ss:$16 sps:$4 sm:$0xff]  }
 0x9d5   :  { %v7448_v45 = vpop.f32.mrf.mxu0  ;;  %v7487_v49 = vpop.f32.mrf.mxu1 }
 0x9d6   :  { %v10020_v21 = vmul.f32 -1.442695, %v7447_v43  ;;  %v7449_v13 = vadd.f32 %v7448_v45, %v11868_v12  ;;  %v7488_v0 = vadd.f32 %v7487_v49, %v11880_v26  ;;  %v11037_v43 = vld [vmem:[#allocation5 + $0x4] ss:$16 sps:$4 sm:$0xff]   ;;  %v11050_v45 = vld [vmem:[#allocation5 + $0x28] ss:$16 sps:$4 sm:$0xff]  }
 0x9d7   :  { %v7450_v51 = vpop.f32.mrf.mxu0  ;;  %v7489_v52 = vpop.f32.mrf.mxu1  ;;  %v11058_v49 = vld [vmem:[#allocation5 + $0xc] ss:$16 sps:$4 sm:$0xff]  }
 0x9d8   :  { %11418 = vpow2.f32 %v10020_v21  ;;  %v10021_v53 = vmul.f32 -1.442695, %v7449_v13  ;;  %v7490_v58 = vadd.f32 %v7489_v52, %v11876_v24  ;;  %v11035_v21 = vld [vmem:[#allocation5] ss:$16 sps:$4 sm:$0xff]   ;;  %v11043_v13 = vld [vmem:[#allocation5 + $0x1e4] ss:$16 sps:$4 sm:$0xff]  }
 0x9d9   :  { %v7451_v54 = vpop.f32.mrf.mxu0  ;;  %v7491_v55 = vpop.f32.mrf.mxu1  ;;  %v11056_v51 = vld [vmem:[#allocation5 + $0x8] ss:$16 sps:$4 sm:$0xff]   ;;  %v11064_v52 = vld [vmem:[#allocation5 + $0x1ec] ss:$16 sps:$4 sm:$0xff]  }
 0x9da   :  { %11420 = vpow2.f32 %v10021_v53  ;;  %v10022_v59 = vmul.f32 -1.442695, %v7490_v58  ;;  %v11041_v53 = vld [vmem:[#allocation5 + $0x1e0] ss:$16 sps:$4 sm:$0xff]   ;;  %v11049_v54 = vld [vmem:[#allocation5 + $0x1c4] ss:$16 sps:$4 sm:$0xff]  }
 0x9db   :  { %v7492_v57 = vpop.f32.mrf.mxu1  ;;  %11422 = vtanh.f32 %v7488_v0  ;;  %v11062_v55 = vld [vmem:[#allocation5 + $0x1e8] ss:$16 sps:$4 sm:$0xff]   ;;  %v11047_v58 = vld [vmem:[#allocation5 + $0x1c0] ss:$16 sps:$4 sm:$0xff]   ;;  %v11055_v0 = vld [vmem:[#allocation5 + $0x1a4] ss:$16 sps:$4 sm:$0xff]  }
 0x9dc   :  { %11424 = vpow2.f32 %v10022_v59  ;;  %v11070_v57 = vld [vmem:[#allocation5 + $0x1cc] ss:$16 sps:$4 sm:$0xff]   ;;  %v11068_v59 = vld [vmem:[#allocation5 + $0x1c8] ss:$16 sps:$4 sm:$0xff]  }
 0x9e5   :  { %v11419_v60 = vpop.eup %11418 }
 0x9e6   :  { %v7497_v61 = vadd.f32 1.0, %v11419_v60  ;;  %v11076_v60 = vld [vmem:[#allocation5 + $0x1ac] ss:$16 sps:$4 sm:$0xff]  }
 0x9e7   :  { %v11421_v62 = vpop.eup %11420 }
 0x9e8   :  { %11426 = vrcp.f32 %v7497_v61  ;;  %v7503_v63 = vadd.f32 1.0, %v11421_v62  ;;  %v11423_v2 = vpop.eup %11422  ;;  %v11053_v61 = vld [vmem:[#allocation5 + $0x1a0] ss:$16 sps:$4 sm:$0xff]   ;;  %v11061_v62 = vld [vmem:[#allocation5 + $0x184] ss:$16 sps:$4 sm:$0xff]  }
 0x9e9   :  { %v11425_v3 = vpop.eup %11424 }
 0x9ea   :  { %11428 = vrcp.f32 %v7503_v63  ;;  %v7510_v5 = vadd.f32 1.0, %v11425_v3  ;;  %v11074_v63 = vld [vmem:[#allocation5 + $0x1a8] ss:$16 sps:$4 sm:$0xff]   ;;  %v11059_v3 = vld [vmem:[#allocation5 + $0x180] ss:$16 sps:$4 sm:$0xff]  }
 0x9ec   :  { %11430 = vrcp.f32 %v7510_v5  ;;  %v11088_v5 = vld [vmem:[#allocation5 + $0x16c] ss:$16 sps:$4 sm:$0xff]  }
 0x9f5   :  { %v11427_v37 = vpop.eup %11426 }
 0x9f6   :  { %v7514_v9 = vmul.f32 %v11427_v37, %v11423_v2  ;;  %v11082_v2 = vld [vmem:[#allocation5 + $0x18c] ss:$16 sps:$4 sm:$0xff]   ;;  %v11067_v37 = vld [vmem:[#allocation5 + $0x164] ss:$16 sps:$4 sm:$0xff]  }
 0x9f7   :  { %v11429_v7 = vpop.eup %11428 }
 0x9f8   :  { %v7513_v23 = vmul.f32 %v11429_v7, %v13441_v22  ;;  %v11010_v22 = vld [vmem:[#allocation5 + $0xa4] ss:$16 sps:$4 sm:$0xff]   ;;  %v11080_v7 = vld [vmem:[#allocation5 + $0x188] ss:$16 sps:$4 sm:$0xff]  }
 0x9f9   :  { %v11431_v6 = vpop.eup %11430 }
 0x9fa   :  { %v13583_v10 = vadd.f32 %v7514_v9, %v7513_v23  ;;  %v11065_v23 = vld [vmem:[#allocation5 + $0x160] ss:$16 sps:$4 sm:$0xff]   ;;  %v11073_v9 = vld [vmem:[#allocation5 + $0x144] ss:$16 sps:$4 sm:$0xff]  }
 0x9fc   :  { %11432 = vtanh.f32 %v13583_v10 }
 0xa09   :  { %v11433_v47 = vpop.eup %11432 }
 0xa0a   :  { %v7517_v18 = vmul.f32 %v11433_v47, %v11431_v6  ;;  %v11086_v6 = vld [vmem:[#allocation5 + $0x168] ss:$16 sps:$4 sm:$0xff]   ;;  %v11091_v47 = vld [vmem:[#allocation5 + $0x14c] ss:$16 sps:$4 sm:$0xff]  }
 0xa0c   :  { %v7518_v30 = vpack.c.bf16 %v7517_v18, %v7517_v18  ;;  %v11071_v18 = vld [vmem:[#allocation5 + $0x140] ss:$16 sps:$4 sm:$0xff]  }
 0xa0e   :  { %7937 = vmatmul.mubr.bf16.vlgmr.msra.gmra.mxu0 %v7518_v30  ;;  %7978 = vmatmul.mubr.bf16.vlgmr.msra.gmra.mxu1 %v7518_v30 }
 0xa0f   :  { %8400 = vmatpush1.bf16.msra.mxu0 %v11002_v46  ;;  %8431 = vmatprep.mubr.bf16.mxu0 %v7518_v30  ;;  %v11079_v46 = vld [vmem:[#allocation5 + $0x124] ss:$16 sps:$4 sm:$0xff]  }
 0xa10   :  { %8472 = vmatprep.mubr.bf16.mxu1 %v7518_v30  ;;  %8401 = vmatprep.subr.bf16.mxu0 %v11007_v14  ;;  %v11089_v30 = vld [vmem:[#allocation5 + $0x148] ss:$16 sps:$4 sm:$0xff]   ;;  %v11094_v14 = vld [vmem:[#allocation5 + $0x12c] ss:$16 sps:$4 sm:$0xff]  }
 0xa11   :  { %8441 = vmatpush1.bf16.msra.mxu1 %v11014_v32  ;;  %v11077_v32 = vld [vmem:[#allocation5 + $0x120] ss:$16 sps:$4 sm:$0xff]  }
 0xa12   :  { %8442 = vmatprep.subr.bf16.mxu1 %v11022_v4  ;;  %v11085_v4 = vld [vmem:[#allocation5 + $0x104] ss:$16 sps:$4 sm:$0xff]  }
 0xa13   :  { %8402 = vmatpush1.bf16.msra.mxu0 %v11005_v40  ;;  %v11092_v40 = vld [vmem:[#allocation5 + $0x128] ss:$16 sps:$4 sm:$0xff]  }
 0xa14   :  { %8403 = vmatprep.subr.bf16.mxu0 %v11010_v22  ;;  %v11097_v22 = vld [vmem:[#allocation5 + $0x10c] ss:$16 sps:$4 sm:$0xff]  }
 0xa15   :  { %8443 = vmatpush1.bf16.msra.mxu1 %v11020_v19  ;;  %v11083_v19 = vld [vmem:[#allocation5 + $0x100] ss:$16 sps:$4 sm:$0xff]  }
 0xa16   :  { %8444 = vmatprep.subr.bf16.mxu1 %v11028_v56  ;;  %v8013_v56 = vld [vmem:[#allocation2 + $0x40] sm:$0xff] }
 0xa17   :  { %8404 = vmatpush1.bf16.msra.mxu0 %v11008_v38  ;;  %v11095_v38 = vld [vmem:[#allocation5 + $0x108] ss:$16 sps:$4 sm:$0xff]  }
 0xa18   :  { %8405 = vmatprep.subr.bf16.mxu0 %v11013_v20  ;;  %v8014_v20 = vpack.c.bf16 %v8013_v56, %v8013_v56  ;;  %v11175_v56 = vld [vmem:[#allocation7 + $0x16c] ss:$16 sps:$4 sm:$0xff]  }
 0xa19   :  { %8445 = vmatpush1.bf16.msra.mxu1 %v11026_v17  ;;  %v11098_v17 = vld [vmem:[#allocation7 + $0xe0] ss:$16 sps:$4 sm:$0xff]  }
 0xa1a   :  { %8446 = vmatprep.subr.bf16.mxu1 %v11034_v35  ;;  %v11100_v35 = vld [vmem:[#allocation7 + $0xe4] ss:$16 sps:$4 sm:$0xff]  }
 0xa1b   :  { %8406 = vmatpush1.bf16.msra.mxu0 %v11011_v8  ;;  %v11101_v8 = vld [vmem:[#allocation7 + $0xe8] ss:$16 sps:$4 sm:$0xff]  }
 0xa1c   :  { %8407 = vmatprep.subr.bf16.mxu0 %v11019_v15  ;;  %v11103_v15 = vld [vmem:[#allocation7 + $0xec] ss:$16 sps:$4 sm:$0xff]  }
 0xa1d   :  { %8447 = vmatpush1.bf16.msra.mxu1 %v11032_v16  ;;  %v11104_v16 = vld [vmem:[#allocation7 + $0xc0] ss:$16 sps:$4 sm:$0xff]  }
 0xa1e   :  { %8448 = vmatprep.subr.bf16.mxu1 %v11040_v1  ;;  %v11106_v1 = vld [vmem:[#allocation7 + $0xc4] ss:$16 sps:$4 sm:$0xff]  }
 0xa1f   :  { %8408 = vmatpush1.bf16.msra.mxu0 %v11017_v44  ;;  %v11107_v44 = vld [vmem:[#allocation7 + $0xc8] ss:$16 sps:$4 sm:$0xff]  }
 0xa20   :  { %8409 = vmatprep.subr.bf16.mxu0 %v11025_v31  ;;  %v11109_v31 = vld [vmem:[#allocation7 + $0xcc] ss:$16 sps:$4 sm:$0xff]  }
 0xa21   :  { %8449 = vmatpush1.bf16.msra.mxu1 %v11038_v28  ;;  %v11112_v28 = vld [vmem:[#allocation7 + $0xa4] ss:$16 sps:$4 sm:$0xff]  }
 0xa22   :  { %8450 = vmatprep.subr.bf16.mxu1 %v11046_v41  ;;  %v11115_v41 = vld [vmem:[#allocation7 + $0xac] ss:$16 sps:$4 sm:$0xff]  }
 0xa23   :  { %8410 = vmatpush1.bf16.msra.mxu0 %v11023_v25  ;;  %v11110_v25 = vld [vmem:[#allocation7 + $0xa0] ss:$16 sps:$4 sm:$0xff]  }
 0xa24   :  { %8411 = vmatprep.subr.bf16.mxu0 %v11031_v27  ;;  %v11113_v27 = vld [vmem:[#allocation7 + $0xa8] ss:$16 sps:$4 sm:$0xff]  }
 0xa25   :  { %8451 = vmatpush1.bf16.msra.mxu1 %v11044_v42  ;;  %v11118_v42 = vld [vmem:[#allocation7 + $0x84] ss:$16 sps:$4 sm:$0xff]  }
 0xa26   :  { %8452 = vmatprep.subr.bf16.mxu1 %v11052_v36  ;;  %v11121_v36 = vld [vmem:[#allocation7 + $0x8c] ss:$16 sps:$4 sm:$0xff]  }
 0xa27   :  { %8412 = vmatpush1.bf16.msra.mxu0 %v11029_v39  ;;  %v11116_v39 = vld [vmem:[#allocation7 + $0x80] ss:$16 sps:$4 sm:$0xff]  }
 0xa28   :  { %8413 = vmatprep.subr.bf16.mxu0 %v11037_v43  ;;  %v11119_v43 = vld [vmem:[#allocation7 + $0x88] ss:$16 sps:$4 sm:$0xff]  }
 0xa29   :  { %8453 = vmatpush1.bf16.msra.mxu1 %v11050_v45  ;;  %v11124_v45 = vld [vmem:[#allocation7 + $0x64] ss:$16 sps:$4 sm:$0xff]  }
 0xa2a   :  { %8454 = vmatprep.subr.bf16.mxu1 %v11058_v49  ;;  %v11127_v49 = vld [vmem:[#allocation7 + $0x6c] ss:$16 sps:$4 sm:$0xff]  }
 0xa2b   :  { %8414 = vmatpush1.bf16.msra.mxu0 %v11035_v21  ;;  %v11122_v21 = vld [vmem:[#allocation7 + $0x60] ss:$16 sps:$4 sm:$0xff]  }
 0xa2c   :  { %8415 = vmatprep.subr.bf16.mxu0 %v11043_v13  ;;  %v11125_v13 = vld [vmem:[#allocation7 + $0x68] ss:$16 sps:$4 sm:$0xff]  }
 0xa2d   :  { %8455 = vmatpush1.bf16.msra.mxu1 %v11056_v51  ;;  %v11130_v51 = vld [vmem:[#allocation7 + $0x44] ss:$16 sps:$4 sm:$0xff]  }
 0xa2e   :  { %8456 = vmatprep.subr.bf16.mxu1 %v11064_v52  ;;  %v11133_v52 = vld [vmem:[#allocation7 + $0x4c] ss:$16 sps:$4 sm:$0xff]  }
 0xa2f   :  { %8416 = vmatpush2.bf16.msra.mxu0 %v11041_v53  ;;  %v11128_v53 = vld [vmem:[#allocation7 + $0x40] ss:$16 sps:$4 sm:$0xff]  }
 0xa30   :  { %8417 = vmatprep.subr.bf16.mxu0 %v11049_v54  ;;  %v11131_v54 = vld [vmem:[#allocation7 + $0x48] ss:$16 sps:$4 sm:$0xff]  }
 0xa31   :  { %8457 = vmatpush2.bf16.msra.mxu1 %v11062_v55  ;;  %v11136_v55 = vld [vmem:[#allocation7 + $0x24] ss:$16 sps:$4 sm:$0xff]  }
 0xa32   :  { %8458 = vmatprep.subr.bf16.mxu1 %v11070_v57  ;;  %v11139_v57 = vld [vmem:[#allocation7 + $0x2c] ss:$16 sps:$4 sm:$0xff]  }
 0xa33   :  { %8418 = vmatpush2.bf16.msra.mxu0 %v11047_v58  ;;  %v11134_v58 = vld [vmem:[#allocation7 + $0x20] ss:$16 sps:$4 sm:$0xff]  }
 0xa34   :  { %8419 = vmatprep.subr.bf16.mxu0 %v11055_v0  ;;  %v11137_v0 = vld [vmem:[#allocation7 + $0x28] ss:$16 sps:$4 sm:$0xff]  }
 0xa35   :  { %8459 = vmatpush2.bf16.msra.mxu1 %v11068_v59  ;;  %v11142_v59 = vld [vmem:[#allocation7 + $0x4] ss:$16 sps:$4 sm:$0xff]  }
 0xa36   :  { %8460 = vmatprep.subr.bf16.mxu1 %v11076_v60  ;;  %v11145_v60 = vld [vmem:[#allocation7 + $0xc] ss:$16 sps:$4 sm:$0xff]  }
 0xa37   :  { %8420 = vmatpush2.bf16.msra.mxu0 %v11053_v61  ;;  %v11140_v61 = vld [vmem:[#allocation7] ss:$16 sps:$4 sm:$0xff]  }
 0xa38   :  { %8421 = vmatprep.subr.bf16.mxu0 %v11061_v62  ;;  %v11143_v62 = vld [vmem:[#allocation7 + $0x8] ss:$16 sps:$4 sm:$0xff]  }
 0xa39   :  { %8461 = vmatpush2.bf16.msra.mxu1 %v11074_v63  ;;  %v11148_v63 = vld [vmem:[#allocation7 + $0x1e4] ss:$16 sps:$4 sm:$0xff]  }
 0xa3a   :  { %8462 = vmatprep.subr.bf16.mxu1 %v11082_v2  ;;  %v11151_v2 = vld [vmem:[#allocation7 + $0x1ec] ss:$16 sps:$4 sm:$0xff]  }
 0xa3b   :  { %8422 = vmatpush2.bf16.msra.mxu0 %v11059_v3  ;;  %v11146_v3 = vld [vmem:[#allocation7 + $0x1e0] ss:$16 sps:$4 sm:$0xff]  }
 0xa3c   :  { %8423 = vmatprep.subr.bf16.mxu0 %v11067_v37  ;;  %v11149_v37 = vld [vmem:[#allocation7 + $0x1e8] ss:$16 sps:$4 sm:$0xff]  }
 0xa3d   :  { %8463 = vmatpush2.bf16.msra.mxu1 %v11080_v7  ;;  %v11154_v7 = vld [vmem:[#allocation7 + $0x1c4] ss:$16 sps:$4 sm:$0xff]  }
 0xa3e   :  { %8464 = vmatprep.subr.bf16.mxu1 %v11088_v5  ;;  %v11157_v5 = vld [vmem:[#allocation7 + $0x1cc] ss:$16 sps:$4 sm:$0xff]  }
 0xa3f   :  { %8424 = vmatpush2.bf16.msra.mxu0 %v11065_v23  ;;  %v11152_v23 = vld [vmem:[#allocation7 + $0x1c0] ss:$16 sps:$4 sm:$0xff]  }
 0xa40   :  { %8425 = vmatprep.subr.bf16.mxu0 %v11073_v9  ;;  %v11155_v9 = vld [vmem:[#allocation7 + $0x1c8] ss:$16 sps:$4 sm:$0xff]  }
 0xa41   :  { %8465 = vmatpush2.bf16.msra.mxu1 %v11086_v6  ;;  %v11160_v6 = vld [vmem:[#allocation7 + $0x1a4] ss:$16 sps:$4 sm:$0xff]  }
 0xa42   :  { %8466 = vmatprep.subr.bf16.mxu1 %v11091_v47  ;;  %v11163_v47 = vld [vmem:[#allocation7 + $0x1ac] ss:$16 sps:$4 sm:$0xff]  }
 0xa43   :  { %8426 = vmatpush2.bf16.msra.mxu0 %v11071_v18  ;;  %v11158_v18 = vld [vmem:[#allocation7 + $0x1a0] ss:$16 sps:$4 sm:$0xff]  }
 0xa44   :  { %8427 = vmatprep.subr.bf16.mxu0 %v11079_v46  ;;  %v11161_v46 = vld [vmem:[#allocation7 + $0x1a8] ss:$16 sps:$4 sm:$0xff]  }
 0xa45   :  { %8467 = vmatpush2.bf16.msra.mxu1 %v11089_v30  ;;  %v11166_v30 = vld [vmem:[#allocation7 + $0x184] ss:$16 sps:$4 sm:$0xff]  }
 0xa46   :  { %8468 = vmatprep.subr.bf16.mxu1 %v11094_v14  ;;  %v11169_v14 = vld [vmem:[#allocation7 + $0x18c] ss:$16 sps:$4 sm:$0xff]  }
 0xa47   :  { %8428 = vmatpush2.bf16.msra.mxu0 %v11077_v32  ;;  %v11164_v32 = vld [vmem:[#allocation7 + $0x180] ss:$16 sps:$4 sm:$0xff]  }
 0xa48   :  { %8429 = vmatprep.subr.bf16.mxu0 %v11085_v4  ;;  %v11167_v4 = vld [vmem:[#allocation7 + $0x188] ss:$16 sps:$4 sm:$0xff]  }
 0xa49   :  { %8469 = vmatpush2.bf16.msra.mxu1 %v11092_v40  ;;  %v11170_v40 = vld [vmem:[#allocation7 + $0x160] ss:$16 sps:$4 sm:$0xff]  }
 0xa4a   :  { %8470 = vmatprep.subr.bf16.mxu1 %v11097_v22  ;;  %v11172_v22 = vld [vmem:[#allocation7 + $0x164] ss:$16 sps:$4 sm:$0xff]  }
 0xa4b   :  { %8430 = vmatpush2.bf16.msra.mxu0 %v11083_v19  ;;  %v11173_v19 = vld [vmem:[#allocation7 + $0x168] ss:$16 sps:$4 sm:$0xff]  }
 0xa4c   :  { %8891 = vmatprep.subr.bf16.mxu0 %v11100_v35  ;;  %v11179_v35 = vld [vmem:[#allocation7 + $0x148] ss:$16 sps:$4 sm:$0xff]  }
 0xa4d   :  { %8471 = vmatpush2.bf16.msra.mxu1 %v11095_v38  ;;  %v11178_v38 = vld [vmem:[#allocation7 + $0x144] ss:$16 sps:$4 sm:$0xff]  }
 0xa4e   :  { %8432 = vmatmul.mubr.bf16.vlgmr.msra.gmra.mxu0 %v8014_v20  ;;  %8932 = vmatprep.subr.bf16.mxu1 %v11103_v15  ;;  %v11187_v15 = vld [vmem:[#allocation7 + $0x12c] ss:$16 sps:$4 sm:$0xff]  }
 0xa4f   :  { %8892 = vmatpush1.bf16.msra.mxu0 %v11098_v17  ;;  %v11176_v17 = vld [vmem:[#allocation7 + $0x140] ss:$16 sps:$4 sm:$0xff]  }
 0xa50   :  { %8473 = vmatmul.mubr.bf16.vlgmr.msra.gmra.mxu1 %v8014_v20  ;;  %8893 = vmatprep.subr.bf16.mxu0 %v11106_v1  ;;  %v11181_v20 = vld [vmem:[#allocation7 + $0x14c] ss:$16 sps:$4 sm:$0xff]   ;;  %v11185_v1 = vld [vmem:[#allocation7 + $0x128] ss:$16 sps:$4 sm:$0xff]  }
 0xa51   :  { %8933 = vmatpush1.bf16.msra.mxu1 %v11101_v8  ;;  %v11184_v8 = vld [vmem:[#allocation7 + $0x124] ss:$16 sps:$4 sm:$0xff]  }
 0xa52   :  { %8934 = vmatprep.subr.bf16.mxu1 %v11109_v31  ;;  %v11193_v31 = vld [vmem:[#allocation7 + $0x10c] ss:$16 sps:$4 sm:$0xff]  }
 0xa53   :  { %8894 = vmatpush1.bf16.msra.mxu0 %v11104_v16  ;;  %v11182_v16 = vld [vmem:[#allocation7 + $0x120] ss:$16 sps:$4 sm:$0xff]  }
 0xa54   :  { %8895 = vmatprep.subr.bf16.mxu0 %v11112_v28  ;;  %v11188_v28 = vld [vmem:[#allocation7 + $0x100] ss:$16 sps:$4 sm:$0xff]  }
 0xa55   :  { %8935 = vmatpush1.bf16.msra.mxu1 %v11107_v44  ;;  %v11190_v44 = vld [vmem:[#allocation7 + $0x104] ss:$16 sps:$4 sm:$0xff]  }
 0xa56   :  { %8936 = vmatprep.subr.bf16.mxu1 %v11115_v41  ;;  %v11191_v41 = vld [vmem:[#allocation7 + $0x108] ss:$16 sps:$4 sm:$0xff]  }
 0xa57   :  { %8896 = vmatpush1.bf16.msra.mxu0 %v11110_v25 }
 0xa58   :  { %8897 = vmatprep.subr.bf16.mxu0 %v11118_v42 }
 0xa59   :  { %8937 = vmatpush1.bf16.msra.mxu1 %v11113_v27 }
 0xa5a   :  { %8938 = vmatprep.subr.bf16.mxu1 %v11121_v36 }
 0xa5b   :  { %8898 = vmatpush1.bf16.msra.mxu0 %v11116_v39 }
 0xa5c   :  { %8899 = vmatprep.subr.bf16.mxu0 %v11124_v45 }
 0xa5d   :  { %8939 = vmatpush1.bf16.msra.mxu1 %v11119_v43 }
 0xa5e   :  { %8940 = vmatprep.subr.bf16.mxu1 %v11127_v49 }
 0xa5f   :  { %8900 = vmatpush1.bf16.msra.mxu0 %v11122_v21 }
 0xa60   :  { %8901 = vmatprep.subr.bf16.mxu0 %v11130_v51 }
 0xa61   :  { %8941 = vmatpush1.bf16.msra.mxu1 %v11125_v13 }
 0xa62   :  { %8942 = vmatprep.subr.bf16.mxu1 %v11133_v52 }
 0xa63   :  { %8902 = vmatpush1.bf16.msra.mxu0 %v11128_v53 }
 0xa64   :  { %8903 = vmatprep.subr.bf16.mxu0 %v11136_v55 }
 0xa65   :  { %8943 = vmatpush1.bf16.msra.mxu1 %v11131_v54 }
 0xa66   :  { %8944 = vmatprep.subr.bf16.mxu1 %v11139_v57 }
 0xa67   :  { %8904 = vmatpush1.bf16.msra.mxu0 %v11134_v58 }
 0xa68   :  { %8905 = vmatprep.subr.bf16.mxu0 %v11142_v59 }
 0xa69   :  { %8945 = vmatpush1.bf16.msra.mxu1 %v11137_v0 }
 0xa6a   :  { %8946 = vmatprep.subr.bf16.mxu1 %v11145_v60 }
 0xa6b   :  { %8906 = vmatpush1.bf16.msra.mxu0 %v11140_v61 }
 0xa6c   :  { %8907 = vmatprep.subr.bf16.mxu0 %v11148_v63 }
 0xa6d   :  { %8947 = vmatpush1.bf16.msra.mxu1 %v11143_v62 }
 0xa6e   :  { %8948 = vmatprep.subr.bf16.mxu1 %v11151_v2 }
 0xa6f   :  { %8908 = vmatpush2.bf16.msra.mxu0 %v11146_v3 }
 0xa70   :  { %8909 = vmatprep.subr.bf16.mxu0 %v11154_v7 }
 0xa71   :  { %8949 = vmatpush2.bf16.msra.mxu1 %v11149_v37 }
 0xa72   :  { %8950 = vmatprep.subr.bf16.mxu1 %v11157_v5 }
 0xa73   :  { %8910 = vmatpush2.bf16.msra.mxu0 %v11152_v23 }
 0xa74   :  { %8911 = vmatprep.subr.bf16.mxu0 %v11160_v6 }
 0xa75   :  { %8951 = vmatpush2.bf16.msra.mxu1 %v11155_v9 }
 0xa76   :  { %8952 = vmatprep.subr.bf16.mxu1 %v11163_v47 }
 0xa77   :  { %8912 = vmatpush2.bf16.msra.mxu0 %v11158_v18 }
 0xa78   :  { %8913 = vmatprep.subr.bf16.mxu0 %v11166_v30 }
 0xa79   :  { %8953 = vmatpush2.bf16.msra.mxu1 %v11161_v46 }
 0xa7a   :  { %8954 = vmatprep.subr.bf16.mxu1 %v11169_v14 }
 0xa7b   :  { %8914 = vmatpush2.bf16.msra.mxu0 %v11164_v32 }
 0xa7c   :  { %8915 = vmatprep.subr.bf16.mxu0 %v11172_v22 }
 0xa7d   :  { %8955 = vmatpush2.bf16.msra.mxu1 %v11167_v4 }
 0xa7e   :  { %8956 = vmatprep.subr.bf16.mxu1 %v11175_v56 }
 0xa7f   :  { %8916 = vmatpush2.bf16.msra.mxu0 %v11170_v40 }
 0xa80   :  { %8917 = vmatprep.subr.bf16.mxu0 %v11178_v38 }
 0xa81   :  { %8957 = vmatpush2.bf16.msra.mxu1 %v11173_v19 }
 0xa82   :  { %8958 = vmatprep.subr.bf16.mxu1 %v11181_v20 }
 0xa83   :  { %8918 = vmatpush2.bf16.msra.mxu0 %v11176_v17 }
 0xa84   :  { %8919 = vmatprep.subr.bf16.mxu0 %v11184_v8 }
 0xa85   :  { %8959 = vmatpush2.bf16.msra.mxu1 %v11179_v35 }
 0xa86   :  { %8960 = vmatprep.subr.bf16.mxu1 %v11187_v15 }
 0xa87   :  { %8920 = vmatpush2.bf16.msra.mxu0 %v11182_v16 }
 0xa88   :  { %8921 = vmatprep.subr.bf16.mxu0 %v11190_v44 }
 0xa89   :  { %8961 = vmatpush2.bf16.msra.mxu1 %v11185_v1 }
 0xa8a   :  { %8962 = vmatprep.subr.bf16.mxu1 %v11193_v31 }
 0xa8b   :  { %8922 = vmatpush2.bf16.msra.mxu0 %v11188_v28 }
 0xa8d   :  { %8963 = vmatpush2.bf16.msra.mxu1 %v11191_v41 }
 0xace   :  { %v7938_v25 = vpop.f32.mrf.mxu0  ;;  %v7979_v27 = vpop.f32.mrf.mxu1 }
 0xacf   :  { %v7939_v42 = vadd.f32 %v7938_v25, %v11928_v33  ;;  %v7980_v57 = vadd.f32 %v7979_v27, %v11946_v50 }
 0xad0   :  { %v7940_v36 = vpop.f32.mrf.mxu0  ;;  %v7981_v39 = vpop.f32.mrf.mxu1 }
 0xad1   :  { %v10087_v43 = vmul.f32 -1.442695, %v7939_v42  ;;  %v7941_v45 = vadd.f32 %v7940_v36, %v11932_v34  ;;  %v7982_v53 = vadd.f32 %v7981_v39, %v11940_v48 }
 0xad2   :  { %v7942_v49 = vpop.f32.mrf.mxu0  ;;  %v7983_v21 = vpop.f32.mrf.mxu1 }
 0xad3   :  { %11434 = vpow2.f32 %v10087_v43  ;;  %v10088_v13 = vmul.f32 -1.442695, %v7941_v45  ;;  %v10089_v54 = vmul.f32 -1.442695, %v7982_v53 }
 0xad4   :  { %v7943_v51 = vpop.f32.mrf.mxu0  ;;  %v7984_v52 = vpop.f32.mrf.mxu1 }
 0xad5   :  { %11436 = vpow2.f32 %v10088_v13 }
 0xad6   :  { %11438 = vpow2.f32 %v10089_v54 }
 0xae0   :  { %v11435_v55 = vpop.eup %11434 }
 0xae1   :  { %v7989_v58 = vadd.f32 1.0, %v11435_v55 }
 0xae2   :  { %v11437_v0 = vpop.eup %11436 }
 0xae3   :  { %11440 = vrcp.f32 %v7989_v58  ;;  %v7995_v59 = vadd.f32 1.0, %v11437_v0  ;;  %v11439_v60 = vpop.eup %11438 }
 0xae4   :  { %11442 = vtanh.f32 %v7980_v57  ;;  %v8002_v2 = vadd.f32 1.0, %v11439_v60 }
 0xae5   :  { %11444 = vrcp.f32 %v7995_v59 }
 0xae6   :  { %11446 = vrcp.f32 %v8002_v2 }
 0xaf0   :  { %v11441_v61 = vpop.eup %11440 }
 0xaf1   :  { %v11443_v62 = vpop.eup %11442 }
 0xaf2   :  { %v11445_v63 = vpop.eup %11444  ;;  %v8006_v3 = vmul.f32 %v11443_v62, %v11441_v61 }
 0xaf3   :  { %v8005_v37 = vmul.f32 %v11445_v63, %v13575_v29  ;;  %v11447_v5 = vpop.eup %11446 }
 0xaf5   :  { %v13591_v7 = vadd.f32 %v8006_v3, %v8005_v37 }
 0xaf7   :  { %11448 = vtanh.f32 %v13591_v7 }
 0xb04   :  { %v11449_v23 = vpop.eup %11448 }
 0xb05   :  { %v8009_v9 = vmul.f32 %v11449_v23, %v11447_v5 }
 0xb07   :  { %8011 = vst [vmem:[#allocation10 + $0x38] sm:$0xff] %v8009_v9  ;;  %v8506_v6 = vpack.c.bf16 %v8009_v9, %v8009_v9 }
 0xb09   :  { %8923 = vmatprep.mubr.bf16.mxu0 %v8506_v6  ;;  %8964 = vmatprep.mubr.bf16.mxu1 %v8506_v6 }
 0xb0e   :  { %v8433_v47 = vpop.f32.mrf.mxu0 }
 0xb0f   :  { %v8434_v18 = vadd.f32 %v8433_v47, %v11864_v11 }
 0xb10   :  { %v8435_v46 = vpop.f32.mrf.mxu0  ;;  %v8474_v30 = vpop.f32.mrf.mxu1 }
 0xb11   :  { %v10154_v14 = vmul.f32 -1.442695, %v8434_v18  ;;  %v8436_v29 = vadd.f32 %v8435_v46, %v11868_v12  ;;  %v8475_v20 = vadd.f32 %v8474_v30, %v11880_v26 }
 0xb12   :  { %v8437_v32 = vpop.f32.mrf.mxu0  ;;  %v8476_v4 = vpop.f32.mrf.mxu1 }
 0xb13   :  { %11450 = vpow2.f32 %v10154_v14  ;;  %v10155_v40 = vmul.f32 -1.442695, %v8436_v29  ;;  %v8477_v38 = vadd.f32 %v8476_v4, %v11876_v24 }
 0xb14   :  { %v8438_v22 = vpop.f32.mrf.mxu0  ;;  %v8478_v19 = vpop.f32.mrf.mxu1 }
 0xb15   :  { %11452 = vpow2.f32 %v10155_v40  ;;  %v10156_v17 = vmul.f32 -1.442695, %v8477_v38 }
 0xb16   :  { %v8479_v56 = vpop.f32.mrf.mxu1  ;;  %11454 = vtanh.f32 %v8475_v20 }
 0xb17   :  { %11456 = vpow2.f32 %v10156_v17 }
 0xb20   :  { %v11451_v35 = vpop.eup %11450 }
 0xb21   :  { %v8484_v11 = vadd.f32 1.0, %v11451_v35 }
 0xb22   :  { %v11453_v8 = vpop.eup %11452 }
 0xb23   :  { %11458 = vrcp.f32 %v8484_v11  ;;  %v8490_v12 = vadd.f32 1.0, %v11453_v8  ;;  %v11455_v15 = vpop.eup %11454 }
 0xb24   :  { %v11457_v16 = vpop.eup %11456 }
 0xb25   :  { %11460 = vrcp.f32 %v8490_v12  ;;  %v8497_v31 = vadd.f32 1.0, %v11457_v16 }
 0xb27   :  { %11462 = vrcp.f32 %v8497_v31 }
 0xb30   :  { %v11459_v1 = vpop.eup %11458 }
 0xb31   :  { %v8501_v41 = vmul.f32 %v11459_v1, %v11455_v15 }
 0xb32   :  { %v11461_v44 = vpop.eup %11460 }
 0xb33   :  { %v8500_v28 = vmul.f32 %v11461_v44, %v13583_v10 }
 0xb34   :  { %v11463_v26 = vpop.eup %11462 }
 0xb35   :  { %v8502_v24 = vadd.f32 %v8501_v41, %v8500_v28 }
 0xb37   :  { %11464 = vtanh.f32 %v8502_v24 }
 0xb44   :  { %v11465_v25 = vpop.eup %11464 }
 0xb45   :  { %v8504_v27 = vmul.f32 %v11465_v25, %v11463_v26 }
 0xb47   :  { %v8505_v42 = vpack.c.bf16 %v8504_v27, %v8504_v27 }
 0xb49   :  { %8924 = vmatmul.mubr.bf16.vlgmr.msra.gmra.mxu0 %v8505_v42  ;;  %8965 = vmatmul.mubr.bf16.vlgmr.msra.gmra.mxu1 %v8505_v42 }
 0xc09   :  { %v8925_v36 = vpop.f32.mrf.mxu0  ;;  %v8966_v39 = vpop.f32.mrf.mxu1 }
 0xc0a   :  { %v8926_v43 = vadd.f32 %v8925_v36, %v11928_v33  ;;  %v8967_v0 = vadd.f32 %v8966_v39, %v11946_v50 }
 0xc0b   :  { %v8927_v45 = vpop.f32.mrf.mxu0  ;;  %v8968_v49 = vpop.f32.mrf.mxu1 }
 0xc0c   :  { %v10221_v21 = vmul.f32 -1.442695, %v8926_v43  ;;  %v8928_v13 = vadd.f32 %v8927_v45, %v11932_v34  ;;  %v8969_v55 = vadd.f32 %v8968_v49, %v11940_v48 }
 0xc0d   :  { %v8929_v10 = vpop.f32.mrf.mxu0  ;;  %v8970_v51 = vpop.f32.mrf.mxu1 }
 0xc0e   :  { %11466 = vpow2.f32 %v10221_v21  ;;  %v10222_v52 = vmul.f32 -1.442695, %v8928_v13  ;;  %v10223_v57 = vmul.f32 -1.442695, %v8969_v55 }
 0xc0f   :  { %v8930_v53 = vpop.f32.mrf.mxu0  ;;  %v8971_v54 = vpop.f32.mrf.mxu1 }
 0xc10   :  { %11468 = vpow2.f32 %v10222_v52 }
 0xc11   :  { %11470 = vpow2.f32 %v10223_v57 }
 0xc1b   :  { %v11467_v58 = vpop.eup %11466 }
 0xc1c   :  { %v8976_v59 = vadd.f32 1.0, %v11467_v58 }
 0xc1d   :  { %v11469_v33 = vpop.eup %11468 }
 0xc1e   :  { %11472 = vrcp.f32 %v8976_v59  ;;  %v8982_v60 = vadd.f32 1.0, %v11469_v33  ;;  %v11471_v34 = vpop.eup %11470 }
 0xc1f   :  { %11474 = vtanh.f32 %v8967_v0  ;;  %v8989_v2 = vadd.f32 1.0, %v11471_v34 }
 0xc20   :  { %11476 = vrcp.f32 %v8982_v60 }
 0xc21   :  { %11478 = vrcp.f32 %v8989_v2 }
 0xc2b   :  { %v11473_v61 = vpop.eup %11472 }
 0xc2c   :  { %v11475_v62 = vpop.eup %11474 }
 0xc2d   :  { %v11477_v63 = vpop.eup %11476  ;;  %v8993_v3 = vmul.f32 %v11475_v62, %v11473_v61 }
 0xc2e   :  { %v8992_v37 = vmul.f32 %v11477_v63, %v13591_v7  ;;  %v11479_v50 = vpop.eup %11478 }
 0xc30   :  { %v8994_v48 = vadd.f32 %v8993_v3, %v8992_v37 }
 0xc32   :  { %11480 = vtanh.f32 %v8994_v48 }
 0xc3f   :  { %v11481_v5 = vpop.eup %11480 }
 0xc40   :  { %v8996_v23 = vmul.f32 %v11481_v5, %v11479_v50 }
 0xc42   :  { %8998 = vst [vmem:[#allocation10 + $0x40] sm:$0xff] %v8996_v23 }
 0xc43   :  { %11665 = shalt.err (!%p11662_p10)
}
 0xc44   :  { %9010 = dma.vmem_to_hbm [thread:$0]  %s9005_s15, 1152, %s13615_s5, [#allocation4], %s11686_s28, %s11686_s28, %s11687_s29  }
 0xc45   :  { %11680 = dma.done.wait [#allocation4], 1152  }
 0xc46   :  { %11681 = vsyncadd [#allocation4], 4294966144 }
 0xc47   :  { %9014 = vsyncpa [#allocation3], 1 }
 0xc48   :  { %9015 = vsyncpa [#allocation6], 1 }
 0xc49   :  { %9016 = vsyncpa [#allocation9], 1 }
 0xc4a   :  { %9017 = vsyncpa [#allocation4], 1 }

</bundles_post_ra>
